<compile_context>
chip_gen: v5e
topology: v5e:2x2
jax: 0.10.0
libtpu: 0.0.40
codegen_flags: <defaults>
</compile_context>

<pallas_src>
import functools

import jax
import jax.numpy as jnp
from jax.experimental import pallas as pl
from jax.experimental.pallas import tpu as pltpu

K = 3            # conv kernel size (3x3x3)
KK = K * K * K   # 27 taps
PAD = 1
EPS = 1e-5       # InstanceNorm3d default eps

_LANE = 128
_TN_CAP = 2048                    # lane-dense tile cap (v6e review: 2048-4096)
_VMEM_BUDGET = 24 * 1024 * 1024   # double-buffered working-set budget (v7x safe)
_VMEM_LIMIT = 32 * 1024 * 1024


def _round_up(x, m):
    return ((x + m - 1) // m) * m


# ---------------------------------------------------------------------------
# Fused single-pass kernel (used when the whole spatial extent fits one tile):
# conv (single folded 27*Cin-contraction MXU matmul) + full-spatial stats +
# InstanceNorm (no affine, biased variance) + PReLU.  Grid = (B,).
# ---------------------------------------------------------------------------
def fused_conv_in_prelu_kernel(a_ref, p_ref, w_ref, o_ref, *, inv_n):
    # a_ref : (1,)           f32  SMEM (PReLU alpha)
    # p_ref : (1, kc, tn)    bf16 im2col patches (tap-major, channel-minor)
    # w_ref : (cout, kc)     bf16 folded conv weight
    # o_ref : (1, cout, tn)  f32  normalized + activated output
    y = jnp.dot(w_ref[...], p_ref[0], preferred_element_type=jnp.float32)
    # Zero-padded patch columns give exactly 0 here (no bias), so they do not
    # pollute sum/ssq; inv_n is 1/N_true.
    s = jnp.sum(y, axis=1, keepdims=True)
    ssq = jnp.sum(y * y, axis=1, keepdims=True)
    mean = s * inv_n
    var = jnp.maximum(ssq * inv_n - mean * mean, 0.0)
    xhat = (y - mean) * jax.lax.rsqrt(var + EPS)
    alpha = a_ref[0]
    o_ref[0] = jnp.where(xhat >= 0.0, xhat, alpha * xhat).astype(o_ref.dtype)


# ---------------------------------------------------------------------------
# Two-pass path for large spatial extents.
# Pass 1: conv matmul + per-channel sum / sumsq accumulated in resident
#         output blocks (grid = (B, nt), tile axis "arbitrary").
# ---------------------------------------------------------------------------
def conv_stats_kernel(p_ref, w_ref, y_ref, sum_ref, ssq_ref):
    # p_ref : (1, kc, tn)    bf16
    # w_ref : (cout, kc)     bf16
    # y_ref : (1, cout, tn)  bf16 conv output tile (pre-norm intermediate)
    # sum_ref/ssq_ref : (1, cout, 1) f32 running spatial sum / sum of squares
    t = pl.program_id(1)

    y = jnp.dot(w_ref[...], p_ref[0], preferred_element_type=jnp.float32)
    y_ref[0] = y.astype(y_ref.dtype)

    @pl.when(t == 0)
    def _():
        sum_ref[...] = jnp.zeros_like(sum_ref)
        ssq_ref[...] = jnp.zeros_like(ssq_ref)

    sum_ref[0] = sum_ref[0] + jnp.sum(y, axis=1, keepdims=True)
    ssq_ref[0] = ssq_ref[0] + jnp.sum(y * y, axis=1, keepdims=True)


# Pass 2: InstanceNorm (full-spatial stats, biased variance) + PReLU.
def norm_prelu_kernel(a_ref, y_ref, sum_ref, ssq_ref, o_ref, *, inv_n):
    # a_ref : (1,)           f32  SMEM
    # y_ref : (1, cout, tn)  bf16 conv output tile
    # o_ref : (1, cout, tn)  f32
    y = y_ref[0].astype(jnp.float32)
    mean = sum_ref[0] * inv_n
    var = jnp.maximum(ssq_ref[0] * inv_n - mean * mean, 0.0)
    xhat = (y - mean) * jax.lax.rsqrt(var + EPS)
    alpha = a_ref[0]
    o_ref[0] = jnp.where(xhat >= 0.0, xhat, alpha * xhat).astype(o_ref.dtype)


# ---------------------------------------------------------------------------
# Glue: channel-first im2col (pure data movement, bf16 end-to-end).
# ---------------------------------------------------------------------------
def _im2col_cf(x, stride):
    # x: (B, C, D, H, W) f32 -> (B, KK*C, N) bf16, plus (Do, Ho, Wo)
    B, C, D, H, W = x.shape
    Do = (D + 2 * PAD - K) // stride + 1
    Ho = (H + 2 * PAD - K) // stride + 1
    Wo = (W + 2 * PAD - K) // stride + 1
    xp = jnp.pad(x.astype(jnp.bfloat16),
                 ((0, 0), (0, 0), (PAD, PAD), (PAD, PAD), (PAD, PAD)))
    taps = []
    for kd in range(K):
        for kh in range(K):
            for kw in range(K):
                sl = xp[:, :,
                        kd:kd + stride * Do:stride,
                        kh:kh + stride * Ho:stride,
                        kw:kw + stride * Wo:stride]
                taps.append(sl.reshape(B, C, Do * Ho * Wo))
    patches = jnp.concatenate(taps, axis=1)          # (B, KK*C, N) bf16
    return patches, (Do, Ho, Wo)


def _spatial_plan(n, kc, cout):
    # Returns (n_pad, tn, nt): spatial extent padded to a multiple of 128,
    # lane-dense tile size chosen from an explicit VMEM byte budget.
    n_pad = _round_up(n, _LANE)
    # per-lane bytes of pipelined blocks: bf16 patch tile x2 buffers + f32
    # output tile x2 buffers (upper bound); folded weight counted once.
    per_lane = 2 * (2 * kc) + 2 * (4 * cout)
    tn_max = (_VMEM_BUDGET - 2 * cout * kc) // per_lane
    tn_max = max(_LANE, (tn_max // _LANE) * _LANE)
    tn_max = min(tn_max, _TN_CAP)
    if n_pad <= tn_max:
        return n_pad, n_pad, 1
    # largest multiple-of-128 divisor of n_pad that fits the budget
    tn = _LANE
    t = _LANE
    while t <= tn_max:
        if n_pad % t == 0:
            tn = t
        t += _LANE
    return n_pad, tn, n_pad // tn


def conv3x3x3_in_prelu(x, layer, stride):
    # x: (B, Cin, D, H, W) f32 (NCDHW) -> (B, Cout, Do, Ho, Wo) f32 (NCDHW)
    B = x.shape[0]
    w = layer["w"]                                   # (Cout, Cin, 3, 3, 3)
    cout, cin = w.shape[0], w.shape[1]
    kc = KK * cin
    # weight folded tap-major/channel-minor to match the im2col ordering
    w2 = jnp.transpose(w, (0, 2, 3, 4, 1)).reshape(cout, kc).astype(jnp.bfloat16)
    alpha = jnp.reshape(layer["alpha"], (1,)).astype(jnp.float32)
    # NOTE: the Conv3d bias is intentionally NOT applied: InstanceNorm3d with
    # affine=False exactly cancels any per-channel constant, so the forward
    # output is unchanged (and variance loses less precision).

    patches, (do_, ho_, wo_) = _im2col_cf(x, stride)  # (B, kc, N) bf16
    n = do_ * ho_ * wo_
    n_pad, tn, nt = _spatial_plan(n, kc, cout)
    if n_pad != n:
        patches = jnp.pad(patches, ((0, 0), (0, 0), (0, n_pad - n)))
    inv_n = 1.0 / float(n)

    if nt == 1:
        # ---- fused single-pass: one pallas_call, no HBM intermediate -------
        out = pl.pallas_call(
            functools.partial(fused_conv_in_prelu_kernel, inv_n=inv_n),
            out_shape=jax.ShapeDtypeStruct((B, cout, n_pad), jnp.float32),
            grid_spec=pltpu.PrefetchScalarGridSpec(
                num_scalar_prefetch=0,
                grid=(B,),
                in_specs=[
                    pl.BlockSpec(memory_space=pltpu.MemorySpace.SMEM),  # alpha
                    pl.BlockSpec((1, kc, n_pad), lambda b: (b, 0, 0)),
                    pl.BlockSpec((cout, kc), lambda b: (0, 0)),
                ],
                out_specs=pl.BlockSpec((1, cout, n_pad), lambda b: (b, 0, 0)),
            ),
            compiler_params=pltpu.CompilerParams(
                dimension_semantics=("parallel",),
                vmem_limit_bytes=_VMEM_LIMIT,
            ),
            cost_estimate=pl.CostEstimate(
                flops=int(2 * B * cout * kc * n_pad),
                transcendentals=int(B * cout),
                bytes_accessed=int(B * kc * n_pad * 2 + cout * kc * 2
                                   + B * cout * n_pad * 4),
            ),
        )(alpha, patches, w2)
    else:
        # ---- pass 1: conv + bf16 intermediate + full-spatial stats ---------
        yconv, csum, cssq = pl.pallas_call(
            conv_stats_kernel,
            out_shape=(
                jax.ShapeDtypeStruct((B, cout, n_pad), jnp.bfloat16),
                jax.ShapeDtypeStruct((B, cout, 1), jnp.float32),
                jax.ShapeDtypeStruct((B, cout, 1), jnp.float32),
            ),
            grid_spec=pltpu.PrefetchScalarGridSpec(
                num_scalar_prefetch=0,
                grid=(B, nt),
                in_specs=[
                    pl.BlockSpec((1, kc, tn), lambda b, t: (b, 0, t)),
                    pl.BlockSpec((cout, kc), lambda b, t: (0, 0)),
                ],
                out_specs=[
                    pl.BlockSpec((1, cout, tn), lambda b, t: (b, 0, t)),
                    pl.BlockSpec((1, cout, 1), lambda b, t: (b, 0, 0)),
                    pl.BlockSpec((1, cout, 1), lambda b, t: (b, 0, 0)),
                ],
            ),
            compiler_params=pltpu.CompilerParams(
                dimension_semantics=("parallel", "arbitrary"),
                vmem_limit_bytes=_VMEM_LIMIT,
            ),
            cost_estimate=pl.CostEstimate(
                flops=int(2 * B * cout * kc * n_pad),
                transcendentals=0,
                bytes_accessed=int(B * kc * n_pad * 2 + cout * kc * 2
                                   + B * cout * n_pad * 2 + 8 * B * cout),
            ),
        )(patches, w2)

        # ---- pass 2: InstanceNorm + PReLU ----------------------------------
        out = pl.pallas_call(
            functools.partial(norm_prelu_kernel, inv_n=inv_n),
            out_shape=jax.ShapeDtypeStruct((B, cout, n_pad), jnp.float32),
            grid_spec=pltpu.PrefetchScalarGridSpec(
                num_scalar_prefetch=0,
                grid=(B, nt),
                in_specs=[
                    pl.BlockSpec(memory_space=pltpu.MemorySpace.SMEM),  # alpha
                    pl.BlockSpec((1, cout, tn), lambda b, t: (b, 0, t)),
                    pl.BlockSpec((1, cout, 1), lambda b, t: (b, 0, 0)),
                    pl.BlockSpec((1, cout, 1), lambda b, t: (b, 0, 0)),
                ],
                out_specs=pl.BlockSpec((1, cout, tn), lambda b, t: (b, 0, t)),
            ),
            compiler_params=pltpu.CompilerParams(
                dimension_semantics=("parallel", "parallel"),
                vmem_limit_bytes=_VMEM_LIMIT,
            ),
            cost_estimate=pl.CostEstimate(
                flops=int(6 * B * cout * n_pad),
                transcendentals=int(B * cout),
                bytes_accessed=int(B * cout * n_pad * 2 + B * cout * n_pad * 4
                                   + 8 * B * cout),
            ),
        )(alpha, yconv, csum, cssq)

    out = out[:, :, :n]                              # drop lane padding
    return out.reshape(B, cout, do_, ho_, wo_)


# ---------------------------------------------------------------------------
# Parameter init (deterministic, shapes from the PyTorch module __init__).
# ---------------------------------------------------------------------------
def _init_conv_layer(key, cin, cout):
    kw, kb = jax.random.split(key)
    fan_in = cin * KK
    w = jax.random.normal(kw, (cout, cin, K, K, K), jnp.float32) / jnp.sqrt(
        jnp.float32(fan_in)
    )
    # bias is kept for parameter-structure fidelity but is unused in the
    # forward pass: InstanceNorm3d (affine=False) cancels it exactly.
    b = 0.01 * jax.random.normal(kb, (cout,), jnp.float32)
    alpha = jnp.float32(0.25)                        # nn.PReLU() default init
    return {"w": w, "b": b, "alpha": alpha}


def init_unet_encoder_params(key, in_chans, depths, dims):
    keys = jax.random.split(key, 128)
    it = iter(range(128))
    params = {
        "stem": _init_conv_layer(keys[next(it)], in_chans, dims[0]),
        "stages": [],
        "down": [],
    }
    for i in range(len(depths)):
        stage = [
            _init_conv_layer(keys[next(it)], dims[i], dims[i])
            for _ in range(depths[i] - 1)
        ]
        params["stages"].append(stage)
        if i != len(depths) - 1:
            params["down"].append(
                _init_conv_layer(keys[next(it)], dims[i], dims[i + 1])
            )
    return params


# ---------------------------------------------------------------------------
# Forward pass (hierarchical=True branch of the PyTorch module).
# Everything stays NCDHW; feats need no transposes.
# ---------------------------------------------------------------------------
def unet_encoder_forward(params, x_ncdhw, depths):
    n_stages = len(depths)
    x = conv3x3x3_in_prelu(x_ncdhw, params["stem"], stride=1)
    feats = []
    for i in range(n_stages):
        for layer in params["stages"][i]:
            x = conv3x3x3_in_prelu(x, layer, stride=1)
        feats.append(x)
        if i != n_stages - 1:
            x = conv3x3x3_in_prelu(x, params["down"][i], stride=2)
    return feats


if __name__ == "__main__":
    # Small config consistent with the module (constructor args are free).
    in_chans = 1
    depths = [2, 2, 2, 1]
    dims = [8, 16, 32, 32]
    B, S = 2, 16                                # spatial 16^3, downsample 2^3

    key = jax.random.PRNGKey(0)
    kp, kx = jax.random.split(key)
    params = init_unet_encoder_params(kp, in_chans, depths, dims)
    x = jax.random.normal(kx, (B, in_chans, S, S, S), jnp.float32)

    fwd = jax.jit(functools.partial(unet_encoder_forward, depths=depths))
    feats = fwd(params, x)
    feats = [jax.block_until_ready(f) for f in feats]

    expected = [
        (B, dims[0], 16, 16, 16),
        (B, dims[1], 8, 8, 8),
        (B, dims[2], 4, 4, 4),
        (B, dims[3], 2, 2, 2),
    ]
    assert [tuple(f.shape) for f in feats] == expected, [f.shape for f in feats]
    assert all(bool(jnp.all(jnp.isfinite(f))) for f in feats)
    print("KERNEL_OK")
</pallas_src>

<mosaic_0001>
module attributes {stable_mosaic.version = 11 : i64} {
  func.func @conv_stats_kernel(%arg0: i32, %arg1: i32, %arg2: memref<1x27x2048xbf16, #tpu.memory_space<vmem>>, %arg3: memref<8x27xbf16, #tpu.memory_space<vmem>>, %arg4: memref<1x8x2048xbf16, #tpu.memory_space<vmem>>, %arg5: memref<1x8x1xf32, #tpu.memory_space<vmem>>, %arg6: memref<1x8x1xf32, #tpu.memory_space<vmem>>) attributes {dimension_semantics = [#tpu.dimension_semantics<parallel>, #tpu.dimension_semantics<arbitrary>], iteration_bounds = array<i64: 2, 2>, scalar_prefetch = 0 : i64, scratch_operands = 0 : i64, tpu.core_type = #tpu.core_type<tc>, window_params = [{transform_indices = @transform_0, window_bounds = array<i64: 1, 27, 2048>}, {pipeline_mode = #tpu.pipeline_mode<synchronous>, transform_indices = @transform_1, window_bounds = array<i64: 8, 27>}, {transform_indices = @transform_2, window_bounds = array<i64: 1, 8, 2048>}, {transform_indices = @transform_3, window_bounds = array<i64: 1, 8, 1>}, {transform_indices = @transform_4, window_bounds = array<i64: 1, 8, 1>}]} {
    %c0 = arith.constant 0 : index
    %c0_0 = arith.constant 0 : index
    %0 = vector.load %arg3[%c0, %c0_0] : memref<8x27xbf16, #tpu.memory_space<vmem>>, vector<8x27xbf16>
    %c0_1 = arith.constant 0 : index
    %c0_2 = arith.constant 0 : index
    %c0_3 = arith.constant 0 : index
    %1 = vector.load %arg2[%c0_1, %c0_2, %c0_3] : memref<1x27x2048xbf16, #tpu.memory_space<vmem>>, vector<1x27x2048xbf16>
    %2 = vector.shape_cast %1 : vector<1x27x2048xbf16> to vector<27x2048xbf16>
    %cst = arith.constant dense<0.000000e+00> : vector<8x2048xf32>
    %3 = tpu.matmul %0, %2, %cst {dimension_numbers = #tpu.dot_dimension_numbers<[1], [0], [0], [1], [0, 0, 1, 1], [], []>} : vector<8x27xbf16>, vector<27x2048xbf16>, vector<8x2048xf32> -> vector<8x2048xf32>
    %4 = arith.truncf %3 : vector<8x2048xf32> to vector<8x2048xbf16>
    %c0_4 = arith.constant 0 : index
    %c0_5 = arith.constant 0 : index
    %c0_6 = arith.constant 0 : index
    %5 = vector.load %arg4[%c0_4, %c0_5, %c0_6] : memref<1x8x2048xbf16, #tpu.memory_space<vmem>>, vector<1x8x2048xbf16>
    %6 = vector.shape_cast %5 : vector<1x8x2048xbf16> to vector<8x2048xbf16>
    %7 = vector.shape_cast %4 : vector<8x2048xbf16> to vector<1x8x2048xbf16>
    tpu.vector_store %arg4[%c0_4, %c0_5, %c0_6], %7 {strides = array<i32>} : memref<1x8x2048xbf16, #tpu.memory_space<vmem>>, vector<1x8x2048xbf16>,
    %c0_i32 = arith.constant 0 : i32
    %8 = arith.cmpi eq, %arg1, %c0_i32 : i32
    %9 = arith.extui %8 : i1 to i32
    %c0_i32_7 = arith.constant 0 : i32
    %10 = arith.cmpi ne, %9, %c0_i32_7 : i32
    scf.if %10 {
      %cst_22 = arith.constant 0.000000e+00 : f32
      %28 = vector.broadcast %cst_22 : f32 to vector<1x8x1xf32>
      %c0_23 = arith.constant 0 : index
      %c0_24 = arith.constant 0 : index
      %c0_25 = arith.constant 0 : index
      %29 = vector.load %arg5[%c0_23, %c0_24, %c0_25] : memref<1x8x1xf32, #tpu.memory_space<vmem>>, vector<1x8x1xf32>
      tpu.vector_store %arg5[%c0_23, %c0_24, %c0_25], %28 {strides = array<i32>} : memref<1x8x1xf32, #tpu.memory_space<vmem>>, vector<1x8x1xf32>,
      %cst_26 = arith.constant 0.000000e+00 : f32
      %30 = vector.broadcast %cst_26 : f32 to vector<1x8x1xf32>
      %c0_27 = arith.constant 0 : index
      %c0_28 = arith.constant 0 : index
      %c0_29 = arith.constant 0 : index
      %31 = vector.load %arg6[%c0_27, %c0_28, %c0_29] : memref<1x8x1xf32, #tpu.memory_space<vmem>>, vector<1x8x1xf32>
      tpu.vector_store %arg6[%c0_27, %c0_28, %c0_29], %30 {strides = array<i32>} : memref<1x8x1xf32, #tpu.memory_space<vmem>>, vector<1x8x1xf32>,
    } else {
    }
    %c0_8 = arith.constant 0 : index
    %c0_9 = arith.constant 0 : index
    %c0_10 = arith.constant 0 : index
    %11 = vector.load %arg5[%c0_8, %c0_9, %c0_10] : memref<1x8x1xf32, #tpu.memory_space<vmem>>, vector<1x8x1xf32>
    %12 = vector.shape_cast %11 : vector<1x8x1xf32> to vector<8x1xf32>
    %cst_11 = arith.constant dense<0.000000e+00> : vector<8xf32>
    %13 = vector.multi_reduction <add>, %3, %cst_11 [1] : vector<8x2048xf32> to vector<8xf32>
    %14 = vector.shape_cast %13 : vector<8xf32> to vector<8x1xf32>
    %15 = arith.addf %12, %14 : vector<8x1xf32>
    %c0_12 = arith.constant 0 : index
    %c0_13 = arith.constant 0 : index
    %c0_14 = arith.constant 0 : index
    %16 = vector.load %arg5[%c0_12, %c0_13, %c0_14] : memref<1x8x1xf32, #tpu.memory_space<vmem>>, vector<1x8x1xf32>
    %17 = vector.shape_cast %16 : vector<1x8x1xf32> to vector<8x1xf32>
    %18 = vector.shape_cast %15 : vector<8x1xf32> to vector<1x8x1xf32>
    tpu.vector_store %arg5[%c0_12, %c0_13, %c0_14], %18 {strides = array<i32>} : memref<1x8x1xf32, #tpu.memory_space<vmem>>, vector<1x8x1xf32>,
    %c0_15 = arith.constant 0 : index
    %c0_16 = arith.constant 0 : index
    %c0_17 = arith.constant 0 : index
    %19 = vector.load %arg6[%c0_15, %c0_16, %c0_17] : memref<1x8x1xf32, #tpu.memory_space<vmem>>, vector<1x8x1xf32>
    %20 = vector.shape_cast %19 : vector<1x8x1xf32> to vector<8x1xf32>
    %21 = arith.mulf %3, %3 : vector<8x2048xf32>
    %cst_18 = arith.constant dense<0.000000e+00> : vector<8xf32>
    %22 = vector.multi_reduction <add>, %21, %cst_18 [1] : vector<8x2048xf32> to vector<8xf32>
    %23 = vector.shape_cast %22 : vector<8xf32> to vector<8x1xf32>
    %24 = arith.addf %20, %23 : vector<8x1xf32>
    %c0_19 = arith.constant 0 : index
    %c0_20 = arith.constant 0 : index
    %c0_21 = arith.constant 0 : index
    %25 = vector.load %arg6[%c0_19, %c0_20, %c0_21] : memref<1x8x1xf32, #tpu.memory_space<vmem>>, vector<1x8x1xf32>
    %26 = vector.shape_cast %25 : vector<1x8x1xf32> to vector<8x1xf32>
    %27 = vector.shape_cast %24 : vector<8x1xf32> to vector<1x8x1xf32>
    tpu.vector_store %arg6[%c0_19, %c0_20, %c0_21], %27 {strides = array<i32>} : memref<1x8x1xf32, #tpu.memory_space<vmem>>, vector<1x8x1xf32>,
    return
  }
  func.func @transform_0(%arg0: i32, %arg1: i32) -> (i32, i32, i32) {
    %c0_i32 = arith.constant 0 : i32
    %c0_i32_0 = arith.constant 0 : i32
    return %arg0, %c0_i32, %arg1 : i32, i32, i32
  }
  func.func @transform_1(%arg0: i32, %arg1: i32) -> (i32, i32) {
    %c0_i32 = arith.constant 0 : i32
    %c0_i32_0 = arith.constant 0 : i32
    %c0_i32_1 = arith.constant 0 : i32
    return %c0_i32, %c0_i32_0 : i32, i32
  }
  func.func @transform_2(%arg0: i32, %arg1: i32) -> (i32, i32, i32) {
    %c0_i32 = arith.constant 0 : i32
    %c0_i32_0 = arith.constant 0 : i32
    return %arg0, %c0_i32, %arg1 : i32, i32, i32
  }
  func.func @transform_3(%arg0: i32, %arg1: i32) -> (i32, i32, i32) {
    %c0_i32 = arith.constant 0 : i32
    %c0_i32_0 = arith.constant 0 : i32
    %c0_i32_1 = arith.constant 0 : i32
    return %arg0, %c0_i32, %c0_i32_0 : i32, i32, i32
  }
  func.func @transform_4(%arg0: i32, %arg1: i32) -> (i32, i32, i32) {
    %c0_i32 = arith.constant 0 : i32
    %c0_i32_0 = arith.constant 0 : i32
    %c0_i32_1 = arith.constant 0 : i32
    return %arg0, %c0_i32, %c0_i32_0 : i32, i32, i32
  }
}

module attributes {stable_mosaic.version = 11 : i64} {
  func.func @norm_prelu_kernel(%arg0: i32, %arg1: i32, %arg2: memref<1xf32, #tpu.memory_space<smem>>, %arg3: memref<1x8x2048xbf16, #tpu.memory_space<vmem>>, %arg4: memref<1x8x1xf32, #tpu.memory_space<vmem>>, %arg5: memref<1x8x1xf32, #tpu.memory_space<vmem>>, %arg6: memref<1x8x2048xf32, #tpu.memory_space<vmem>>) attributes {dimension_semantics = [#tpu.dimension_semantics<parallel>, #tpu.dimension_semantics<parallel>], iteration_bounds = array<i64: 2, 2>, scalar_prefetch = 0 : i64, scratch_operands = 0 : i64, tpu.core_type = #tpu.core_type<tc>, window_params = [{transform_indices = @transform_0, window_bounds = array<i64: 1>}, {transform_indices = @transform_1, window_bounds = array<i64: 1, 8, 2048>}, {transform_indices = @transform_2, window_bounds = array<i64: 1, 8, 1>}, {transform_indices = @transform_3, window_bounds = array<i64: 1, 8, 1>}, {transform_indices = @transform_4, window_bounds = array<i64: 1, 8, 2048>}]} {
    %c0 = arith.constant 0 : index
    %c0_0 = arith.constant 0 : index
    %c0_1 = arith.constant 0 : index
    %0 = vector.load %arg3[%c0, %c0_0, %c0_1] : memref<1x8x2048xbf16, #tpu.memory_space<vmem>>, vector<1x8x2048xbf16>
    %1 = vector.shape_cast %0 : vector<1x8x2048xbf16> to vector<8x2048xbf16>
    %2 = arith.extf %1 : vector<8x2048xbf16> to vector<8x2048xf32>
    %c0_2 = arith.constant 0 : index
    %c0_3 = arith.constant 0 : index
    %c0_4 = arith.constant 0 : index
    %3 = vector.load %arg4[%c0_2, %c0_3, %c0_4] : memref<1x8x1xf32, #tpu.memory_space<vmem>>, vector<1x8x1xf32>
    %4 = vector.shape_cast %3 : vector<1x8x1xf32> to vector<8x1xf32>
    %cst = arith.constant 2.44140625E-4 : f32
    %5 = vector.broadcast %cst : f32 to vector<8x1xf32>
    %6 = arith.mulf %4, %5 : vector<8x1xf32>
    %c0_5 = arith.constant 0 : index
    %c0_6 = arith.constant 0 : index
    %c0_7 = arith.constant 0 : index
    %7 = vector.load %arg5[%c0_5, %c0_6, %c0_7] : memref<1x8x1xf32, #tpu.memory_space<vmem>>, vector<1x8x1xf32>
    %8 = vector.shape_cast %7 : vector<1x8x1xf32> to vector<8x1xf32>
    %cst_8 = arith.constant 2.44140625E-4 : f32
    %9 = vector.broadcast %cst_8 : f32 to vector<8x1xf32>
    %10 = arith.mulf %8, %9 : vector<8x1xf32>
    %11 = arith.mulf %6, %6 : vector<8x1xf32>
    %12 = arith.subf %10, %11 : vector<8x1xf32>
    %cst_9 = arith.constant 0.000000e+00 : f32
    %13 = vector.broadcast %cst_9 : f32 to vector<8x1xf32>
    %14 = arith.maximumf %12, %13 : vector<8x1xf32>
    %15 = vector.broadcast %6 : vector<8x1xf32> to vector<8x2048xf32>
    %16 = arith.subf %2, %15 : vector<8x2048xf32>
    %cst_10 = arith.constant 9.99999974E-6 : f32
    %17 = vector.broadcast %cst_10 : f32 to vector<8x1xf32>
    %18 = arith.addf %14, %17 : vector<8x1xf32>
    %19 = math.rsqrt %18 : vector<8x1xf32>
    %20 = vector.broadcast %19 : vector<8x1xf32> to vector<8x2048xf32>
    %21 = arith.mulf %16, %20 : vector<8x2048xf32>
    %c0_11 = arith.constant 0 : index
    %22 = memref.load %arg2[%c0_11] : memref<1xf32, #tpu.memory_space<smem>>
    %cst_12 = arith.constant 0.000000e+00 : f32
    %23 = vector.broadcast %cst_12 : f32 to vector<8x2048xf32>
    %24 = arith.cmpf oge, %21, %23 : vector<8x2048xf32>
    %25 = vector.broadcast %22 : f32 to vector<8x2048xf32>
    %26 = arith.mulf %25, %21 : vector<8x2048xf32>
    %27 = arith.select %24, %21, %26 : vector<8x2048xi1>, vector<8x2048xf32>
    %c0_13 = arith.constant 0 : index
    %c0_14 = arith.constant 0 : index
    %c0_15 = arith.constant 0 : index
    %28 = vector.load %arg6[%c0_13, %c0_14, %c0_15] : memref<1x8x2048xf32, #tpu.memory_space<vmem>>, vector<1x8x2048xf32>
    %29 = vector.shape_cast %28 : vector<1x8x2048xf32> to vector<8x2048xf32>
    %30 = vector.shape_cast %27 : vector<8x2048xf32> to vector<1x8x2048xf32>
    tpu.vector_store %arg6[%c0_13, %c0_14, %c0_15], %30 {strides = array<i32>} : memref<1x8x2048xf32, #tpu.memory_space<vmem>>, vector<1x8x2048xf32>,
    return
  }
  func.func @transform_0(%arg0: i32, %arg1: i32) -> i32 {
    %c0_i32 = arith.constant 0 : i32
    %c0_i32_0 = arith.constant 0 : i32
    return %c0_i32 : i32
  }
  func.func @transform_1(%arg0: i32, %arg1: i32) -> (i32, i32, i32) {
    %c0_i32 = arith.constant 0 : i32
    %c0_i32_0 = arith.constant 0 : i32
    return %arg0, %c0_i32, %arg1 : i32, i32, i32
  }
  func.func @transform_2(%arg0: i32, %arg1: i32) -> (i32, i32, i32) {
    %c0_i32 = arith.constant 0 : i32
    %c0_i32_0 = arith.constant 0 : i32
    %c0_i32_1 = arith.constant 0 : i32
    return %arg0, %c0_i32, %c0_i32_0 : i32, i32, i32
  }
  func.func @transform_3(%arg0: i32, %arg1: i32) -> (i32, i32, i32) {
    %c0_i32 = arith.constant 0 : i32
    %c0_i32_0 = arith.constant 0 : i32
    %c0_i32_1 = arith.constant 0 : i32
    return %arg0, %c0_i32, %c0_i32_0 : i32, i32, i32
  }
  func.func @transform_4(%arg0: i32, %arg1: i32) -> (i32, i32, i32) {
    %c0_i32 = arith.constant 0 : i32
    %c0_i32_0 = arith.constant 0 : i32
    return %arg0, %c0_i32, %arg1 : i32, i32, i32
  }
}

module attributes {stable_mosaic.version = 11 : i64} {
  func.func @conv_stats_kernel(%arg0: i32, %arg1: i32, %arg2: memref<1x216x2048xbf16, #tpu.memory_space<vmem>>, %arg3: memref<8x216xbf16, #tpu.memory_space<vmem>>, %arg4: memref<1x8x2048xbf16, #tpu.memory_space<vmem>>, %arg5: memref<1x8x1xf32, #tpu.memory_space<vmem>>, %arg6: memref<1x8x1xf32, #tpu.memory_space<vmem>>) attributes {dimension_semantics = [#tpu.dimension_semantics<parallel>, #tpu.dimension_semantics<arbitrary>], iteration_bounds = array<i64: 2, 2>, scalar_prefetch = 0 : i64, scratch_operands = 0 : i64, tpu.core_type = #tpu.core_type<tc>, window_params = [{transform_indices = @transform_0, window_bounds = array<i64: 1, 216, 2048>}, {pipeline_mode = #tpu.pipeline_mode<synchronous>, transform_indices = @transform_1, window_bounds = array<i64: 8, 216>}, {transform_indices = @transform_2, window_bounds = array<i64: 1, 8, 2048>}, {transform_indices = @transform_3, window_bounds = array<i64: 1, 8, 1>}, {transform_indices = @transform_4, window_bounds = array<i64: 1, 8, 1>}]} {
    %c0 = arith.constant 0 : index
    %c0_0 = arith.constant 0 : index
    %0 = vector.load %arg3[%c0, %c0_0] : memref<8x216xbf16, #tpu.memory_space<vmem>>, vector<8x216xbf16>
    %c0_1 = arith.constant 0 : index
    %c0_2 = arith.constant 0 : index
    %c0_3 = arith.constant 0 : index
    %1 = vector.load %arg2[%c0_1, %c0_2, %c0_3] : memref<1x216x2048xbf16, #tpu.memory_space<vmem>>, vector<1x216x2048xbf16>
    %2 = vector.shape_cast %1 : vector<1x216x2048xbf16> to vector<216x2048xbf16>
    %cst = arith.constant dense<0.000000e+00> : vector<8x2048xf32>
    %3 = tpu.matmul %0, %2, %cst {dimension_numbers = #tpu.dot_dimension_numbers<[1], [0], [0], [1], [0, 0, 1, 1], [], []>} : vector<8x216xbf16>, vector<216x2048xbf16>, vector<8x2048xf32> -> vector<8x2048xf32>
    %4 = arith.truncf %3 : vector<8x2048xf32> to vector<8x2048xbf16>
    %c0_4 = arith.constant 0 : index
    %c0_5 = arith.constant 0 : index
    %c0_6 = arith.constant 0 : index
    %5 = vector.load %arg4[%c0_4, %c0_5, %c0_6] : memref<1x8x2048xbf16, #tpu.memory_space<vmem>>, vector<1x8x2048xbf16>
    %6 = vector.shape_cast %5 : vector<1x8x2048xbf16> to vector<8x2048xbf16>
    %7 = vector.shape_cast %4 : vector<8x2048xbf16> to vector<1x8x2048xbf16>
    tpu.vector_store %arg4[%c0_4, %c0_5, %c0_6], %7 {strides = array<i32>} : memref<1x8x2048xbf16, #tpu.memory_space<vmem>>, vector<1x8x2048xbf16>,
    %c0_i32 = arith.constant 0 : i32
    %8 = arith.cmpi eq, %arg1, %c0_i32 : i32
    %9 = arith.extui %8 : i1 to i32
    %c0_i32_7 = arith.constant 0 : i32
    %10 = arith.cmpi ne, %9, %c0_i32_7 : i32
    scf.if %10 {
      %cst_22 = arith.constant 0.000000e+00 : f32
      %28 = vector.broadcast %cst_22 : f32 to vector<1x8x1xf32>
      %c0_23 = arith.constant 0 : index
      %c0_24 = arith.constant 0 : index
      %c0_25 = arith.constant 0 : index
      %29 = vector.load %arg5[%c0_23, %c0_24, %c0_25] : memref<1x8x1xf32, #tpu.memory_space<vmem>>, vector<1x8x1xf32>
      tpu.vector_store %arg5[%c0_23, %c0_24, %c0_25], %28 {strides = array<i32>} : memref<1x8x1xf32, #tpu.memory_space<vmem>>, vector<1x8x1xf32>,
      %cst_26 = arith.constant 0.000000e+00 : f32
      %30 = vector.broadcast %cst_26 : f32 to vector<1x8x1xf32>
      %c0_27 = arith.constant 0 : index
      %c0_28 = arith.constant 0 : index
      %c0_29 = arith.constant 0 : index
      %31 = vector.load %arg6[%c0_27, %c0_28, %c0_29] : memref<1x8x1xf32, #tpu.memory_space<vmem>>, vector<1x8x1xf32>
      tpu.vector_store %arg6[%c0_27, %c0_28, %c0_29], %30 {strides = array<i32>} : memref<1x8x1xf32, #tpu.memory_space<vmem>>, vector<1x8x1xf32>,
    } else {
    }
    %c0_8 = arith.constant 0 : index
    %c0_9 = arith.constant 0 : index
    %c0_10 = arith.constant 0 : index
    %11 = vector.load %arg5[%c0_8, %c0_9, %c0_10] : memref<1x8x1xf32, #tpu.memory_space<vmem>>, vector<1x8x1xf32>
    %12 = vector.shape_cast %11 : vector<1x8x1xf32> to vector<8x1xf32>
    %cst_11 = arith.constant dense<0.000000e+00> : vector<8xf32>
    %13 = vector.multi_reduction <add>, %3, %cst_11 [1] : vector<8x2048xf32> to vector<8xf32>
    %14 = vector.shape_cast %13 : vector<8xf32> to vector<8x1xf32>
    %15 = arith.addf %12, %14 : vector<8x1xf32>
    %c0_12 = arith.constant 0 : index
    %c0_13 = arith.constant 0 : index
    %c0_14 = arith.constant 0 : index
    %16 = vector.load %arg5[%c0_12, %c0_13, %c0_14] : memref<1x8x1xf32, #tpu.memory_space<vmem>>, vector<1x8x1xf32>
    %17 = vector.shape_cast %16 : vector<1x8x1xf32> to vector<8x1xf32>
    %18 = vector.shape_cast %15 : vector<8x1xf32> to vector<1x8x1xf32>
    tpu.vector_store %arg5[%c0_12, %c0_13, %c0_14], %18 {strides = array<i32>} : memref<1x8x1xf32, #tpu.memory_space<vmem>>, vector<1x8x1xf32>,
    %c0_15 = arith.constant 0 : index
    %c0_16 = arith.constant 0 : index
    %c0_17 = arith.constant 0 : index
    %19 = vector.load %arg6[%c0_15, %c0_16, %c0_17] : memref<1x8x1xf32, #tpu.memory_space<vmem>>, vector<1x8x1xf32>
    %20 = vector.shape_cast %19 : vector<1x8x1xf32> to vector<8x1xf32>
    %21 = arith.mulf %3, %3 : vector<8x2048xf32>
    %cst_18 = arith.constant dense<0.000000e+00> : vector<8xf32>
    %22 = vector.multi_reduction <add>, %21, %cst_18 [1] : vector<8x2048xf32> to vector<8xf32>
    %23 = vector.shape_cast %22 : vector<8xf32> to vector<8x1xf32>
    %24 = arith.addf %20, %23 : vector<8x1xf32>
    %c0_19 = arith.constant 0 : index
    %c0_20 = arith.constant 0 : index
    %c0_21 = arith.constant 0 : index
    %25 = vector.load %arg6[%c0_19, %c0_20, %c0_21] : memref<1x8x1xf32, #tpu.memory_space<vmem>>, vector<1x8x1xf32>
    %26 = vector.shape_cast %25 : vector<1x8x1xf32> to vector<8x1xf32>
    %27 = vector.shape_cast %24 : vector<8x1xf32> to vector<1x8x1xf32>
    tpu.vector_store %arg6[%c0_19, %c0_20, %c0_21], %27 {strides = array<i32>} : memref<1x8x1xf32, #tpu.memory_space<vmem>>, vector<1x8x1xf32>,
    return
  }
  func.func @transform_0(%arg0: i32, %arg1: i32) -> (i32, i32, i32) {
    %c0_i32 = arith.constant 0 : i32
    %c0_i32_0 = arith.constant 0 : i32
    return %arg0, %c0_i32, %arg1 : i32, i32, i32
  }
  func.func @transform_1(%arg0: i32, %arg1: i32) -> (i32, i32) {
    %c0_i32 = arith.constant 0 : i32
    %c0_i32_0 = arith.constant 0 : i32
    %c0_i32_1 = arith.constant 0 : i32
    return %c0_i32, %c0_i32_0 : i32, i32
  }
  func.func @transform_2(%arg0: i32, %arg1: i32) -> (i32, i32, i32) {
    %c0_i32 = arith.constant 0 : i32
    %c0_i32_0 = arith.constant 0 : i32
    return %arg0, %c0_i32, %arg1 : i32, i32, i32
  }
  func.func @transform_3(%arg0: i32, %arg1: i32) -> (i32, i32, i32) {
    %c0_i32 = arith.constant 0 : i32
    %c0_i32_0 = arith.constant 0 : i32
    %c0_i32_1 = arith.constant 0 : i32
    return %arg0, %c0_i32, %c0_i32_0 : i32, i32, i32
  }
  func.func @transform_4(%arg0: i32, %arg1: i32) -> (i32, i32, i32) {
    %c0_i32 = arith.constant 0 : i32
    %c0_i32_0 = arith.constant 0 : i32
    %c0_i32_1 = arith.constant 0 : i32
    return %arg0, %c0_i32, %c0_i32_0 : i32, i32, i32
  }
}

module attributes {stable_mosaic.version = 11 : i64} {
  func.func @fused_conv_in_prelu_kernel(%arg0: i32, %arg1: memref<1xf32, #tpu.memory_space<smem>>, %arg2: memref<1x216x512xbf16, #tpu.memory_space<vmem>>, %arg3: memref<16x216xbf16, #tpu.memory_space<vmem>>, %arg4: memref<1x16x512xf32, #tpu.memory_space<vmem>>) attributes {dimension_semantics = [#tpu.dimension_semantics<parallel>], iteration_bounds = array<i64: 2>, scalar_prefetch = 0 : i64, scratch_operands = 0 : i64, tpu.core_type = #tpu.core_type<tc>, window_params = [{transform_indices = @transform_0, window_bounds = array<i64: 1>}, {transform_indices = @transform_1, window_bounds = array<i64: 1, 216, 512>}, {pipeline_mode = #tpu.pipeline_mode<synchronous>, transform_indices = @transform_2, window_bounds = array<i64: 16, 216>}, {transform_indices = @transform_3, window_bounds = array<i64: 1, 16, 512>}]} {
    %c0 = arith.constant 0 : index
    %c0_0 = arith.constant 0 : index
    %0 = vector.load %arg3[%c0, %c0_0] : memref<16x216xbf16, #tpu.memory_space<vmem>>, vector<16x216xbf16>
    %c0_1 = arith.constant 0 : index
    %c0_2 = arith.constant 0 : index
    %c0_3 = arith.constant 0 : index
    %1 = vector.load %arg2[%c0_1, %c0_2, %c0_3] : memref<1x216x512xbf16, #tpu.memory_space<vmem>>, vector<1x216x512xbf16>
    %2 = vector.shape_cast %1 : vector<1x216x512xbf16> to vector<216x512xbf16>
    %cst = arith.constant dense<0.000000e+00> : vector<16x512xf32>
    %3 = tpu.matmul %0, %2, %cst {dimension_numbers = #tpu.dot_dimension_numbers<[1], [0], [0], [1], [0, 0, 1, 1], [], []>} : vector<16x216xbf16>, vector<216x512xbf16>, vector<16x512xf32> -> vector<16x512xf32>
    %cst_4 = arith.constant dense<0.000000e+00> : vector<16xf32>
    %4 = vector.multi_reduction <add>, %3, %cst_4 [1] : vector<16x512xf32> to vector<16xf32>
    %5 = vector.shape_cast %4 : vector<16xf32> to vector<16x1xf32>
    %6 = arith.mulf %3, %3 : vector<16x512xf32>
    %cst_5 = arith.constant dense<0.000000e+00> : vector<16xf32>
    %7 = vector.multi_reduction <add>, %6, %cst_5 [1] : vector<16x512xf32> to vector<16xf32>
    %8 = vector.shape_cast %7 : vector<16xf32> to vector<16x1xf32>
    %cst_6 = arith.constant 0.001953125 : f32
    %9 = vector.broadcast %cst_6 : f32 to vector<16x1xf32>
    %10 = arith.mulf %5, %9 : vector<16x1xf32>
    %cst_7 = arith.constant 0.001953125 : f32
    %11 = vector.broadcast %cst_7 : f32 to vector<16x1xf32>
    %12 = arith.mulf %8, %11 : vector<16x1xf32>
    %13 = arith.mulf %10, %10 : vector<16x1xf32>
    %14 = arith.subf %12, %13 : vector<16x1xf32>
    %cst_8 = arith.constant 0.000000e+00 : f32
    %15 = vector.broadcast %cst_8 : f32 to vector<16x1xf32>
    %16 = arith.maximumf %14, %15 : vector<16x1xf32>
    %17 = vector.broadcast %10 : vector<16x1xf32> to vector<16x512xf32>
    %18 = arith.subf %3, %17 : vector<16x512xf32>
    %cst_9 = arith.constant 9.99999974E-6 : f32
    %19 = vector.broadcast %cst_9 : f32 to vector<16x1xf32>
    %20 = arith.addf %16, %19 : vector<16x1xf32>
    %21 = math.rsqrt %20 : vector<16x1xf32>
    %22 = vector.broadcast %21 : vector<16x1xf32> to vector<16x512xf32>
    %23 = arith.mulf %18, %22 : vector<16x512xf32>
    %c0_10 = arith.constant 0 : index
    %24 = memref.load %arg1[%c0_10] : memref<1xf32, #tpu.memory_space<smem>>
    %cst_11 = arith.constant 0.000000e+00 : f32
    %25 = vector.broadcast %cst_11 : f32 to vector<16x512xf32>
    %26 = arith.cmpf oge, %23, %25 : vector<16x512xf32>
    %27 = vector.broadcast %24 : f32 to vector<16x512xf32>
    %28 = arith.mulf %27, %23 : vector<16x512xf32>
    %29 = arith.select %26, %23, %28 : vector<16x512xi1>, vector<16x512xf32>
    %c0_12 = arith.constant 0 : index
    %c0_13 = arith.constant 0 : index
    %c0_14 = arith.constant 0 : index
    %30 = vector.load %arg4[%c0_12, %c0_13, %c0_14] : memref<1x16x512xf32, #tpu.memory_space<vmem>>, vector<1x16x512xf32>
    %31 = vector.shape_cast %30 : vector<1x16x512xf32> to vector<16x512xf32>
    %32 = vector.shape_cast %29 : vector<16x512xf32> to vector<1x16x512xf32>
    tpu.vector_store %arg4[%c0_12, %c0_13, %c0_14], %32 {strides = array<i32>} : memref<1x16x512xf32, #tpu.memory_space<vmem>>, vector<1x16x512xf32>,
    return
  }
  func.func @transform_0(%arg0: i32) -> i32 {
    %c0_i32 = arith.constant 0 : i32
    %c0_i32_0 = arith.constant 0 : i32
    return %c0_i32 : i32
  }
  func.func @transform_1(%arg0: i32) -> (i32, i32, i32) {
    %c0_i32 = arith.constant 0 : i32
    %c0_i32_0 = arith.constant 0 : i32
    %c0_i32_1 = arith.constant 0 : i32
    return %arg0, %c0_i32, %c0_i32_0 : i32, i32, i32
  }
  func.func @transform_2(%arg0: i32) -> (i32, i32) {
    %c0_i32 = arith.constant 0 : i32
    %c0_i32_0 = arith.constant 0 : i32
    %c0_i32_1 = arith.constant 0 : i32
    return %c0_i32, %c0_i32_0 : i32, i32
  }
  func.func @transform_3(%arg0: i32) -> (i32, i32, i32) {
    %c0_i32 = arith.constant 0 : i32
    %c0_i32_0 = arith.constant 0 : i32
    %c0_i32_1 = arith.constant 0 : i32
    return %arg0, %c0_i32, %c0_i32_0 : i32, i32, i32
  }
}

module attributes {stable_mosaic.version = 11 : i64} {
  func.func @fused_conv_in_prelu_kernel(%arg0: i32, %arg1: memref<1xf32, #tpu.memory_space<smem>>, %arg2: memref<1x432x512xbf16, #tpu.memory_space<vmem>>, %arg3: memref<16x432xbf16, #tpu.memory_space<vmem>>, %arg4: memref<1x16x512xf32, #tpu.memory_space<vmem>>) attributes {dimension_semantics = [#tpu.dimension_semantics<parallel>], iteration_bounds = array<i64: 2>, scalar_prefetch = 0 : i64, scratch_operands = 0 : i64, tpu.core_type = #tpu.core_type<tc>, window_params = [{transform_indices = @transform_0, window_bounds = array<i64: 1>}, {transform_indices = @transform_1, window_bounds = array<i64: 1, 432, 512>}, {pipeline_mode = #tpu.pipeline_mode<synchronous>, transform_indices = @transform_2, window_bounds = array<i64: 16, 432>}, {transform_indices = @transform_3, window_bounds = array<i64: 1, 16, 512>}]} {
    %c0 = arith.constant 0 : index
    %c0_0 = arith.constant 0 : index
    %0 = vector.load %arg3[%c0, %c0_0] : memref<16x432xbf16, #tpu.memory_space<vmem>>, vector<16x432xbf16>
    %c0_1 = arith.constant 0 : index
    %c0_2 = arith.constant 0 : index
    %c0_3 = arith.constant 0 : index
    %1 = vector.load %arg2[%c0_1, %c0_2, %c0_3] : memref<1x432x512xbf16, #tpu.memory_space<vmem>>, vector<1x432x512xbf16>
    %2 = vector.shape_cast %1 : vector<1x432x512xbf16> to vector<432x512xbf16>
    %cst = arith.constant dense<0.000000e+00> : vector<16x512xf32>
    %3 = tpu.matmul %0, %2, %cst {dimension_numbers = #tpu.dot_dimension_numbers<[1], [0], [0], [1], [0, 0, 1, 1], [], []>} : vector<16x432xbf16>, vector<432x512xbf16>, vector<16x512xf32> -> vector<16x512xf32>
    %cst_4 = arith.constant dense<0.000000e+00> : vector<16xf32>
    %4 = vector.multi_reduction <add>, %3, %cst_4 [1] : vector<16x512xf32> to vector<16xf32>
    %5 = vector.shape_cast %4 : vector<16xf32> to vector<16x1xf32>
    %6 = arith.mulf %3, %3 : vector<16x512xf32>
    %cst_5 = arith.constant dense<0.000000e+00> : vector<16xf32>
    %7 = vector.multi_reduction <add>, %6, %cst_5 [1] : vector<16x512xf32> to vector<16xf32>
    %8 = vector.shape_cast %7 : vector<16xf32> to vector<16x1xf32>
    %cst_6 = arith.constant 0.001953125 : f32
    %9 = vector.broadcast %cst_6 : f32 to vector<16x1xf32>
    %10 = arith.mulf %5, %9 : vector<16x1xf32>
    %cst_7 = arith.constant 0.001953125 : f32
    %11 = vector.broadcast %cst_7 : f32 to vector<16x1xf32>
    %12 = arith.mulf %8, %11 : vector<16x1xf32>
    %13 = arith.mulf %10, %10 : vector<16x1xf32>
    %14 = arith.subf %12, %13 : vector<16x1xf32>
    %cst_8 = arith.constant 0.000000e+00 : f32
    %15 = vector.broadcast %cst_8 : f32 to vector<16x1xf32>
    %16 = arith.maximumf %14, %15 : vector<16x1xf32>
    %17 = vector.broadcast %10 : vector<16x1xf32> to vector<16x512xf32>
    %18 = arith.subf %3, %17 : vector<16x512xf32>
    %cst_9 = arith.constant 9.99999974E-6 : f32
    %19 = vector.broadcast %cst_9 : f32 to vector<16x1xf32>
    %20 = arith.addf %16, %19 : vector<16x1xf32>
    %21 = math.rsqrt %20 : vector<16x1xf32>
    %22 = vector.broadcast %21 : vector<16x1xf32> to vector<16x512xf32>
    %23 = arith.mulf %18, %22 : vector<16x512xf32>
    %c0_10 = arith.constant 0 : index
    %24 = memref.load %arg1[%c0_10] : memref<1xf32, #tpu.memory_space<smem>>
    %cst_11 = arith.constant 0.000000e+00 : f32
    %25 = vector.broadcast %cst_11 : f32 to vector<16x512xf32>
    %26 = arith.cmpf oge, %23, %25 : vector<16x512xf32>
    %27 = vector.broadcast %24 : f32 to vector<16x512xf32>
    %28 = arith.mulf %27, %23 : vector<16x512xf32>
    %29 = arith.select %26, %23, %28 : vector<16x512xi1>, vector<16x512xf32>
    %c0_12 = arith.constant 0 : index
    %c0_13 = arith.constant 0 : index
    %c0_14 = arith.constant 0 : index
    %30 = vector.load %arg4[%c0_12, %c0_13, %c0_14] : memref<1x16x512xf32, #tpu.memory_space<vmem>>, vector<1x16x512xf32>
    %31 = vector.shape_cast %30 : vector<1x16x512xf32> to vector<16x512xf32>
    %32 = vector.shape_cast %29 : vector<16x512xf32> to vector<1x16x512xf32>
    tpu.vector_store %arg4[%c0_12, %c0_13, %c0_14], %32 {strides = array<i32>} : memref<1x16x512xf32, #tpu.memory_space<vmem>>, vector<1x16x512xf32>,
    return
  }
  func.func @transform_0(%arg0: i32) -> i32 {
    %c0_i32 = arith.constant 0 : i32
    %c0_i32_0 = arith.constant 0 : i32
    return %c0_i32 : i32
  }
  func.func @transform_1(%arg0: i32) -> (i32, i32, i32) {
    %c0_i32 = arith.constant 0 : i32
    %c0_i32_0 = arith.constant 0 : i32
    %c0_i32_1 = arith.constant 0 : i32
    return %arg0, %c0_i32, %c0_i32_0 : i32, i32, i32
  }
  func.func @transform_2(%arg0: i32) -> (i32, i32) {
    %c0_i32 = arith.constant 0 : i32
    %c0_i32_0 = arith.constant 0 : i32
    %c0_i32_1 = arith.constant 0 : i32
    return %c0_i32, %c0_i32_0 : i32, i32
  }
  func.func @transform_3(%arg0: i32) -> (i32, i32, i32) {
    %c0_i32 = arith.constant 0 : i32
    %c0_i32_0 = arith.constant 0 : i32
    %c0_i32_1 = arith.constant 0 : i32
    return %arg0, %c0_i32, %c0_i32_0 : i32, i32, i32
  }
}

module attributes {stable_mosaic.version = 11 : i64} {
  func.func @fused_conv_in_prelu_kernel(%arg0: i32, %arg1: memref<1xf32, #tpu.memory_space<smem>>, %arg2: memref<1x432x128xbf16, #tpu.memory_space<vmem>>, %arg3: memref<32x432xbf16, #tpu.memory_space<vmem>>, %arg4: memref<1x32x128xf32, #tpu.memory_space<vmem>>) attributes {dimension_semantics = [#tpu.dimension_semantics<parallel>], iteration_bounds = array<i64: 2>, scalar_prefetch = 0 : i64, scratch_operands = 0 : i64, tpu.core_type = #tpu.core_type<tc>, window_params = [{transform_indices = @transform_0, window_bounds = array<i64: 1>}, {transform_indices = @transform_1, window_bounds = array<i64: 1, 432, 128>}, {pipeline_mode = #tpu.pipeline_mode<synchronous>, transform_indices = @transform_2, window_bounds = array<i64: 32, 432>}, {transform_indices = @transform_3, window_bounds = array<i64: 1, 32, 128>}]} {
    %c0 = arith.constant 0 : index
    %c0_0 = arith.constant 0 : index
    %0 = vector.load %arg3[%c0, %c0_0] : memref<32x432xbf16, #tpu.memory_space<vmem>>, vector<32x432xbf16>
    %c0_1 = arith.constant 0 : index
    %c0_2 = arith.constant 0 : index
    %c0_3 = arith.constant 0 : index
    %1 = vector.load %arg2[%c0_1, %c0_2, %c0_3] : memref<1x432x128xbf16, #tpu.memory_space<vmem>>, vector<1x432x128xbf16>
    %2 = vector.shape_cast %1 : vector<1x432x128xbf16> to vector<432x128xbf16>
    %cst = arith.constant dense<0.000000e+00> : vector<32x128xf32>
    %3 = tpu.matmul %0, %2, %cst {dimension_numbers = #tpu.dot_dimension_numbers<[1], [0], [0], [1], [0, 0, 1, 1], [], []>} : vector<32x432xbf16>, vector<432x128xbf16>, vector<32x128xf32> -> vector<32x128xf32>
    %cst_4 = arith.constant dense<0.000000e+00> : vector<32xf32>
    %4 = vector.multi_reduction <add>, %3, %cst_4 [1] : vector<32x128xf32> to vector<32xf32>
    %5 = vector.shape_cast %4 : vector<32xf32> to vector<32x1xf32>
    %6 = arith.mulf %3, %3 : vector<32x128xf32>
    %cst_5 = arith.constant dense<0.000000e+00> : vector<32xf32>
    %7 = vector.multi_reduction <add>, %6, %cst_5 [1] : vector<32x128xf32> to vector<32xf32>
    %8 = vector.shape_cast %7 : vector<32xf32> to vector<32x1xf32>
    %cst_6 = arith.constant 1.562500e-02 : f32
    %9 = vector.broadcast %cst_6 : f32 to vector<32x1xf32>
    %10 = arith.mulf %5, %9 : vector<32x1xf32>
    %cst_7 = arith.constant 1.562500e-02 : f32
    %11 = vector.broadcast %cst_7 : f32 to vector<32x1xf32>
    %12 = arith.mulf %8, %11 : vector<32x1xf32>
    %13 = arith.mulf %10, %10 : vector<32x1xf32>
    %14 = arith.subf %12, %13 : vector<32x1xf32>
    %cst_8 = arith.constant 0.000000e+00 : f32
    %15 = vector.broadcast %cst_8 : f32 to vector<32x1xf32>
    %16 = arith.maximumf %14, %15 : vector<32x1xf32>
    %17 = vector.broadcast %10 : vector<32x1xf32> to vector<32x128xf32>
    %18 = arith.subf %3, %17 : vector<32x128xf32>
    %cst_9 = arith.constant 9.99999974E-6 : f32
    %19 = vector.broadcast %cst_9 : f32 to vector<32x1xf32>
    %20 = arith.addf %16, %19 : vector<32x1xf32>
    %21 = math.rsqrt %20 : vector<32x1xf32>
    %22 = vector.broadcast %21 : vector<32x1xf32> to vector<32x128xf32>
    %23 = arith.mulf %18, %22 : vector<32x128xf32>
    %c0_10 = arith.constant 0 : index
    %24 = memref.load %arg1[%c0_10] : memref<1xf32, #tpu.memory_space<smem>>
    %cst_11 = arith.constant 0.000000e+00 : f32
    %25 = vector.broadcast %cst_11 : f32 to vector<32x128xf32>
    %26 = arith.cmpf oge, %23, %25 : vector<32x128xf32>
    %27 = vector.broadcast %24 : f32 to vector<32x128xf32>
    %28 = arith.mulf %27, %23 : vector<32x128xf32>
    %29 = arith.select %26, %23, %28 : vector<32x128xi1>, vector<32x128xf32>
    %c0_12 = arith.constant 0 : index
    %c0_13 = arith.constant 0 : index
    %c0_14 = arith.constant 0 : index
    %30 = vector.load %arg4[%c0_12, %c0_13, %c0_14] : memref<1x32x128xf32, #tpu.memory_space<vmem>>, vector<1x32x128xf32>
    %31 = vector.shape_cast %30 : vector<1x32x128xf32> to vector<32x128xf32>
    %32 = vector.shape_cast %29 : vector<32x128xf32> to vector<1x32x128xf32>
    tpu.vector_store %arg4[%c0_12, %c0_13, %c0_14], %32 {strides = array<i32>} : memref<1x32x128xf32, #tpu.memory_space<vmem>>, vector<1x32x128xf32>,
    return
  }
  func.func @transform_0(%arg0: i32) -> i32 {
    %c0_i32 = arith.constant 0 : i32
    %c0_i32_0 = arith.constant 0 : i32
    return %c0_i32 : i32
  }
  func.func @transform_1(%arg0: i32) -> (i32, i32, i32) {
    %c0_i32 = arith.constant 0 : i32
    %c0_i32_0 = arith.constant 0 : i32
    %c0_i32_1 = arith.constant 0 : i32
    return %arg0, %c0_i32, %c0_i32_0 : i32, i32, i32
  }
  func.func @transform_2(%arg0: i32) -> (i32, i32) {
    %c0_i32 = arith.constant 0 : i32
    %c0_i32_0 = arith.constant 0 : i32
    %c0_i32_1 = arith.constant 0 : i32
    return %c0_i32, %c0_i32_0 : i32, i32
  }
  func.func @transform_3(%arg0: i32) -> (i32, i32, i32) {
    %c0_i32 = arith.constant 0 : i32
    %c0_i32_0 = arith.constant 0 : i32
    %c0_i32_1 = arith.constant 0 : i32
    return %arg0, %c0_i32, %c0_i32_0 : i32, i32, i32
  }
}

module attributes {stable_mosaic.version = 11 : i64} {
  func.func @fused_conv_in_prelu_kernel(%arg0: i32, %arg1: memref<1xf32, #tpu.memory_space<smem>>, %arg2: memref<1x864x128xbf16, #tpu.memory_space<vmem>>, %arg3: memref<32x864xbf16, #tpu.memory_space<vmem>>, %arg4: memref<1x32x128xf32, #tpu.memory_space<vmem>>) attributes {dimension_semantics = [#tpu.dimension_semantics<parallel>], iteration_bounds = array<i64: 2>, scalar_prefetch = 0 : i64, scratch_operands = 0 : i64, tpu.core_type = #tpu.core_type<tc>, window_params = [{transform_indices = @transform_0, window_bounds = array<i64: 1>}, {transform_indices = @transform_1, window_bounds = array<i64: 1, 864, 128>}, {pipeline_mode = #tpu.pipeline_mode<synchronous>, transform_indices = @transform_2, window_bounds = array<i64: 32, 864>}, {transform_indices = @transform_3, window_bounds = array<i64: 1, 32, 128>}]} {
    %c0 = arith.constant 0 : index
    %c0_0 = arith.constant 0 : index
    %0 = vector.load %arg3[%c0, %c0_0] : memref<32x864xbf16, #tpu.memory_space<vmem>>, vector<32x864xbf16>
    %c0_1 = arith.constant 0 : index
    %c0_2 = arith.constant 0 : index
    %c0_3 = arith.constant 0 : index
    %1 = vector.load %arg2[%c0_1, %c0_2, %c0_3] : memref<1x864x128xbf16, #tpu.memory_space<vmem>>, vector<1x864x128xbf16>
    %2 = vector.shape_cast %1 : vector<1x864x128xbf16> to vector<864x128xbf16>
    %cst = arith.constant dense<0.000000e+00> : vector<32x128xf32>
    %3 = tpu.matmul %0, %2, %cst {dimension_numbers = #tpu.dot_dimension_numbers<[1], [0], [0], [1], [0, 0, 1, 1], [], []>} : vector<32x864xbf16>, vector<864x128xbf16>, vector<32x128xf32> -> vector<32x128xf32>
    %cst_4 = arith.constant dense<0.000000e+00> : vector<32xf32>
    %4 = vector.multi_reduction <add>, %3, %cst_4 [1] : vector<32x128xf32> to vector<32xf32>
    %5 = vector.shape_cast %4 : vector<32xf32> to vector<32x1xf32>
    %6 = arith.mulf %3, %3 : vector<32x128xf32>
    %cst_5 = arith.constant dense<0.000000e+00> : vector<32xf32>
    %7 = vector.multi_reduction <add>, %6, %cst_5 [1] : vector<32x128xf32> to vector<32xf32>
    %8 = vector.shape_cast %7 : vector<32xf32> to vector<32x1xf32>
    %cst_6 = arith.constant 1.562500e-02 : f32
    %9 = vector.broadcast %cst_6 : f32 to vector<32x1xf32>
    %10 = arith.mulf %5, %9 : vector<32x1xf32>
    %cst_7 = arith.constant 1.562500e-02 : f32
    %11 = vector.broadcast %cst_7 : f32 to vector<32x1xf32>
    %12 = arith.mulf %8, %11 : vector<32x1xf32>
    %13 = arith.mulf %10, %10 : vector<32x1xf32>
    %14 = arith.subf %12, %13 : vector<32x1xf32>
    %cst_8 = arith.constant 0.000000e+00 : f32
    %15 = vector.broadcast %cst_8 : f32 to vector<32x1xf32>
    %16 = arith.maximumf %14, %15 : vector<32x1xf32>
    %17 = vector.broadcast %10 : vector<32x1xf32> to vector<32x128xf32>
    %18 = arith.subf %3, %17 : vector<32x128xf32>
    %cst_9 = arith.constant 9.99999974E-6 : f32
    %19 = vector.broadcast %cst_9 : f32 to vector<32x1xf32>
    %20 = arith.addf %16, %19 : vector<32x1xf32>
    %21 = math.rsqrt %20 : vector<32x1xf32>
    %22 = vector.broadcast %21 : vector<32x1xf32> to vector<32x128xf32>
    %23 = arith.mulf %18, %22 : vector<32x128xf32>
    %c0_10 = arith.constant 0 : index
    %24 = memref.load %arg1[%c0_10] : memref<1xf32, #tpu.memory_space<smem>>
    %cst_11 = arith.constant 0.000000e+00 : f32
    %25 = vector.broadcast %cst_11 : f32 to vector<32x128xf32>
    %26 = arith.cmpf oge, %23, %25 : vector<32x128xf32>
    %27 = vector.broadcast %24 : f32 to vector<32x128xf32>
    %28 = arith.mulf %27, %23 : vector<32x128xf32>
    %29 = arith.select %26, %23, %28 : vector<32x128xi1>, vector<32x128xf32>
    %c0_12 = arith.constant 0 : index
    %c0_13 = arith.constant 0 : index
    %c0_14 = arith.constant 0 : index
    %30 = vector.load %arg4[%c0_12, %c0_13, %c0_14] : memref<1x32x128xf32, #tpu.memory_space<vmem>>, vector<1x32x128xf32>
    %31 = vector.shape_cast %30 : vector<1x32x128xf32> to vector<32x128xf32>
    %32 = vector.shape_cast %29 : vector<32x128xf32> to vector<1x32x128xf32>
    tpu.vector_store %arg4[%c0_12, %c0_13, %c0_14], %32 {strides = array<i32>} : memref<1x32x128xf32, #tpu.memory_space<vmem>>, vector<1x32x128xf32>,
    return
  }
  func.func @transform_0(%arg0: i32) -> i32 {
    %c0_i32 = arith.constant 0 : i32
    %c0_i32_0 = arith.constant 0 : i32
    return %c0_i32 : i32
  }
  func.func @transform_1(%arg0: i32) -> (i32, i32, i32) {
    %c0_i32 = arith.constant 0 : i32
    %c0_i32_0 = arith.constant 0 : i32
    %c0_i32_1 = arith.constant 0 : i32
    return %arg0, %c0_i32, %c0_i32_0 : i32, i32, i32
  }
  func.func @transform_2(%arg0: i32) -> (i32, i32) {
    %c0_i32 = arith.constant 0 : i32
    %c0_i32_0 = arith.constant 0 : i32
    %c0_i32_1 = arith.constant 0 : i32
    return %c0_i32, %c0_i32_0 : i32, i32
  }
  func.func @transform_3(%arg0: i32) -> (i32, i32, i32) {
    %c0_i32 = arith.constant 0 : i32
    %c0_i32_0 = arith.constant 0 : i32
    %c0_i32_1 = arith.constant 0 : i32
    return %arg0, %c0_i32, %c0_i32_0 : i32, i32, i32
  }
}

module attributes {stable_mosaic.version = 11 : i64} {
  func.func @fused_conv_in_prelu_kernel(%arg0: i32, %arg1: memref<1xf32, #tpu.memory_space<smem>>, %arg2: memref<1x864x128xbf16, #tpu.memory_space<vmem>>, %arg3: memref<32x864xbf16, #tpu.memory_space<vmem>>, %arg4: memref<1x32x128xf32, #tpu.memory_space<vmem>>) attributes {dimension_semantics = [#tpu.dimension_semantics<parallel>], iteration_bounds = array<i64: 2>, scalar_prefetch = 0 : i64, scratch_operands = 0 : i64, tpu.core_type = #tpu.core_type<tc>, window_params = [{transform_indices = @transform_0, window_bounds = array<i64: 1>}, {transform_indices = @transform_1, window_bounds = array<i64: 1, 864, 128>}, {pipeline_mode = #tpu.pipeline_mode<synchronous>, transform_indices = @transform_2, window_bounds = array<i64: 32, 864>}, {transform_indices = @transform_3, window_bounds = array<i64: 1, 32, 128>}]} {
    %c0 = arith.constant 0 : index
    %c0_0 = arith.constant 0 : index
    %0 = vector.load %arg3[%c0, %c0_0] : memref<32x864xbf16, #tpu.memory_space<vmem>>, vector<32x864xbf16>
    %c0_1 = arith.constant 0 : index
    %c0_2 = arith.constant 0 : index
    %c0_3 = arith.constant 0 : index
    %1 = vector.load %arg2[%c0_1, %c0_2, %c0_3] : memref<1x864x128xbf16, #tpu.memory_space<vmem>>, vector<1x864x128xbf16>
    %2 = vector.shape_cast %1 : vector<1x864x128xbf16> to vector<864x128xbf16>
    %cst = arith.constant dense<0.000000e+00> : vector<32x128xf32>
    %3 = tpu.matmul %0, %2, %cst {dimension_numbers = #tpu.dot_dimension_numbers<[1], [0], [0], [1], [0, 0, 1, 1], [], []>} : vector<32x864xbf16>, vector<864x128xbf16>, vector<32x128xf32> -> vector<32x128xf32>
    %cst_4 = arith.constant dense<0.000000e+00> : vector<32xf32>
    %4 = vector.multi_reduction <add>, %3, %cst_4 [1] : vector<32x128xf32> to vector<32xf32>
    %5 = vector.shape_cast %4 : vector<32xf32> to vector<32x1xf32>
    %6 = arith.mulf %3, %3 : vector<32x128xf32>
    %cst_5 = arith.constant dense<0.000000e+00> : vector<32xf32>
    %7 = vector.multi_reduction <add>, %6, %cst_5 [1] : vector<32x128xf32> to vector<32xf32>
    %8 = vector.shape_cast %7 : vector<32xf32> to vector<32x1xf32>
    %cst_6 = arith.constant 1.250000e-01 : f32
    %9 = vector.broadcast %cst_6 : f32 to vector<32x1xf32>
    %10 = arith.mulf %5, %9 : vector<32x1xf32>
    %cst_7 = arith.constant 1.250000e-01 : f32
    %11 = vector.broadcast %cst_7 : f32 to vector<32x1xf32>
    %12 = arith.mulf %8, %11 : vector<32x1xf32>
    %13 = arith.mulf %10, %10 : vector<32x1xf32>
    %14 = arith.subf %12, %13 : vector<32x1xf32>
    %cst_8 = arith.constant 0.000000e+00 : f32
    %15 = vector.broadcast %cst_8 : f32 to vector<32x1xf32>
    %16 = arith.maximumf %14, %15 : vector<32x1xf32>
    %17 = vector.broadcast %10 : vector<32x1xf32> to vector<32x128xf32>
    %18 = arith.subf %3, %17 : vector<32x128xf32>
    %cst_9 = arith.constant 9.99999974E-6 : f32
    %19 = vector.broadcast %cst_9 : f32 to vector<32x1xf32>
    %20 = arith.addf %16, %19 : vector<32x1xf32>
    %21 = math.rsqrt %20 : vector<32x1xf32>
    %22 = vector.broadcast %21 : vector<32x1xf32> to vector<32x128xf32>
    %23 = arith.mulf %18, %22 : vector<32x128xf32>
    %c0_10 = arith.constant 0 : index
    %24 = memref.load %arg1[%c0_10] : memref<1xf32, #tpu.memory_space<smem>>
    %cst_11 = arith.constant 0.000000e+00 : f32
    %25 = vector.broadcast %cst_11 : f32 to vector<32x128xf32>
    %26 = arith.cmpf oge, %23, %25 : vector<32x128xf32>
    %27 = vector.broadcast %24 : f32 to vector<32x128xf32>
    %28 = arith.mulf %27, %23 : vector<32x128xf32>
    %29 = arith.select %26, %23, %28 : vector<32x128xi1>, vector<32x128xf32>
    %c0_12 = arith.constant 0 : index
    %c0_13 = arith.constant 0 : index
    %c0_14 = arith.constant 0 : index
    %30 = vector.load %arg4[%c0_12, %c0_13, %c0_14] : memref<1x32x128xf32, #tpu.memory_space<vmem>>, vector<1x32x128xf32>
    %31 = vector.shape_cast %30 : vector<1x32x128xf32> to vector<32x128xf32>
    %32 = vector.shape_cast %29 : vector<32x128xf32> to vector<1x32x128xf32>
    tpu.vector_store %arg4[%c0_12, %c0_13, %c0_14], %32 {strides = array<i32>} : memref<1x32x128xf32, #tpu.memory_space<vmem>>, vector<1x32x128xf32>,
    return
  }
  func.func @transform_0(%arg0: i32) -> i32 {
    %c0_i32 = arith.constant 0 : i32
    %c0_i32_0 = arith.constant 0 : i32
    return %c0_i32 : i32
  }
  func.func @transform_1(%arg0: i32) -> (i32, i32, i32) {
    %c0_i32 = arith.constant 0 : i32
    %c0_i32_0 = arith.constant 0 : i32
    %c0_i32_1 = arith.constant 0 : i32
    return %arg0, %c0_i32, %c0_i32_0 : i32, i32, i32
  }
  func.func @transform_2(%arg0: i32) -> (i32, i32) {
    %c0_i32 = arith.constant 0 : i32
    %c0_i32_0 = arith.constant 0 : i32
    %c0_i32_1 = arith.constant 0 : i32
    return %c0_i32, %c0_i32_0 : i32, i32
  }
  func.func @transform_3(%arg0: i32) -> (i32, i32, i32) {
    %c0_i32 = arith.constant 0 : i32
    %c0_i32_0 = arith.constant 0 : i32
    %c0_i32_1 = arith.constant 0 : i32
    return %arg0, %c0_i32, %c0_i32_0 : i32, i32, i32
  }
}

</mosaic_0001>

<bundles_post_ra>
// kernel: unet_encoder_forward.9
= control target key start
LH: loop header
LB: loop body
LE: loop exit
PB: predicated region body
PF: predicated region fallthrough
CT: control target
= control target key end

     0   :  { %s1341_s15 = smov 0   ;;  %s1343_s16 = smov 0   ;;  %s1651_s0 = inlined_call_operand.vmem [shape: bf16[2,27,4096], index: 0, kind: input, shape index: {}]   ;;  %s1652_s1 = inlined_call_operand.vmem [shape: bf16[8,27], index: 1, kind: input, shape index: {}]   ;;  %s1653_s2 = inlined_call_operand.vmem [shape: bf16[2,8,4096], index: 2, kind: output, shape index: {0}]   ;;  %s1654_s3 = inlined_call_operand.vmem [shape: f32[2,8,1], index: 3, kind: output, shape index: {1}]   ;;  %s1655_s4 = inlined_call_operand.vmem [shape: f32[2,8,1], index: 4, kind: output, shape index: {2}]  }
   0x1   :  { %s1345_s17 = smov 0   ;;  %s1347_s18 = smov 0  }
   0x2   :  { %s1349_s19 = smov 0   ;;  %s1351_s20 = smov 0  }
   0x3   :  { %s1353_s21 = smov 0  }
   0x4 LB: > { %s24_s22 = sadd.s32 1, %s1304_s19  ;;  %s27_s23 = sadd.s32 1, %s1308_s20  ;;  %s1312_s21 = sphi %s1353_s21, %s15_s21   ;;  %s1308_s20 = sphi %s1351_s20, %s1661_s20   ;;  %s1304_s19 = sphi %s1349_s19, %s1660_s19   ;;  %s1300_s18 = sphi %s1347_s18, %s1659_s18   ;;  %s1296_s17 = sphi %s1345_s17, %s1658_s17   ;;  %s1292_s16 = sphi %s1343_s16, %s1657_s16   ;;  %s1288_s15 = sphi %s1341_s15, %s1656_s15  }
   0x5   : > { %p25_p0 = scmp.ge.s32.totalorder %s24_s22, 2  ;;  %p43_p1 = scmp.ne.s32.totalorder %s1292_s16, %s1288_s15 }
   0x6   : > { %p44_p2 = scmp.eq.s32.totalorder %s1312_s21, 0  ;;  %s36_s27 = sadd.s32 1, %s1292_s16 }
   0x7   : > { %s1663_s22 = smov (%p25_p0, %s24_s22), 0  ;;  %s1665_s23 = smov (!%p25_p0, %s27_s23), %s1308_s20 }
   0x8   : > { %p45_p3 = por %p44_p2, %p43_p1  ;;  %p29_p4 = scmp.ge.s32.totalorder %s1665_s23, 2 }
   0x9   : > { %s32_s24 = ssub.s32 %s1304_s19, %s1663_s22  ;;  %p1009_p6 = scmp.ge.s32.totalorder %s1312_s21, 4 }
   0xa   : > { %s1667_s23 = smov (%p29_p4, %s1665_s23), 0 }
   0xb   : > { %s31_s25 = ssub.s32 %s1308_s20, %s1667_s23  ;;  %173 = sbr.rel (%p1009_p6) target bundleno = 55 (0x37), region = 20 }
   0xc   : > { %s33_s26 = sor.u32 %s32_s24, %s31_s25 }
   0xd   : > { %p34_p5 = scmp.eq.s32.totalorder %s33_s26, 0 }
   0xf   : > { %s1392_s28 = scalar_select %p34_p5, %s1292_s16, %s36_s27  }
  0x10   : > { %176 = sbr.rel (!%p45_p3) target bundleno = 55 (0x37), region = 24  ;;  %s178_s29 = sand.u32 (%p45_p3), 1, %s1292_s16  }
  0x11   : > { %s1011_s30 = sshll.u32 (%p45_p3), %s1304_s19, 4  ;;  %s1010_s5 = sshll.u32 (%p45_p3), %s178_s29, 8 }
  0x12   : > { %s1012_s6 = sshll.u32 (%p45_p3), %s1308_s20, 7  ;;  %s1406_s12 = scalar_lea.vmem (%p45_p3), [#allocation2], %s1010_s5 }
  0x13   : > { %s183_s7 = sadd.s32 (%p45_p3), %s1012_s6, %s1011_s30 }
  0x14   : > { %s1013_s8 = sshll.u32 (%p45_p3), %s183_s7, 2 }
  0x15   : > { %s1401_s11 = scalar_lea.vmem %s1651_s0, %s1013_s8 }
  0x16   : > { %v198_v0 = vld [vmem:[%s1401_s11] sm:$0xff]  ;;  %v200_v1 = vld [vmem:[%s1401_s11 + $0x8] sm:$0xff]  ;;  %v202_v2 = vld [vmem:[%s1401_s11 + $0x10] sm:$0xff] }
  0x17   : > { %199 = vst [vmem:[%s1406_s12] sm:$0xff] %v198_v0  ;;  %v204_v3 = vld [vmem:[%s1401_s11 + $0x18] sm:$0xff]  ;;  %v206_v4 = vld [vmem:[%s1401_s11 + $0x20] sm:$0xff]  ;;  %v208_v5 = vld [vmem:[%s1401_s11 + $0x28] sm:$0xff] }
  0x18   : > { %201 = vst [vmem:[%s1406_s12 + $0x8] sm:$0xff] %v200_v1  ;;  %v210_v6 = vld [vmem:[%s1401_s11 + $0x30] sm:$0xff]  ;;  %v212_v7 = vld [vmem:[%s1401_s11 + $0x38] sm:$0xff]  ;;  %v214_v8 = vld [vmem:[%s1401_s11 + $0x80] sm:$0xff] }
  0x19   : > { %203 = vst [vmem:[%s1406_s12 + $0x10] sm:$0xff] %v202_v2  ;;  %v216_v9 = vld [vmem:[%s1401_s11 + $0x88] sm:$0xff]  ;;  %v218_v10 = vld [vmem:[%s1401_s11 + $0x90] sm:$0xff]  ;;  %v220_v11 = vld [vmem:[%s1401_s11 + $0x98] sm:$0xff] }
  0x1a   : > { %205 = vst [vmem:[%s1406_s12 + $0x18] sm:$0xff] %v204_v3  ;;  %v222_v12 = vld [vmem:[%s1401_s11 + $0xa0] sm:$0xff]  ;;  %v224_v13 = vld [vmem:[%s1401_s11 + $0xa8] sm:$0xff]  ;;  %v226_v14 = vld [vmem:[%s1401_s11 + $0xb0] sm:$0xff] }
  0x1b   : > { %207 = vst [vmem:[%s1406_s12 + $0x20] sm:$0xff] %v206_v4  ;;  %v228_v15 = vld [vmem:[%s1401_s11 + $0xb8] sm:$0xff]  ;;  %v230_v16 = vld [vmem:[%s1401_s11 + $0x100] sm:$0xff]  ;;  %v232_v17 = vld [vmem:[%s1401_s11 + $0x108] sm:$0xff] }
  0x1c   : > { %209 = vst [vmem:[%s1406_s12 + $0x28] sm:$0xff] %v208_v5  ;;  %v234_v18 = vld [vmem:[%s1401_s11 + $0x110] sm:$0xff]  ;;  %v236_v19 = vld [vmem:[%s1401_s11 + $0x118] sm:$0xff]  ;;  %v238_v20 = vld [vmem:[%s1401_s11 + $0x120] sm:$0xff] }
  0x1d   : > { %211 = vst [vmem:[%s1406_s12 + $0x30] sm:$0xff] %v210_v6  ;;  %v240_v21 = vld [vmem:[%s1401_s11 + $0x128] sm:$0xff]  ;;  %v242_v22 = vld [vmem:[%s1401_s11 + $0x130] sm:$0xff]  ;;  %v244_v23 = vld [vmem:[%s1401_s11 + $0x138] sm:$0xff] }
  0x1e   : > { %213 = vst [vmem:[%s1406_s12 + $0x38] sm:$0xff] %v212_v7  ;;  %v246_v24 = vld [vmem:[%s1401_s11 + $0x180] sm:$0xff]  ;;  %v248_v25 = vld [vmem:[%s1401_s11 + $0x188] sm:$0xff]  ;;  %v250_v26 = vld [vmem:[%s1401_s11 + $0x190] sm:$0xff] }
  0x1f   : > { %215 = vst [vmem:[%s1406_s12 + $0x40] sm:$0xff] %v214_v8  ;;  %v252_v27 = vld [vmem:[%s1401_s11 + $0x198] sm:$0xff]  ;;  %v254_v28 = vld [vmem:[%s1401_s11 + $0x1a0] sm:$0xff]  ;;  %v256_v29 = vld [vmem:[%s1401_s11 + $0x1a8] sm:$0xff] }
  0x20   : > { %217 = vst [vmem:[%s1406_s12 + $0x48] sm:$0xff] %v216_v9  ;;  %v258_v30 = vld [vmem:[%s1401_s11 + $0x1b0] sm:$0xff]  ;;  %v260_v31 = vld [vmem:[%s1401_s11 + $0x1b8] sm:$0xff] }
  0x21   : > { %219 = vst [vmem:[%s1406_s12 + $0x50] sm:$0xff] %v218_v10 }
  0x22   : > { %221 = vst [vmem:[%s1406_s12 + $0x58] sm:$0xff] %v220_v11 }
  0x23   : > { %223 = vst [vmem:[%s1406_s12 + $0x60] sm:$0xff] %v222_v12 }
  0x24   : > { %225 = vst [vmem:[%s1406_s12 + $0x68] sm:$0xff] %v224_v13 }
  0x25   : > { %227 = vst [vmem:[%s1406_s12 + $0x70] sm:$0xff] %v226_v14 }
  0x26   : > { %229 = vst [vmem:[%s1406_s12 + $0x78] sm:$0xff] %v228_v15 }
  0x27   : > { %231 = vst [vmem:[%s1406_s12 + $0x80] sm:$0xff] %v230_v16 }
  0x28   : > { %233 = vst [vmem:[%s1406_s12 + $0x88] sm:$0xff] %v232_v17 }
  0x29   : > { %235 = vst [vmem:[%s1406_s12 + $0x90] sm:$0xff] %v234_v18 }
  0x2a   : > { %237 = vst [vmem:[%s1406_s12 + $0x98] sm:$0xff] %v236_v19 }
  0x2b   : > { %239 = vst [vmem:[%s1406_s12 + $0xa0] sm:$0xff] %v238_v20 }
  0x2c   : > { %241 = vst [vmem:[%s1406_s12 + $0xa8] sm:$0xff] %v240_v21 }
  0x2d   : > { %243 = vst [vmem:[%s1406_s12 + $0xb0] sm:$0xff] %v242_v22 }
  0x2e   : > { %245 = vst [vmem:[%s1406_s12 + $0xb8] sm:$0xff] %v244_v23 }
  0x2f   : > { %247 = vst [vmem:[%s1406_s12 + $0xc0] sm:$0xff] %v246_v24 }
  0x30   : > { %249 = vst [vmem:[%s1406_s12 + $0xc8] sm:$0xff] %v248_v25 }
  0x31   : > { %251 = vst [vmem:[%s1406_s12 + $0xd0] sm:$0xff] %v250_v26 }
  0x32   : > { %253 = vst [vmem:[%s1406_s12 + $0xd8] sm:$0xff] %v252_v27 }
  0x33   : > { %255 = vst [vmem:[%s1406_s12 + $0xe0] sm:$0xff] %v254_v28 }
  0x34   : > { %257 = vst [vmem:[%s1406_s12 + $0xe8] sm:$0xff] %v256_v29 }
  0x35   : > { %259 = vst [vmem:[%s1406_s12 + $0xf0] sm:$0xff] %v258_v30 }
  0x36   : > { %261 = vst [vmem:[%s1406_s12 + $0xf8] sm:$0xff] %v260_v31 }
  0x37 PF: > { %p1014_p7 = scmp.ge.s32.totalorder %s1312_s21, 1  ;;  %p266_p8 = scmp.lt.s32.totalorder %s1312_s21, 5 }
  0x39   : > { %p267_p9 = pnand %p1014_p7, %p266_p8 }
  0x3a   : > { %s273_s13 = sand.u32 (!%p267_p9), 1, %s1288_s15   ;;  %p312_p10 = scmp.lt.s32.totalorder (!%p267_p9), %s1300_s18, 1 }
  0x3b   : > { %270 = sbr.rel (%p267_p9) target bundleno = 428 (0x1ac), region = 47  ;;  %s1015_s14 = sshll.u32 (!%p267_p9), %s273_s13, 8 }
  0x3c   : > { %s1474_s24 = scalar_lea.vmem (!%p267_p9), [#allocation2], %s1015_s14  ;;  %s1016_s8 = sshll.u32 (!%p267_p9), %s1296_s17, 4 }
  0x3d   : > { %p314_p11 = scmp.lt.s32.totalorder (!%p267_p9), %s1016_s8, 31  ;;  %p1165_p12 = scmp.ne.s32.totalorder (!%p267_p9), %s1296_s17, 0 }
  0x40   : > { %vm511_vm0 = vcmask 1044480   ;;  %vm512_vm1 = vcmask 1045504   ;;  %v1314_v32 = vmov 65535   ;;  %v1087_v35 = vld [vmem:[%s1474_s24 + $0x80] sm:$0xf]  ;;  %vm507_vm2 = vcmask 220160  }
  0x41   : > { %v513_v33 = vsel %vm511_vm0, 4294967295, %v1314_v32  ;;  %v1192_v36 = vld [vmem:[%s1474_s24 + $0xbc] sm:$0x30]  ;;  %v1184_v37 = vld [vmem:[%s1474_s24 + $0x84] sm:$0xf]  ;;  %s1669_s18 = smov (!%p312_p10, %s1300_s18), 1 }
  0x42   : > { %v1472_v34 = vsel %vm512_vm1, %v513_v33, 0  ;;  %v1088_v38 = vor.u32 %v1192_v36, %v1087_v35  ;;  %v1089_v39 = vld [vmem:[%s1474_s24 + $0xc0] sm:$0x30]  ;;  %v1095_v40 = vld [vmem:[%s1474_s24 + $0x88] sm:$0xf]  ;;  %s1019_s26 = sshll.u32 %s1669_s18, 3 }
  0x43   : > { %v1193_v41 = vld [vmem:[%s1474_s24 + $0xc4] sm:$0x30]  ;;  %v1092_v42 = vor.u32 %v1184_v37, %v1089_v39  ;;  %v1185_v44 = vld [vmem:[%s1474_s24 + $0x8c] sm:$0xf]  ;;  %v1023_v46 = vld [vmem:[%s1474_s24] sm:$0xf]  ;;  %s1566_s30 = scalar_lea.vmem %s1654_s3, %s1019_s26  ;;  %s1576_s7 = scalar_lea.vmem %s1655_s4, %s1019_s26 }
  0x44   : > { %v1096_v43 = vor.u32 %v1193_v41, %v1095_v40  ;;  %v1097_v45 = vld [vmem:[%s1474_s24 + $0xc8] sm:$0x30]  ;;  %v516_v47 = vand.u32 %v1088_v38, %v1472_v34  ;;  %v1176_v49 = vld [vmem:[%s1474_s24 + $0x3c] sm:$0xf0]  ;;  %v1168_v50 = vld [vmem:[%s1474_s24 + $0x4] sm:$0xf] }
  0x45   : > { %v1100_v48 = vor.u32 %v1185_v44, %v1097_v45  ;;  %v1025_v51 = vld [vmem:[%s1474_s24 + $0x40] sm:$0xf0]  ;;  %v519_v52 = vand.u32 %v1092_v42, %v1472_v34  ;;  %v1031_v54 = vld [vmem:[%s1474_s24 + $0x8] sm:$0xf]  ;;  %v1169_v56 = vld [vmem:[%s1474_s24 + $0xc] sm:$0xf]  ;;  %v1024_v58 = vor.u32 %v1176_v49, %v1023_v46 }
  0x46   : > { %v522_v53 = vand.u32 %v1096_v43, %v1472_v34  ;;  %v1177_v55 = vld [vmem:[%s1474_s24 + $0x44] sm:$0xf0]  ;;  %569 = vmatpush.bf16.msra.mxu0 %v516_v47  ;;  %v1033_v59 = vld [vmem:[%s1474_s24 + $0x48] sm:$0xf0]  ;;  %v1111_v60 = vld [vmem:[%s1474_s24 + $0x98] sm:$0xf]  ;;  %v1028_v62 = vor.u32 %v1168_v50, %v1025_v51 }
  0x47   : > { %v525_v57 = vand.u32 %v1100_v48, %v1472_v34  ;;  %v1195_v61 = vld [vmem:[%s1474_s24 + $0xd4] sm:$0x30]  ;;  %582 = vmatpush.bf16.msra.mxu1 %v519_v52  ;;  %v1032_v63 = vor.u32 %v1177_v55, %v1031_v54  ;;  %v1187_v1 = vld [vmem:[%s1474_s24 + $0x9c] sm:$0xf]  ;;  %v1103_v3 = vld [vmem:[%s1474_s24 + $0x90] sm:$0xf]  ;;  %v1036_v4 = vor.u32 %v1169_v56, %v1033_v59 }
  0x48   : > { %595 = vmatpush.bf16.msra.mxu2 %v522_v53  ;;  %v1112_v0 = vor.u32 %v1195_v61, %v1111_v60  ;;  %v1113_v2 = vld [vmem:[%s1474_s24 + $0xd8] sm:$0x30]  ;;  %v1504_v5 = vld [vmem:[%s1652_s1] sm:$0xf]  ;;  %v1194_v7 = vld [vmem:[%s1474_s24 + $0xcc] sm:$0x30] }
  0x49   : > { %608 = vmatpush.bf16.msra.mxu3 %v525_v57  ;;  %v1116_v6 = vor.u32 %v1187_v1, %v1113_v2  ;;  %v1186_v8 = vld [vmem:[%s1474_s24 + $0x94] sm:$0xf]  ;;  %v1104_v11 = vor.u32 %v1194_v7, %v1103_v3  ;;  %v1047_v13 = vld [vmem:[%s1474_s24 + $0x18] sm:$0xf]  ;;  %v1171_v15 = vld [vmem:[%s1474_s24 + $0x1c] sm:$0xf] }
  0x4a   : > { %v1105_v9 = vld [vmem:[%s1474_s24 + $0xd0] sm:$0x30]  ;;  %v534_v10 = vand.u32 %v1112_v0, %v1472_v34  ;;  %v1179_v14 = vld [vmem:[%s1474_s24 + $0x54] sm:$0xf0]  ;;  %570 = vmatpush.bf16.msra.mxu0 %v1024_v58  ;;  %v1049_v17 = vld [vmem:[%s1474_s24 + $0x58] sm:$0xf0] }
  0x4b   : > { %v1108_v12 = vor.u32 %v1186_v8, %v1105_v9  ;;  %v537_v16 = vand.u32 %v1116_v6, %v1472_v34  ;;  %v1039_v18 = vld [vmem:[%s1474_s24 + $0x10] sm:$0xf]  ;;  %583 = vmatpush.bf16.msra.mxu1 %v1028_v62  ;;  %v528_v20 = vand.u32 %v1104_v11, %v1472_v34  ;;  %v1170_v21 = vld [vmem:[%s1474_s24 + $0x14] sm:$0xf]  ;;  %v1127_v23 = vld [vmem:[%s1474_s24 + $0xa8] sm:$0xf]  ;;  %v1048_v25 = vor.u32 %v1179_v14, %v1047_v13 }
  0x4c   : > { %v1178_v19 = vld [vmem:[%s1474_s24 + $0x4c] sm:$0xf0]  ;;  %596 = vmatpush.bf16.msra.mxu2 %v1032_v63  ;;  %v1041_v22 = vld [vmem:[%s1474_s24 + $0x50] sm:$0xf0]  ;;  %v1197_v26 = vld [vmem:[%s1474_s24 + $0xe4] sm:$0x30]  ;;  %v1052_v29 = vor.u32 %v1171_v15, %v1049_v17 }
  0x4d   : > { %609 = vmatpush.bf16.msra.mxu3 %v1036_v4  ;;  %v531_v24 = vand.u32 %v1108_v12, %v1472_v34  ;;  %v1189_v27 = vld [vmem:[%s1474_s24 + $0xac] sm:$0xf]  ;;  %1149 = vmatmul.msk.bf16.vlgmr.msra.gmra.mxu0 %vm507_vm2, %v1504_v5  ;;  %v1128_v30 = vor.u32 %v1197_v26, %v1127_v23  ;;  %v1119_v32 = vld [vmem:[%s1474_s24 + $0xa0] sm:$0xf]  ;;  %v1188_v35 = vld [vmem:[%s1474_s24 + $0xa4] sm:$0xf]  ;;  %v1040_v36 = vor.u32 %v1178_v19, %v1039_v18 }
  0x4e   : > { %v1129_v28 = vld [vmem:[%s1474_s24 + $0xe8] sm:$0x30]  ;;  %v1196_v33 = vld [vmem:[%s1474_s24 + $0xdc] sm:$0x30]  ;;  %1150 = vmatmul.msk.bf16.vlgmr.msra.gmra.mxu1 %vm507_vm2, %v1504_v5  ;;  %v1121_v38 = vld [vmem:[%s1474_s24 + $0xe0] sm:$0x30]  ;;  %621 = vmatpush.bf16.msrb.mxu0 %v528_v20  ;;  %v1044_v46 = vor.u32 %v1170_v21, %v1041_v22 }
  0x4f   : > { %v1132_v31 = vor.u32 %v1189_v27, %v1129_v28  ;;  %1151 = vmatmul.msk.bf16.vlgmr.msra.gmra.mxu2 %vm507_vm2, %v1504_v5  ;;  %v1120_v37 = vor.u32 %v1196_v33, %v1119_v32  ;;  %v1063_v39 = vld [vmem:[%s1474_s24 + $0x28] sm:$0xf]  ;;  %v546_v41 = vand.u32 %v1128_v30, %v1472_v34  ;;  %v1124_v43 = vor.u32 %v1188_v35, %v1121_v38  ;;  %v1173_v44 = vld [vmem:[%s1474_s24 + $0x2c] sm:$0xf]  ;;  %v1055_v50 = vld [vmem:[%s1474_s24 + $0x20] sm:$0xf] }
  0x50   : > { %647 = vmatpush.bf16.msrb.mxu2 %v534_v10  ;;  %v1181_v40 = vld [vmem:[%s1474_s24 + $0x64] sm:$0xf0]  ;;  %1152 = vmatmul.msk.bf16.vlgmr.msra.gmra.mxu3 %vm507_vm2, %v1504_v5  ;;  %v1065_v45 = vld [vmem:[%s1474_s24 + $0x68] sm:$0xf0]  ;;  %v1180_v51 = vld [vmem:[%s1474_s24 + $0x5c] sm:$0xf0] }
  0x51   : > { %660 = vmatpush.bf16.msrb.mxu3 %v537_v16  ;;  %v549_v42 = vand.u32 %v1132_v31, %v1472_v34  ;;  %634 = vmatpush.bf16.msrb.mxu1 %v531_v24  ;;  %v540_v47 = vand.u32 %v1120_v37, %v1472_v34  ;;  %v543_v48 = vand.u32 %v1124_v43, %v1472_v34  ;;  %v1172_v53 = vld [vmem:[%s1474_s24 + $0x24] sm:$0xf]  ;;  %v1143_v56 = vld [vmem:[%s1474_s24 + $0xb8] sm:$0xf]  ;;  %v1191_v58 = vld [vmem:[%s1474_s24 + $0xbc] sm:$0xf] }
  0x52   : > { %v1064_v49 = vor.u32 %v1181_v40, %v1063_v39  ;;  %v1068_v52 = vor.u32 %v1173_v44, %v1065_v45  ;;  %v1057_v54 = vld [vmem:[%s1474_s24 + $0x60] sm:$0xf0]  ;;  %622 = vmatpush.bf16.msrb.mxu0 %v1040_v36  ;;  %v1056_v55 = vor.u32 %v1180_v51, %v1055_v50  ;;  %v1199_v57 = vld [vmem:[%s1474_s24 + $0xf4] sm:$0x30]  ;;  %v1145_v60 = vld [vmem:[%s1474_s24 + $0xf8] sm:$0x30] }
  0x53   : > { %v1060_v59 = vor.u32 %v1172_v53, %v1057_v54  ;;  %v1135_v61 = vld [vmem:[%s1474_s24 + $0xb0] sm:$0xf]  ;;  %v1190_v63 = vld [vmem:[%s1474_s24 + $0xb4] sm:$0xf]  ;;  %v1144_v1 = vor.u32 %v1199_v57, %v1143_v56  ;;  %v1148_v2 = vor.u32 %v1191_v58, %v1145_v60  ;;  %v1079_v9 = vld [vmem:[%s1474_s24 + $0x38] sm:$0xf] }
  0x54   : > { %648 = vmatpush.bf16.msrb.mxu2 %v1048_v25  ;;  %v1198_v62 = vld [vmem:[%s1474_s24 + $0xec] sm:$0x30]  ;;  %v1137_v0 = vld [vmem:[%s1474_s24 + $0xf0] sm:$0x30]  ;;  %v1183_v10 = vld [vmem:[%s1474_s24 + $0x74] sm:$0xf0] }
  0x55   : > { %661 = vmatpush.bf16.msrb.mxu3 %v1052_v29  ;;  %635 = vmatpush.bf16.msrb.mxu1 %v1044_v46  ;;  %v1136_v3 = vor.u32 %v1198_v62, %v1135_v61  ;;  %v1140_v4 = vor.u32 %v1190_v63, %v1137_v0  ;;  %v558_v6 = vand.u32 %v1144_v1, %v1472_v34  ;;  %v1175_v11 = vld [vmem:[%s1474_s24 + $0x3c] sm:$0xf]  ;;  %v1071_v14 = vld [vmem:[%s1474_s24 + $0x30] sm:$0xf]  ;;  %v1174_v16 = vld [vmem:[%s1474_s24 + $0x34] sm:$0xf] }
  0x56   : > { %673 = vmatpush.bf16.msra.mxu0 %v540_v47  ;;  %v561_v7 = vand.u32 %v1148_v2, %v1472_v34  ;;  %v1081_v13 = vld [vmem:[%s1474_s24 + $0x78] sm:$0xf0]  ;;  %v1182_v15 = vld [vmem:[%s1474_s24 + $0x6c] sm:$0xf0]  ;;  %v1073_v17 = vld [vmem:[%s1474_s24 + $0x70] sm:$0xf0]  ;;  %v1080_v18 = vor.u32 %v1183_v10, %v1079_v9 }
  0x57   : > { %v552_v8 = vand.u32 %v1136_v3, %v1472_v34  ;;  %v555_v12 = vand.u32 %v1140_v4, %v1472_v34  ;;  %v1084_v19 = vor.u32 %v1175_v11, %v1081_v13  ;;  %v1072_v34 = vor.u32 %v1182_v15, %v1071_v14  ;;  %s1671_s8 = smov (!%p314_p11, %s1016_s8), 31  ;;  %s1017_s9 = sshll.u32 %s1669_s18, 5 }
  0x58   : > { %699 = vmatpush.bf16.msra.mxu2 %v546_v41  ;;  %v1076_v20 = vor.u32 %v1174_v16, %v1073_v17  ;;  %s317_s10 = sadd.s32 %s1017_s9, %s1671_s8 }
  0x59   : > { %712 = vmatpush.bf16.msra.mxu3 %v549_v42  ;;  %686 = vmatpush.bf16.msra.mxu1 %v543_v48  ;;  %s1018_s11 = sshll.u32 %s317_s10, 2 }
  0x5a   : > { %674 = vmatpush.bf16.msra.mxu0 %v1056_v55  ;;  %s1613_s14 = scalar_lea.vmem %s1653_s2, %s1018_s11 }
  0x5c   : > { %700 = vmatpush.bf16.msra.mxu2 %v1064_v49 }
  0x5d   : > { %713 = vmatpush.bf16.msra.mxu3 %v1068_v52  ;;  %687 = vmatpush.bf16.msra.mxu1 %v1060_v59 }
  0x5e   : > { %1153 = vmatmul.msk.bf16.vlgmr.msrb.gmra.mxu0 %vm507_vm2, %v1504_v5  ;;  %1154 = vmatmul.msk.bf16.vlgmr.msrb.gmra.mxu1 %vm507_vm2, %v1504_v5 }
  0x5f   : > { %1155 = vmatmul.msk.bf16.vlgmr.msrb.gmra.mxu2 %vm507_vm2, %v1504_v5  ;;  %725 = vmatpush.bf16.msrb.mxu0 %v552_v8 }
  0x60   : > { %1156 = vmatmul.msk.bf16.vlgmr.msrb.gmra.mxu3 %vm507_vm2, %v1504_v5  ;;  %751 = vmatpush.bf16.msrb.mxu2 %v558_v6 }
  0x61   : > { %764 = vmatpush.bf16.msrb.mxu3 %v561_v7  ;;  %738 = vmatpush.bf16.msrb.mxu1 %v555_v12 }
  0x63   : > { %726 = vmatpush.bf16.msrb.mxu0 %v1072_v34 }
  0x64   : > { %752 = vmatpush.bf16.msrb.mxu2 %v1080_v18 }
  0x65   : > { %765 = vmatpush.bf16.msrb.mxu3 %v1084_v19  ;;  %739 = vmatpush.bf16.msrb.mxu1 %v1076_v20 }
  0x6e   : > { %1157 = vmatmul.msk.bf16.vlgmr.msra.gmra.mxu0 %vm507_vm2, %v1504_v5  ;;  %1158 = vmatmul.msk.bf16.vlgmr.msra.gmra.mxu1 %vm507_vm2, %v1504_v5 }
  0x6f   : > { %1159 = vmatmul.msk.bf16.vlgmr.msra.gmra.mxu2 %vm507_vm2, %v1504_v5 }
  0x70   : > { %1160 = vmatmul.msk.bf16.vlgmr.msra.gmra.mxu3 %vm507_vm2, %v1504_v5 }
  0x7e   : > { %1161 = vmatmul.msk.bf16.vlgmr.msrb.gmra.mxu0 %vm507_vm2, %v1504_v5  ;;  %1162 = vmatmul.msk.bf16.vlgmr.msrb.gmra.mxu1 %vm507_vm2, %v1504_v5 }
  0x7f   : > { %1163 = vmatmul.msk.bf16.vlgmr.msrb.gmra.mxu2 %vm507_vm2, %v1504_v5 }
  0x80   : > { %1164 = vmatmul.msk.bf16.vlgmr.msrb.gmra.mxu3 %vm507_vm2, %v1504_v5 }
  0xca   : > { %v572_v21 = vpop.f32.mrf.mxu0 }
  0xcb   : > { %v585_v22 = vpop.f32.mrf.mxu1 }
  0xcc   : > { %v771_v23 = vpack.c.bf16 %v585_v22, %v572_v21 }
  0xce   : > { %779 = vst [vmem:[%s1613_s14] sm:$0xff] %v771_v23 }
  0xd2   : > { %v598_v24 = vpop.f32.mrf.mxu2  ;;  %v574_v25 = vpop.f32.mrf.mxu0 }
  0xd3   : > { %v611_v5 = vpop.f32.mrf.mxu3  ;;  %v587_v27 = vpop.f32.mrf.mxu1 }
  0xd4   : > { %v772_v26 = vpack.c.bf16 %v611_v5, %v598_v24 }
  0xd6   : > { %780 = vst [vmem:[%s1613_s14 + $0x8] sm:$0xff] %v772_v26 }
  0xda   : > { %v600_v28 = vpop.f32.mrf.mxu2 }
  0xdb   : > { %v613_v29 = vpop.f32.mrf.mxu3  ;;  %v624_v30 = vpop.f32.mrf.mxu0 }
  0xdc   : > { %v637_v31 = vpop.f32.mrf.mxu1 }
  0xdd   : > { %v773_v32 = vpack.c.bf16 %v637_v31, %v624_v30 }
  0xdf   : > { %781 = vst [vmem:[%s1613_s14 + $0x10] sm:$0xff] %v773_v32 }
  0xe2   : > { %v650_v33 = vpop.f32.mrf.mxu2 }
  0xe3   : > { %v663_v35 = vpop.f32.mrf.mxu3  ;;  %v626_v36 = vpop.f32.mrf.mxu0 }
  0xe4   : > { %v774_v37 = vpack.c.bf16 %v663_v35, %v650_v33  ;;  %v639_v38 = vpop.f32.mrf.mxu1 }
  0xe6   : > { %782 = vst [vmem:[%s1613_s14 + $0x18] sm:$0xff] %v774_v37 }
  0xea   : > { %v652_v39 = vpop.f32.mrf.mxu2 }
  0xeb   : > { %v665_v40 = vpop.f32.mrf.mxu3  ;;  %v676_v41 = vpop.f32.mrf.mxu0 }
  0xec   : > { %v689_v42 = vpop.f32.mrf.mxu1 }
  0xed   : > { %v775_v43 = vpack.c.bf16 %v689_v42, %v676_v41 }
  0xef   : > { %783 = vst [vmem:[%s1613_s14 + $0x20] sm:$0xff] %v775_v43 }
  0xf2   : > { %v702_v44 = vpop.f32.mrf.mxu2 }
  0xf3   : > { %v715_v45 = vpop.f32.mrf.mxu3  ;;  %v678_v46 = vpop.f32.mrf.mxu0 }
  0xf4   : > { %v776_v47 = vpack.c.bf16 %v715_v45, %v702_v44  ;;  %v691_v48 = vpop.f32.mrf.mxu1 }
  0xf6   : > { %784 = vst [vmem:[%s1613_s14 + $0x28] sm:$0xff] %v776_v47 }
  0xfa   : > { %v704_v49 = vpop.f32.mrf.mxu2 }
  0xfb   : > { %v717_v50 = vpop.f32.mrf.mxu3  ;;  %v728_v51 = vpop.f32.mrf.mxu0 }
  0xfc   : > { %v741_v52 = vpop.f32.mrf.mxu1 }
  0xfd   : > { %v777_v53 = vpack.c.bf16 %v741_v52, %v728_v51 }
  0xff   : > { %785 = vst [vmem:[%s1613_s14 + $0x30] sm:$0xff] %v777_v53 }
 0x102   : > { %v754_v54 = vpop.f32.mrf.mxu2 }
 0x103   : > { %v767_v55 = vpop.f32.mrf.mxu3  ;;  %v730_v56 = vpop.f32.mrf.mxu0 }
 0x104   : > { %v778_v57 = vpack.c.bf16 %v767_v55, %v754_v54  ;;  %v743_v58 = vpop.f32.mrf.mxu1 }
 0x106   : > { %786 = vst [vmem:[%s1613_s14 + $0x38] sm:$0xff] %v778_v57 }
 0x107   : > { %790 = sbr.rel (%p1165_p12) target bundleno = 271 (0x10f), region = 55 }
 0x10a   : > { %v756_v59 = vpop.f32.mrf.mxu2 }
 0x10b   : > { %v769_v60 = vpop.f32.mrf.mxu3 }
 0x10c   : > { %vm791_vm3 = vcmask 7168   ;;  %v1315_v61 = vmov 0.0  }
 0x10d   : > { %792 = vst.msk [vmem:[%s1566_s30] sm:$0xff] %vm791_vm3, %v1315_v61 }
 0x10e   : > { %793 = vst.msk [vmem:[%s1576_s7] sm:$0xff] %vm791_vm3, %v1315_v61 }
 0x10f PF: > { %v795_v62 = vadd.f32 %v585_v22, %v572_v21  ;;  %v816_v63 = vmul.f32 %v572_v21, %v572_v21  ;;  %v817_v0 = vmul.f32 %v585_v22, %v585_v22  ;;  %v818_v2 = vmul.f32 %v598_v24, %v598_v24 }
 0x110   : > { %v819_v4 = vmul.f32 %v611_v5, %v611_v5  ;;  %v820_v8 = vmul.f32 %v624_v30, %v624_v30  ;;  %v821_v11 = vmul.f32 %v637_v31, %v637_v31  ;;  %v822_v14 = vmul.f32 %v650_v33, %v650_v33 }
 0x111   : > { %v796_v1 = vadd.f32 %v795_v62, %v598_v24  ;;  %v832_v6 = vadd.f32 %v817_v0, %v816_v63  ;;  %v823_v17 = vmul.f32 %v663_v35, %v663_v35  ;;  %v824_v34 = vmul.f32 %v676_v41, %v676_v41 }
 0x112   : > { %v825_v22 = vmul.f32 %v689_v42, %v689_v42  ;;  %v827_v27 = vmul.f32 %v715_v45, %v715_v45  ;;  %v830_v37 = vmul.f32 %v754_v54, %v754_v54  ;;  %vm813_vm4 = vcmask 7168  }
 0x113   : > { %v797_v3 = vadd.f32 %v796_v1, %v611_v5  ;;  %v833_v9 = vadd.f32 %v832_v6, %v818_v2  ;;  %v826_v5 = vmul.f32 %v702_v44, %v702_v44 }
 0x115   : > { %v798_v7 = vadd.f32 %v797_v3, %v624_v30  ;;  %v834_v12 = vadd.f32 %v833_v9, %v819_v4  ;;  %v828_v30 = vmul.f32 %v728_v51, %v728_v51  ;;  %v815_v47 = vld [vmem:[%s1576_s7] sm:$0xff] }
 0x117   : > { %v799_v10 = vadd.f32 %v798_v7, %v637_v31  ;;  %v835_v15 = vadd.f32 %v834_v12, %v820_v8 }
 0x119   : > { %v800_v13 = vadd.f32 %v799_v10, %v650_v33  ;;  %v836_v18 = vadd.f32 %v835_v15, %v821_v11  ;;  %v829_v33 = vmul.f32 %v741_v52, %v741_v52 }
 0x11b   : > { %v801_v16 = vadd.f32 %v800_v13, %v663_v35  ;;  %v837_v20 = vadd.f32 %v836_v18, %v822_v14 }
 0x11d   : > { %v802_v19 = vadd.f32 %v801_v16, %v676_v41  ;;  %v838_v23 = vadd.f32 %v837_v20, %v823_v17  ;;  %v831_v41 = vmul.f32 %v767_v55, %v767_v55 }
 0x11f   : > { %v803_v21 = vadd.f32 %v802_v19, %v689_v42  ;;  %v839_v25 = vadd.f32 %v838_v23, %v824_v34 }
 0x121   : > { %v804_v24 = vadd.f32 %v803_v21, %v702_v44  ;;  %v840_v28 = vadd.f32 %v839_v25, %v825_v22  ;;  %v794_v44 = vld [vmem:[%s1566_s30] sm:$0xff] }
 0x123   : > { %v805_v26 = vadd.f32 %v804_v24, %v715_v45  ;;  %v841_v31 = vadd.f32 %v840_v28, %v826_v5 }
 0x125   : > { %v806_v29 = vadd.f32 %v805_v26, %v728_v51  ;;  %v842_v35 = vadd.f32 %v841_v31, %v827_v27 }
 0x127   : > { %v807_v32 = vadd.f32 %v806_v29, %v741_v52  ;;  %v843_v38 = vadd.f32 %v842_v35, %v828_v30 }
 0x129   : > { %v808_v36 = vadd.f32 %v807_v32, %v754_v54  ;;  %v844_v40 = vadd.f32 %v843_v38, %v829_v33 }
 0x12b   : > { %v809_v39 = vadd.f32 %v808_v36, %v767_v55  ;;  %v845_v42 = vadd.f32 %v844_v40, %v830_v37 }
 0x12d   : > { %810 = vadd.xlane.f32.xlu0 %v809_v39  ;;  %v846_v43 = vadd.f32 %v845_v42, %v831_v41 }
 0x135   : > { %847 = vadd.xlane.f32.xlu0 %v846_v43 }
 0x1a0   : > { %v811_v45 = vpop.xlane.xlu0 %810 }
 0x1a1   : > { %v812_v46 = vadd.f32 %v811_v45, %v794_v44 }
 0x1a3   : > { %814 = vst.msk [vmem:[%s1566_s30] sm:$0xff] %vm813_vm4, %v812_v46 }
 0x1a8   : > { %v848_v48 = vpop.xlane.xlu0 %847 }
 0x1a9   : > { %v849_v49 = vadd.f32 %v848_v48, %v815_v47 }
 0x1ab   : > { %850 = vst.msk [vmem:[%s1576_s7] sm:$0xff] %vm813_vm4, %v849_v49 }
 0x1ac PF: > { %s15_s21 = sadd.s32 1, %s1312_s21   ;;  %s1656_s15 = smov %s1292_s16 }
 0x1ad   : > { %p12_p13 = scmp.ge.s32.totalorder %s15_s21, 6   ;;  %s1657_s16 = smov %s1392_s28 }
 0x1ae   : > { %s1658_s17 = smov %s1304_s19  ;;  %s1659_s18 = smov %s1308_s20 }
 0x1af   : > { %s1660_s19 = smov %s1663_s22  ;;  %s1661_s20 = smov %s1667_s23 }
 0x1b0   :  { %14 = sbr.rel (!%p12_p13) target bundleno = 4 (0x4), region = 114 }

// kernel: unet_encoder_forward.10
= control target key start
LH: loop header
LB: loop body
LE: loop exit
PB: predicated region body
PF: predicated region fallthrough
CT: control target
= control target key end

     0   :  { %s664_s17 = smov 0   ;;  %s666_s18 = smov 0   ;;  %s790_s0 = inlined_call_operand.<no memory space> [shape: f32[1], index: 0, kind: input, shape index: {}]   ;;  %s791_s1 = inlined_call_operand.vmem [shape: bf16[2,8,4096], index: 1, kind: input, shape index: {}]   ;;  %s792_s2 = inlined_call_operand.vmem [shape: f32[2,8,1], index: 2, kind: input, shape index: {}]   ;;  %s793_s3 = inlined_call_operand.vmem [shape: f32[2,8,1], index: 3, kind: input, shape index: {}]   ;;  %s794_s4 = inlined_call_operand.vmem [shape: f32[2,8,4096], index: 4, kind: output, shape index: {}]  }
   0x1   :  { %9 = sst [smem:[#allocation2]] %s790_s0  ;;  %s668_s19 = smov 0  }
   0x2   :  { %s670_s20 = smov 0   ;;  %s672_s21 = smov 0  }
   0x3 LB: > { %s24_s0 = sadd.s32 1, %s625_s19  ;;  %s27_s22 = sadd.s32 1, %s629_s20  ;;  %s633_s21 = sphi %s672_s21, %s15_s21   ;;  %s629_s20 = sphi %s670_s20, %s798_s20   ;;  %s625_s19 = sphi %s668_s19, %s797_s19   ;;  %s621_s18 = sphi %s666_s18, %s796_s18   ;;  %s617_s17 = sphi %s664_s17, %s795_s17  }
   0x4   : > { %p25_p0 = scmp.ge.s32.totalorder %s24_s0, 2  ;;  %p540_p1 = scmp.ge.s32.totalorder %s633_s21, 1 }
   0x5   : > { %p202_p2 = scmp.lt.s32.totalorder %s633_s21, 5 }
   0x6   : > { %s800_s0 = smov (%p25_p0, %s24_s0), 0  ;;  %s802_s22 = smov (!%p25_p0, %s27_s22), %s629_s20 }
   0x7   : > { %p203_p3 = pnand %p540_p1, %p202_p2  ;;  %p29_p4 = scmp.ge.s32.totalorder %s802_s22, 2 }
   0x8   : > { %p245_p5 = scmp.lt.s32.totalorder (!%p203_p3), %s621_s18, 1  ;;  %s541_s30 = sshll.u32 (!%p203_p3), %s617_s17, 4 }
   0x9   : > { %s804_s22 = smov (%p29_p4, %s802_s22), 0  ;;  %206 = sbr.rel (%p203_p3) target bundleno = 184 (0xb8), region = 36 }
   0xa   : > { %p247_p6 = scmp.lt.s32.totalorder (!%p203_p3), %s541_s30, 31  ;;  %s356_s11 = sld [smem:[#allocation2]] (!%p203_p3) }
   0xe   : > { %v635_v0 = vmov 0   ;;  %s806_s18 = smov (!%p245_p5, %s621_s18), 1  ;;  %s808_s30 = smov (!%p247_p6, %s541_s30), 31 }
   0xf   : > { %592 = vset.pattern.permute.xlu0 %v635_v0  ;;  %s544_s23 = sshll.u32 %s806_s18, 3  ;;  %s542_s5 = sshll.u32 %s806_s18, 5 }
  0x10   : > { %s257_s26 = scalar_lea.vmem %s792_s2, %s544_s23  ;;  %s261_s29 = scalar_lea.vmem %s793_s3, %s544_s23  ;;  %v715_v42 = vstv %s356_s11 }
  0x11   : > { %v296_v1 = vld [vmem:[%s257_s26] sm:$0xff]  ;;  %s707_s6 = sadd.s32 %s542_s5, %s808_s30 }
  0x12   : > { %v297_v2 = vmul.f32 0.00024414063, %v296_v1  ;;  %v298_v3 = vld [vmem:[%s261_s29] sm:$0xff]  ;;  %s543_s7 = sshll.u32 %s707_s6, 2  ;;  %s548_s12 = sshll.u32 %s707_s6, 3 }
  0x13   : > { %v299_v4 = vmul.f32 0.00024414063, %v298_v3  ;;  %s252_s10 = scalar_lea.vmem %s791_s1, %s543_s7  ;;  %s733_s15 = scalar_lea.vmem %s794_s4, %s548_s12 }
  0x14   : > { %305 = vperm.xlu0 %592, %v297_v2   ;;  %v300_v5 = vmul.f32 %v297_v2, %v297_v2  ;;  %v272_v17 = vld [vmem:[%s252_s10] sm:$0xff]  ;;  %v273_v18 = vld [vmem:[%s252_s10 + $0x8] sm:$0xff]  ;;  %v274_v19 = vld [vmem:[%s252_s10 + $0x10] sm:$0xff] }
  0x15   : > { %v275_v20 = vld [vmem:[%s252_s10 + $0x18] sm:$0xff]  ;;  %v276_v21 = vld [vmem:[%s252_s10 + $0x20] sm:$0xff]  ;;  %v277_v22 = vld [vmem:[%s252_s10 + $0x28] sm:$0xff]  ;;  %v280_v25 = vunpack.c.l.bf16 %v272_v17  ;;  %v281_v26 = vunpack.c.h.bf16 %v272_v17  ;;  %v282_v27 = vunpack.c.l.bf16 %v273_v18  ;;  %v283_v28 = vunpack.c.h.bf16 %v273_v18 }
  0x16   : > { %v301_v6 = vsub.f32 %v299_v4, %v300_v5  ;;  %v278_v23 = vld [vmem:[%s252_s10 + $0x30] sm:$0xff]  ;;  %v279_v24 = vld [vmem:[%s252_s10 + $0x38] sm:$0xff]  ;;  %v284_v29 = vunpack.c.l.bf16 %v274_v19  ;;  %v285_v30 = vunpack.c.h.bf16 %v274_v19  ;;  %v286_v31 = vunpack.c.l.bf16 %v275_v20 }
  0x17   : > { %v287_v32 = vunpack.c.h.bf16 %v275_v20  ;;  %v288_v33 = vunpack.c.l.bf16 %v276_v21  ;;  %v289_v34 = vunpack.c.h.bf16 %v276_v21  ;;  %v290_v35 = vunpack.c.l.bf16 %v277_v22 }
  0x18   : > { %v302_v7 = vmax.f32 %v301_v6, 0.0  ;;  %v291_v36 = vunpack.c.h.bf16 %v277_v22  ;;  %v292_v37 = vunpack.c.l.bf16 %v278_v23  ;;  %v293_v38 = vunpack.c.h.bf16 %v278_v23 }
  0x19   : > { %v294_v39 = vunpack.c.l.bf16 %v279_v24  ;;  %v295_v40 = vunpack.c.h.bf16 %v279_v24 }
  0x1a   : > { %v324_v8 = vadd.f32 1e-05, %v302_v7 }
  0x1c   : > { %593 = vrsqrt.f32 %v324_v8  ;;  %vm331_vm0 = vweird.f32 %v324_v8 }
  0x22   : > { %v594_v9 = vpop.eup %593 }
  0x23   : > { %v326_v10 = vmul.f32 %v594_v9, %v324_v8  ;;  %vm332_vm1 = vweird.f32 %v594_v9 }
  0x24   : > { %vm333_vm2 = vmor %vm331_vm0, %vm332_vm1 }
  0x25   : > { %v327_v11 = vmul.f32 %v594_v9, %v326_v10 }
  0x27   : > { %v328_v12 = vmul.f32 0.5, %v327_v11 }
  0x29   : > { %v329_v13 = vsub.f32 1.5, %v328_v12 }
  0x2b   : > { %v330_v14 = vmul.f32 %v594_v9, %v329_v13 }
  0x2d   : > { %v334_v15 = vsel %vm333_vm2, %v594_v9, %v330_v14 }
  0x2e   : > { %337 = vperm.xlu0 %592, %v334_v15  }
  0x86   : > { %v306_v16 = vpop.permute.xlu0 %305 }
  0x87   : > { %v308_v43 = vsub.f32 %v280_v25, %v306_v16  ;;  %v309_v44 = vsub.f32 %v281_v26, %v306_v16  ;;  %v310_v45 = vsub.f32 %v282_v27, %v306_v16  ;;  %v311_v46 = vsub.f32 %v283_v28, %v306_v16 }
  0x88   : > { %v312_v47 = vsub.f32 %v284_v29, %v306_v16  ;;  %v313_v48 = vsub.f32 %v285_v30, %v306_v16  ;;  %v314_v49 = vsub.f32 %v286_v31, %v306_v16  ;;  %v315_v50 = vsub.f32 %v287_v32, %v306_v16 }
  0x89   : > { %v316_v54 = vsub.f32 %v288_v33, %v306_v16  ;;  %v317_v55 = vsub.f32 %v289_v34, %v306_v16  ;;  %v318_v56 = vsub.f32 %v290_v35, %v306_v16  ;;  %v319_v58 = vsub.f32 %v291_v36, %v306_v16 }
  0x8a   : > { %v320_v59 = vsub.f32 %v292_v37, %v306_v16  ;;  %v321_v60 = vsub.f32 %v293_v38, %v306_v16  ;;  %v322_v62 = vsub.f32 %v294_v39, %v306_v16  ;;  %v323_v63 = vsub.f32 %v295_v40, %v306_v16 }
  0xa0   : > { %v713_v41 = vpop.permute.xlu0 %337 }
  0xa1   : > { %v340_v51 = vmul.f32 %v713_v41, %v308_v43  ;;  %v341_v52 = vmul.f32 %v713_v41, %v309_v44  ;;  %v342_v53 = vmul.f32 %v713_v41, %v310_v45  ;;  %v343_v57 = vmul.f32 %v713_v41, %v311_v46 }
  0xa2   : > { %v344_v61 = vmul.f32 %v713_v41, %v312_v47  ;;  %v345_v0 = vmul.f32 %v713_v41, %v313_v48  ;;  %v346_v1 = vmul.f32 %v713_v41, %v314_v49  ;;  %v347_v2 = vmul.f32 %v713_v41, %v315_v50 }
  0xa3   : > { %v374_v3 = vmul.f32 %v715_v42, %v340_v51  ;;  %v375_v4 = vmul.f32 %v715_v42, %v341_v52  ;;  %v376_v5 = vmul.f32 %v715_v42, %v342_v53  ;;  %vm357_vm3 = vcmp.ge.f32.partialorder %v340_v51, 0.0 }
  0xa4   : > { %vm358_vm4 = vcmp.ge.f32.partialorder %v341_v52, 0.0  ;;  %vm359_vm5 = vcmp.ge.f32.partialorder %v342_v53, 0.0  ;;  %v377_v6 = vmul.f32 %v715_v42, %v343_v57  ;;  %v348_v7 = vmul.f32 %v713_v41, %v316_v54 }
  0xa5   : > { %v349_v8 = vmul.f32 %v713_v41, %v317_v55  ;;  %vm360_vm6 = vcmp.ge.f32.partialorder %v343_v57, 0.0  ;;  %v378_v9 = vmul.f32 %v715_v42, %v344_v61  ;;  %v350_v10 = vmul.f32 %v713_v41, %v318_v56 }
  0xa6   : > { %vm361_vm7 = vcmp.ge.f32.partialorder %v344_v61, 0.0  ;;  %vm362_vm8 = vcmp.ge.f32.partialorder %v345_v0, 0.0  ;;  %v379_v11 = vmul.f32 %v715_v42, %v345_v0  ;;  %v380_v12 = vmul.f32 %v715_v42, %v346_v1 }
  0xa7   : > { %v390_v13 = vsel %vm357_vm3, %v340_v51, %v374_v3  ;;  %v391_v14 = vsel %vm358_vm4, %v341_v52, %v375_v4  ;;  %v392_v15 = vsel %vm359_vm5, %v342_v53, %v376_v5  ;;  %v351_v16 = vmul.f32 %v713_v41, %v319_v58 }
  0xa8   : > { %vm363_vm9 = vcmp.ge.f32.partialorder %v346_v1, 0.0  ;;  %v381_v17 = vmul.f32 %v715_v42, %v347_v2  ;;  %v393_v18 = vsel %vm360_vm6, %v343_v57, %v377_v6  ;;  %406 = vst [vmem:[%s733_s15] sm:$0xff] %v390_v13  ;;  %v352_v19 = vmul.f32 %v713_v41, %v320_v59 }
  0xa9   : > { %vm364_vm10 = vcmp.ge.f32.partialorder %v347_v2, 0.0  ;;  %v382_v20 = vmul.f32 %v715_v42, %v348_v7  ;;  %v394_v21 = vsel %vm361_vm7, %v344_v61, %v378_v9  ;;  %407 = vst [vmem:[%s733_s15 + $0x8] sm:$0xff] %v391_v14  ;;  %v353_v22 = vmul.f32 %v713_v41, %v321_v60 }
  0xaa   : > { %vm365_vm11 = vcmp.ge.f32.partialorder %v348_v7, 0.0  ;;  %v383_v23 = vmul.f32 %v715_v42, %v349_v8  ;;  %v395_v24 = vsel %vm362_vm8, %v345_v0, %v379_v11  ;;  %408 = vst [vmem:[%s733_s15 + $0x10] sm:$0xff] %v392_v15  ;;  %v354_v25 = vmul.f32 %v713_v41, %v322_v62 }
  0xab   : > { %vm366_vm12 = vcmp.ge.f32.partialorder %v349_v8, 0.0  ;;  %v384_v26 = vmul.f32 %v715_v42, %v350_v10  ;;  %v396_v27 = vsel %vm363_vm9, %v346_v1, %v380_v12  ;;  %409 = vst [vmem:[%s733_s15 + $0x18] sm:$0xff] %v393_v18  ;;  %v355_v28 = vmul.f32 %v713_v41, %v323_v63 }
  0xac   : > { %vm367_vm13 = vcmp.ge.f32.partialorder %v350_v10, 0.0  ;;  %v385_v29 = vmul.f32 %v715_v42, %v351_v16  ;;  %v397_v30 = vsel %vm364_vm10, %v347_v2, %v381_v17  ;;  %410 = vst [vmem:[%s733_s15 + $0x20] sm:$0xff] %v394_v21  ;;  %vm368_vm14 = vcmp.ge.f32.partialorder %v351_v16, 0.0 }
  0xad   : > { %v386_v31 = vmul.f32 %v715_v42, %v352_v19  ;;  %v398_v32 = vsel %vm365_vm11, %v348_v7, %v382_v20  ;;  %411 = vst [vmem:[%s733_s15 + $0x28] sm:$0xff] %v395_v24  ;;  %vm369_vm15 = vcmp.ge.f32.partialorder %v352_v19, 0.0  ;;  %v387_v33 = vmul.f32 %v715_v42, %v353_v22 }
  0xae   : > { %v399_v34 = vsel %vm366_vm12, %v349_v8, %v383_v23  ;;  %412 = vst [vmem:[%s733_s15 + $0x30] sm:$0xff] %v396_v27  ;;  %vm370_vm0 = vcmp.ge.f32.partialorder %v353_v22, 0.0  ;;  %v388_v35 = vmul.f32 %v715_v42, %v354_v25  ;;  %v400_v36 = vsel %vm367_vm13, %v350_v10, %v384_v26 }
  0xaf   : > { %413 = vst [vmem:[%s733_s15 + $0x38] sm:$0xff] %v397_v30  ;;  %vm371_vm1 = vcmp.ge.f32.partialorder %v354_v25, 0.0  ;;  %v389_v37 = vmul.f32 %v715_v42, %v355_v28  ;;  %v401_v38 = vsel %vm368_vm14, %v351_v16, %v385_v29  ;;  %vm372_vm2 = vcmp.ge.f32.partialorder %v355_v28, 0.0 }
  0xb0   : > { %414 = vst [vmem:[%s733_s15 + $0x40] sm:$0xff] %v398_v32  ;;  %v402_v39 = vsel %vm369_vm15, %v352_v19, %v386_v31  ;;  %v403_v40 = vsel %vm370_vm0, %v353_v22, %v387_v33  ;;  %v404_v41 = vsel %vm371_vm1, %v354_v25, %v388_v35 }
  0xb1   : > { %415 = vst [vmem:[%s733_s15 + $0x48] sm:$0xff] %v399_v34  ;;  %v405_v43 = vsel %vm372_vm2, %v355_v28, %v389_v37 }
  0xb2   : > { %416 = vst [vmem:[%s733_s15 + $0x50] sm:$0xff] %v400_v36 }
  0xb3   : > { %417 = vst [vmem:[%s733_s15 + $0x58] sm:$0xff] %v401_v38 }
  0xb4   : > { %418 = vst [vmem:[%s733_s15 + $0x60] sm:$0xff] %v402_v39 }
  0xb5   : > { %419 = vst [vmem:[%s733_s15 + $0x68] sm:$0xff] %v403_v40 }
  0xb6   : > { %420 = vst [vmem:[%s733_s15 + $0x70] sm:$0xff] %v404_v41 }
  0xb7   : > { %421 = vst [vmem:[%s733_s15 + $0x78] sm:$0xff] %v405_v43 }
  0xb8 PF: > { %s15_s21 = sadd.s32 1, %s633_s21   ;;  %s795_s17 = smov %s625_s19 }
  0xb9   : > { %p12_p7 = scmp.ge.s32.totalorder %s15_s21, 6   ;;  %s796_s18 = smov %s629_s20 }
  0xba   : > { %s797_s19 = smov %s800_s0  ;;  %s798_s20 = smov %s804_s22 }
  0xbb   :  { %14 = sbr.rel (!%p12_p7) target bundleno = 3 (0x3), region = 72 }

// kernel: unet_encoder_forward.11
= control target key start
LH: loop header
LB: loop body
LE: loop exit
PB: predicated region body
PF: predicated region fallthrough
CT: control target
= control target key end

     0   :  { %s3918_s15 = smov 0   ;;  %s3920_s16 = smov 0   ;;  %s5067_s0 = inlined_call_operand.vmem [shape: bf16[2,216,4096], index: 0, kind: input, shape index: {}]   ;;  %s5068_s1 = inlined_call_operand.vmem [shape: bf16[8,216], index: 1, kind: input, shape index: {}]   ;;  %s5069_s2 = inlined_call_operand.vmem [shape: bf16[2,8,4096], index: 2, kind: output, shape index: {0}]   ;;  %s5070_s3 = inlined_call_operand.vmem [shape: f32[2,8,1], index: 3, kind: output, shape index: {1}]   ;;  %s5071_s4 = inlined_call_operand.vmem [shape: f32[2,8,1], index: 4, kind: output, shape index: {2}]  }
   0x1   :  { %s3922_s17 = smov 0   ;;  %s3924_s18 = smov 0  }
   0x2   :  { %s3926_s19 = smov 0   ;;  %s3928_s20 = smov 0  }
   0x3   :  { %s3930_s21 = smov 0  }
   0x4 LB: > { %s24_s22 = sadd.s32 1, %s3882_s19  ;;  %s27_s23 = sadd.s32 1, %s3886_s20  ;;  %s3890_s21 = sphi %s3930_s21, %s15_s21   ;;  %s3886_s20 = sphi %s3928_s20, %s5078_s20   ;;  %s3882_s19 = sphi %s3926_s19, %s5077_s19   ;;  %s3878_s18 = sphi %s3924_s18, %s5076_s18   ;;  %s3874_s17 = sphi %s3922_s17, %s5075_s17   ;;  %s3870_s16 = sphi %s3920_s16, %s5074_s16   ;;  %s3866_s15 = sphi %s3918_s15, %s5073_s15  }
   0x5   : > { %p25_p0 = scmp.ge.s32.totalorder %s24_s22, 2  ;;  %p43_p1 = scmp.ne.s32.totalorder %s3870_s16, %s3866_s15 }
   0x6   : > { %p44_p2 = scmp.eq.s32.totalorder %s3890_s21, 0  ;;  %s36_s27 = sadd.s32 1, %s3870_s16 }
   0x7   : > { %s5080_s22 = smov (%p25_p0, %s24_s22), 0  ;;  %s5082_s23 = smov (!%p25_p0, %s27_s23), %s3886_s20 }
   0x8   : > { %p45_p3 = por %p44_p2, %p43_p1  ;;  %p29_p4 = scmp.ge.s32.totalorder %s5082_s23, 2 }
   0x9   : > { %s32_s24 = ssub.s32 %s3882_s19, %s5080_s22  ;;  %p2708_p6 = scmp.ge.s32.totalorder %s3890_s21, 4 }
   0xa   : > { %s5084_s23 = smov (%p29_p4, %s5082_s23), 0 }
   0xb   : > { %s31_s25 = ssub.s32 %s3886_s20, %s5084_s23  ;;  %173 = sbr.rel (%p2708_p6) target bundleno = 240 (0xf0), region = 20 }
   0xc   : > { %s33_s26 = sor.u32 %s32_s24, %s31_s25 }
   0xd   : > { %p34_p5 = scmp.eq.s32.totalorder %s33_s26, 0 }
   0xf   : > { %s3969_s28 = scalar_select %p34_p5, %s3870_s16, %s36_s27  }
  0x10   : > { %176 = sbr.rel (!%p45_p3) target bundleno = 240 (0xf0), region = 24  ;;  %s178_s29 = sand.u32 (%p45_p3), 1, %s3870_s16  }
  0x11   : > { %s3776_s30 = smul.u32 (%p45_p3), 1728, %s178_s29  ;;  %s2709_s5 = sshll.u32 (%p45_p3), %s3882_s19, 4 }
  0x12   : > { %s3777_s6 = smul.u32 (%p45_p3), 864, %s3886_s20 }
  0x13   : > { %s3983_s12 = scalar_lea.vmem (%p45_p3), [#allocation2], %s3776_s30 }
  0x14   : > { %s183_s7 = sadd.s32 (%p45_p3), %s3777_s6, %s2709_s5 }
  0x15   : > { %s2710_s8 = sshll.u32 %s183_s7, 2 }
  0x16   : > { %s3978_s11 = scalar_lea.vmem %s5067_s0, %s2710_s8 }
  0x17   : > { %v198_v0 = vld [vmem:[%s3978_s11] sm:$0xff]  ;;  %v200_v1 = vld [vmem:[%s3978_s11 + $0x8] sm:$0xff]  ;;  %v202_v2 = vld [vmem:[%s3978_s11 + $0x10] sm:$0xff] }
  0x18   : > { %199 = vst [vmem:[%s3983_s12] sm:$0xff] %v198_v0  ;;  %v204_v3 = vld [vmem:[%s3978_s11 + $0x18] sm:$0xff]  ;;  %v206_v4 = vld [vmem:[%s3978_s11 + $0x20] sm:$0xff]  ;;  %v208_v5 = vld [vmem:[%s3978_s11 + $0x28] sm:$0xff] }
  0x19   : > { %201 = vst [vmem:[%s3983_s12 + $0x8] sm:$0xff] %v200_v1  ;;  %v210_v6 = vld [vmem:[%s3978_s11 + $0x30] sm:$0xff]  ;;  %v212_v7 = vld [vmem:[%s3978_s11 + $0x38] sm:$0xff]  ;;  %v214_v8 = vld [vmem:[%s3978_s11 + $0x80] sm:$0xff] }
  0x1a   : > { %203 = vst [vmem:[%s3983_s12 + $0x10] sm:$0xff] %v202_v2  ;;  %v216_v9 = vld [vmem:[%s3978_s11 + $0x88] sm:$0xff]  ;;  %v218_v10 = vld [vmem:[%s3978_s11 + $0x90] sm:$0xff]  ;;  %v220_v11 = vld [vmem:[%s3978_s11 + $0x98] sm:$0xff] }
  0x1b   : > { %205 = vst [vmem:[%s3983_s12 + $0x18] sm:$0xff] %v204_v3  ;;  %v222_v12 = vld [vmem:[%s3978_s11 + $0xa0] sm:$0xff]  ;;  %v224_v13 = vld [vmem:[%s3978_s11 + $0xa8] sm:$0xff]  ;;  %v226_v14 = vld [vmem:[%s3978_s11 + $0xb0] sm:$0xff] }
  0x1c   : > { %207 = vst [vmem:[%s3983_s12 + $0x20] sm:$0xff] %v206_v4  ;;  %v228_v15 = vld [vmem:[%s3978_s11 + $0xb8] sm:$0xff]  ;;  %v230_v16 = vld [vmem:[%s3978_s11 + $0x100] sm:$0xff]  ;;  %v232_v17 = vld [vmem:[%s3978_s11 + $0x108] sm:$0xff] }
  0x1d   : > { %209 = vst [vmem:[%s3983_s12 + $0x28] sm:$0xff] %v208_v5  ;;  %v234_v18 = vld [vmem:[%s3978_s11 + $0x110] sm:$0xff]  ;;  %v236_v19 = vld [vmem:[%s3978_s11 + $0x118] sm:$0xff]  ;;  %v238_v20 = vld [vmem:[%s3978_s11 + $0x120] sm:$0xff] }
  0x1e   : > { %211 = vst [vmem:[%s3983_s12 + $0x30] sm:$0xff] %v210_v6  ;;  %v240_v21 = vld [vmem:[%s3978_s11 + $0x128] sm:$0xff]  ;;  %v242_v22 = vld [vmem:[%s3978_s11 + $0x130] sm:$0xff]  ;;  %v244_v23 = vld [vmem:[%s3978_s11 + $0x138] sm:$0xff] }
  0x1f   : > { %213 = vst [vmem:[%s3983_s12 + $0x38] sm:$0xff] %v212_v7  ;;  %v246_v24 = vld [vmem:[%s3978_s11 + $0x180] sm:$0xff]  ;;  %v248_v25 = vld [vmem:[%s3978_s11 + $0x188] sm:$0xff]  ;;  %v250_v26 = vld [vmem:[%s3978_s11 + $0x190] sm:$0xff] }
  0x20   : > { %215 = vst [vmem:[%s3983_s12 + $0x40] sm:$0xff] %v214_v8  ;;  %v252_v27 = vld [vmem:[%s3978_s11 + $0x198] sm:$0xff]  ;;  %v254_v28 = vld [vmem:[%s3978_s11 + $0x1a0] sm:$0xff]  ;;  %v256_v29 = vld [vmem:[%s3978_s11 + $0x1a8] sm:$0xff] }
  0x21   : > { %217 = vst [vmem:[%s3983_s12 + $0x48] sm:$0xff] %v216_v9  ;;  %v258_v30 = vld [vmem:[%s3978_s11 + $0x1b0] sm:$0xff]  ;;  %v260_v31 = vld [vmem:[%s3978_s11 + $0x1b8] sm:$0xff]  ;;  %v262_v32 = vld [vmem:[%s3978_s11 + $0x200] sm:$0xff] }
  0x22   : > { %219 = vst [vmem:[%s3983_s12 + $0x50] sm:$0xff] %v218_v10  ;;  %v264_v33 = vld [vmem:[%s3978_s11 + $0x208] sm:$0xff]  ;;  %v266_v34 = vld [vmem:[%s3978_s11 + $0x210] sm:$0xff]  ;;  %v268_v35 = vld [vmem:[%s3978_s11 + $0x218] sm:$0xff] }
  0x23   : > { %221 = vst [vmem:[%s3983_s12 + $0x58] sm:$0xff] %v220_v11  ;;  %v270_v36 = vld [vmem:[%s3978_s11 + $0x220] sm:$0xff]  ;;  %v272_v37 = vld [vmem:[%s3978_s11 + $0x228] sm:$0xff]  ;;  %v274_v38 = vld [vmem:[%s3978_s11 + $0x230] sm:$0xff] }
  0x24   : > { %223 = vst [vmem:[%s3983_s12 + $0x60] sm:$0xff] %v222_v12  ;;  %v276_v39 = vld [vmem:[%s3978_s11 + $0x238] sm:$0xff]  ;;  %v278_v40 = vld [vmem:[%s3978_s11 + $0x280] sm:$0xff]  ;;  %v280_v41 = vld [vmem:[%s3978_s11 + $0x288] sm:$0xff] }
  0x25   : > { %225 = vst [vmem:[%s3983_s12 + $0x68] sm:$0xff] %v224_v13  ;;  %v282_v42 = vld [vmem:[%s3978_s11 + $0x290] sm:$0xff]  ;;  %v284_v43 = vld [vmem:[%s3978_s11 + $0x298] sm:$0xff]  ;;  %v286_v44 = vld [vmem:[%s3978_s11 + $0x2a0] sm:$0xff] }
  0x26   : > { %227 = vst [vmem:[%s3983_s12 + $0x70] sm:$0xff] %v226_v14  ;;  %v288_v45 = vld [vmem:[%s3978_s11 + $0x2a8] sm:$0xff]  ;;  %v290_v46 = vld [vmem:[%s3978_s11 + $0x2b0] sm:$0xff]  ;;  %v292_v47 = vld [vmem:[%s3978_s11 + $0x2b8] sm:$0xff] }
  0x27   : > { %229 = vst [vmem:[%s3983_s12 + $0x78] sm:$0xff] %v228_v15  ;;  %v294_v48 = vld [vmem:[%s3978_s11 + $0x300] sm:$0xff]  ;;  %v296_v49 = vld [vmem:[%s3978_s11 + $0x308] sm:$0xff]  ;;  %v298_v50 = vld [vmem:[%s3978_s11 + $0x310] sm:$0xff] }
  0x28   : > { %231 = vst [vmem:[%s3983_s12 + $0x80] sm:$0xff] %v230_v16  ;;  %v300_v51 = vld [vmem:[%s3978_s11 + $0x318] sm:$0xff]  ;;  %v302_v52 = vld [vmem:[%s3978_s11 + $0x320] sm:$0xff]  ;;  %v304_v53 = vld [vmem:[%s3978_s11 + $0x328] sm:$0xff] }
  0x29   : > { %233 = vst [vmem:[%s3983_s12 + $0x88] sm:$0xff] %v232_v17  ;;  %v306_v54 = vld [vmem:[%s3978_s11 + $0x330] sm:$0xff]  ;;  %v308_v55 = vld [vmem:[%s3978_s11 + $0x338] sm:$0xff]  ;;  %v310_v56 = vld [vmem:[%s3978_s11 + $0x380] sm:$0xff] }
  0x2a   : > { %235 = vst [vmem:[%s3983_s12 + $0x90] sm:$0xff] %v234_v18  ;;  %v312_v57 = vld [vmem:[%s3978_s11 + $0x388] sm:$0xff]  ;;  %v314_v58 = vld [vmem:[%s3978_s11 + $0x390] sm:$0xff]  ;;  %v316_v59 = vld [vmem:[%s3978_s11 + $0x398] sm:$0xff] }
  0x2b   : > { %237 = vst [vmem:[%s3983_s12 + $0x98] sm:$0xff] %v236_v19  ;;  %v318_v60 = vld [vmem:[%s3978_s11 + $0x3a0] sm:$0xff]  ;;  %v320_v61 = vld [vmem:[%s3978_s11 + $0x3a8] sm:$0xff]  ;;  %v322_v62 = vld [vmem:[%s3978_s11 + $0x3b0] sm:$0xff] }
  0x2c   : > { %239 = vst [vmem:[%s3983_s12 + $0xa0] sm:$0xff] %v238_v20  ;;  %v324_v63 = vld [vmem:[%s3978_s11 + $0x3b8] sm:$0xff]  ;;  %v326_v0 = vld [vmem:[%s3978_s11 + $0x400] sm:$0xff]  ;;  %v328_v1 = vld [vmem:[%s3978_s11 + $0x408] sm:$0xff] }
  0x2d   : > { %241 = vst [vmem:[%s3983_s12 + $0xa8] sm:$0xff] %v240_v21  ;;  %v330_v2 = vld [vmem:[%s3978_s11 + $0x410] sm:$0xff]  ;;  %v332_v3 = vld [vmem:[%s3978_s11 + $0x418] sm:$0xff]  ;;  %v334_v4 = vld [vmem:[%s3978_s11 + $0x420] sm:$0xff] }
  0x2e   : > { %243 = vst [vmem:[%s3983_s12 + $0xb0] sm:$0xff] %v242_v22  ;;  %v336_v5 = vld [vmem:[%s3978_s11 + $0x428] sm:$0xff]  ;;  %v338_v6 = vld [vmem:[%s3978_s11 + $0x430] sm:$0xff]  ;;  %v340_v7 = vld [vmem:[%s3978_s11 + $0x438] sm:$0xff] }
  0x2f   : > { %245 = vst [vmem:[%s3983_s12 + $0xb8] sm:$0xff] %v244_v23  ;;  %v342_v8 = vld [vmem:[%s3978_s11 + $0x480] sm:$0xff]  ;;  %v344_v9 = vld [vmem:[%s3978_s11 + $0x488] sm:$0xff]  ;;  %v346_v10 = vld [vmem:[%s3978_s11 + $0x490] sm:$0xff] }
  0x30   : > { %247 = vst [vmem:[%s3983_s12 + $0xc0] sm:$0xff] %v246_v24  ;;  %v348_v11 = vld [vmem:[%s3978_s11 + $0x498] sm:$0xff]  ;;  %v350_v12 = vld [vmem:[%s3978_s11 + $0x4a0] sm:$0xff]  ;;  %v352_v13 = vld [vmem:[%s3978_s11 + $0x4a8] sm:$0xff] }
  0x31   : > { %249 = vst [vmem:[%s3983_s12 + $0xc8] sm:$0xff] %v248_v25  ;;  %v354_v14 = vld [vmem:[%s3978_s11 + $0x4b0] sm:$0xff]  ;;  %v356_v15 = vld [vmem:[%s3978_s11 + $0x4b8] sm:$0xff]  ;;  %v358_v16 = vld [vmem:[%s3978_s11 + $0x500] sm:$0xff] }
  0x32   : > { %251 = vst [vmem:[%s3983_s12 + $0xd0] sm:$0xff] %v250_v26  ;;  %v360_v17 = vld [vmem:[%s3978_s11 + $0x508] sm:$0xff]  ;;  %v362_v18 = vld [vmem:[%s3978_s11 + $0x510] sm:$0xff]  ;;  %v364_v19 = vld [vmem:[%s3978_s11 + $0x518] sm:$0xff] }
  0x33   : > { %253 = vst [vmem:[%s3983_s12 + $0xd8] sm:$0xff] %v252_v27  ;;  %v366_v20 = vld [vmem:[%s3978_s11 + $0x520] sm:$0xff]  ;;  %v368_v21 = vld [vmem:[%s3978_s11 + $0x528] sm:$0xff]  ;;  %v370_v22 = vld [vmem:[%s3978_s11 + $0x530] sm:$0xff] }
  0x34   : > { %255 = vst [vmem:[%s3983_s12 + $0xe0] sm:$0xff] %v254_v28  ;;  %v372_v23 = vld [vmem:[%s3978_s11 + $0x538] sm:$0xff]  ;;  %v374_v24 = vld [vmem:[%s3978_s11 + $0x580] sm:$0xff]  ;;  %v376_v25 = vld [vmem:[%s3978_s11 + $0x588] sm:$0xff] }
  0x35   : > { %257 = vst [vmem:[%s3983_s12 + $0xe8] sm:$0xff] %v256_v29  ;;  %v378_v26 = vld [vmem:[%s3978_s11 + $0x590] sm:$0xff]  ;;  %v380_v27 = vld [vmem:[%s3978_s11 + $0x598] sm:$0xff]  ;;  %v382_v28 = vld [vmem:[%s3978_s11 + $0x5a0] sm:$0xff] }
  0x36   : > { %259 = vst [vmem:[%s3983_s12 + $0xf0] sm:$0xff] %v258_v30  ;;  %v384_v29 = vld [vmem:[%s3978_s11 + $0x5a8] sm:$0xff]  ;;  %v386_v30 = vld [vmem:[%s3978_s11 + $0x5b0] sm:$0xff] }
  0x37   : > { %261 = vst [vmem:[%s3983_s12 + $0xf8] sm:$0xff] %v260_v31  ;;  %v388_v31 = vld [vmem:[%s3978_s11 + $0x5b8] sm:$0xff] }
  0x38   : > { %263 = vst [vmem:[%s3983_s12 + $0x100] sm:$0xff] %v262_v32  ;;  %v390_v32 = vld [vmem:[%s3978_s11 + $0x600] sm:$0xff] }
  0x39   : > { %265 = vst [vmem:[%s3983_s12 + $0x108] sm:$0xff] %v264_v33  ;;  %v392_v33 = vld [vmem:[%s3978_s11 + $0x608] sm:$0xff] }
  0x3a   : > { %267 = vst [vmem:[%s3983_s12 + $0x110] sm:$0xff] %v266_v34  ;;  %v394_v34 = vld [vmem:[%s3978_s11 + $0x610] sm:$0xff] }
  0x3b   : > { %269 = vst [vmem:[%s3983_s12 + $0x118] sm:$0xff] %v268_v35  ;;  %v396_v35 = vld [vmem:[%s3978_s11 + $0x618] sm:$0xff] }
  0x3c   : > { %271 = vst [vmem:[%s3983_s12 + $0x120] sm:$0xff] %v270_v36  ;;  %v398_v36 = vld [vmem:[%s3978_s11 + $0x620] sm:$0xff] }
  0x3d   : > { %273 = vst [vmem:[%s3983_s12 + $0x128] sm:$0xff] %v272_v37  ;;  %v400_v37 = vld [vmem:[%s3978_s11 + $0x628] sm:$0xff] }
  0x3e   : > { %275 = vst [vmem:[%s3983_s12 + $0x130] sm:$0xff] %v274_v38  ;;  %v402_v38 = vld [vmem:[%s3978_s11 + $0x630] sm:$0xff] }
  0x3f   : > { %277 = vst [vmem:[%s3983_s12 + $0x138] sm:$0xff] %v276_v39  ;;  %v404_v39 = vld [vmem:[%s3978_s11 + $0x638] sm:$0xff] }
  0x40   : > { %279 = vst [vmem:[%s3983_s12 + $0x140] sm:$0xff] %v278_v40  ;;  %v406_v40 = vld [vmem:[%s3978_s11 + $0x680] sm:$0xff] }
  0x41   : > { %281 = vst [vmem:[%s3983_s12 + $0x148] sm:$0xff] %v280_v41  ;;  %v408_v41 = vld [vmem:[%s3978_s11 + $0x688] sm:$0xff] }
  0x42   : > { %283 = vst [vmem:[%s3983_s12 + $0x150] sm:$0xff] %v282_v42  ;;  %v410_v42 = vld [vmem:[%s3978_s11 + $0x690] sm:$0xff] }
  0x43   : > { %285 = vst [vmem:[%s3983_s12 + $0x158] sm:$0xff] %v284_v43  ;;  %v412_v43 = vld [vmem:[%s3978_s11 + $0x698] sm:$0xff] }
  0x44   : > { %287 = vst [vmem:[%s3983_s12 + $0x160] sm:$0xff] %v286_v44  ;;  %v414_v44 = vld [vmem:[%s3978_s11 + $0x6a0] sm:$0xff] }
  0x45   : > { %289 = vst [vmem:[%s3983_s12 + $0x168] sm:$0xff] %v288_v45  ;;  %v416_v45 = vld [vmem:[%s3978_s11 + $0x6a8] sm:$0xff] }
  0x46   : > { %291 = vst [vmem:[%s3983_s12 + $0x170] sm:$0xff] %v290_v46  ;;  %v418_v46 = vld [vmem:[%s3978_s11 + $0x6b0] sm:$0xff] }
  0x47   : > { %293 = vst [vmem:[%s3983_s12 + $0x178] sm:$0xff] %v292_v47  ;;  %v420_v47 = vld [vmem:[%s3978_s11 + $0x6b8] sm:$0xff] }
  0x48   : > { %295 = vst [vmem:[%s3983_s12 + $0x180] sm:$0xff] %v294_v48  ;;  %v422_v48 = vld [vmem:[%s3978_s11 + $0x700] sm:$0xff] }
  0x49   : > { %297 = vst [vmem:[%s3983_s12 + $0x188] sm:$0xff] %v296_v49  ;;  %v424_v49 = vld [vmem:[%s3978_s11 + $0x708] sm:$0xff] }
  0x4a   : > { %299 = vst [vmem:[%s3983_s12 + $0x190] sm:$0xff] %v298_v50  ;;  %v426_v50 = vld [vmem:[%s3978_s11 + $0x710] sm:$0xff] }
  0x4b   : > { %301 = vst [vmem:[%s3983_s12 + $0x198] sm:$0xff] %v300_v51  ;;  %v428_v51 = vld [vmem:[%s3978_s11 + $0x718] sm:$0xff] }
  0x4c   : > { %303 = vst [vmem:[%s3983_s12 + $0x1a0] sm:$0xff] %v302_v52  ;;  %v430_v52 = vld [vmem:[%s3978_s11 + $0x720] sm:$0xff] }
  0x4d   : > { %305 = vst [vmem:[%s3983_s12 + $0x1a8] sm:$0xff] %v304_v53  ;;  %v432_v53 = vld [vmem:[%s3978_s11 + $0x728] sm:$0xff] }
  0x4e   : > { %307 = vst [vmem:[%s3983_s12 + $0x1b0] sm:$0xff] %v306_v54  ;;  %v434_v54 = vld [vmem:[%s3978_s11 + $0x730] sm:$0xff] }
  0x4f   : > { %309 = vst [vmem:[%s3983_s12 + $0x1b8] sm:$0xff] %v308_v55  ;;  %v436_v55 = vld [vmem:[%s3978_s11 + $0x738] sm:$0xff] }
  0x50   : > { %311 = vst [vmem:[%s3983_s12 + $0x1c0] sm:$0xff] %v310_v56  ;;  %v438_v56 = vld [vmem:[%s3978_s11 + $0x780] sm:$0xff] }
  0x51   : > { %313 = vst [vmem:[%s3983_s12 + $0x1c8] sm:$0xff] %v312_v57  ;;  %v440_v57 = vld [vmem:[%s3978_s11 + $0x788] sm:$0xff] }
  0x52   : > { %315 = vst [vmem:[%s3983_s12 + $0x1d0] sm:$0xff] %v314_v58  ;;  %v442_v58 = vld [vmem:[%s3978_s11 + $0x790] sm:$0xff] }
  0x53   : > { %317 = vst [vmem:[%s3983_s12 + $0x1d8] sm:$0xff] %v316_v59  ;;  %v444_v59 = vld [vmem:[%s3978_s11 + $0x798] sm:$0xff] }
  0x54   : > { %319 = vst [vmem:[%s3983_s12 + $0x1e0] sm:$0xff] %v318_v60  ;;  %v446_v60 = vld [vmem:[%s3978_s11 + $0x7a0] sm:$0xff] }
  0x55   : > { %321 = vst [vmem:[%s3983_s12 + $0x1e8] sm:$0xff] %v320_v61  ;;  %v448_v61 = vld [vmem:[%s3978_s11 + $0x7a8] sm:$0xff] }
  0x56   : > { %323 = vst [vmem:[%s3983_s12 + $0x1f0] sm:$0xff] %v322_v62  ;;  %v450_v62 = vld [vmem:[%s3978_s11 + $0x7b0] sm:$0xff] }
  0x57   : > { %325 = vst [vmem:[%s3983_s12 + $0x1f8] sm:$0xff] %v324_v63  ;;  %v452_v63 = vld [vmem:[%s3978_s11 + $0x7b8] sm:$0xff] }
  0x58   : > { %327 = vst [vmem:[%s3983_s12 + $0x200] sm:$0xff] %v326_v0  ;;  %v454_v0 = vld [vmem:[%s3978_s11 + $0x800] sm:$0xff] }
  0x59   : > { %329 = vst [vmem:[%s3983_s12 + $0x208] sm:$0xff] %v328_v1  ;;  %v456_v1 = vld [vmem:[%s3978_s11 + $0x808] sm:$0xff] }
  0x5a   : > { %331 = vst [vmem:[%s3983_s12 + $0x210] sm:$0xff] %v330_v2  ;;  %v458_v2 = vld [vmem:[%s3978_s11 + $0x810] sm:$0xff] }
  0x5b   : > { %333 = vst [vmem:[%s3983_s12 + $0x218] sm:$0xff] %v332_v3  ;;  %v460_v3 = vld [vmem:[%s3978_s11 + $0x818] sm:$0xff] }
  0x5c   : > { %335 = vst [vmem:[%s3983_s12 + $0x220] sm:$0xff] %v334_v4  ;;  %v462_v4 = vld [vmem:[%s3978_s11 + $0x820] sm:$0xff] }
  0x5d   : > { %337 = vst [vmem:[%s3983_s12 + $0x228] sm:$0xff] %v336_v5  ;;  %v464_v5 = vld [vmem:[%s3978_s11 + $0x828] sm:$0xff] }
  0x5e   : > { %339 = vst [vmem:[%s3983_s12 + $0x230] sm:$0xff] %v338_v6  ;;  %v466_v6 = vld [vmem:[%s3978_s11 + $0x830] sm:$0xff] }
  0x5f   : > { %341 = vst [vmem:[%s3983_s12 + $0x238] sm:$0xff] %v340_v7  ;;  %v468_v7 = vld [vmem:[%s3978_s11 + $0x838] sm:$0xff] }
  0x60   : > { %343 = vst [vmem:[%s3983_s12 + $0x240] sm:$0xff] %v342_v8  ;;  %v470_v8 = vld [vmem:[%s3978_s11 + $0x880] sm:$0xff] }
  0x61   : > { %345 = vst [vmem:[%s3983_s12 + $0x248] sm:$0xff] %v344_v9  ;;  %v472_v9 = vld [vmem:[%s3978_s11 + $0x888] sm:$0xff] }
  0x62   : > { %347 = vst [vmem:[%s3983_s12 + $0x250] sm:$0xff] %v346_v10  ;;  %v474_v10 = vld [vmem:[%s3978_s11 + $0x890] sm:$0xff] }
  0x63   : > { %349 = vst [vmem:[%s3983_s12 + $0x258] sm:$0xff] %v348_v11  ;;  %v476_v11 = vld [vmem:[%s3978_s11 + $0x898] sm:$0xff] }
  0x64   : > { %351 = vst [vmem:[%s3983_s12 + $0x260] sm:$0xff] %v350_v12  ;;  %v478_v12 = vld [vmem:[%s3978_s11 + $0x8a0] sm:$0xff] }
  0x65   : > { %353 = vst [vmem:[%s3983_s12 + $0x268] sm:$0xff] %v352_v13  ;;  %v480_v13 = vld [vmem:[%s3978_s11 + $0x8a8] sm:$0xff] }
  0x66   : > { %355 = vst [vmem:[%s3983_s12 + $0x270] sm:$0xff] %v354_v14  ;;  %v482_v14 = vld [vmem:[%s3978_s11 + $0x8b0] sm:$0xff] }
  0x67   : > { %357 = vst [vmem:[%s3983_s12 + $0x278] sm:$0xff] %v356_v15  ;;  %v484_v15 = vld [vmem:[%s3978_s11 + $0x8b8] sm:$0xff] }
  0x68   : > { %359 = vst [vmem:[%s3983_s12 + $0x280] sm:$0xff] %v358_v16  ;;  %v486_v16 = vld [vmem:[%s3978_s11 + $0x900] sm:$0xff] }
  0x69   : > { %361 = vst [vmem:[%s3983_s12 + $0x288] sm:$0xff] %v360_v17  ;;  %v488_v17 = vld [vmem:[%s3978_s11 + $0x908] sm:$0xff] }
  0x6a   : > { %363 = vst [vmem:[%s3983_s12 + $0x290] sm:$0xff] %v362_v18  ;;  %v490_v18 = vld [vmem:[%s3978_s11 + $0x910] sm:$0xff] }
  0x6b   : > { %365 = vst [vmem:[%s3983_s12 + $0x298] sm:$0xff] %v364_v19  ;;  %v492_v19 = vld [vmem:[%s3978_s11 + $0x918] sm:$0xff] }
  0x6c   : > { %367 = vst [vmem:[%s3983_s12 + $0x2a0] sm:$0xff] %v366_v20  ;;  %v494_v20 = vld [vmem:[%s3978_s11 + $0x920] sm:$0xff] }
  0x6d   : > { %369 = vst [vmem:[%s3983_s12 + $0x2a8] sm:$0xff] %v368_v21  ;;  %v496_v21 = vld [vmem:[%s3978_s11 + $0x928] sm:$0xff] }
  0x6e   : > { %371 = vst [vmem:[%s3983_s12 + $0x2b0] sm:$0xff] %v370_v22  ;;  %v498_v22 = vld [vmem:[%s3978_s11 + $0x930] sm:$0xff] }
  0x6f   : > { %373 = vst [vmem:[%s3983_s12 + $0x2b8] sm:$0xff] %v372_v23  ;;  %v500_v23 = vld [vmem:[%s3978_s11 + $0x938] sm:$0xff] }
  0x70   : > { %375 = vst [vmem:[%s3983_s12 + $0x2c0] sm:$0xff] %v374_v24  ;;  %v502_v24 = vld [vmem:[%s3978_s11 + $0x980] sm:$0xff] }
  0x71   : > { %377 = vst [vmem:[%s3983_s12 + $0x2c8] sm:$0xff] %v376_v25  ;;  %v504_v25 = vld [vmem:[%s3978_s11 + $0x988] sm:$0xff] }
  0x72   : > { %379 = vst [vmem:[%s3983_s12 + $0x2d0] sm:$0xff] %v378_v26  ;;  %v506_v26 = vld [vmem:[%s3978_s11 + $0x990] sm:$0xff] }
  0x73   : > { %381 = vst [vmem:[%s3983_s12 + $0x2d8] sm:$0xff] %v380_v27  ;;  %v508_v27 = vld [vmem:[%s3978_s11 + $0x998] sm:$0xff] }
  0x74   : > { %383 = vst [vmem:[%s3983_s12 + $0x2e0] sm:$0xff] %v382_v28  ;;  %v510_v28 = vld [vmem:[%s3978_s11 + $0x9a0] sm:$0xff] }
  0x75   : > { %385 = vst [vmem:[%s3983_s12 + $0x2e8] sm:$0xff] %v384_v29  ;;  %v512_v29 = vld [vmem:[%s3978_s11 + $0x9a8] sm:$0xff] }
  0x76   : > { %387 = vst [vmem:[%s3983_s12 + $0x2f0] sm:$0xff] %v386_v30  ;;  %v514_v30 = vld [vmem:[%s3978_s11 + $0x9b0] sm:$0xff] }
  0x77   : > { %389 = vst [vmem:[%s3983_s12 + $0x2f8] sm:$0xff] %v388_v31  ;;  %v516_v31 = vld [vmem:[%s3978_s11 + $0x9b8] sm:$0xff] }
  0x78   : > { %391 = vst [vmem:[%s3983_s12 + $0x300] sm:$0xff] %v390_v32  ;;  %v518_v32 = vld [vmem:[%s3978_s11 + $0xa00] sm:$0xff] }
  0x79   : > { %393 = vst [vmem:[%s3983_s12 + $0x308] sm:$0xff] %v392_v33  ;;  %v520_v33 = vld [vmem:[%s3978_s11 + $0xa08] sm:$0xff] }
  0x7a   : > { %395 = vst [vmem:[%s3983_s12 + $0x310] sm:$0xff] %v394_v34  ;;  %v522_v34 = vld [vmem:[%s3978_s11 + $0xa10] sm:$0xff] }
  0x7b   : > { %397 = vst [vmem:[%s3983_s12 + $0x318] sm:$0xff] %v396_v35  ;;  %v524_v35 = vld [vmem:[%s3978_s11 + $0xa18] sm:$0xff] }
  0x7c   : > { %399 = vst [vmem:[%s3983_s12 + $0x320] sm:$0xff] %v398_v36  ;;  %v526_v36 = vld [vmem:[%s3978_s11 + $0xa20] sm:$0xff] }
  0x7d   : > { %401 = vst [vmem:[%s3983_s12 + $0x328] sm:$0xff] %v400_v37  ;;  %v528_v37 = vld [vmem:[%s3978_s11 + $0xa28] sm:$0xff] }
  0x7e   : > { %403 = vst [vmem:[%s3983_s12 + $0x330] sm:$0xff] %v402_v38  ;;  %v530_v38 = vld [vmem:[%s3978_s11 + $0xa30] sm:$0xff] }
  0x7f   : > { %405 = vst [vmem:[%s3983_s12 + $0x338] sm:$0xff] %v404_v39  ;;  %v532_v39 = vld [vmem:[%s3978_s11 + $0xa38] sm:$0xff] }
  0x80   : > { %407 = vst [vmem:[%s3983_s12 + $0x340] sm:$0xff] %v406_v40  ;;  %v534_v40 = vld [vmem:[%s3978_s11 + $0xa80] sm:$0xff] }
  0x81   : > { %409 = vst [vmem:[%s3983_s12 + $0x348] sm:$0xff] %v408_v41  ;;  %v536_v41 = vld [vmem:[%s3978_s11 + $0xa88] sm:$0xff] }
  0x82   : > { %411 = vst [vmem:[%s3983_s12 + $0x350] sm:$0xff] %v410_v42  ;;  %v538_v42 = vld [vmem:[%s3978_s11 + $0xa90] sm:$0xff] }
  0x83   : > { %413 = vst [vmem:[%s3983_s12 + $0x358] sm:$0xff] %v412_v43  ;;  %v540_v43 = vld [vmem:[%s3978_s11 + $0xa98] sm:$0xff] }
  0x84   : > { %415 = vst [vmem:[%s3983_s12 + $0x360] sm:$0xff] %v414_v44  ;;  %v542_v44 = vld [vmem:[%s3978_s11 + $0xaa0] sm:$0xff] }
  0x85   : > { %417 = vst [vmem:[%s3983_s12 + $0x368] sm:$0xff] %v416_v45  ;;  %v544_v45 = vld [vmem:[%s3978_s11 + $0xaa8] sm:$0xff] }
  0x86   : > { %419 = vst [vmem:[%s3983_s12 + $0x370] sm:$0xff] %v418_v46  ;;  %v546_v46 = vld [vmem:[%s3978_s11 + $0xab0] sm:$0xff] }
  0x87   : > { %421 = vst [vmem:[%s3983_s12 + $0x378] sm:$0xff] %v420_v47  ;;  %v548_v47 = vld [vmem:[%s3978_s11 + $0xab8] sm:$0xff] }
  0x88   : > { %423 = vst [vmem:[%s3983_s12 + $0x380] sm:$0xff] %v422_v48  ;;  %v550_v48 = vld [vmem:[%s3978_s11 + $0xb00] sm:$0xff] }
  0x89   : > { %425 = vst [vmem:[%s3983_s12 + $0x388] sm:$0xff] %v424_v49  ;;  %v552_v49 = vld [vmem:[%s3978_s11 + $0xb08] sm:$0xff] }
  0x8a   : > { %427 = vst [vmem:[%s3983_s12 + $0x390] sm:$0xff] %v426_v50  ;;  %v554_v50 = vld [vmem:[%s3978_s11 + $0xb10] sm:$0xff] }
  0x8b   : > { %429 = vst [vmem:[%s3983_s12 + $0x398] sm:$0xff] %v428_v51  ;;  %v556_v51 = vld [vmem:[%s3978_s11 + $0xb18] sm:$0xff] }
  0x8c   : > { %431 = vst [vmem:[%s3983_s12 + $0x3a0] sm:$0xff] %v430_v52  ;;  %v558_v52 = vld [vmem:[%s3978_s11 + $0xb20] sm:$0xff] }
  0x8d   : > { %433 = vst [vmem:[%s3983_s12 + $0x3a8] sm:$0xff] %v432_v53  ;;  %v560_v53 = vld [vmem:[%s3978_s11 + $0xb28] sm:$0xff] }
  0x8e   : > { %435 = vst [vmem:[%s3983_s12 + $0x3b0] sm:$0xff] %v434_v54  ;;  %v562_v54 = vld [vmem:[%s3978_s11 + $0xb30] sm:$0xff] }
  0x8f   : > { %437 = vst [vmem:[%s3983_s12 + $0x3b8] sm:$0xff] %v436_v55  ;;  %v564_v55 = vld [vmem:[%s3978_s11 + $0xb38] sm:$0xff] }
  0x90   : > { %439 = vst [vmem:[%s3983_s12 + $0x3c0] sm:$0xff] %v438_v56  ;;  %v566_v56 = vld [vmem:[%s3978_s11 + $0xb80] sm:$0xff] }
  0x91   : > { %441 = vst [vmem:[%s3983_s12 + $0x3c8] sm:$0xff] %v440_v57  ;;  %v568_v57 = vld [vmem:[%s3978_s11 + $0xb88] sm:$0xff] }
  0x92   : > { %443 = vst [vmem:[%s3983_s12 + $0x3d0] sm:$0xff] %v442_v58  ;;  %v570_v58 = vld [vmem:[%s3978_s11 + $0xb90] sm:$0xff] }
  0x93   : > { %445 = vst [vmem:[%s3983_s12 + $0x3d8] sm:$0xff] %v444_v59  ;;  %v572_v59 = vld [vmem:[%s3978_s11 + $0xb98] sm:$0xff] }
  0x94   : > { %447 = vst [vmem:[%s3983_s12 + $0x3e0] sm:$0xff] %v446_v60  ;;  %v574_v60 = vld [vmem:[%s3978_s11 + $0xba0] sm:$0xff] }
  0x95   : > { %449 = vst [vmem:[%s3983_s12 + $0x3e8] sm:$0xff] %v448_v61  ;;  %v576_v61 = vld [vmem:[%s3978_s11 + $0xba8] sm:$0xff] }
  0x96   : > { %451 = vst [vmem:[%s3983_s12 + $0x3f0] sm:$0xff] %v450_v62  ;;  %v578_v62 = vld [vmem:[%s3978_s11 + $0xbb0] sm:$0xff] }
  0x97   : > { %453 = vst [vmem:[%s3983_s12 + $0x3f8] sm:$0xff] %v452_v63  ;;  %v580_v63 = vld [vmem:[%s3978_s11 + $0xbb8] sm:$0xff] }
  0x98   : > { %455 = vst [vmem:[%s3983_s12 + $0x400] sm:$0xff] %v454_v0  ;;  %v582_v0 = vld [vmem:[%s3978_s11 + $0xc00] sm:$0xff] }
  0x99   : > { %457 = vst [vmem:[%s3983_s12 + $0x408] sm:$0xff] %v456_v1  ;;  %v584_v1 = vld [vmem:[%s3978_s11 + $0xc08] sm:$0xff] }
  0x9a   : > { %459 = vst [vmem:[%s3983_s12 + $0x410] sm:$0xff] %v458_v2  ;;  %v586_v2 = vld [vmem:[%s3978_s11 + $0xc10] sm:$0xff] }
  0x9b   : > { %461 = vst [vmem:[%s3983_s12 + $0x418] sm:$0xff] %v460_v3  ;;  %v588_v3 = vld [vmem:[%s3978_s11 + $0xc18] sm:$0xff] }
  0x9c   : > { %463 = vst [vmem:[%s3983_s12 + $0x420] sm:$0xff] %v462_v4  ;;  %v590_v4 = vld [vmem:[%s3978_s11 + $0xc20] sm:$0xff] }
  0x9d   : > { %465 = vst [vmem:[%s3983_s12 + $0x428] sm:$0xff] %v464_v5  ;;  %v592_v5 = vld [vmem:[%s3978_s11 + $0xc28] sm:$0xff] }
  0x9e   : > { %467 = vst [vmem:[%s3983_s12 + $0x430] sm:$0xff] %v466_v6  ;;  %v594_v6 = vld [vmem:[%s3978_s11 + $0xc30] sm:$0xff] }
  0x9f   : > { %469 = vst [vmem:[%s3983_s12 + $0x438] sm:$0xff] %v468_v7  ;;  %v596_v7 = vld [vmem:[%s3978_s11 + $0xc38] sm:$0xff] }
  0xa0   : > { %471 = vst [vmem:[%s3983_s12 + $0x440] sm:$0xff] %v470_v8  ;;  %v598_v8 = vld [vmem:[%s3978_s11 + $0xc80] sm:$0xff] }
  0xa1   : > { %473 = vst [vmem:[%s3983_s12 + $0x448] sm:$0xff] %v472_v9  ;;  %v600_v9 = vld [vmem:[%s3978_s11 + $0xc88] sm:$0xff] }
  0xa2   : > { %475 = vst [vmem:[%s3983_s12 + $0x450] sm:$0xff] %v474_v10  ;;  %v602_v10 = vld [vmem:[%s3978_s11 + $0xc90] sm:$0xff] }
  0xa3   : > { %477 = vst [vmem:[%s3983_s12 + $0x458] sm:$0xff] %v476_v11  ;;  %v604_v11 = vld [vmem:[%s3978_s11 + $0xc98] sm:$0xff] }
  0xa4   : > { %479 = vst [vmem:[%s3983_s12 + $0x460] sm:$0xff] %v478_v12  ;;  %v606_v12 = vld [vmem:[%s3978_s11 + $0xca0] sm:$0xff] }
  0xa5   : > { %481 = vst [vmem:[%s3983_s12 + $0x468] sm:$0xff] %v480_v13  ;;  %v608_v13 = vld [vmem:[%s3978_s11 + $0xca8] sm:$0xff] }
  0xa6   : > { %483 = vst [vmem:[%s3983_s12 + $0x470] sm:$0xff] %v482_v14  ;;  %v610_v14 = vld [vmem:[%s3978_s11 + $0xcb0] sm:$0xff] }
  0xa7   : > { %485 = vst [vmem:[%s3983_s12 + $0x478] sm:$0xff] %v484_v15  ;;  %v612_v15 = vld [vmem:[%s3978_s11 + $0xcb8] sm:$0xff] }
  0xa8   : > { %487 = vst [vmem:[%s3983_s12 + $0x480] sm:$0xff] %v486_v16  ;;  %v614_v16 = vld [vmem:[%s3978_s11 + $0xd00] sm:$0xff] }
  0xa9   : > { %489 = vst [vmem:[%s3983_s12 + $0x488] sm:$0xff] %v488_v17  ;;  %v616_v17 = vld [vmem:[%s3978_s11 + $0xd08] sm:$0xff] }
  0xaa   : > { %491 = vst [vmem:[%s3983_s12 + $0x490] sm:$0xff] %v490_v18  ;;  %v618_v18 = vld [vmem:[%s3978_s11 + $0xd10] sm:$0xff] }
  0xab   : > { %493 = vst [vmem:[%s3983_s12 + $0x498] sm:$0xff] %v492_v19  ;;  %v620_v19 = vld [vmem:[%s3978_s11 + $0xd18] sm:$0xff] }
  0xac   : > { %495 = vst [vmem:[%s3983_s12 + $0x4a0] sm:$0xff] %v494_v20  ;;  %v622_v20 = vld [vmem:[%s3978_s11 + $0xd20] sm:$0xff] }
  0xad   : > { %497 = vst [vmem:[%s3983_s12 + $0x4a8] sm:$0xff] %v496_v21  ;;  %v624_v21 = vld [vmem:[%s3978_s11 + $0xd28] sm:$0xff] }
  0xae   : > { %499 = vst [vmem:[%s3983_s12 + $0x4b0] sm:$0xff] %v498_v22  ;;  %v626_v22 = vld [vmem:[%s3978_s11 + $0xd30] sm:$0xff] }
  0xaf   : > { %501 = vst [vmem:[%s3983_s12 + $0x4b8] sm:$0xff] %v500_v23  ;;  %v628_v23 = vld [vmem:[%s3978_s11 + $0xd38] sm:$0xff] }
  0xb0   : > { %503 = vst [vmem:[%s3983_s12 + $0x4c0] sm:$0xff] %v502_v24 }
  0xb1   : > { %505 = vst [vmem:[%s3983_s12 + $0x4c8] sm:$0xff] %v504_v25 }
  0xb2   : > { %507 = vst [vmem:[%s3983_s12 + $0x4d0] sm:$0xff] %v506_v26 }
  0xb3   : > { %509 = vst [vmem:[%s3983_s12 + $0x4d8] sm:$0xff] %v508_v27 }
  0xb4   : > { %511 = vst [vmem:[%s3983_s12 + $0x4e0] sm:$0xff] %v510_v28 }
  0xb5   : > { %513 = vst [vmem:[%s3983_s12 + $0x4e8] sm:$0xff] %v512_v29 }
  0xb6   : > { %515 = vst [vmem:[%s3983_s12 + $0x4f0] sm:$0xff] %v514_v30 }
  0xb7   : > { %517 = vst [vmem:[%s3983_s12 + $0x4f8] sm:$0xff] %v516_v31 }
  0xb8   : > { %519 = vst [vmem:[%s3983_s12 + $0x500] sm:$0xff] %v518_v32 }
  0xb9   : > { %521 = vst [vmem:[%s3983_s12 + $0x508] sm:$0xff] %v520_v33 }
  0xba   : > { %523 = vst [vmem:[%s3983_s12 + $0x510] sm:$0xff] %v522_v34 }
  0xbb   : > { %525 = vst [vmem:[%s3983_s12 + $0x518] sm:$0xff] %v524_v35 }
  0xbc   : > { %527 = vst [vmem:[%s3983_s12 + $0x520] sm:$0xff] %v526_v36 }
  0xbd   : > { %529 = vst [vmem:[%s3983_s12 + $0x528] sm:$0xff] %v528_v37 }
  0xbe   : > { %531 = vst [vmem:[%s3983_s12 + $0x530] sm:$0xff] %v530_v38 }
  0xbf   : > { %533 = vst [vmem:[%s3983_s12 + $0x538] sm:$0xff] %v532_v39 }
  0xc0   : > { %535 = vst [vmem:[%s3983_s12 + $0x540] sm:$0xff] %v534_v40 }
  0xc1   : > { %537 = vst [vmem:[%s3983_s12 + $0x548] sm:$0xff] %v536_v41 }
  0xc2   : > { %539 = vst [vmem:[%s3983_s12 + $0x550] sm:$0xff] %v538_v42 }
  0xc3   : > { %541 = vst [vmem:[%s3983_s12 + $0x558] sm:$0xff] %v540_v43 }
  0xc4   : > { %543 = vst [vmem:[%s3983_s12 + $0x560] sm:$0xff] %v542_v44 }
  0xc5   : > { %545 = vst [vmem:[%s3983_s12 + $0x568] sm:$0xff] %v544_v45 }
  0xc6   : > { %547 = vst [vmem:[%s3983_s12 + $0x570] sm:$0xff] %v546_v46 }
  0xc7   : > { %549 = vst [vmem:[%s3983_s12 + $0x578] sm:$0xff] %v548_v47 }
  0xc8   : > { %551 = vst [vmem:[%s3983_s12 + $0x580] sm:$0xff] %v550_v48 }
  0xc9   : > { %553 = vst [vmem:[%s3983_s12 + $0x588] sm:$0xff] %v552_v49 }
  0xca   : > { %555 = vst [vmem:[%s3983_s12 + $0x590] sm:$0xff] %v554_v50 }
  0xcb   : > { %557 = vst [vmem:[%s3983_s12 + $0x598] sm:$0xff] %v556_v51 }
  0xcc   : > { %559 = vst [vmem:[%s3983_s12 + $0x5a0] sm:$0xff] %v558_v52 }
  0xcd   : > { %561 = vst [vmem:[%s3983_s12 + $0x5a8] sm:$0xff] %v560_v53 }
  0xce   : > { %563 = vst [vmem:[%s3983_s12 + $0x5b0] sm:$0xff] %v562_v54 }
  0xcf   : > { %565 = vst [vmem:[%s3983_s12 + $0x5b8] sm:$0xff] %v564_v55 }
  0xd0   : > { %567 = vst [vmem:[%s3983_s12 + $0x5c0] sm:$0xff] %v566_v56 }
  0xd1   : > { %569 = vst [vmem:[%s3983_s12 + $0x5c8] sm:$0xff] %v568_v57 }
  0xd2   : > { %571 = vst [vmem:[%s3983_s12 + $0x5d0] sm:$0xff] %v570_v58 }
  0xd3   : > { %573 = vst [vmem:[%s3983_s12 + $0x5d8] sm:$0xff] %v572_v59 }
  0xd4   : > { %575 = vst [vmem:[%s3983_s12 + $0x5e0] sm:$0xff] %v574_v60 }
  0xd5   : > { %577 = vst [vmem:[%s3983_s12 + $0x5e8] sm:$0xff] %v576_v61 }
  0xd6   : > { %579 = vst [vmem:[%s3983_s12 + $0x5f0] sm:$0xff] %v578_v62 }
  0xd7   : > { %581 = vst [vmem:[%s3983_s12 + $0x5f8] sm:$0xff] %v580_v63 }
  0xd8   : > { %583 = vst [vmem:[%s3983_s12 + $0x600] sm:$0xff] %v582_v0 }
  0xd9   : > { %585 = vst [vmem:[%s3983_s12 + $0x608] sm:$0xff] %v584_v1 }
  0xda   : > { %587 = vst [vmem:[%s3983_s12 + $0x610] sm:$0xff] %v586_v2 }
  0xdb   : > { %589 = vst [vmem:[%s3983_s12 + $0x618] sm:$0xff] %v588_v3 }
  0xdc   : > { %591 = vst [vmem:[%s3983_s12 + $0x620] sm:$0xff] %v590_v4 }
  0xdd   : > { %593 = vst [vmem:[%s3983_s12 + $0x628] sm:$0xff] %v592_v5 }
  0xde   : > { %595 = vst [vmem:[%s3983_s12 + $0x630] sm:$0xff] %v594_v6 }
  0xdf   : > { %597 = vst [vmem:[%s3983_s12 + $0x638] sm:$0xff] %v596_v7 }
  0xe0   : > { %599 = vst [vmem:[%s3983_s12 + $0x640] sm:$0xff] %v598_v8 }
  0xe1   : > { %601 = vst [vmem:[%s3983_s12 + $0x648] sm:$0xff] %v600_v9 }
  0xe2   : > { %603 = vst [vmem:[%s3983_s12 + $0x650] sm:$0xff] %v602_v10 }
  0xe3   : > { %605 = vst [vmem:[%s3983_s12 + $0x658] sm:$0xff] %v604_v11 }
  0xe4   : > { %607 = vst [vmem:[%s3983_s12 + $0x660] sm:$0xff] %v606_v12 }
  0xe5   : > { %609 = vst [vmem:[%s3983_s12 + $0x668] sm:$0xff] %v608_v13 }
  0xe6   : > { %611 = vst [vmem:[%s3983_s12 + $0x670] sm:$0xff] %v610_v14 }
  0xe7   : > { %613 = vst [vmem:[%s3983_s12 + $0x678] sm:$0xff] %v612_v15 }
  0xe8   : > { %615 = vst [vmem:[%s3983_s12 + $0x680] sm:$0xff] %v614_v16 }
  0xe9   : > { %617 = vst [vmem:[%s3983_s12 + $0x688] sm:$0xff] %v616_v17 }
  0xea   : > { %619 = vst [vmem:[%s3983_s12 + $0x690] sm:$0xff] %v618_v18 }
  0xeb   : > { %621 = vst [vmem:[%s3983_s12 + $0x698] sm:$0xff] %v620_v19 }
  0xec   : > { %623 = vst [vmem:[%s3983_s12 + $0x6a0] sm:$0xff] %v622_v20 }
  0xed   : > { %625 = vst [vmem:[%s3983_s12 + $0x6a8] sm:$0xff] %v624_v21 }
  0xee   : > { %627 = vst [vmem:[%s3983_s12 + $0x6b0] sm:$0xff] %v626_v22 }
  0xef   : > { %629 = vst [vmem:[%s3983_s12 + $0x6b8] sm:$0xff] %v628_v23 }
  0xf0 PF: > { %p2711_p7 = scmp.ge.s32.totalorder %s3890_s21, 1  ;;  %p634_p8 = scmp.lt.s32.totalorder %s3890_s21, 5 }
  0xf2   : > { %p635_p9 = pnand %p2711_p7, %p634_p8 }
  0xf3   : > { %s641_s13 = sand.u32 (!%p635_p9), 1, %s3866_s15   ;;  %p680_p10 = scmp.lt.s32.totalorder (!%p635_p9), %s3878_s18, 1 }
  0xf4   : > { %638 = sbr.rel (%p635_p9) target bundleno = 779 (0x30b), region = 47  ;;  %s2712_s8 = sshll.u32 (!%p635_p9), %s3874_s17, 4 }
  0xf5   : > { %s3778_s14 = smul.u32 (!%p635_p9), 1728, %s641_s13  ;;  %p4813_p11 = scmp.lt.s32.totalorder (!%p635_p9), %s2712_s8, 31 }
  0xf6   : > { %p3565_p12 = scmp.ne.s32.totalorder (!%p635_p9), %s3874_s17, 0 }
  0xf7   : > { %s4417_s24 = scalar_lea.vmem (!%p635_p9), [#allocation2], %s3778_s14 }
  0xf9   : > { %v3167_v24 = vld [vmem:[%s4417_s24 + $0x380] sm:$0xf]  ;;  %v3680_v26 = vld [vmem:[%s4417_s24 + $0x384] sm:$0xf]  ;;  %vm2005_vm0 = vcmask 1043456   ;;  %v908_v23 = vld [vmem:[%s4417_s24 + $0x688] sm:$0xff] }
  0xfa   : > { %v3688_v25 = vld [vmem:[%s4417_s24 + $0x3bc] sm:$0xf0]  ;;  %v3169_v28 = vld [vmem:[%s4417_s24 + $0x3c0] sm:$0xf0]  ;;  %vm2001_vm1 = vcmask 719872   ;;  %s5086_s18 = smov (!%p680_p10, %s3878_s18), 1 }
  0xfb   : > { %v3168_v27 = vor.u32 %v3688_v25, %v3167_v24  ;;  %v907_v29 = vld [vmem:[%s4417_s24 + $0x680] sm:$0xff]  ;;  %v3172_v31 = vor.u32 %v3680_v26, %v3169_v28  ;;  %v1555_v24 = vunpack.c.l.b16 %v908_v23  ;;  %s2715_s26 = sshll.u32 %s5086_s18, 3  ;;  %s5088_s8 = smov (!%p4813_p11, %s2712_s8), 31 }
  0xfc   : > { %v3103_v30 = vld [vmem:[%s4417_s24 + $0x300] sm:$0xf]  ;;  %v1553_v32 = vunpack.c.l.b16 %v907_v29  ;;  %v1554_v33 = vunpack.c.h.b16 %v907_v29  ;;  %v3664_v35 = vld [vmem:[%s4417_s24 + $0x304] sm:$0xf]  ;;  %s4614_s30 = scalar_lea.vmem %s5070_s3, %s2715_s26  ;;  %s4622_s7 = scalar_lea.vmem %s5071_s4, %s2715_s26 }
  0xfd   : > { %v3672_v34 = vld [vmem:[%s4417_s24 + $0x33c] sm:$0xf0]  ;;  %v3105_v36 = vld [vmem:[%s4417_s24 + $0x340] sm:$0xf0]  ;;  %2054 = vmatpush.bf16.msra.mxu0 %v3168_v27  ;;  %2080 = vmatpush.bf16.msra.mxu2 %v3172_v31  ;;  %s2713_s10 = sshll.u32 %s5086_s18, 5 }
  0xfe   : > { %v3487_v37 = vld [vmem:[%s4417_s24 + $0x600] sm:$0xf]  ;;  %v1777_v39 = vpack.c.b16 %v1553_v32, %v1553_v32  ;;  %v1778_v40 = vpack.c.b16 %v1554_v33, %v1554_v33  ;;  %v3104_v41 = vor.u32 %v3672_v34, %v3103_v30  ;;  %v3108_v42 = vor.u32 %v3664_v35, %v3105_v36  ;;  %v3760_v43 = vld [vmem:[%s4417_s24 + $0x604] sm:$0xf]  ;;  %s4845_s18 = sadd.s32 %s2713_s10, %s5088_s8 }
  0xff   : > { %v3768_v38 = vld [vmem:[%s4417_s24 + $0x63c] sm:$0xf0]  ;;  %v3489_v44 = vld [vmem:[%s4417_s24 + $0x640] sm:$0xf0]  ;;  %s2714_s11 = sshll.u32 %s4845_s18, 2 }
 0x100   : > { %v3039_v45 = vld [vmem:[%s4417_s24 + $0x280] sm:$0xf]  ;;  %v3648_v47 = vld [vmem:[%s4417_s24 + $0x284] sm:$0xf]  ;;  %v2007_v49 = vsel %vm2005_vm0, %v1777_v39, 0  ;;  %v2010_v50 = vsel %vm2005_vm0, %v1778_v40, 0  ;;  %v3488_v51 = vor.u32 %v3768_v38, %v3487_v37  ;;  %v3492_v52 = vor.u32 %v3760_v43, %v3489_v44  ;;  %s4873_s14 = scalar_lea.vmem %s5069_s2, %s2714_s11 }
 0x101   : > { %v3656_v46 = vld [vmem:[%s4417_s24 + $0x2bc] sm:$0xf0]  ;;  %v3041_v48 = vld [vmem:[%s4417_s24 + $0x2c0] sm:$0xf0]  ;;  %2069 = vmatpush.bf16.msra.mxu1 %v2007_v49  ;;  %2095 = vmatpush.bf16.msra.mxu3 %v2010_v50  ;;  %v3175_v37 = vld [vmem:[%s4417_s24 + $0x388] sm:$0xf]  ;;  %v1779_v39 = vpack.c.b16 %v1555_v24, %v1555_v24  ;;  %v1556_v40 = vunpack.c.h.b16 %v908_v23 }
 0x102   : > { %v3423_v53 = vld [vmem:[%s4417_s24 + $0x580] sm:$0xf]  ;;  %2055 = vmatpush.bf16.msra.mxu0 %v3104_v41  ;;  %2081 = vmatpush.bf16.msra.mxu2 %v3108_v42  ;;  %v3040_v55 = vor.u32 %v3656_v46, %v3039_v45  ;;  %v3044_v56 = vor.u32 %v3648_v47, %v3041_v48  ;;  %v3744_v57 = vld [vmem:[%s4417_s24 + $0x584] sm:$0xf]  ;;  %v3689_v38 = vld [vmem:[%s4417_s24 + $0x3c4] sm:$0xf0] }
 0x103   : > { %v3752_v54 = vld [vmem:[%s4417_s24 + $0x5bc] sm:$0xf0]  ;;  %v3425_v58 = vld [vmem:[%s4417_s24 + $0x5c0] sm:$0xf0]  ;;  %v3176_v48 = vor.u32 %v3689_v38, %v3175_v37  ;;  %v3111_v50 = vld [vmem:[%s4417_s24 + $0x308] sm:$0xf] }
 0x104   : > { %v2975_v59 = vld [vmem:[%s4417_s24 + $0x200] sm:$0xf]  ;;  %v3632_v61 = vld [vmem:[%s4417_s24 + $0x204] sm:$0xf]  ;;  %v3424_v63 = vor.u32 %v3752_v54, %v3423_v53  ;;  %v3428_v0 = vor.u32 %v3744_v57, %v3425_v58  ;;  %v3495_v53 = vld [vmem:[%s4417_s24 + $0x608] sm:$0xf] }
 0x105   : > { %v3640_v60 = vld [vmem:[%s4417_s24 + $0x23c] sm:$0xf0]  ;;  %v2977_v62 = vld [vmem:[%s4417_s24 + $0x240] sm:$0xf0]  ;;  %2070 = vmatpush.bf16.msra.mxu1 %v3488_v51  ;;  %2096 = vmatpush.bf16.msra.mxu3 %v3492_v52  ;;  %v3673_v51 = vld [vmem:[%s4417_s24 + $0x344] sm:$0xf0] }
 0x106   : > { %v3359_v1 = vld [vmem:[%s4417_s24 + $0x500] sm:$0xf]  ;;  %2056 = vmatpush.bf16.msra.mxu0 %v3040_v55  ;;  %2082 = vmatpush.bf16.msra.mxu2 %v3044_v56  ;;  %v2976_v3 = vor.u32 %v3640_v60, %v2975_v59  ;;  %v2980_v4 = vor.u32 %v3632_v61, %v2977_v62  ;;  %v3728_v5 = vld [vmem:[%s4417_s24 + $0x504] sm:$0xf]  ;;  %v2013_v52 = vsel %vm2005_vm0, %v1779_v39, 0  ;;  %v1780_v55 = vpack.c.b16 %v1556_v40, %v1556_v40 }
 0x107   : > { %v3736_v2 = vld [vmem:[%s4417_s24 + $0x53c] sm:$0xf0]  ;;  %v3361_v6 = vld [vmem:[%s4417_s24 + $0x540] sm:$0xf0]  ;;  %v3769_v54 = vld [vmem:[%s4417_s24 + $0x644] sm:$0xf0]  ;;  %v3112_v61 = vor.u32 %v3673_v51, %v3111_v50 }
 0x108   : > { %v2911_v7 = vld [vmem:[%s4417_s24 + $0x180] sm:$0xf]  ;;  %v3616_v9 = vld [vmem:[%s4417_s24 + $0x184] sm:$0xf]  ;;  %v3360_v11 = vor.u32 %v3736_v2, %v3359_v1  ;;  %v3364_v12 = vor.u32 %v3728_v5, %v3361_v6  ;;  %v3681_v56 = vld [vmem:[%s4417_s24 + $0x38c] sm:$0xf]  ;;  %v3496_v62 = vor.u32 %v3769_v54, %v3495_v53 }
 0x109   : > { %v3624_v8 = vld [vmem:[%s4417_s24 + $0x1bc] sm:$0xf0]  ;;  %v2913_v10 = vld [vmem:[%s4417_s24 + $0x1c0] sm:$0xf0]  ;;  %2071 = vmatpush.bf16.msra.mxu1 %v3424_v63  ;;  %2097 = vmatpush.bf16.msra.mxu3 %v3428_v0  ;;  %v3177_v57 = vld [vmem:[%s4417_s24 + $0x3c8] sm:$0xf0] }
 0x10a   : > { %v3295_v13 = vld [vmem:[%s4417_s24 + $0x480] sm:$0xf]  ;;  %v3712_v15 = vld [vmem:[%s4417_s24 + $0x484] sm:$0xf]  ;;  %2057 = vmatpush.bf16.msra.mxu0 %v2976_v3  ;;  %2083 = vmatpush.bf16.msra.mxu2 %v2980_v4  ;;  %v2912_v16 = vor.u32 %v3624_v8, %v2911_v7  ;;  %v2916_v17 = vor.u32 %v3616_v9, %v2913_v10  ;;  %v3047_v60 = vld [vmem:[%s4417_s24 + $0x288] sm:$0xf]  ;;  %v3180_v2 = vor.u32 %v3681_v56, %v3177_v57 }
 0x10b   : > { %v3720_v14 = vld [vmem:[%s4417_s24 + $0x4bc] sm:$0xf0]  ;;  %v3297_v18 = vld [vmem:[%s4417_s24 + $0x4c0] sm:$0xf0]  ;;  %v3657_v63 = vld [vmem:[%s4417_s24 + $0x2c4] sm:$0xf0] }
 0x10c   : > { %v2847_v19 = vld [vmem:[%s4417_s24 + $0x100] sm:$0xf]  ;;  %v3600_v21 = vld [vmem:[%s4417_s24 + $0x104] sm:$0xf]  ;;  %v3296_v25 = vor.u32 %v3720_v14, %v3295_v13  ;;  %v3300_v26 = vor.u32 %v3712_v15, %v3297_v18  ;;  %v3431_v0 = vld [vmem:[%s4417_s24 + $0x588] sm:$0xf]  ;;  %v3048_v13 = vor.u32 %v3657_v63, %v3047_v60 }
 0x10d   : > { %v3608_v20 = vld [vmem:[%s4417_s24 + $0x13c] sm:$0xf0]  ;;  %v2849_v22 = vld [vmem:[%s4417_s24 + $0x140] sm:$0xf0]  ;;  %2072 = vmatpush.bf16.msra.mxu1 %v3360_v11  ;;  %2098 = vmatpush.bf16.msra.mxu3 %v3364_v12  ;;  %v2016_v3 = vsel %vm2005_vm0, %v1780_v55, 0  ;;  %v909_v51 = vld [vmem:[%s4417_s24 + $0x690] sm:$0xff] }
 0x10e   : > { %v3231_v27 = vld [vmem:[%s4417_s24 + $0x400] sm:$0xf]  ;;  %2058 = vmatpush.bf16.msra.mxu0 %v2912_v16  ;;  %2084 = vmatpush.bf16.msra.mxu2 %v2916_v17  ;;  %v2848_v29 = vor.u32 %v3608_v20, %v2847_v19  ;;  %v2852_v30 = vor.u32 %v3600_v21, %v2849_v22  ;;  %v3696_v31 = vld [vmem:[%s4417_s24 + $0x404] sm:$0xf]  ;;  %v3753_v4 = vld [vmem:[%s4417_s24 + $0x5c4] sm:$0xf0] }
 0x10f   : > { %v3704_v28 = vld [vmem:[%s4417_s24 + $0x43c] sm:$0xf0]  ;;  %v3233_v32 = vld [vmem:[%s4417_s24 + $0x440] sm:$0xf0]  ;;  %v3665_v5 = vld [vmem:[%s4417_s24 + $0x30c] sm:$0xf]  ;;  %v3432_v14 = vor.u32 %v3753_v4, %v3431_v0  ;;  %v1557_v0 = vunpack.c.l.b16 %v909_v51 }
 0x110   : > { %v2783_v33 = vld [vmem:[%s4417_s24 + $0x80] sm:$0xf]  ;;  %v3584_v35 = vld [vmem:[%s4417_s24 + $0x84] sm:$0xf]  ;;  %v3232_v41 = vor.u32 %v3704_v28, %v3231_v27  ;;  %v3236_v42 = vor.u32 %v3696_v31, %v3233_v32  ;;  %v3113_v8 = vld [vmem:[%s4417_s24 + $0x348] sm:$0xf0] }
 0x111   : > { %v3592_v34 = vld [vmem:[%s4417_s24 + $0xbc] sm:$0xf0]  ;;  %v2785_v36 = vld [vmem:[%s4417_s24 + $0xc0] sm:$0xf0]  ;;  %2073 = vmatpush.bf16.msra.mxu1 %v3296_v25  ;;  %2099 = vmatpush.bf16.msra.mxu3 %v3300_v26  ;;  %v3761_v9 = vld [vmem:[%s4417_s24 + $0x60c] sm:$0xf]  ;;  %v3116_v17 = vor.u32 %v3665_v5, %v3113_v8 }
 0x112   : > { %2059 = vmatpush.bf16.msra.mxu0 %v2848_v29  ;;  %2085 = vmatpush.bf16.msra.mxu2 %v2852_v30  ;;  %v2784_v43 = vor.u32 %v3592_v34, %v2783_v33  ;;  %v2788_v44 = vor.u32 %v3584_v35, %v2785_v36  ;;  %v2719_v45 = vld [vmem:[%s4417_s24] sm:$0xf]  ;;  %v3568_v47 = vld [vmem:[%s4417_s24 + $0x4] sm:$0xf]  ;;  %v3497_v10 = vld [vmem:[%s4417_s24 + $0x648] sm:$0xf0] }
 0x113   : > { %v3576_v46 = vld [vmem:[%s4417_s24 + $0x3c] sm:$0xf0]  ;;  %v2721_v49 = vld [vmem:[%s4417_s24 + $0x40] sm:$0xf0]  ;;  %v2983_v15 = vld [vmem:[%s4417_s24 + $0x208] sm:$0xf]  ;;  %v3500_v18 = vor.u32 %v3761_v9, %v3497_v10 }
 0x114   : > { %v2720_v58 = vor.u32 %v3576_v46, %v2719_v45  ;;  %v2724_v59 = vor.u32 %v3568_v47, %v2721_v49  ;;  %v698_v1 = vld [vmem:[%s5068_s1] sm:$0xff]  ;;  %v3641_v16 = vld [vmem:[%s4417_s24 + $0x244] sm:$0xf0]  ;;  %v3649_v21 = vld [vmem:[%s4417_s24 + $0x28c] sm:$0xf] }
 0x115   : > { %2074 = vmatpush.bf16.msra.mxu1 %v3232_v41  ;;  %2100 = vmatpush.bf16.msra.mxu3 %v3236_v42  ;;  %v916_v6 = vunpack.c.l.b16 %v698_v1  ;;  %v917_v7 = vunpack.c.h.b16 %v698_v1  ;;  %v3367_v19 = vld [vmem:[%s4417_s24 + $0x508] sm:$0xf]  ;;  %v3049_v22 = vld [vmem:[%s4417_s24 + $0x2c8] sm:$0xf0]  ;;  %v2984_v25 = vor.u32 %v3641_v16, %v2983_v15  ;;  %v3183_v49 = vld [vmem:[%s4417_s24 + $0x390] sm:$0xf]  ;;  %v1781_v16 = vpack.c.b16 %v1557_v0, %v1557_v0 }
 0x116   : > { %2060 = vmatpush.bf16.msra.mxu0 %v2784_v43  ;;  %2086 = vmatpush.bf16.msra.mxu2 %v2788_v44  ;;  %v3737_v20 = vld [vmem:[%s4417_s24 + $0x544] sm:$0xf0]  ;;  %v3745_v23 = vld [vmem:[%s4417_s24 + $0x58c] sm:$0xf]  ;;  %v3052_v29 = vor.u32 %v3649_v21, %v3049_v22  ;;  %v3690_v50 = vld [vmem:[%s4417_s24 + $0x3cc] sm:$0xf0]  ;;  %v1558_v21 = vunpack.c.h.b16 %v909_v51 }
 0x117   : > { %v4496_v11 = vpack.c.b16 %v916_v6, %v916_v6  ;;  %v4498_v12 = vpack.c.b16 %v917_v7, %v917_v7  ;;  %v3433_v24 = vld [vmem:[%s4417_s24 + $0x5c8] sm:$0xf0]  ;;  %v3368_v26 = vor.u32 %v3737_v20, %v3367_v19  ;;  %v2919_v27 = vld [vmem:[%s4417_s24 + $0x188] sm:$0xf]  ;;  %v3184_v60 = vor.u32 %v3690_v50, %v3183_v49  ;;  %v3119_v63 = vld [vmem:[%s4417_s24 + $0x310] sm:$0xf] }
 0x118   : > { %v3625_v28 = vld [vmem:[%s4417_s24 + $0x1c4] sm:$0xf0]  ;;  %v3436_v30 = vor.u32 %v3745_v23, %v3433_v24  ;;  %v3633_v33 = vld [vmem:[%s4417_s24 + $0x20c] sm:$0xf]  ;;  %v3674_v1 = vld [vmem:[%s4417_s24 + $0x34c] sm:$0xf0] }
 0x119   : > { %2106 = vmatpush.bf16.msrb.mxu1 %v3176_v48  ;;  %2121 = vmatpush.bf16.msrb.mxu3 %v2013_v52  ;;  %v3303_v31 = vld [vmem:[%s4417_s24 + $0x488] sm:$0xf]  ;;  %v2985_v34 = vld [vmem:[%s4417_s24 + $0x248] sm:$0xf0]  ;;  %v2920_v37 = vor.u32 %v3625_v28, %v2919_v27  ;;  %v3120_v9 = vor.u32 %v3674_v1, %v3119_v63  ;;  %v3055_v15 = vld [vmem:[%s4417_s24 + $0x290] sm:$0xf] }
 0x11a   : > { %2061 = vmatpush.bf16.msra.mxu0 %v2720_v58  ;;  %2087 = vmatpush.bf16.msra.mxu2 %v2724_v59  ;;  %v3721_v32 = vld [vmem:[%s4417_s24 + $0x4c4] sm:$0xf0]  ;;  %v3729_v35 = vld [vmem:[%s4417_s24 + $0x50c] sm:$0xf]  ;;  %v2988_v41 = vor.u32 %v3633_v33, %v2985_v34  ;;  %v3121_v19 = vld [vmem:[%s4417_s24 + $0x350] sm:$0xf0]  ;;  %v1782_v34 = vpack.c.b16 %v1558_v21, %v1558_v21 }
 0x11b   : > { %3550 = vmatmul.msk.bf16.vlgmr.msra.gmra.mxu3 %vm2001_vm1, %v4498_v12  ;;  %3549 = vmatmul.msk.bf16.vlgmr.msra.gmra.mxu1 %vm2001_vm1, %v4498_v12  ;;  %v3369_v36 = vld [vmem:[%s4417_s24 + $0x548] sm:$0xf0]  ;;  %v3304_v38 = vor.u32 %v3721_v32, %v3303_v31  ;;  %v2855_v39 = vld [vmem:[%s4417_s24 + $0x108] sm:$0xf]  ;;  %v2019_v27 = vsel %vm2005_vm0, %v1781_v16, 0 }
 0x11c   : > { %v3609_v40 = vld [vmem:[%s4417_s24 + $0x144] sm:$0xf0]  ;;  %v3372_v42 = vor.u32 %v3729_v35, %v3369_v36  ;;  %v3617_v45 = vld [vmem:[%s4417_s24 + $0x18c] sm:$0xf]  ;;  %v3642_v31 = vld [vmem:[%s4417_s24 + $0x24c] sm:$0xf0] }
 0x11d   : > { %2107 = vmatpush.bf16.msrb.mxu1 %v3112_v61  ;;  %2122 = vmatpush.bf16.msrb.mxu3 %v3496_v62  ;;  %v3239_v43 = vld [vmem:[%s4417_s24 + $0x408] sm:$0xf]  ;;  %v2921_v46 = vld [vmem:[%s4417_s24 + $0x1c8] sm:$0xf0]  ;;  %v2856_v52 = vor.u32 %v3609_v40, %v2855_v39  ;;  %v3650_v32 = vld [vmem:[%s4417_s24 + $0x294] sm:$0xf] }
 0x11e   : > { %2132 = vmatpush.bf16.msrb.mxu0 %v3180_v2  ;;  %2147 = vmatpush.bf16.msrb.mxu2 %v2016_v3  ;;  %v3705_v44 = vld [vmem:[%s4417_s24 + $0x444] sm:$0xf0]  ;;  %v3713_v47 = vld [vmem:[%s4417_s24 + $0x48c] sm:$0xf]  ;;  %v2924_v55 = vor.u32 %v3617_v45, %v2921_v46  ;;  %v3682_v2 = vld [vmem:[%s4417_s24 + $0x394] sm:$0xf] }
 0x11f   : > { %2088 = vmatmul.bf16.vlgmr.msra.gmra.mxu2 %v4496_v11  ;;  %2062 = vmatmul.bf16.vlgmr.msra.gmra.mxu0 %v4496_v11  ;;  %v3305_v48 = vld [vmem:[%s4417_s24 + $0x4c8] sm:$0xf0]  ;;  %v3240_v53 = vor.u32 %v3705_v44, %v3239_v43  ;;  %v2791_v54 = vld [vmem:[%s4417_s24 + $0x88] sm:$0xf]  ;;  %v3185_v3 = vld [vmem:[%s4417_s24 + $0x3d0] sm:$0xf0] }
 0x120   : > { %v3308_v56 = vor.u32 %v3713_v47, %v3305_v48  ;;  %v3593_v57 = vld [vmem:[%s4417_s24 + $0xc4] sm:$0xf0]  ;;  %v3601_v58 = vld [vmem:[%s4417_s24 + $0x10c] sm:$0xf]  ;;  %v3188_v10 = vor.u32 %v3682_v2, %v3185_v3  ;;  %v3057_v33 = vld [vmem:[%s4417_s24 + $0x2d0] sm:$0xf0] }
 0x121   : > { %2108 = vmatpush.bf16.msrb.mxu1 %v3048_v13  ;;  %2123 = vmatpush.bf16.msrb.mxu3 %v3432_v14  ;;  %v2857_v59 = vld [vmem:[%s4417_s24 + $0x148] sm:$0xf0]  ;;  %v2792_v4 = vor.u32 %v3593_v57, %v2791_v54  ;;  %v2727_v7 = vld [vmem:[%s4417_s24 + $0x8] sm:$0xf]  ;;  %v2927_v39 = vld [vmem:[%s4417_s24 + $0x190] sm:$0xf] }
 0x122   : > { %2133 = vmatpush.bf16.msrb.mxu0 %v3116_v17  ;;  %2148 = vmatpush.bf16.msrb.mxu2 %v3500_v18  ;;  %v3697_v61 = vld [vmem:[%s4417_s24 + $0x40c] sm:$0xf]  ;;  %v2860_v5 = vor.u32 %v3601_v58, %v2857_v59  ;;  %v3577_v8 = vld [vmem:[%s4417_s24 + $0x44] sm:$0xf0]  ;;  %v3658_v17 = vld [vmem:[%s4417_s24 + $0x2cc] sm:$0xf0] }
 0x123   : > { %v3241_v62 = vld [vmem:[%s4417_s24 + $0x448] sm:$0xf0]  ;;  %v3666_v18 = vld [vmem:[%s4417_s24 + $0x314] sm:$0xf]  ;;  %v2728_v20 = vor.u32 %v3577_v8, %v2727_v7  ;;  %v3439_v40 = vld [vmem:[%s4417_s24 + $0x590] sm:$0xf] }
 0x124   : > { %v3244_v6 = vor.u32 %v3697_v61, %v3241_v62  ;;  %v3585_v13 = vld [vmem:[%s4417_s24 + $0x8c] sm:$0xf]  ;;  %v3124_v28 = vor.u32 %v3666_v18, %v3121_v19  ;;  %v3634_v43 = vld [vmem:[%s4417_s24 + $0x214] sm:$0xf]  ;;  %v2022_v45 = vsel %vm2005_vm0, %v1782_v34, 0  ;;  %v910_v3 = vld [vmem:[%s4417_s24 + $0x698] sm:$0xff] }
 0x125   : > { %2109 = vmatpush.bf16.msrb.mxu1 %v2984_v25  ;;  %2124 = vmatpush.bf16.msrb.mxu3 %v3368_v26  ;;  %v2793_v14 = vld [vmem:[%s4417_s24 + $0xc8] sm:$0xf0]  ;;  %v2991_v25 = vld [vmem:[%s4417_s24 + $0x210] sm:$0xf]  ;;  %v3056_v26 = vor.u32 %v3658_v17, %v3055_v15  ;;  %v2993_v44 = vld [vmem:[%s4417_s24 + $0x250] sm:$0xf0] }
 0x126   : > { %2134 = vmatpush.bf16.msrb.mxu0 %v3052_v29  ;;  %2149 = vmatpush.bf16.msrb.mxu2 %v3436_v30  ;;  %v2796_v22 = vor.u32 %v3585_v13, %v2793_v14  ;;  %v3569_v23 = vld [vmem:[%s4417_s24 + $0xc] sm:$0xf]  ;;  %v3503_v29 = vld [vmem:[%s4417_s24 + $0x610] sm:$0xf]  ;;  %v3762_v46 = vld [vmem:[%s4417_s24 + $0x614] sm:$0xf]  ;;  %v2996_v50 = vor.u32 %v3634_v43, %v2993_v44  ;;  %v1559_v14 = vunpack.c.l.b16 %v910_v3 }
 0x127   : > { %v2729_v24 = vld [vmem:[%s4417_s24 + $0x48] sm:$0xf0]  ;;  %v3770_v30 = vld [vmem:[%s4417_s24 + $0x64c] sm:$0xf0]  ;;  %v3505_v47 = vld [vmem:[%s4417_s24 + $0x650] sm:$0xf0] }
 0x128   : > { %v2732_v35 = vor.u32 %v3569_v23, %v2729_v24  ;;  %v3504_v36 = vor.u32 %v3770_v30, %v3503_v29  ;;  %v2863_v51 = vld [vmem:[%s4417_s24 + $0x110] sm:$0xf]  ;;  %v3508_v54 = vor.u32 %v3762_v46, %v3505_v47  ;;  %v2929_v57 = vld [vmem:[%s4417_s24 + $0x1d0] sm:$0xf0]  ;;  %v3191_v24 = vld [vmem:[%s4417_s24 + $0x398] sm:$0xf] }
 0x129   : > { %2110 = vmatpush.bf16.msrb.mxu1 %v2920_v37  ;;  %2125 = vmatpush.bf16.msrb.mxu3 %v3304_v38  ;;  %v2992_v37 = vor.u32 %v3642_v31, %v2991_v25  ;;  %v3060_v38 = vor.u32 %v3650_v32, %v3057_v33  ;;  %v3746_v58 = vld [vmem:[%s4417_s24 + $0x594] sm:$0xf]  ;;  %v2799_v61 = vld [vmem:[%s4417_s24 + $0x90] sm:$0xf]  ;;  %v3691_v25 = vld [vmem:[%s4417_s24 + $0x3d4] sm:$0xf0]  ;;  %v1560_v32 = vunpack.c.h.b16 %v910_v3 }
 0x12a   : > { %2135 = vmatpush.bf16.msrb.mxu0 %v2988_v41  ;;  %2150 = vmatpush.bf16.msrb.mxu2 %v3372_v42  ;;  %v3754_v41 = vld [vmem:[%s4417_s24 + $0x5cc] sm:$0xf0]  ;;  %v3441_v59 = vld [vmem:[%s4417_s24 + $0x5d0] sm:$0xf0]  ;;  %v3192_v34 = vor.u32 %v3691_v25, %v3191_v24  ;;  %v3193_v43 = vld [vmem:[%s4417_s24 + $0x3d8] sm:$0xf0] }
 0x12b   : > { %v3626_v42 = vld [vmem:[%s4417_s24 + $0x1cc] sm:$0xf0]  ;;  %v3440_v48 = vor.u32 %v3754_v41, %v3439_v40  ;;  %v3730_v7 = vld [vmem:[%s4417_s24 + $0x514] sm:$0xf]  ;;  %v3771_v40 = vld [vmem:[%s4417_s24 + $0x654] sm:$0xf0] }
 0x12c   : > { %v2928_v49 = vor.u32 %v3626_v42, %v2927_v39  ;;  %v3594_v62 = vld [vmem:[%s4417_s24 + $0xcc] sm:$0xf0]  ;;  %v3377_v8 = vld [vmem:[%s4417_s24 + $0x550] sm:$0xf0]  ;;  %v3511_v39 = vld [vmem:[%s4417_s24 + $0x618] sm:$0xf] }
 0x12d   : > { %2111 = vmatpush.bf16.msrb.mxu1 %v2856_v52  ;;  %2126 = vmatpush.bf16.msrb.mxu3 %v3240_v53  ;;  %v3375_v52 = vld [vmem:[%s4417_s24 + $0x510] sm:$0xf]  ;;  %v2800_v15 = vor.u32 %v3594_v62, %v2799_v61  ;;  %v3586_v19 = vld [vmem:[%s4417_s24 + $0x94] sm:$0xf]  ;;  %v3683_v42 = vld [vmem:[%s4417_s24 + $0x39c] sm:$0xf] }
 0x12e   : > { %2136 = vmatpush.bf16.msrb.mxu0 %v2924_v55  ;;  %2151 = vmatpush.bf16.msrb.mxu2 %v3308_v56  ;;  %v3738_v53 = vld [vmem:[%s4417_s24 + $0x54c] sm:$0xf0]  ;;  %v3618_v56 = vld [vmem:[%s4417_s24 + $0x194] sm:$0xf]  ;;  %v2999_v62 = vld [vmem:[%s4417_s24 + $0x218] sm:$0xf] }
 0x12f   : > { %v3610_v55 = vld [vmem:[%s4417_s24 + $0x14c] sm:$0xf0]  ;;  %v2932_v0 = vor.u32 %v3618_v56, %v2929_v57  ;;  %v2801_v21 = vld [vmem:[%s4417_s24 + $0xd0] sm:$0xf0]  ;;  %v3763_v57 = vld [vmem:[%s4417_s24 + $0x61c] sm:$0xf] }
 0x130   : > { %3551 = vmatmul.msk.bf16.vlgmr.msrb.gmra.mxu3 %vm2001_vm1, %v4498_v12  ;;  %v2864_v63 = vor.u32 %v3610_v55, %v2863_v51  ;;  %v3311_v1 = vld [vmem:[%s4417_s24 + $0x490] sm:$0xf]  ;;  %v3313_v23 = vld [vmem:[%s4417_s24 + $0x4d0] sm:$0xf0]  ;;  %v2804_v29 = vor.u32 %v3586_v19, %v2801_v21  ;;  %v3659_v51 = vld [vmem:[%s4417_s24 + $0x2d4] sm:$0xf0] }
 0x131   : > { %2158 = vmatpush.bf16.msra.mxu3 %v3184_v60  ;;  %2112 = vmatpush.bf16.msrb.mxu1 %v2792_v4  ;;  %v3376_v60 = vor.u32 %v3738_v53, %v3375_v52  ;;  %v3722_v2 = vld [vmem:[%s4417_s24 + $0x4cc] sm:$0xf0]  ;;  %v3444_v4 = vor.u32 %v3746_v58, %v3441_v59  ;;  %v3570_v30 = vld [vmem:[%s4417_s24 + $0x14] sm:$0xf]  ;;  %v3447_v52 = vld [vmem:[%s4417_s24 + $0x598] sm:$0xf] }
 0x132   : > { %2137 = vmatpush.bf16.msrb.mxu0 %v2860_v5  ;;  %2152 = vmatpush.bf16.msrb.mxu2 %v3244_v6  ;;  %v3602_v5 = vld [vmem:[%s4417_s24 + $0x114] sm:$0xf]  ;;  %v3578_v13 = vld [vmem:[%s4417_s24 + $0x4c] sm:$0xf0]  ;;  %v3755_v53 = vld [vmem:[%s4417_s24 + $0x5d4] sm:$0xf0] }
 0x133   : > { %v2865_v6 = vld [vmem:[%s4417_s24 + $0x150] sm:$0xf0]  ;;  %v3247_v17 = vld [vmem:[%s4417_s24 + $0x410] sm:$0xf]  ;;  %v3129_v55 = vld [vmem:[%s4417_s24 + $0x358] sm:$0xf0] }
 0x134   : > { %v2868_v16 = vor.u32 %v3602_v5, %v2865_v6  ;;  %v3706_v18 = vld [vmem:[%s4417_s24 + $0x44c] sm:$0xf0]  ;;  %v2737_v31 = vld [vmem:[%s4417_s24 + $0x50] sm:$0xf0]  ;;  %v3513_v58 = vld [vmem:[%s4417_s24 + $0x658] sm:$0xf0] }
 0x135   : > { %2159 = vmatpush.bf16.msra.mxu3 %v3120_v9  ;;  %2113 = vmatpush.bf16.msrb.mxu1 %v2728_v20  ;;  %v3312_v9 = vor.u32 %v3722_v2, %v3311_v1  ;;  %v3380_v20 = vor.u32 %v3730_v7, %v3377_v8  ;;  %v2740_v44 = vor.u32 %v3570_v30, %v2737_v31  ;;  %v3739_v2 = vld [vmem:[%s4417_s24 + $0x554] sm:$0xf0]  ;;  %v3651_v3 = vld [vmem:[%s4417_s24 + $0x29c] sm:$0xf] }
 0x136   : > { %2184 = vmatpush.bf16.msra.mxu2 %v3188_v10  ;;  %2138 = vmatpush.bf16.msrb.mxu0 %v2796_v22  ;;  %v2735_v10 = vld [vmem:[%s4417_s24 + $0x10] sm:$0xf]  ;;  %v3714_v22 = vld [vmem:[%s4417_s24 + $0x494] sm:$0xf]  ;;  %v3516_v1 = vor.u32 %v3763_v57, %v3513_v58  ;;  %v3747_v5 = vld [vmem:[%s4417_s24 + $0x59c] sm:$0xf] }
 0x137   : > { %3552 = vmatmul.msk.bf16.vlgmr.msrb.gmra.mxu2 %vm2001_vm1, %v4498_v12  ;;  %v3316_v33 = vor.u32 %v3714_v22, %v3313_v23  ;;  %v3449_v6 = vld [vmem:[%s4417_s24 + $0x5d8] sm:$0xf0]  ;;  %v2871_v22 = vld [vmem:[%s4417_s24 + $0x118] sm:$0xf] }
 0x138   : > { %2114 = vmatmul.bf16.vlgmr.msrb.gmra.mxu1 %v4496_v11  ;;  %v3731_v19 = vld [vmem:[%s4417_s24 + $0x51c] sm:$0xf]  ;;  %v3611_v23 = vld [vmem:[%s4417_s24 + $0x154] sm:$0xf0] }
 0x139   : > { %2173 = vmatpush.bf16.msra.mxu1 %v2019_v27  ;;  %2160 = vmatpush.bf16.msra.mxu3 %v3056_v26  ;;  %v3248_v26 = vor.u32 %v3706_v18, %v3247_v17  ;;  %v1783_v27 = vpack.c.b16 %v1559_v14, %v1559_v14  ;;  %v3319_v14 = vld [vmem:[%s4417_s24 + $0x498] sm:$0xf]  ;;  %v3635_v17 = vld [vmem:[%s4417_s24 + $0x21c] sm:$0xf] }
 0x13a   : > { %2185 = vmatpush.bf16.msra.mxu2 %v3124_v28  ;;  %2139 = vmatpush.bf16.msrb.mxu0 %v2732_v35  ;;  %v2736_v28 = vor.u32 %v3578_v13, %v2735_v10  ;;  %v3698_v35 = vld [vmem:[%s4417_s24 + $0x414] sm:$0xf]  ;;  %v2935_v10 = vld [vmem:[%s4417_s24 + $0x198] sm:$0xf]  ;;  %v3001_v18 = vld [vmem:[%s4417_s24 + $0x258] sm:$0xf0] }
 0x13b   : > { %v2025_v41 = vsel %vm2005_vm0, %v1783_v27, 0  ;;  %v3627_v13 = vld [vmem:[%s4417_s24 + $0x1d4] sm:$0xf0]  ;;  %v3004_v25 = vor.u32 %v3635_v17, %v3001_v18  ;;  %v2937_v30 = vld [vmem:[%s4417_s24 + $0x1d8] sm:$0xf0] }
 0x13c   : > { %v2936_v21 = vor.u32 %v3627_v13, %v2935_v10  ;;  %v3707_v27 = vld [vmem:[%s4417_s24 + $0x454] sm:$0xf0]  ;;  %v3715_v31 = vld [vmem:[%s4417_s24 + $0x49c] sm:$0xf]  ;;  %v3519_v10 = vld [vmem:[%s4417_s24 + $0x620] sm:$0xf] }
 0x13d   : > { %2174 = vmatpush.bf16.msra.mxu1 %v3504_v36  ;;  %2161 = vmatpush.bf16.msra.mxu3 %v2992_v37  ;;  %v3249_v36 = vld [vmem:[%s4417_s24 + $0x450] sm:$0xf0]  ;;  %v3127_v37 = vld [vmem:[%s4417_s24 + $0x318] sm:$0xf]  ;;  %v3772_v13 = vld [vmem:[%s4417_s24 + $0x65c] sm:$0xf0] }
 0x13e   : > { %2186 = vmatpush.bf16.msra.mxu2 %v3060_v38  ;;  %2199 = vmatpush.bf16.msra.mxu0 %v2022_v45  ;;  %v3675_v38 = vld [vmem:[%s4417_s24 + $0x354] sm:$0xf0]  ;;  %v1784_v45 = vpack.c.b16 %v1560_v32, %v1560_v32  ;;  %v3252_v46 = vor.u32 %v3698_v35, %v3249_v36  ;;  %v911_v32 = vld [vmem:[%s4417_s24 + $0x6a0] sm:$0xff]  ;;  %v2872_v36 = vor.u32 %v3611_v23, %v2871_v22 }
 0x13f   : > { %2140 = vmatmul.bf16.vlgmr.msrb.gmra.mxu0 %v4496_v11  ;;  %v3128_v47 = vor.u32 %v3675_v38, %v3127_v37  ;;  %v3692_v35 = vld [vmem:[%s4417_s24 + $0x3dc] sm:$0xf0]  ;;  %v1562_v57 = vunpack.c.h.b16 %v911_v32  ;;  %v3652_v17 = vld [vmem:[%s4417_s24 + $0x2a4] sm:$0xf] }
 0x140   : > { %v2028_v56 = vsel %vm2005_vm0, %v1784_v45, 0  ;;  %v2873_v45 = vld [vmem:[%s4417_s24 + $0x158] sm:$0xf0]  ;;  %v3073_v18 = vld [vmem:[%s4417_s24 + $0x2e0] sm:$0xf0] }
 0x141   : > { %2175 = vmatpush.bf16.msra.mxu1 %v3440_v48  ;;  %2162 = vmatpush.bf16.msra.mxu3 %v2928_v49  ;;  %v3512_v48 = vor.u32 %v3771_v40, %v3511_v39  ;;  %v3196_v49 = vor.u32 %v3683_v42, %v3193_v43  ;;  %v2807_v39 = vld [vmem:[%s4417_s24 + $0x98] sm:$0xf]  ;;  %v2943_v23 = vld [vmem:[%s4417_s24 + $0x1a0] sm:$0xf] }
 0x142   : > { %2187 = vmatpush.bf16.msra.mxu2 %v2996_v50  ;;  %2200 = vmatpush.bf16.msra.mxu0 %v3508_v54  ;;  %v3063_v50 = vld [vmem:[%s4417_s24 + $0x298] sm:$0xf]  ;;  %v3667_v54 = vld [vmem:[%s4417_s24 + $0x31c] sm:$0xf] }
 0x143   : > { %v3064_v59 = vor.u32 %v3659_v51, %v3063_v50  ;;  %v3132_v61 = vor.u32 %v3667_v54, %v3129_v55  ;;  %v3595_v40 = vld [vmem:[%s4417_s24 + $0xd4] sm:$0xf0]  ;;  %v3684_v51 = vld [vmem:[%s4417_s24 + $0x3a4] sm:$0xf] }
 0x144   : > { %v2808_v50 = vor.u32 %v3595_v40, %v2807_v39  ;;  %v2743_v54 = vld [vmem:[%s4417_s24 + $0x18] sm:$0xf]  ;;  %v3748_v40 = vld [vmem:[%s4417_s24 + $0x5a4] sm:$0xf] }
 0x145   : > { %2176 = vmatpush.bf16.msra.mxu1 %v3376_v60  ;;  %2163 = vmatpush.bf16.msra.mxu3 %v2864_v63  ;;  %v3448_v60 = vor.u32 %v3755_v53, %v3447_v52  ;;  %v3643_v63 = vld [vmem:[%s4417_s24 + $0x254] sm:$0xf0]  ;;  %v3201_v52 = vld [vmem:[%s4417_s24 + $0x3e0] sm:$0xf0] }
 0x146   : > { %2188 = vmatpush.bf16.msra.mxu2 %v2932_v0  ;;  %2201 = vmatpush.bf16.msra.mxu0 %v3444_v4  ;;  %v3383_v0 = vld [vmem:[%s4417_s24 + $0x518] sm:$0xf]  ;;  %v3065_v4 = vld [vmem:[%s4417_s24 + $0x2d8] sm:$0xf0]  ;;  %v3000_v7 = vor.u32 %v3643_v63, %v2999_v62  ;;  %v3204_v62 = vor.u32 %v3684_v51, %v3201_v52  ;;  %v3071_v63 = vld [vmem:[%s4417_s24 + $0x2a0] sm:$0xf] }
 0x147   : > { %v3384_v8 = vor.u32 %v3739_v2, %v3383_v0  ;;  %v3579_v55 = vld [vmem:[%s4417_s24 + $0x54] sm:$0xf0]  ;;  %v3660_v0 = vld [vmem:[%s4417_s24 + $0x2dc] sm:$0xf0]  ;;  %v3668_v2 = vld [vmem:[%s4417_s24 + $0x324] sm:$0xf] }
 0x149   : > { %2177 = vmatpush.bf16.msra.mxu1 %v3312_v9  ;;  %2164 = vmatpush.bf16.msra.mxu3 %v2800_v15  ;;  %v3068_v9 = vor.u32 %v3651_v3, %v3065_v4  ;;  %v3452_v15 = vor.u32 %v3747_v5, %v3449_v6  ;;  %v3137_v3 = vld [vmem:[%s4417_s24 + $0x360] sm:$0xf0]  ;;  %v3571_v6 = vld [vmem:[%s4417_s24 + $0x1c] sm:$0xf] }
 0x14a   : > { %2189 = vmatpush.bf16.msra.mxu2 %v2868_v16  ;;  %2202 = vmatpush.bf16.msra.mxu0 %v3380_v20  ;;  %v3723_v16 = vld [vmem:[%s4417_s24 + $0x4d4] sm:$0xf0]  ;;  %v3385_v20 = vld [vmem:[%s4417_s24 + $0x558] sm:$0xf0] }
 0x14b   : > { %v3320_v24 = vor.u32 %v3723_v16, %v3319_v14  ;;  %v3140_v14 = vor.u32 %v3668_v2, %v3137_v3  ;;  %v3644_v16 = vld [vmem:[%s4417_s24 + $0x25c] sm:$0xf0]  ;;  %v3588_v3 = vld [vmem:[%s4417_s24 + $0xa4] sm:$0xf] }
 0x14d   : > { %2178 = vmatpush.bf16.msra.mxu1 %v3248_v26  ;;  %2165 = vmatpush.bf16.msra.mxu3 %v2736_v28  ;;  %v3255_v26 = vld [vmem:[%s4417_s24 + $0x418] sm:$0xf]  ;;  %v3619_v28 = vld [vmem:[%s4417_s24 + $0x19c] sm:$0xf] }
 0x14e   : > { %2190 = vmatpush.bf16.msra.mxu2 %v2804_v29  ;;  %2203 = vmatpush.bf16.msra.mxu0 %v3316_v33  ;;  %v3388_v29 = vor.u32 %v3731_v19, %v3385_v20  ;;  %v3321_v33 = vld [vmem:[%s4417_s24 + $0x4d8] sm:$0xf0]  ;;  %v3256_v37 = vor.u32 %v3707_v27, %v3255_v26  ;;  %v2940_v38 = vor.u32 %v3619_v28, %v2937_v30  ;;  %v3628_v27 = vld [vmem:[%s4417_s24 + $0x1dc] sm:$0xf0]  ;;  %v3764_v28 = vld [vmem:[%s4417_s24 + $0x624] sm:$0xf] }
 0x14f   : > { %v3324_v42 = vor.u32 %v3715_v31, %v3321_v33  ;;  %v3520_v20 = vor.u32 %v3772_v13, %v3519_v10  ;;  %v3076_v26 = vor.u32 %v3652_v17, %v3073_v18  ;;  %v3636_v30 = vld [vmem:[%s4417_s24 + $0x224] sm:$0xf]  ;;  %v2879_v33 = vld [vmem:[%s4417_s24 + $0x120] sm:$0xf] }
 0x150   : > { %3553 = vmatmul.msk.bf16.vlgmr.msra.gmra.mxu1 %vm2001_vm1, %v4498_v12  ;;  %2166 = vmatmul.bf16.vlgmr.msra.gmra.mxu3 %v4496_v11  ;;  %v3009_v31 = vld [vmem:[%s4417_s24 + $0x260] sm:$0xf0] }
 0x151   : > { %2210 = vmatpush.bf16.msrb.mxu1 %v3192_v34  ;;  %2225 = vmatpush.bf16.msrb.mxu3 %v2025_v41  ;;  %v3199_v34 = vld [vmem:[%s4417_s24 + $0x3a0] sm:$0xf]  ;;  %v1561_v41 = vunpack.c.l.b16 %v911_v32  ;;  %v3012_v39 = vor.u32 %v3636_v30, %v3009_v31 }
 0x152   : > { %2191 = vmatpush.bf16.msra.mxu2 %v2740_v44  ;;  %2204 = vmatpush.bf16.msra.mxu0 %v3252_v46  ;;  %v3200_v43 = vor.u32 %v3692_v35, %v3199_v34  ;;  %v3603_v44 = vld [vmem:[%s4417_s24 + $0x11c] sm:$0xf]  ;;  %v2944_v34 = vor.u32 %v3628_v27, %v2943_v23  ;;  %v3677_v23 = vld [vmem:[%s4417_s24 + $0x364] sm:$0xf0]  ;;  %v3209_v27 = vld [vmem:[%s4417_s24 + $0x3e8] sm:$0xf0] }
 0x153   : > { %v3699_v46 = vld [vmem:[%s4417_s24 + $0x41c] sm:$0xf]  ;;  %v2876_v53 = vor.u32 %v3603_v44, %v2873_v45  ;;  %v2945_v44 = vld [vmem:[%s4417_s24 + $0x1e0] sm:$0xf0] }
 0x155   : > { %2211 = vmatpush.bf16.msrb.mxu1 %v3128_v47  ;;  %2226 = vmatpush.bf16.msrb.mxu3 %v3512_v48  ;;  %v3257_v47 = vld [vmem:[%s4417_s24 + $0x458] sm:$0xf0]  ;;  %v3135_v48 = vld [vmem:[%s4417_s24 + $0x320] sm:$0xf] }
 0x156   : > { %2236 = vmatpush.bf16.msrb.mxu0 %v3196_v49  ;;  %2251 = vmatpush.bf16.msrb.mxu2 %v2028_v56  ;;  %v3676_v49 = vld [vmem:[%s4417_s24 + $0x35c] sm:$0xf0]  ;;  %v1785_v56 = vpack.c.b16 %v1561_v41, %v1561_v41  ;;  %v3260_v58 = vor.u32 %v3699_v46, %v3257_v47  ;;  %v3457_v41 = vld [vmem:[%s4417_s24 + $0x5e0] sm:$0xf0] }
 0x157   : > { %2192 = vmatmul.bf16.vlgmr.msra.gmra.mxu2 %v4496_v11  ;;  %3554 = vmatmul.msk.bf16.vlgmr.msra.gmra.mxu0 %vm2001_vm1, %v4498_v12  ;;  %v3460_v47 = vor.u32 %v3748_v40, %v3457_v41  ;;  %v3765_v41 = vld [vmem:[%s4417_s24 + $0x62c] sm:$0xf] }
 0x158   : > { %v2031_v5 = vsel %vm2005_vm0, %v1785_v56, 0  ;;  %v3604_v56 = vld [vmem:[%s4417_s24 + $0x124] sm:$0xf] }
 0x159   : > { %2212 = vmatpush.bf16.msrb.mxu1 %v3064_v59  ;;  %2227 = vmatpush.bf16.msrb.mxu3 %v3448_v60  ;;  %v3136_v59 = vor.u32 %v3676_v49, %v3135_v48  ;;  %v3587_v60 = vld [vmem:[%s4417_s24 + $0x9c] sm:$0xf]  ;;  %v2815_v48 = vld [vmem:[%s4417_s24 + $0xa0] sm:$0xf] }
 0x15a   : > { %2237 = vmatpush.bf16.msrb.mxu0 %v3132_v61  ;;  %2252 = vmatpush.bf16.msrb.mxu2 %v3516_v1  ;;  %v2809_v61 = vld [vmem:[%s4417_s24 + $0xd8] sm:$0xf0]  ;;  %v2744_v1 = vor.u32 %v3579_v55, %v2743_v54  ;;  %v3327_v49 = vld [vmem:[%s4417_s24 + $0x4a0] sm:$0xf]  ;;  %v3732_v54 = vld [vmem:[%s4417_s24 + $0x524] sm:$0xf] }
 0x15b   : > { %v2812_v4 = vor.u32 %v3587_v60, %v2809_v61  ;;  %v3393_v55 = vld [vmem:[%s4417_s24 + $0x560] sm:$0xf0] }
 0x15c   : > { %v3396_v61 = vor.u32 %v3732_v54, %v3393_v55  ;;  %v3465_v54 = vld [vmem:[%s4417_s24 + $0x5e8] sm:$0xf0] }
 0x15d   : > { %2213 = vmatpush.bf16.msrb.mxu1 %v3000_v7  ;;  %2228 = vmatpush.bf16.msrb.mxu3 %v3384_v8  ;;  %v1786_v7 = vpack.c.b16 %v1562_v57, %v1562_v57  ;;  %v3072_v8 = vor.u32 %v3660_v0, %v3071_v63  ;;  %v2881_v57 = vld [vmem:[%s4417_s24 + $0x160] sm:$0xf0]  ;;  %v3263_v63 = vld [vmem:[%s4417_s24 + $0x420] sm:$0xf] }
 0x15e   : > { %2238 = vmatpush.bf16.msrb.mxu0 %v3068_v9  ;;  %2253 = vmatpush.bf16.msrb.mxu2 %v3452_v15  ;;  %v2745_v9 = vld [vmem:[%s4417_s24 + $0x58] sm:$0xf0]  ;;  %v3007_v15 = vld [vmem:[%s4417_s24 + $0x220] sm:$0xf]  ;;  %v2884_v2 = vor.u32 %v3604_v56, %v2881_v57 }
 0x15f   : > { %v2748_v19 = vor.u32 %v3571_v6, %v2745_v9  ;;  %v3008_v22 = vor.u32 %v3644_v16, %v3007_v15  ;;  %v3708_v0 = vld [vmem:[%s4417_s24 + $0x45c] sm:$0xf0]  ;;  %v2817_v6 = vld [vmem:[%s4417_s24 + $0xe0] sm:$0xf0] }
 0x160   : > { %v3264_v9 = vor.u32 %v3708_v0, %v3263_v63  ;;  %v3572_v15 = vld [vmem:[%s4417_s24 + $0x24] sm:$0xf]  ;;  %v2820_v17 = vor.u32 %v3588_v3, %v2817_v6  ;;  %v3637_v63 = vld [vmem:[%s4417_s24 + $0x22c] sm:$0xf] }
 0x161   : > { %2214 = vmatpush.bf16.msrb.mxu1 %v2936_v21  ;;  %2229 = vmatpush.bf16.msrb.mxu3 %v3320_v24  ;;  %v2034_v21 = vsel %vm2005_vm0, %v1786_v7, 0  ;;  %v3455_v24 = vld [vmem:[%s4417_s24 + $0x5a0] sm:$0xf]  ;;  %v3207_v7 = vld [vmem:[%s4417_s24 + $0x3a8] sm:$0xf] }
 0x162   : > { %2239 = vmatpush.bf16.msrb.mxu0 %v3004_v25  ;;  %2254 = vmatpush.bf16.msrb.mxu2 %v3388_v29  ;;  %v3756_v25 = vld [vmem:[%s4417_s24 + $0x5dc] sm:$0xf0]  ;;  %v3521_v29 = vld [vmem:[%s4417_s24 + $0x660] sm:$0xf0]  ;;  %v3017_v0 = vld [vmem:[%s4417_s24 + $0x268] sm:$0xf0] }
 0x163   : > { %v3456_v32 = vor.u32 %v3756_v25, %v3455_v24  ;;  %v3524_v35 = vor.u32 %v3764_v28, %v3521_v29  ;;  %v3527_v24 = vld [vmem:[%s4417_s24 + $0x628] sm:$0xf] }
 0x164   : > { %v3773_v25 = vld [vmem:[%s4417_s24 + $0x664] sm:$0xf0] }
 0x165   : > { %2215 = vmatpush.bf16.msrb.mxu1 %v2872_v36  ;;  %2230 = vmatpush.bf16.msrb.mxu3 %v3256_v37  ;;  %v3612_v36 = vld [vmem:[%s4417_s24 + $0x15c] sm:$0xf0] }
 0x166   : > { %2240 = vmatpush.bf16.msrb.mxu0 %v2940_v38  ;;  %2255 = vmatpush.bf16.msrb.mxu2 %v3324_v42  ;;  %v3391_v37 = vld [vmem:[%s4417_s24 + $0x520] sm:$0xf]  ;;  %v4720_v42 = vld [vmem:[%s4417_s24 + $0x6a8] sm:$0xff]  ;;  %v2880_v46 = vor.u32 %v3612_v36, %v2879_v33 }
 0x167   : > { %v3740_v38 = vld [vmem:[%s4417_s24 + $0x55c] sm:$0xf0]  ;;  %v1563_v51 = vunpack.c.l.b16 %v4720_v42  ;;  %v1564_v16 = vunpack.c.h.b16 %v4720_v42  ;;  %v3463_v36 = vld [vmem:[%s4417_s24 + $0x5a8] sm:$0xf]  ;;  %v3529_v42 = vld [vmem:[%s4417_s24 + $0x668] sm:$0xf0] }
 0x168   : > { %3555 = vmatmul.msk.bf16.vlgmr.msrb.gmra.mxu3 %vm2001_vm1, %v4498_v12  ;;  %v3392_v45 = vor.u32 %v3740_v38, %v3391_v37  ;;  %v3757_v37 = vld [vmem:[%s4417_s24 + $0x5e4] sm:$0xf0]  ;;  %v3669_v38 = vld [vmem:[%s4417_s24 + $0x32c] sm:$0xf] }
 0x169   : > { %2262 = vmatpush.bf16.msra.mxu3 %v3200_v43  ;;  %2216 = vmatpush.bf16.msrb.mxu1 %v2808_v50  ;;  %v3620_v43 = vld [vmem:[%s4417_s24 + $0x1a4] sm:$0xf]  ;;  %v3724_v50 = vld [vmem:[%s4417_s24 + $0x4dc] sm:$0xf0]  ;;  %v1788_v29 = vpack.c.b16 %v1564_v16, %v1564_v16  ;;  %v913_v16 = vld [vmem:[%s4417_s24 + $0x6b0] sm:$0xff] }
 0x16a   : > { %2241 = vmatpush.bf16.msrb.mxu0 %v2876_v53  ;;  %2256 = vmatpush.bf16.msrb.mxu2 %v3260_v58  ;;  %v2948_v52 = vor.u32 %v3620_v43, %v2945_v44  ;;  %v3596_v53 = vld [vmem:[%s4417_s24 + $0xdc] sm:$0xf0]  ;;  %v3328_v58 = vor.u32 %v3724_v50, %v3327_v49  ;;  %v3464_v44 = vor.u32 %v3757_v37, %v3463_v36  ;;  %v3741_v50 = vld [vmem:[%s4417_s24 + $0x564] sm:$0xf0]  ;;  %v3217_v36 = vld [vmem:[%s4417_s24 + $0x3f0] sm:$0xf0] }
 0x16b   : > { %v2816_v60 = vor.u32 %v3596_v53, %v2815_v48  ;;  %v2040_v40 = vsel %vm2005_vm0, %v1788_v29, 0  ;;  %v3399_v48 = vld [vmem:[%s4417_s24 + $0x528] sm:$0xf]  ;;  %v3532_v49 = vor.u32 %v3765_v41, %v3529_v42  ;;  %v3749_v53 = vld [vmem:[%s4417_s24 + $0x5ac] sm:$0xf]  ;;  %v1566_v41 = vunpack.c.h.b16 %v913_v16 }
 0x16c   : > { %v3400_v56 = vor.u32 %v3741_v50, %v3399_v48  ;;  %v2889_v29 = vld [vmem:[%s4417_s24 + $0x168] sm:$0xf0]  ;;  %v3662_v48 = vld [vmem:[%s4417_s24 + $0x2ec] sm:$0xf0]  ;;  %v3670_v50 = vld [vmem:[%s4417_s24 + $0x334] sm:$0xf] }
 0x16d   : > { %2263 = vmatpush.bf16.msra.mxu3 %v3136_v59  ;;  %2217 = vmatpush.bf16.msrb.mxu1 %v2744_v1  ;;  %v2751_v59 = vld [vmem:[%s4417_s24 + $0x20] sm:$0xf]  ;;  %v1787_v1 = vpack.c.b16 %v1563_v51, %v1563_v51  ;;  %v3653_v51 = vld [vmem:[%s4417_s24 + $0x2ac] sm:$0xf] }
 0x16e   : > { %2288 = vmatpush.bf16.msra.mxu2 %v3204_v62  ;;  %2242 = vmatpush.bf16.msrb.mxu0 %v2812_v4  ;;  %v3580_v62 = vld [vmem:[%s4417_s24 + $0x5c] sm:$0xf0]  ;;  %v3716_v4 = vld [vmem:[%s4417_s24 + $0x4a4] sm:$0xf] }
 0x16f   : > { %3556 = vmatmul.msk.bf16.vlgmr.msrb.gmra.mxu2 %vm2001_vm1, %v4498_v12  ;;  %v2752_v10 = vor.u32 %v3580_v62, %v2751_v59  ;;  %v3629_v59 = vld [vmem:[%s4417_s24 + $0x1e4] sm:$0xf0] }
 0x170   : > { %2218 = vmatmul.bf16.vlgmr.msrb.gmra.mxu1 %v4496_v11  ;;  %v3725_v62 = vld [vmem:[%s4417_s24 + $0x4e4] sm:$0xf0] }
 0x171   : > { %2277 = vmatpush.bf16.msra.mxu1 %v2031_v5  ;;  %2264 = vmatpush.bf16.msra.mxu3 %v3072_v8  ;;  %v3329_v5 = vld [vmem:[%s4417_s24 + $0x4e0] sm:$0xf0]  ;;  %v3693_v8 = vld [vmem:[%s4417_s24 + $0x3e4] sm:$0xf0] }
 0x172   : > { %2289 = vmatpush.bf16.msra.mxu2 %v3140_v14  ;;  %2243 = vmatpush.bf16.msrb.mxu0 %v2748_v19  ;;  %v3332_v13 = vor.u32 %v3716_v4, %v3329_v5  ;;  %v2037_v14 = vsel %vm2005_vm0, %v1787_v1, 0  ;;  %v3208_v18 = vor.u32 %v3693_v8, %v3207_v7  ;;  %v2753_v19 = vld [vmem:[%s4417_s24 + $0x60] sm:$0xf0]  ;;  %v3733_v1 = vld [vmem:[%s4417_s24 + $0x52c] sm:$0xf]  ;;  %v3020_v7 = vor.u32 %v3637_v63, %v3017_v0 }
 0x173   : > { %v2756_v30 = vor.u32 %v3572_v15, %v2753_v19  ;;  %v2887_v4 = vld [vmem:[%s4417_s24 + $0x128] sm:$0xf]  ;;  %v3717_v15 = vld [vmem:[%s4417_s24 + $0x4ac] sm:$0xf]  ;;  %v3694_v19 = vld [vmem:[%s4417_s24 + $0x3ec] sm:$0xf0] }
 0x174   : > { %v3613_v5 = vld [vmem:[%s4417_s24 + $0x164] sm:$0xf0]  ;;  %v3654_v63 = vld [vmem:[%s4417_s24 + $0x2b4] sm:$0xf] }
 0x175   : > { %2278 = vmatpush.bf16.msra.mxu1 %v3520_v20  ;;  %2265 = vmatpush.bf16.msra.mxu3 %v3008_v22  ;;  %v3700_v20 = vld [vmem:[%s4417_s24 + $0x424] sm:$0xf]  ;;  %v3143_v22 = vld [vmem:[%s4417_s24 + $0x328] sm:$0xf]  ;;  %v3089_v0 = vld [vmem:[%s4417_s24 + $0x2f0] sm:$0xf0] }
 0x176   : > { %2303 = vmatpush.bf16.msra.mxu0 %v2034_v21  ;;  %2290 = vmatpush.bf16.msra.mxu2 %v3076_v26  ;;  %v3265_v21 = vld [vmem:[%s4417_s24 + $0x460] sm:$0xf0]  ;;  %v3685_v26 = vld [vmem:[%s4417_s24 + $0x3ac] sm:$0xf]  ;;  %v3144_v31 = vor.u32 %v3677_v23, %v3143_v22  ;;  %v3271_v8 = vld [vmem:[%s4417_s24 + $0x428] sm:$0xf] }
 0x177   : > { %2244 = vmatmul.bf16.vlgmr.msrb.gmra.mxu0 %v4496_v11  ;;  %v3268_v28 = vor.u32 %v3700_v20, %v3265_v21  ;;  %v3212_v33 = vor.u32 %v3685_v26, %v3209_v27  ;;  %v2888_v20 = vor.u32 %v3613_v5, %v2887_v4  ;;  %v2823_v23 = vld [vmem:[%s4417_s24 + $0xa8] sm:$0xf]  ;;  %v2959_v5 = vld [vmem:[%s4417_s24 + $0x1b0] sm:$0xf] }
 0x179   : > { %2279 = vmatpush.bf16.msra.mxu1 %v3456_v32  ;;  %2266 = vmatpush.bf16.msra.mxu3 %v2944_v34  ;;  %v3528_v32 = vor.u32 %v3773_v25, %v3527_v24  ;;  %v3079_v34 = vld [vmem:[%s4417_s24 + $0x2a8] sm:$0xf]  ;;  %v1565_v25 = vunpack.c.l.b16 %v913_v16  ;;  %v3638_v16 = vld [vmem:[%s4417_s24 + $0x234] sm:$0xf] }
 0x17a   : > { %2304 = vmatpush.bf16.msra.mxu0 %v3524_v35  ;;  %2291 = vmatpush.bf16.msra.mxu2 %v3012_v39  ;;  %v3661_v35 = vld [vmem:[%s4417_s24 + $0x2e4] sm:$0xf0]  ;;  %v3145_v39 = vld [vmem:[%s4417_s24 + $0x368] sm:$0xf0] }
 0x17b   : > { %v3080_v43 = vor.u32 %v3661_v35, %v3079_v34  ;;  %v3597_v24 = vld [vmem:[%s4417_s24 + $0xe4] sm:$0xf0]  ;;  %v3686_v35 = vld [vmem:[%s4417_s24 + $0x3b4] sm:$0xf] }
 0x17c   : > { %v2824_v34 = vor.u32 %v3597_v24, %v2823_v23  ;;  %v3407_v23 = vld [vmem:[%s4417_s24 + $0x530] sm:$0xf] }
 0x17d   : > { %2280 = vmatpush.bf16.msra.mxu1 %v3392_v45  ;;  %2267 = vmatpush.bf16.msra.mxu3 %v2880_v46  ;;  %v3148_v45 = vor.u32 %v3669_v38, %v3145_v39  ;;  %v3015_v46 = vld [vmem:[%s4417_s24 + $0x228] sm:$0xf]  ;;  %v3742_v24 = vld [vmem:[%s4417_s24 + $0x56c] sm:$0xf0] }
 0x17e   : > { %2305 = vmatpush.bf16.msra.mxu0 %v3460_v47  ;;  %2292 = vmatpush.bf16.msra.mxu2 %v2948_v52  ;;  %v3645_v47 = vld [vmem:[%s4417_s24 + $0x264] sm:$0xf0]  ;;  %v3081_v52 = vld [vmem:[%s4417_s24 + $0x2e8] sm:$0xf0] }
 0x17f   : > { %v3016_v55 = vor.u32 %v3645_v47, %v3015_v46  ;;  %v3084_v57 = vor.u32 %v3653_v51, %v3081_v52  ;;  %v2759_v38 = vld [vmem:[%s4417_s24 + $0x28] sm:$0xf]  ;;  %v3220_v46 = vor.u32 %v3686_v35, %v3217_v36  ;;  %v3087_v47 = vld [vmem:[%s4417_s24 + $0x2b0] sm:$0xf]  ;;  %v3153_v51 = vld [vmem:[%s4417_s24 + $0x370] sm:$0xf0]  ;;  %v3408_v35 = vor.u32 %v3742_v24, %v3407_v23 }
 0x180   : > { %v3581_v39 = vld [vmem:[%s4417_s24 + $0x64] sm:$0xf0] }
 0x181   : > { %2281 = vmatpush.bf16.msra.mxu1 %v3328_v58  ;;  %2268 = vmatpush.bf16.msra.mxu3 %v2816_v60  ;;  %v2951_v58 = vld [vmem:[%s4417_s24 + $0x1a8] sm:$0xf] }
 0x182   : > { %2306 = vmatpush.bf16.msra.mxu0 %v3396_v61  ;;  %2293 = vmatpush.bf16.msra.mxu2 %v2884_v2  ;;  %v3335_v60 = vld [vmem:[%s4417_s24 + $0x4a8] sm:$0xf]  ;;  %v3468_v61 = vor.u32 %v3749_v53, %v3465_v54  ;;  %v3401_v2 = vld [vmem:[%s4417_s24 + $0x568] sm:$0xf0]  ;;  %v2952_v3 = vor.u32 %v3629_v59, %v2951_v58  ;;  %v3535_v58 = vld [vmem:[%s4417_s24 + $0x630] sm:$0xf] }
 0x183   : > { %v3336_v6 = vor.u32 %v3725_v62, %v3335_v60  ;;  %v3573_v54 = vld [vmem:[%s4417_s24 + $0x2c] sm:$0xf]  ;;  %v3774_v59 = vld [vmem:[%s4417_s24 + $0x66c] sm:$0xf0]  ;;  %v3156_v60 = vor.u32 %v3670_v50, %v3153_v51  ;;  %v2897_v50 = vld [vmem:[%s4417_s24 + $0x170] sm:$0xf0] }
 0x184   : > { %v3646_v62 = vld [vmem:[%s4417_s24 + $0x26c] sm:$0xf0] }
 0x185   : > { %2282 = vmatpush.bf16.msra.mxu1 %v3264_v9  ;;  %2269 = vmatpush.bf16.msra.mxu3 %v2752_v10  ;;  %v3709_v9 = vld [vmem:[%s4417_s24 + $0x464] sm:$0xf0]  ;;  %v3621_v10 = vld [vmem:[%s4417_s24 + $0x1ac] sm:$0xf] }
 0x186   : > { %2307 = vmatpush.bf16.msra.mxu0 %v3332_v13  ;;  %2294 = vmatpush.bf16.msra.mxu2 %v2820_v17  ;;  %v3404_v13 = vor.u32 %v3733_v1, %v3401_v2  ;;  %v3337_v17 = vld [vmem:[%s4417_s24 + $0x4e8] sm:$0xf0]  ;;  %v3272_v21 = vor.u32 %v3709_v9, %v3271_v8  ;;  %v3536_v2 = vor.u32 %v3774_v59, %v3535_v58 }
 0x187   : > { %v3340_v26 = vor.u32 %v3717_v15, %v3337_v17  ;;  %v3537_v15 = vld [vmem:[%s4417_s24 + $0x670] sm:$0xf0] }
 0x188   : > { %3557 = vmatmul.msk.bf16.vlgmr.msra.gmra.mxu1 %vm2001_vm1, %v4498_v12  ;;  %2270 = vmatmul.bf16.vlgmr.msra.gmra.mxu3 %v4496_v11  ;;  %v3025_v17 = vld [vmem:[%s4417_s24 + $0x270] sm:$0xf0] }
 0x189   : > { %2314 = vmatpush.bf16.msrb.mxu1 %v3208_v18  ;;  %2329 = vmatpush.bf16.msrb.mxu3 %v2037_v14  ;;  %v2953_v14 = vld [vmem:[%s4417_s24 + $0x1e8] sm:$0xf0]  ;;  %v3215_v18 = vld [vmem:[%s4417_s24 + $0x3b0] sm:$0xf] }
 0x18a   : > { %2308 = vmatpush.bf16.msra.mxu0 %v3268_v28  ;;  %2295 = vmatpush.bf16.msra.mxu2 %v2756_v30  ;;  %v2956_v22 = vor.u32 %v3621_v10, %v2953_v14  ;;  %v3216_v27 = vor.u32 %v3694_v19, %v3215_v18  ;;  %v3605_v28 = vld [vmem:[%s4417_s24 + $0x12c] sm:$0xf]  ;;  %v3092_v10 = vor.u32 %v3654_v63, %v3089_v0  ;;  %v3766_v14 = vld [vmem:[%s4417_s24 + $0x634] sm:$0xf]  ;;  %v2895_v19 = vld [vmem:[%s4417_s24 + $0x130] sm:$0xf] }
 0x18b   : > { %v3701_v30 = vld [vmem:[%s4417_s24 + $0x42c] sm:$0xf]  ;;  %v2892_v37 = vor.u32 %v3605_v28, %v2889_v29  ;;  %v3473_v28 = vld [vmem:[%s4417_s24 + $0x5f0] sm:$0xf0]  ;;  %v4863_v29 = vld [vmem:[%s4417_s24 + $0x6b8] sm:$0xff] }
 0x18d   : > { %2315 = vmatpush.bf16.msrb.mxu1 %v3144_v31  ;;  %2330 = vmatpush.bf16.msrb.mxu3 %v3528_v32  ;;  %v3273_v31 = vld [vmem:[%s4417_s24 + $0x468] sm:$0xf0]  ;;  %v3151_v32 = vld [vmem:[%s4417_s24 + $0x330] sm:$0xf] }
 0x18e   : > { %2340 = vmatpush.bf16.msrb.mxu0 %v3212_v33  ;;  %2355 = vmatpush.bf16.msrb.mxu2 %v2040_v40  ;;  %v3678_v33 = vld [vmem:[%s4417_s24 + $0x36c] sm:$0xf0]  ;;  %v1789_v40 = vpack.c.b16 %v1565_v25, %v1565_v25  ;;  %v3276_v42 = vor.u32 %v3701_v30, %v3273_v31 }
 0x18f   : > { %3558 = vmatmul.msk.bf16.vlgmr.msra.gmra.mxu0 %vm2001_vm1, %v4498_v12  ;;  %2296 = vmatmul.bf16.vlgmr.msra.gmra.mxu2 %v4496_v11 }
 0x190   : > { %v2043_v53 = vsel %vm2005_vm0, %v1789_v40, 0  ;;  %v3726_v40 = vld [vmem:[%s4417_s24 + $0x4ec] sm:$0xf0] }
 0x191   : > { %2316 = vmatpush.bf16.msrb.mxu1 %v3080_v43  ;;  %2331 = vmatpush.bf16.msrb.mxu3 %v3464_v44  ;;  %v3152_v43 = vor.u32 %v3678_v33, %v3151_v32  ;;  %v3589_v44 = vld [vmem:[%s4417_s24 + $0xac] sm:$0xf]  ;;  %v3622_v32 = vld [vmem:[%s4417_s24 + $0x1b4] sm:$0xf] }
 0x192   : > { %2341 = vmatpush.bf16.msrb.mxu0 %v3148_v45  ;;  %2356 = vmatpush.bf16.msrb.mxu2 %v3532_v49  ;;  %v2825_v45 = vld [vmem:[%s4417_s24 + $0xe8] sm:$0xf0]  ;;  %v2760_v49 = vor.u32 %v3581_v39, %v2759_v38  ;;  %v2961_v33 = vld [vmem:[%s4417_s24 + $0x1f0] sm:$0xf0]  ;;  %v2831_v38 = vld [vmem:[%s4417_s24 + $0xb0] sm:$0xf] }
 0x193   : > { %v2828_v52 = vor.u32 %v3589_v44, %v2825_v45  ;;  %v3343_v39 = vld [vmem:[%s4417_s24 + $0x4b0] sm:$0xf]  ;;  %v2964_v45 = vor.u32 %v3622_v32, %v2961_v33  ;;  %v3479_v32 = vld [vmem:[%s4417_s24 + $0x5b8] sm:$0xf] }
 0x194   : > { %v3344_v51 = vor.u32 %v3726_v40, %v3343_v39  ;;  %v3767_v39 = vld [vmem:[%s4417_s24 + $0x63c] sm:$0xf] }
 0x195   : > { %2317 = vmatpush.bf16.msrb.mxu1 %v3016_v55  ;;  %2332 = vmatpush.bf16.msrb.mxu3 %v3400_v56  ;;  %v1790_v55 = vpack.c.b16 %v1566_v41, %v1566_v41  ;;  %v3088_v56 = vor.u32 %v3662_v48, %v3087_v47  ;;  %v1567_v41 = vunpack.c.l.b16 %v4863_v29  ;;  %v3734_v47 = vld [vmem:[%s4417_s24 + $0x534] sm:$0xf]  ;;  %v3545_v40 = vld [vmem:[%s4417_s24 + $0x678] sm:$0xf0] }
 0x196   : > { %2342 = vmatpush.bf16.msrb.mxu0 %v3084_v57  ;;  %2357 = vmatpush.bf16.msrb.mxu2 %v3468_v61  ;;  %v2761_v57 = vld [vmem:[%s4417_s24 + $0x68] sm:$0xf0]  ;;  %v3023_v61 = vld [vmem:[%s4417_s24 + $0x230] sm:$0xf]  ;;  %v3409_v48 = vld [vmem:[%s4417_s24 + $0x570] sm:$0xf0] }
 0x197   : > { %v2764_v1 = vor.u32 %v3573_v54, %v2761_v57  ;;  %v3024_v4 = vor.u32 %v3646_v62, %v3023_v61  ;;  %v3412_v54 = vor.u32 %v3734_v47, %v3409_v48  ;;  %v3710_v57 = vld [vmem:[%s4417_s24 + $0x46c] sm:$0xf0]  ;;  %v1791_v58 = vpack.c.b16 %v1567_v41, %v1567_v41  ;;  %v3718_v61 = vld [vmem:[%s4417_s24 + $0x4b4] sm:$0xf]  ;;  %v3415_v47 = vld [vmem:[%s4417_s24 + $0x538] sm:$0xf] }
 0x198   : > { %v2076_v9 = vpop.f32.mrf.mxu1  ;;  %v3345_v62 = vld [vmem:[%s4417_s24 + $0x4f0] sm:$0xf0]  ;;  %v3548_v48 = vor.u32 %v3767_v39, %v3545_v40  ;;  %v2775_v39 = vld [vmem:[%s4417_s24 + $0x38] sm:$0xf] }
 0x199   : > { %2318 = vmatpush.bf16.msrb.mxu1 %v2952_v3  ;;  %2333 = vmatpush.bf16.msrb.mxu3 %v3336_v6  ;;  %v2046_v3 = vsel %vm2005_vm0, %v1790_v55, 0  ;;  %v3471_v6 = vld [vmem:[%s4417_s24 + $0x5b0] sm:$0xf]  ;;  %v3583_v40 = vld [vmem:[%s4417_s24 + $0x74] sm:$0xf0] }
 0x19a   : > { %2343 = vmatpush.bf16.msrb.mxu0 %v3020_v7  ;;  %2358 = vmatpush.bf16.msrb.mxu2 %v3404_v13  ;;  %v3758_v7 = vld [vmem:[%s4417_s24 + $0x5ec] sm:$0xf0] }
 0x19b   : > { %v3630_v13 = vld [vmem:[%s4417_s24 + $0x1ec] sm:$0xf0]  ;;  %v3472_v18 = vor.u32 %v3758_v7, %v3471_v6  ;;  %v3348_v6 = vor.u32 %v3718_v61, %v3345_v62  ;;  %v2049_v7 = vsel %vm2005_vm0, %v1791_v58, 0  ;;  %v3631_v61 = vld [vmem:[%s4417_s24 + $0x1f4] sm:$0xf0] }
 0x19c   : > { %v2063_v8 = vpop.f32.mrf.mxu0  ;;  %v3582_v55 = vld [vmem:[%s4417_s24 + $0x6c] sm:$0xf0]  ;;  %v3351_v62 = vld [vmem:[%s4417_s24 + $0x4b8] sm:$0xf] }
 0x19d   : > { %2319 = vmatpush.bf16.msrb.mxu1 %v2888_v20  ;;  %2334 = vmatpush.bf16.msrb.mxu3 %v3272_v21  ;;  %v2960_v20 = vor.u32 %v3630_v13, %v2959_v5  ;;  %v3540_v21 = vor.u32 %v3766_v14, %v3537_v15  ;;  %v4858_v25 = vadd.f32 %v2076_v9, %v2063_v8  ;;  %v3574_v8 = vld [vmem:[%s4417_s24 + $0x34] sm:$0xf]  ;;  %v1568_v9 = vunpack.c.h.b16 %v4863_v29 }
 0x19e   : > { %2344 = vmatpush.bf16.msrb.mxu0 %v2956_v22  ;;  %2359 = vmatpush.bf16.msrb.mxu2 %v3340_v26  ;;  %v3614_v22 = vld [vmem:[%s4417_s24 + $0x16c] sm:$0xf0]  ;;  %v3028_v26 = vor.u32 %v3638_v16, %v3025_v17  ;;  %v2102_v31 = vpop.f32.mrf.mxu3  ;;  %v2769_v14 = vld [vmem:[%s4417_s24 + $0x70] sm:$0xf0]  ;;  %v3159_v17 = vld [vmem:[%s4417_s24 + $0x338] sm:$0xf] }
 0x19f   : > { %v2896_v36 = vor.u32 %v3614_v22, %v2895_v19  ;;  %v3702_v15 = vld [vmem:[%s4417_s24 + $0x434] sm:$0xf]  ;;  %v3543_v19 = vld [vmem:[%s4417_s24 + $0x638] sm:$0xf]  ;;  %v3225_v22 = vld [vmem:[%s4417_s24 + $0x3f8] sm:$0xf0]  ;;  %v1792_v24 = vpack.c.b16 %v1568_v9, %v1568_v9 }
 0x1a0   : > { %3559 = vmatmul.msk.bf16.vlgmr.msrb.gmra.mxu3 %vm2001_vm1, %v4498_v12  ;;  %v2078_v44 = vpop.f32.mrf.mxu1  ;;  %v3281_v16 = vld [vmem:[%s4417_s24 + $0x470] sm:$0xf0] }
 0x1a1   : > { %2366 = vmatpush.bf16.msra.mxu3 %v3216_v27  ;;  %2320 = vmatpush.bf16.msrb.mxu1 %v2824_v34  ;;  %v3750_v27 = vld [vmem:[%s4417_s24 + $0x5b4] sm:$0xf]  ;;  %v3284_v23 = vor.u32 %v3702_v15, %v3281_v16  ;;  %v3615_v15 = vld [vmem:[%s4417_s24 + $0x174] sm:$0xf0] }
 0x1a2   : > { %2345 = vmatpush.bf16.msrb.mxu0 %v2892_v37  ;;  %2360 = vmatpush.bf16.msrb.mxu2 %v3276_v42  ;;  %v2089_v30 = vpop.f32.mrf.mxu2  ;;  %v3476_v37 = vor.u32 %v3750_v27, %v3473_v28  ;;  %v3287_v16 = vld [vmem:[%s4417_s24 + $0x438] sm:$0xf] }
 0x1a3   : > { %v4868_v34 = vadd.f32 %v2102_v31, %v2089_v30  ;;  %v3095_v30 = vld [vmem:[%s4417_s24 + $0x2b8] sm:$0xf] }
 0x1a4   : > { %v3663_v31 = vld [vmem:[%s4417_s24 + $0x2f4] sm:$0xf0] }
 0x1a5   : > { %2367 = vmatpush.bf16.msra.mxu3 %v3152_v43  ;;  %2321 = vmatpush.bf16.msrb.mxu1 %v2760_v49  ;;  %v2470_v42 = vpack.c.bf16 %v4868_v34, %v4858_v25  ;;  %v2065_v43 = vpop.f32.mrf.mxu0  ;;  %v3606_v49 = vld [vmem:[%s4417_s24 + $0x134] sm:$0xf] }
 0x1a6   : > { %2392 = vmatpush.bf16.msra.mxu2 %v3220_v46  ;;  %2346 = vmatpush.bf16.msrb.mxu0 %v2828_v52  ;;  %v3598_v46 = vld [vmem:[%s4417_s24 + $0xec] sm:$0xf0]  ;;  %v2900_v59 = vor.u32 %v3606_v49, %v2897_v50  ;;  %v2104_v0 = vpop.f32.mrf.mxu3  ;;  %v3743_v49 = vld [vmem:[%s4417_s24 + $0x574] sm:$0xf0]  ;;  %v3655_v50 = vld [vmem:[%s4417_s24 + $0x2bc] sm:$0xf] }
 0x1a7   : > { %3560 = vmatmul.msk.bf16.vlgmr.msrb.gmra.mxu2 %vm2001_vm1, %v4498_v12  ;;  %2478 = vst [vmem:[%s4873_s14] sm:$0xff] %v2470_v42  ;;  %v2767_v52 = vld [vmem:[%s4417_s24 + $0x30] sm:$0xf]  ;;  %v3096_v42 = vor.u32 %v3663_v31, %v3095_v30  ;;  %v3416_v58 = vor.u32 %v3743_v49, %v3415_v47  ;;  %v3599_v30 = vld [vmem:[%s4417_s24 + $0xf4] sm:$0xf0]  ;;  %v3575_v47 = vld [vmem:[%s4417_s24 + $0x3c] sm:$0xf] }
 0x1a8   : > { %2322 = vmatmul.bf16.vlgmr.msrb.gmra.mxu1 %v4496_v11  ;;  %v2768_v5 = vor.u32 %v3582_v55, %v2767_v52 }
 0x1a9   : > { %2381 = vmatpush.bf16.msra.mxu1 %v2043_v53  ;;  %2368 = vmatpush.bf16.msra.mxu3 %v3088_v56  ;;  %v2832_v53 = vor.u32 %v3598_v46, %v2831_v38  ;;  %v3279_v56 = vld [vmem:[%s4417_s24 + $0x430] sm:$0xf]  ;;  %v2052_v38 = vsel %vm2005_vm0, %v1792_v24, 0  ;;  %v3647_v46 = vld [vmem:[%s4417_s24 + $0x274] sm:$0xf0] }
 0x1aa   : > { %2393 = vmatpush.bf16.msra.mxu2 %v3156_v60  ;;  %2347 = vmatpush.bf16.msrb.mxu0 %v2764_v1  ;;  %v3590_v60 = vld [vmem:[%s4417_s24 + $0xb4] sm:$0xf]  ;;  %v2091_v63 = vpop.f32.mrf.mxu2 }
 0x1ab   : > { %v2833_v1 = vld [vmem:[%s4417_s24 + $0xf0] sm:$0xf0] }
 0x1ad   : > { %2382 = vmatpush.bf16.msra.mxu1 %v3536_v2  ;;  %2369 = vmatpush.bf16.msra.mxu3 %v3024_v4  ;;  %v3223_v2 = vld [vmem:[%s4417_s24 + $0x3b8] sm:$0xf]  ;;  %v3280_v4 = vor.u32 %v3710_v57, %v3279_v56 }
 0x1ae   : > { %2407 = vmatpush.bf16.msra.mxu0 %v2046_v3  ;;  %2394 = vmatpush.bf16.msra.mxu2 %v3092_v10  ;;  %v3695_v3 = vld [vmem:[%s4417_s24 + $0x3f4] sm:$0xf0]  ;;  %v2836_v10 = vor.u32 %v3590_v60, %v2833_v1 }
 0x1af   : > { %2348 = vmatmul.bf16.vlgmr.msrb.gmra.mxu0 %v4496_v11  ;;  %v3224_v13 = vor.u32 %v3695_v3, %v3223_v2  ;;  %v2967_v60 = vld [vmem:[%s4417_s24 + $0x1b8] sm:$0xf]  ;;  %v3639_v3 = vld [vmem:[%s4417_s24 + $0x23c] sm:$0xf] }
 0x1b0   : > { %v3727_v2 = vld [vmem:[%s4417_s24 + $0x4f4] sm:$0xf0]  ;;  %v2968_v9 = vor.u32 %v3631_v61, %v2967_v60 }
 0x1b1   : > { %2383 = vmatpush.bf16.msra.mxu1 %v3472_v18  ;;  %2370 = vmatpush.bf16.msra.mxu3 %v2960_v20  ;;  %v3679_v18 = vld [vmem:[%s4417_s24 + $0x374] sm:$0xf0] }
 0x1b2   : > { %2408 = vmatpush.bf16.msra.mxu0 %v3540_v21  ;;  %2395 = vmatpush.bf16.msra.mxu2 %v3028_v26  ;;  %v3775_v20 = vld [vmem:[%s4417_s24 + $0x674] sm:$0xf0]  ;;  %v3687_v21 = vld [vmem:[%s4417_s24 + $0x3bc] sm:$0xf]  ;;  %v2772_v26 = vor.u32 %v3574_v8, %v2769_v14  ;;  %v3160_v27 = vor.u32 %v3679_v18, %v3159_v17 }
 0x1b3   : > { %v3544_v28 = vor.u32 %v3775_v20, %v3543_v19  ;;  %v3228_v29 = vor.u32 %v3687_v21, %v3225_v22  ;;  %v2128_v33 = vpop.f32.mrf.mxu3  ;;  %v3711_v18 = vld [vmem:[%s4417_s24 + $0x474] sm:$0xf0]  ;;  %v3623_v19 = vld [vmem:[%s4417_s24 + $0x1bc] sm:$0xf] }
 0x1b4   : > { %v2969_v20 = vld [vmem:[%s4417_s24 + $0x1f8] sm:$0xf0] }
 0x1b5   : > { %2384 = vmatpush.bf16.msra.mxu1 %v3408_v35  ;;  %2371 = vmatpush.bf16.msra.mxu3 %v2896_v36  ;;  %v3759_v35 = vld [vmem:[%s4417_s24 + $0x5f4] sm:$0xf0]  ;;  %v3671_v36 = vld [vmem:[%s4417_s24 + $0x33c] sm:$0xf]  ;;  %v2115_v41 = vpop.f32.mrf.mxu1 }
 0x1b6   : > { %2409 = vmatpush.bf16.msra.mxu0 %v3476_v37  ;;  %2396 = vmatpush.bf16.msra.mxu2 %v2964_v45  ;;  %v3161_v37 = vld [vmem:[%s4417_s24 + $0x378] sm:$0xf0]  ;;  %v3480_v43 = vor.u32 %v3759_v35, %v3479_v32  ;;  %v3031_v45 = vld [vmem:[%s4417_s24 + $0x238] sm:$0xf]  ;;  %v4932_v55 = vadd.f32 %v2128_v33, %v2115_v41 }
 0x1b7   : > { %v3164_v44 = vor.u32 %v3671_v36, %v3161_v37  ;;  %v3032_v56 = vor.u32 %v3647_v46, %v3031_v45  ;;  %v3719_v22 = vld [vmem:[%s4417_s24 + $0x4bc] sm:$0xf] }
 0x1b8   : > { %v3607_v32 = vld [vmem:[%s4417_s24 + $0x13c] sm:$0xf] }
 0x1b9   : > { %2385 = vmatpush.bf16.msra.mxu1 %v3344_v51  ;;  %2372 = vmatpush.bf16.msra.mxu3 %v2832_v53  ;;  %v3097_v51 = vld [vmem:[%s4417_s24 + $0x2f8] sm:$0xf0] }
 0x1ba   : > { %2410 = vmatpush.bf16.msra.mxu0 %v3412_v54  ;;  %2397 = vmatpush.bf16.msra.mxu2 %v2900_v59  ;;  %v2154_v52 = vpop.f32.mrf.mxu2  ;;  %v3751_v53 = vld [vmem:[%s4417_s24 + $0x5bc] sm:$0xf]  ;;  %v3100_v59 = vor.u32 %v3655_v50, %v3097_v51 }
 0x1bb   : > { %v3481_v54 = vld [vmem:[%s4417_s24 + $0x5f8] sm:$0xf0]  ;;  %v2130_v0 = vpop.f32.mrf.mxu3 }
 0x1bc   : > { %v2141_v57 = vpop.f32.mrf.mxu0  ;;  %v3484_v1 = vor.u32 %v3751_v53, %v3481_v54  ;;  %v2905_v33 = vld [vmem:[%s4417_s24 + $0x178] sm:$0xf0] }
 0x1bd   : > { %2386 = vmatpush.bf16.msra.mxu1 %v3280_v4  ;;  %2373 = vmatpush.bf16.msra.mxu3 %v2768_v5  ;;  %v4937_v63 = vadd.f32 %v2154_v52, %v2141_v57  ;;  %v3033_v4 = vld [vmem:[%s4417_s24 + $0x278] sm:$0xf0] }
 0x1be   : > { %2411 = vmatpush.bf16.msra.mxu0 %v3348_v6  ;;  %2398 = vmatpush.bf16.msra.mxu2 %v2836_v10  ;;  %v3735_v5 = vld [vmem:[%s4417_s24 + $0x53c] sm:$0xf]  ;;  %v2903_v10 = vld [vmem:[%s4417_s24 + $0x138] sm:$0xf]  ;;  %v3036_v14 = vor.u32 %v3639_v3, %v3033_v4 }
 0x1bf   : > { %v3417_v6 = vld [vmem:[%s4417_s24 + $0x578] sm:$0xf0]  ;;  %v2471_v8 = vpack.c.bf16 %v4937_v63, %v4932_v55  ;;  %v2904_v24 = vor.u32 %v3615_v15, %v2903_v10 }
 0x1c0   : > { %3561 = vmatmul.msk.bf16.vlgmr.msra.gmra.mxu1 %vm2001_vm1, %v4498_v12  ;;  %2374 = vmatmul.bf16.vlgmr.msra.gmra.mxu3 %v4496_v11  ;;  %v3420_v17 = vor.u32 %v3735_v5, %v3417_v6  ;;  %v3703_v35 = vld [vmem:[%s4417_s24 + $0x43c] sm:$0xf] }
 0x1c1   : > { %2418 = vmatpush.bf16.msrb.mxu1 %v3224_v13  ;;  %2433 = vmatpush.bf16.msrb.mxu3 %v2049_v7  ;;  %v2117_v7 = vpop.f32.mrf.mxu1  ;;  %v3352_v13 = vor.u32 %v3727_v2, %v3351_v62  ;;  %2479 = vst [vmem:[%s4873_s14 + $0x8] sm:$0xff] %v2471_v8  ;;  %v3289_v36 = vld [vmem:[%s4417_s24 + $0x478] sm:$0xf0] }
 0x1c2   : > { %2412 = vmatpush.bf16.msra.mxu0 %v3284_v23  ;;  %2399 = vmatpush.bf16.msra.mxu2 %v2772_v26  ;;  %v2156_v21 = vpop.f32.mrf.mxu2  ;;  %v3353_v23 = vld [vmem:[%s4417_s24 + $0x4f8] sm:$0xf0]  ;;  %v3292_v41 = vor.u32 %v3703_v35, %v3289_v36 }
 0x1c3   : > { %v3356_v31 = vor.u32 %v3719_v22, %v3353_v23 }
 0x1c4   : > { %v2143_v26 = vpop.f32.mrf.mxu0 }
 0x1c5   : > { %2419 = vmatpush.bf16.msrb.mxu1 %v3160_v27  ;;  %2434 = vmatpush.bf16.msrb.mxu3 %v3544_v28  ;;  %v3288_v27 = vor.u32 %v3711_v18, %v3287_v16  ;;  %v2972_v28 = vor.u32 %v3623_v19, %v2969_v20 }
 0x1c6   : > { %2444 = vmatpush.bf16.msrb.mxu0 %v3228_v29  ;;  %2459 = vmatpush.bf16.msrb.mxu2 %v2052_v38  ;;  %v2839_v29 = vld [vmem:[%s4417_s24 + $0xb8] sm:$0xf]  ;;  %v2908_v38 = vor.u32 %v3607_v32, %v2905_v33 }
 0x1c7   : > { %3562 = vmatmul.msk.bf16.vlgmr.msra.gmra.mxu0 %vm2001_vm1, %v4498_v12  ;;  %2400 = vmatmul.bf16.vlgmr.msra.gmra.mxu2 %v4496_v11  ;;  %v2840_v37 = vor.u32 %v3599_v30, %v2839_v29 }
 0x1c9   : > { %2420 = vmatpush.bf16.msrb.mxu1 %v3096_v42  ;;  %2435 = vmatpush.bf16.msrb.mxu3 %v3480_v43  ;;  %v3591_v42 = vld [vmem:[%s4417_s24 + $0xbc] sm:$0xf] }
 0x1ca   : > { %2445 = vmatpush.bf16.msrb.mxu0 %v3164_v44  ;;  %2460 = vmatpush.bf16.msrb.mxu2 %v3548_v48  ;;  %v2841_v43 = vld [vmem:[%s4417_s24 + $0xf8] sm:$0xf0]  ;;  %v2776_v44 = vor.u32 %v3583_v40, %v2775_v39 }
 0x1cb   : > { %v2844_v46 = vor.u32 %v3591_v42, %v2841_v43  ;;  %v2777_v48 = vld [vmem:[%s4417_s24 + $0x78] sm:$0xf0] }
 0x1cc   : > { %v2780_v49 = vor.u32 %v3575_v47, %v2777_v48 }
 0x1cd   : > { %2421 = vmatpush.bf16.msrb.mxu1 %v3032_v56  ;;  %2436 = vmatpush.bf16.msrb.mxu3 %v3416_v58  ;;  %v2180_v45 = vpop.f32.mrf.mxu1 }
 0x1ce   : > { %2446 = vmatpush.bf16.msrb.mxu0 %v3100_v59  ;;  %2461 = vmatpush.bf16.msrb.mxu2 %v3484_v1 }
 0x1d1   : > { %2422 = vmatpush.bf16.msrb.mxu1 %v2968_v9  ;;  %2437 = vmatpush.bf16.msrb.mxu3 %v3352_v13 }
 0x1d2   : > { %2447 = vmatpush.bf16.msrb.mxu0 %v3036_v14  ;;  %2462 = vmatpush.bf16.msrb.mxu2 %v3420_v17 }
 0x1d3   : > { %v2167_v51 = vpop.f32.mrf.mxu3 }
 0x1d4   : > { %v2206_v50 = vpop.f32.mrf.mxu0  ;;  %v4972_v53 = vadd.f32 %v2180_v45, %v2167_v51 }
 0x1d5   : > { %2423 = vmatpush.bf16.msrb.mxu1 %v2904_v24  ;;  %2438 = vmatpush.bf16.msrb.mxu3 %v3288_v27  ;;  %v2182_v52 = vpop.f32.mrf.mxu1 }
 0x1d6   : > { %2448 = vmatpush.bf16.msrb.mxu0 %v2972_v28  ;;  %2463 = vmatpush.bf16.msrb.mxu2 %v3356_v31 }
 0x1d8   : > { %3563 = vmatmul.msk.bf16.vlgmr.msrb.gmra.mxu3 %vm2001_vm1, %v4498_v12 }
 0x1d9   : > { %2424 = vmatpush.bf16.msrb.mxu1 %v2840_v37 }
 0x1da   : > { %2449 = vmatpush.bf16.msrb.mxu0 %v2908_v38  ;;  %2464 = vmatpush.bf16.msrb.mxu2 %v3292_v41  ;;  %v2193_v54 = vpop.f32.mrf.mxu2 }
 0x1db   : > { %v4975_v56 = vadd.f32 %v2206_v50, %v2193_v54  ;;  %v2169_v58 = vpop.f32.mrf.mxu3 }
 0x1dc   : > { %v2208_v57 = vpop.f32.mrf.mxu0 }
 0x1dd   : > { %2425 = vmatpush.bf16.msrb.mxu1 %v2776_v44  ;;  %3564 = vmatmul.msk.bf16.vlgmr.msrb.gmra.mxu2 %vm2001_vm1, %v4498_v12  ;;  %v2472_v12 = vpack.c.bf16 %v4975_v56, %v4972_v53 }
 0x1de   : > { %2450 = vmatpush.bf16.msrb.mxu0 %v2844_v46 }
 0x1df   : > { %2480 = vst [vmem:[%s4873_s14 + $0x10] sm:$0xff] %v2472_v12 }
 0x1e0   : > { %2426 = vmatmul.bf16.vlgmr.msrb.gmra.mxu1 %v4496_v11 }
 0x1e2   : > { %2451 = vmatpush.bf16.msrb.mxu0 %v2780_v49  ;;  %v2195_v59 = vpop.f32.mrf.mxu2 }
 0x1e5   : > { %2452 = vmatmul.bf16.vlgmr.msrb.gmra.mxu0 %v4496_v11 }
 0x1eb   : > { %v2232_v60 = vpop.f32.mrf.mxu3 }
 0x1ed   : > { %v2219_v61 = vpop.f32.mrf.mxu1 }
 0x1ee   : > { %v4980_v62 = vadd.f32 %v2232_v60, %v2219_v61 }
 0x1f2   : > { %v2258_v1 = vpop.f32.mrf.mxu2 }
 0x1f3   : > { %v2234_v11 = vpop.f32.mrf.mxu3 }
 0x1f4   : > { %v2245_v0 = vpop.f32.mrf.mxu0 }
 0x1f5   : > { %v4982_v2 = vadd.f32 %v2258_v1, %v2245_v0  ;;  %v2221_v3 = vpop.f32.mrf.mxu1 }
 0x1f7   : > { %v2473_v4 = vpack.c.bf16 %v4982_v2, %v4980_v62 }
 0x1f9   : > { %2481 = vst [vmem:[%s4873_s14 + $0x18] sm:$0xff] %v2473_v4 }
 0x1fa   : > { %v2260_v6 = vpop.f32.mrf.mxu2 }
 0x1fc   : > { %v2247_v5 = vpop.f32.mrf.mxu0 }
 0x205   : > { %v2284_v7 = vpop.f32.mrf.mxu1 }
 0x20b   : > { %v2271_v9 = vpop.f32.mrf.mxu3 }
 0x20c   : > { %v2310_v8 = vpop.f32.mrf.mxu0  ;;  %v4987_v13 = vadd.f32 %v2284_v7, %v2271_v9 }
 0x20d   : > { %v2286_v10 = vpop.f32.mrf.mxu1 }
 0x212   : > { %v2297_v14 = vpop.f32.mrf.mxu2 }
 0x213   : > { %v4989_v15 = vadd.f32 %v2310_v8, %v2297_v14  ;;  %v2273_v18 = vpop.f32.mrf.mxu3 }
 0x214   : > { %v2312_v16 = vpop.f32.mrf.mxu0 }
 0x215   : > { %v2474_v17 = vpack.c.bf16 %v4989_v15, %v4987_v13 }
 0x217   : > { %2482 = vst [vmem:[%s4873_s14 + $0x20] sm:$0xff] %v2474_v17 }
 0x21a   : > { %v2299_v19 = vpop.f32.mrf.mxu2 }
 0x223   : > { %v2336_v20 = vpop.f32.mrf.mxu3 }
 0x225   : > { %v2323_v21 = vpop.f32.mrf.mxu1 }
 0x226   : > { %v4994_v22 = vadd.f32 %v2336_v20, %v2323_v21 }
 0x22a   : > { %v2362_v24 = vpop.f32.mrf.mxu2 }
 0x22b   : > { %v2338_v27 = vpop.f32.mrf.mxu3 }
 0x22c   : > { %v2349_v23 = vpop.f32.mrf.mxu0 }
 0x22d   : > { %v4996_v26 = vadd.f32 %v2362_v24, %v2349_v23  ;;  %v2325_v29 = vpop.f32.mrf.mxu1 }
 0x22f   : > { %v2475_v28 = vpack.c.bf16 %v4996_v26, %v4994_v22 }
 0x231   : > { %2483 = vst [vmem:[%s4873_s14 + $0x28] sm:$0xff] %v2475_v28 }
 0x232   : > { %v2364_v31 = vpop.f32.mrf.mxu2 }
 0x234   : > { %v2351_v30 = vpop.f32.mrf.mxu0 }
 0x23d   : > { %v2388_v32 = vpop.f32.mrf.mxu1 }
 0x243   : > { %v2375_v35 = vpop.f32.mrf.mxu3 }
 0x244   : > { %v2414_v33 = vpop.f32.mrf.mxu0  ;;  %v2389_v37 = vadd.f32 %v2388_v32, %v2375_v35 }
 0x245   : > { %v2390_v36 = vpop.f32.mrf.mxu1 }
 0x24a   : > { %v2401_v38 = vpop.f32.mrf.mxu2 }
 0x24b   : > { %v2415_v39 = vadd.f32 %v2414_v33, %v2401_v38  ;;  %v2377_v42 = vpop.f32.mrf.mxu3 }
 0x24c   : > { %v2416_v40 = vpop.f32.mrf.mxu0 }
 0x24d   : > { %v2476_v41 = vpack.c.bf16 %v2415_v39, %v2389_v37 }
 0x24f   : > { %2484 = vst [vmem:[%s4873_s14 + $0x30] sm:$0xff] %v2476_v41 }
 0x252   : > { %v2403_v43 = vpop.f32.mrf.mxu2 }
 0x25b   : > { %v2440_v44 = vpop.f32.mrf.mxu3 }
 0x25d   : > { %v2427_v45 = vpop.f32.mrf.mxu1 }
 0x25e   : > { %v2441_v46 = vadd.f32 %v2440_v44, %v2427_v45 }
 0x260   : > { %v2466_v47 = vpop.f32.mrf.mxu2 }
 0x262   : > { %v2453_v48 = vpop.f32.mrf.mxu0 }
 0x263   : > { %v2467_v49 = vadd.f32 %v2466_v47, %v2453_v48  ;;  %v2442_v50 = vpop.f32.mrf.mxu3 }
 0x265   : > { %v2477_v51 = vpack.c.bf16 %v2467_v49, %v2441_v46  ;;  %v2429_v52 = vpop.f32.mrf.mxu1 }
 0x266   : > { %2489 = sbr.rel (%p3565_p12) target bundleno = 622 (0x26e), region = 55 }
 0x267   : > { %2485 = vst [vmem:[%s4873_s14 + $0x38] sm:$0xff] %v2477_v51 }
 0x268   : > { %v2468_v54 = vpop.f32.mrf.mxu2 }
 0x26a   : > { %v2455_v57 = vpop.f32.mrf.mxu0 }
 0x26b   : > { %vm2490_vm2 = vcmask 7168   ;;  %v3892_v12 = vmov 0.0  }
 0x26c   : > { %2491 = vst.msk [vmem:[%s4614_s30] sm:$0xff] %vm2490_vm2, %v3892_v12 }
 0x26d   : > { %2492 = vst.msk [vmem:[%s4622_s7] sm:$0xff] %vm2490_vm2, %v3892_v12 }
 0x26e PF: > { %v2494_v58 = vadd.f32 %v4868_v34, %v4858_v25  ;;  %v2515_v59 = vmul.f32 %v4858_v25, %v4858_v25  ;;  %v2516_v60 = vmul.f32 %v4868_v34, %v4868_v34  ;;  %v2517_v0 = vmul.f32 %v4932_v55, %v4932_v55 }
 0x26f   : > { %v2518_v11 = vmul.f32 %v4937_v63, %v4937_v63  ;;  %v2519_v5 = vmul.f32 %v4972_v53, %v4972_v53  ;;  %v2520_v34 = vmul.f32 %v4975_v56, %v4975_v56  ;;  %v2521_v8 = vmul.f32 %v4980_v62, %v4980_v62 }
 0x270   : > { %v2495_v61 = vadd.f32 %v2494_v58, %v4932_v55  ;;  %v2531_v3 = vadd.f32 %v2516_v60, %v2515_v59  ;;  %v2522_v10 = vmul.f32 %v4982_v2, %v4982_v2  ;;  %v2523_v16 = vmul.f32 %v4987_v13, %v4987_v13 }
 0x271   : > { %v2524_v18 = vmul.f32 %v4989_v15, %v4989_v15  ;;  %v2525_v20 = vmul.f32 %v4994_v22, %v4994_v22  ;;  %v2526_v23 = vmul.f32 %v4996_v26, %v4996_v26  ;;  %v2527_v27 = vmul.f32 %v2389_v37, %v2389_v37 }
 0x272   : > { %v2496_v1 = vadd.f32 %v2495_v61, %v4937_v63  ;;  %v2532_v25 = vadd.f32 %v2531_v3, %v2517_v0  ;;  %v2528_v30 = vmul.f32 %v2415_v39, %v2415_v39  ;;  %v2529_v32 = vmul.f32 %v2441_v46, %v2441_v46 }
 0x273   : > { %v2530_v36 = vmul.f32 %v2467_v49, %v2467_v49  ;;  %v2493_v40 = vld [vmem:[%s4614_s30] sm:$0xff]  ;;  %vm2512_vm3 = vcmask 7168  }
 0x274   : > { %v2497_v4 = vadd.f32 %v2496_v1, %v4972_v53  ;;  %v2533_v7 = vadd.f32 %v2532_v25, %v2518_v11 }
 0x276   : > { %v2498_v6 = vadd.f32 %v2497_v4, %v4975_v56  ;;  %v2534_v9 = vadd.f32 %v2533_v7, %v2519_v5 }
 0x278   : > { %v2499_v55 = vadd.f32 %v2498_v6, %v4980_v62  ;;  %v2535_v14 = vadd.f32 %v2534_v9, %v2520_v34 }
 0x27a   : > { %v2500_v63 = vadd.f32 %v2499_v55, %v4982_v2  ;;  %v2536_v17 = vadd.f32 %v2535_v14, %v2521_v8 }
 0x27c   : > { %v2501_v53 = vadd.f32 %v2500_v63, %v4987_v13  ;;  %v2537_v19 = vadd.f32 %v2536_v17, %v2522_v10 }
 0x27e   : > { %v2502_v56 = vadd.f32 %v2501_v53, %v4989_v15  ;;  %v2538_v21 = vadd.f32 %v2537_v19, %v2523_v16 }
 0x280   : > { %v2503_v62 = vadd.f32 %v2502_v56, %v4994_v22  ;;  %v2539_v24 = vadd.f32 %v2538_v21, %v2524_v18 }
 0x282   : > { %v2504_v2 = vadd.f32 %v2503_v62, %v4996_v26  ;;  %v2540_v28 = vadd.f32 %v2539_v24, %v2525_v20 }
 0x284   : > { %v2505_v13 = vadd.f32 %v2504_v2, %v2389_v37  ;;  %v2541_v15 = vadd.f32 %v2540_v28, %v2526_v23 }
 0x286   : > { %v2506_v29 = vadd.f32 %v2505_v13, %v2415_v39  ;;  %v2542_v33 = vadd.f32 %v2541_v15, %v2527_v27  ;;  %v2514_v39 = vld [vmem:[%s4622_s7] sm:$0xff] }
 0x288   : > { %v2507_v31 = vadd.f32 %v2506_v29, %v2441_v46  ;;  %v2543_v35 = vadd.f32 %v2542_v33, %v2528_v30 }
 0x28a   : > { %v2508_v22 = vadd.f32 %v2507_v31, %v2467_v49  ;;  %v2544_v38 = vadd.f32 %v2543_v35, %v2529_v32 }
 0x28c   : > { %2509 = vadd.xlane.f32.xlu0 %v2508_v22  ;;  %v2545_v26 = vadd.f32 %v2544_v38, %v2530_v36 }
 0x294   : > { %2546 = vadd.xlane.f32.xlu0 %v2545_v26 }
 0x2ff   : > { %v2510_v37 = vpop.xlane.xlu0 %2509 }
 0x300   : > { %v2511_v41 = vadd.f32 %v2510_v37, %v2493_v40 }
 0x302   : > { %2513 = vst.msk [vmem:[%s4614_s30] sm:$0xff] %vm2512_vm3, %v2511_v41 }
 0x307   : > { %v2547_v42 = vpop.xlane.xlu0 %2546 }
 0x308   : > { %v2548_v43 = vadd.f32 %v2547_v42, %v2514_v39 }
 0x30a   : > { %2549 = vst.msk [vmem:[%s4622_s7] sm:$0xff] %vm2512_vm3, %v2548_v43 }
 0x30b PF: > { %s15_s21 = sadd.s32 1, %s3890_s21   ;;  %s5073_s15 = smov %s3870_s16 }
 0x30c   : > { %p12_p13 = scmp.ge.s32.totalorder %s15_s21, 6   ;;  %s5074_s16 = smov %s3969_s28 }
 0x30d   : > { %s5075_s17 = smov %s3882_s19  ;;  %s5076_s18 = smov %s3886_s20 }
 0x30e   : > { %s5077_s19 = smov %s5080_s22  ;;  %s5078_s20 = smov %s5084_s23 }
 0x30f   :  { %14 = sbr.rel (!%p12_p13) target bundleno = 4 (0x4), region = 114 }

// kernel: unet_encoder_forward.13
= control target key start
LH: loop header
LB: loop body
LE: loop exit
PB: predicated region body
PF: predicated region fallthrough
CT: control target
= control target key end

     0   :  { %s1131_s14 = smov 0   ;;  %s1358_s0 = inlined_call_operand.<no memory space> [shape: f32[1], index: 0, kind: input, shape index: {}]   ;;  %s1359_s1 = inlined_call_operand.vmem [shape: bf16[2,216,512], index: 1, kind: input, shape index: {}]   ;;  %s1360_s2 = inlined_call_operand.vmem [shape: bf16[16,216], index: 2, kind: input, shape index: {}]   ;;  %s1361_s3 = inlined_call_operand.vmem [shape: f32[2,16,512], index: 3, kind: output, shape index: {}]  }
   0x1   :  { %8 = sst [smem:[#allocation2]] %s1358_s0 }
   0x2 LB: > { %s802_s15 = sadd.s32 4294967295, %s1106_s14   ;;  %p806_p0 = scmp.ge.s32.totalorder %s1106_s14, 1  ;;  %s1106_s14 = sphi %s1131_s14, %s14_s14  }
   0x3   : > { %p138_p1 = scmp.lt.s32.totalorder %s1106_s14, 3 }
   0x5   : > { %p139_p2 = pnand %p806_p0, %p138_p1 }
   0x6   : > { %p162_p3 = scmp.lt.s32.totalorder (!%p139_p2), %s802_s15, 1  ;;  %s713_s27 = sld [smem:[#allocation2]] (!%p139_p2) }
   0x7   : > { %142 = sbr.rel (%p139_p2) target bundleno = 376 (0x178), region = 32 }
   0xc   : > { %s1363_s15 = smov (!%p162_p3, %s802_s15), 1  ;;  %vm512_vm0 = vcmask 1043456   ;;  %vm508_vm1 = vcmask 719872  }
   0xd   : > { %s1087_s0 = smul.u32 432, %s1363_s15  ;;  %s1032_s28 = sshll.u32 %s1363_s15, 6 }
   0xe   : > { %s1337_s4 = scalar_lea.vmem %s1361_s3, %s1032_s28 }
   0xf   : > { %s1145_s18 = scalar_lea.vmem %s1359_s1, %s1087_s0 }
  0x10   : > { %v932_v0 = vld [vmem:[%s1145_s18 + $0xe0] sm:$0xf]  ;;  %v1065_v1 = vld [vmem:[%s1145_s18 + $0xec] sm:$0xf0]  ;;  %v1063_v2 = vld [vmem:[%s1145_s18 + $0xe4] sm:$0xf] }
  0x11   : > { %v933_v3 = vor.u32 %v1065_v1, %v932_v0  ;;  %v934_v4 = vld [vmem:[%s1145_s18 + $0xf0] sm:$0xf0]  ;;  %v227_v5 = vld [vmem:[%s1145_s18 + $0x1a0] sm:$0xff]  ;;  %v1061_v10 = vld [vmem:[%s1145_s18 + $0xcc] sm:$0xf0] }
  0x12   : > { %v916_v6 = vld [vmem:[%s1145_s18 + $0xc0] sm:$0xf]  ;;  %v937_v7 = vor.u32 %v1063_v2, %v934_v4  ;;  %v396_v8 = vunpack.c.l.b16 %v227_v5  ;;  %v397_v9 = vunpack.c.h.b16 %v227_v5  ;;  %v1059_v11 = vld [vmem:[%s1145_s18 + $0xc4] sm:$0xf]  ;;  %v918_v12 = vld [vmem:[%s1145_s18 + $0xd0] sm:$0xf0] }
  0x13   : > { %525 = vmatpush.bf16.msra.mxu0 %v933_v3  ;;  %v1012_v13 = vld [vmem:[%s1145_s18 + $0x180] sm:$0xf]  ;;  %v1085_v14 = vld [vmem:[%s1145_s18 + $0x18c] sm:$0xf0]  ;;  %v917_v17 = vor.u32 %v1061_v10, %v916_v6  ;;  %v921_v18 = vor.u32 %v1059_v11, %v918_v12  ;;  %v1083_v19 = vld [vmem:[%s1145_s18 + $0x184] sm:$0xf] }
  0x14   : > { %553 = vmatpush.bf16.msra.mxu2 %v937_v7  ;;  %v452_v15 = vpack.c.b16 %v396_v8, %v396_v8  ;;  %v453_v16 = vpack.c.b16 %v397_v9, %v397_v9  ;;  %v1014_v20 = vld [vmem:[%s1145_s18 + $0x190] sm:$0xf0]  ;;  %v900_v21 = vld [vmem:[%s1145_s18 + $0xa0] sm:$0xf]  ;;  %v1057_v22 = vld [vmem:[%s1145_s18 + $0xac] sm:$0xf0]  ;;  %v1013_v27 = vor.u32 %v1085_v14, %v1012_v13 }
  0x15   : > { %v1055_v23 = vld [vmem:[%s1145_s18 + $0xa4] sm:$0xf]  ;;  %v902_v24 = vld [vmem:[%s1145_s18 + $0xb0] sm:$0xf0]  ;;  %v1017_v28 = vor.u32 %v1083_v19, %v1014_v20  ;;  %v996_v29 = vld [vmem:[%s1145_s18 + $0x160] sm:$0xf]  ;;  %v901_v31 = vor.u32 %v1057_v22, %v900_v21 }
  0x16   : > { %v514_v25 = vsel %vm512_vm0, %v452_v15, 0  ;;  %v517_v26 = vsel %vm512_vm0, %v453_v16, 0  ;;  %v1081_v30 = vld [vmem:[%s1145_s18 + $0x16c] sm:$0xf0]  ;;  %v905_v32 = vor.u32 %v1055_v23, %v902_v24  ;;  %v1079_v33 = vld [vmem:[%s1145_s18 + $0x164] sm:$0xf] }
  0x17   : > { %541 = vmatpush.bf16.msra.mxu1 %v514_v25  ;;  %569 = vmatpush.bf16.msra.mxu3 %v517_v26  ;;  %v998_v34 = vld [vmem:[%s1145_s18 + $0x170] sm:$0xf0]  ;;  %v884_v35 = vld [vmem:[%s1145_s18 + $0x80] sm:$0xf]  ;;  %v1053_v36 = vld [vmem:[%s1145_s18 + $0x8c] sm:$0xf0]  ;;  %v997_v39 = vor.u32 %v1081_v30, %v996_v29 }
  0x18   : > { %526 = vmatpush.bf16.msra.mxu0 %v917_v17  ;;  %554 = vmatpush.bf16.msra.mxu2 %v921_v18  ;;  %v1051_v37 = vld [vmem:[%s1145_s18 + $0x84] sm:$0xf]  ;;  %v886_v38 = vld [vmem:[%s1145_s18 + $0x90] sm:$0xf0]  ;;  %v1001_v40 = vor.u32 %v1079_v33, %v998_v34  ;;  %v980_v41 = vld [vmem:[%s1145_s18 + $0x140] sm:$0xf]  ;;  %v885_v43 = vor.u32 %v1053_v36, %v884_v35 }
  0x19   : > { %v1077_v42 = vld [vmem:[%s1145_s18 + $0x14c] sm:$0xf0]  ;;  %v889_v44 = vor.u32 %v1051_v37, %v886_v38  ;;  %v1075_v45 = vld [vmem:[%s1145_s18 + $0x144] sm:$0xf]  ;;  %v982_v46 = vld [vmem:[%s1145_s18 + $0x150] sm:$0xf0] }
  0x1a   : > { %v868_v47 = vld [vmem:[%s1145_s18 + $0x60] sm:$0xf]  ;;  %v1049_v48 = vld [vmem:[%s1145_s18 + $0x6c] sm:$0xf0]  ;;  %v1047_v49 = vld [vmem:[%s1145_s18 + $0x64] sm:$0xf]  ;;  %v981_v51 = vor.u32 %v1077_v42, %v980_v41  ;;  %v985_v52 = vor.u32 %v1075_v45, %v982_v46 }
  0x1b   : > { %542 = vmatpush.bf16.msra.mxu1 %v1013_v27  ;;  %570 = vmatpush.bf16.msra.mxu3 %v1017_v28  ;;  %v870_v50 = vld [vmem:[%s1145_s18 + $0x70] sm:$0xf0]  ;;  %v964_v53 = vld [vmem:[%s1145_s18 + $0x120] sm:$0xf]  ;;  %v1073_v54 = vld [vmem:[%s1145_s18 + $0x12c] sm:$0xf0]  ;;  %v869_v56 = vor.u32 %v1049_v48, %v868_v47 }
  0x1c   : > { %527 = vmatpush.bf16.msra.mxu0 %v901_v31  ;;  %555 = vmatpush.bf16.msra.mxu2 %v905_v32  ;;  %v1071_v55 = vld [vmem:[%s1145_s18 + $0x124] sm:$0xf]  ;;  %v873_v57 = vor.u32 %v1047_v49, %v870_v50  ;;  %v966_v58 = vld [vmem:[%s1145_s18 + $0x130] sm:$0xf0]  ;;  %v852_v59 = vld [vmem:[%s1145_s18 + $0x40] sm:$0xf]  ;;  %v965_v1 = vor.u32 %v1073_v54, %v964_v53 }
  0x1d   : > { %v1045_v60 = vld [vmem:[%s1145_s18 + $0x4c] sm:$0xf0]  ;;  %v1043_v61 = vld [vmem:[%s1145_s18 + $0x44] sm:$0xf]  ;;  %v854_v62 = vld [vmem:[%s1145_s18 + $0x50] sm:$0xf0]  ;;  %v969_v2 = vor.u32 %v1071_v55, %v966_v58 }
  0x1e   : > { %v228_v63 = vld [vmem:[%s1145_s18 + $0x1a8] sm:$0xff]  ;;  %v948_v3 = vld [vmem:[%s1145_s18 + $0x100] sm:$0xf]  ;;  %v1069_v4 = vld [vmem:[%s1145_s18 + $0x10c] sm:$0xf0]  ;;  %v853_v5 = vor.u32 %v1045_v60, %v852_v59  ;;  %v857_v6 = vor.u32 %v1043_v61, %v854_v62 }
  0x1f   : > { %543 = vmatpush.bf16.msra.mxu1 %v997_v39  ;;  %571 = vmatpush.bf16.msra.mxu3 %v1001_v40  ;;  %v398_v0 = vunpack.c.l.b16 %v228_v63  ;;  %v1067_v7 = vld [vmem:[%s1145_s18 + $0x104] sm:$0xf]  ;;  %v950_v8 = vld [vmem:[%s1145_s18 + $0x110] sm:$0xf0]  ;;  %v836_v9 = vld [vmem:[%s1145_s18 + $0x20] sm:$0xf]  ;;  %v399_v13 = vunpack.c.h.b16 %v228_v63  ;;  %v949_v17 = vor.u32 %v1069_v4, %v948_v3 }
  0x20   : > { %528 = vmatpush.bf16.msra.mxu0 %v885_v43  ;;  %556 = vmatpush.bf16.msra.mxu2 %v889_v44  ;;  %v1041_v10 = vld [vmem:[%s1145_s18 + $0x2c] sm:$0xf0]  ;;  %v1039_v11 = vld [vmem:[%s1145_s18 + $0x24] sm:$0xf]  ;;  %v838_v12 = vld [vmem:[%s1145_s18 + $0x30] sm:$0xf0]  ;;  %v953_v18 = vor.u32 %v1067_v7, %v950_v8 }
  0x21   : > { %v940_v14 = vld [vmem:[%s1145_s18 + $0xe8] sm:$0xf]  ;;  %v1066_v15 = vld [vmem:[%s1145_s18 + $0xf4] sm:$0xf0]  ;;  %v454_v16 = vpack.c.b16 %v398_v0, %v398_v0  ;;  %v1033_v19 = vld [vmem:[%s1360_s2 + $0x4] sm:$0xf]  ;;  %v837_v21 = vor.u32 %v1041_v10, %v836_v9  ;;  %v841_v22 = vor.u32 %v1039_v11, %v838_v12  ;;  %v455_v30 = vpack.c.b16 %v399_v13, %v399_v13 }
  0x22   : > { %v814_v20 = vld [vmem:[%s1360_s2 + $0x8] sm:$0xf0]  ;;  %v820_v23 = vld [vmem:[%s1145_s18] sm:$0xf]  ;;  %v1037_v24 = vld [vmem:[%s1145_s18 + $0xc] sm:$0xf0]  ;;  %v941_v26 = vor.u32 %v1066_v15, %v940_v14 }
  0x23   : > { %544 = vmatpush.bf16.msra.mxu1 %v981_v51  ;;  %572 = vmatpush.bf16.msra.mxu3 %v985_v52  ;;  %v1035_v25 = vld [vmem:[%s1145_s18 + $0x4] sm:$0xf]  ;;  %v822_v27 = vld [vmem:[%s1145_s18 + $0x10] sm:$0xf0]  ;;  %v924_v28 = vld [vmem:[%s1145_s18 + $0xc8] sm:$0xf]  ;;  %v1214_v32 = vor.u32 %v1033_v19, %v814_v20  ;;  %v821_v37 = vor.u32 %v1037_v24, %v820_v23 }
  0x24   : > { %529 = vmatpush.bf16.msra.mxu0 %v869_v56  ;;  %557 = vmatpush.bf16.msra.mxu2 %v873_v57  ;;  %v1062_v29 = vld [vmem:[%s1145_s18 + $0xd4] sm:$0xf0]  ;;  %v520_v31 = vsel %vm512_vm0, %v454_v16, 0  ;;  %v1020_v33 = vld [vmem:[%s1145_s18 + $0x188] sm:$0xf]  ;;  %v825_v38 = vor.u32 %v1035_v25, %v822_v27  ;;  %v523_v43 = vsel %vm512_vm0, %v455_v30, 0 }
  0x25   : > { %v1086_v34 = vld [vmem:[%s1145_s18 + $0x194] sm:$0xf0]  ;;  %v1064_v35 = vld [vmem:[%s1145_s18 + $0xec] sm:$0xf]  ;;  %v942_v36 = vld [vmem:[%s1145_s18 + $0xf8] sm:$0xf0]  ;;  %v925_v41 = vor.u32 %v1062_v29, %v924_v28 }
  0x26   : > { %v812_v39 = vld [vmem:[%s1360_s2] sm:$0xf]  ;;  %v1034_v40 = vld [vmem:[%s1360_s2 + $0x4] sm:$0xf0]  ;;  %v1021_v42 = vor.u32 %v1086_v34, %v1020_v33  ;;  %v1058_v45 = vld [vmem:[%s1145_s18 + $0xb4] sm:$0xf0]  ;;  %v945_v46 = vor.u32 %v1064_v35, %v942_v36 }
  0x27   : > { %545 = vmatpush.bf16.msra.mxu1 %v965_v1  ;;  %573 = vmatpush.bf16.msra.mxu3 %v969_v2  ;;  %v908_v44 = vld [vmem:[%s1145_s18 + $0xa8] sm:$0xf]  ;;  %v1082_v48 = vld [vmem:[%s1145_s18 + $0x174] sm:$0xf0]  ;;  %v1060_v49 = vld [vmem:[%s1145_s18 + $0xcc] sm:$0xf]  ;;  %v1236_v50 = vor.u32 %v1034_v40, %v812_v39 }
  0x28   : > { %530 = vmatpush.bf16.msra.mxu0 %v853_v5  ;;  %558 = vmatpush.bf16.msra.mxu2 %v857_v6  ;;  %v1004_v47 = vld [vmem:[%s1145_s18 + $0x168] sm:$0xf]  ;;  %v926_v51 = vld [vmem:[%s1145_s18 + $0xd8] sm:$0xf0]  ;;  %v1084_v52 = vld [vmem:[%s1145_s18 + $0x18c] sm:$0xf]  ;;  %v909_v54 = vor.u32 %v1058_v45, %v908_v44 }
  0x29   : > { %v1022_v53 = vld [vmem:[%s1145_s18 + $0x198] sm:$0xf0]  ;;  %v1005_v55 = vor.u32 %v1082_v48, %v1004_v47  ;;  %v892_v56 = vld [vmem:[%s1145_s18 + $0x88] sm:$0xf]  ;;  %v1054_v57 = vld [vmem:[%s1145_s18 + $0x94] sm:$0xf0]  ;;  %v929_v58 = vor.u32 %v1060_v49, %v926_v51 }
  0x2a   : > { %v1025_v59 = vor.u32 %v1084_v52, %v1022_v53  ;;  %v988_v60 = vld [vmem:[%s1145_s18 + $0x148] sm:$0xf]  ;;  %v1078_v61 = vld [vmem:[%s1145_s18 + $0x154] sm:$0xf0]  ;;  %v1056_v62 = vld [vmem:[%s1145_s18 + $0xac] sm:$0xf]  ;;  %v893_v2 = vor.u32 %v1054_v57, %v892_v56 }
  0x2b   : > { %546 = vmatpush.bf16.msra.mxu1 %v949_v17  ;;  %574 = vmatpush.bf16.msra.mxu3 %v953_v18  ;;  %v910_v63 = vld [vmem:[%s1145_s18 + $0xb8] sm:$0xf0]  ;;  %v1080_v0 = vld [vmem:[%s1145_s18 + $0x16c] sm:$0xf]  ;;  %v989_v3 = vor.u32 %v1078_v61, %v988_v60  ;;  %v876_v4 = vld [vmem:[%s1145_s18 + $0x68] sm:$0xf] }
  0x2c   : > { %531 = vmatpush.bf16.msra.mxu0 %v837_v21  ;;  %559 = vmatpush.bf16.msra.mxu2 %v841_v22  ;;  %v1006_v1 = vld [vmem:[%s1145_s18 + $0x178] sm:$0xf0]  ;;  %v1050_v5 = vld [vmem:[%s1145_s18 + $0x74] sm:$0xf0]  ;;  %v913_v6 = vor.u32 %v1056_v62, %v910_v63  ;;  %v972_v8 = vld [vmem:[%s1145_s18 + $0x128] sm:$0xf] }
  0x2d   : > { %v1009_v7 = vor.u32 %v1080_v0, %v1006_v1  ;;  %v1074_v9 = vld [vmem:[%s1145_s18 + $0x134] sm:$0xf0]  ;;  %v1052_v10 = vld [vmem:[%s1145_s18 + $0x8c] sm:$0xf]  ;;  %v894_v11 = vld [vmem:[%s1145_s18 + $0x98] sm:$0xf0]  ;;  %v877_v14 = vor.u32 %v1050_v5, %v876_v4 }
  0x2e   : > { %1027 = vmatmul.msk.bf16.vlgmr.msra.gmra.mxu3 %vm508_vm1, %v1214_v32  ;;  %1026 = vmatmul.msk.bf16.vlgmr.msra.gmra.mxu1 %vm508_vm1, %v1214_v32  ;;  %v1076_v12 = vld [vmem:[%s1145_s18 + $0x14c] sm:$0xf]  ;;  %v990_v13 = vld [vmem:[%s1145_s18 + $0x158] sm:$0xf0]  ;;  %v973_v15 = vor.u32 %v1074_v9, %v972_v8  ;;  %v860_v16 = vld [vmem:[%s1145_s18 + $0x48] sm:$0xf]  ;;  %v897_v18 = vor.u32 %v1052_v10, %v894_v11 }
  0x2f   : > { %581 = vmatpush.bf16.msrb.mxu1 %v941_v26  ;;  %597 = vmatpush.bf16.msrb.mxu3 %v520_v31  ;;  %v1046_v17 = vld [vmem:[%s1145_s18 + $0x54] sm:$0xf0]  ;;  %v993_v19 = vor.u32 %v1076_v12, %v990_v13  ;;  %v956_v20 = vld [vmem:[%s1145_s18 + $0x108] sm:$0xf]  ;;  %v1048_v22 = vld [vmem:[%s1145_s18 + $0x6c] sm:$0xf] }
  0x30   : > { %532 = vmatpush.bf16.msra.mxu0 %v821_v37  ;;  %560 = vmatpush.bf16.msra.mxu2 %v825_v38  ;;  %v1070_v21 = vld [vmem:[%s1145_s18 + $0x114] sm:$0xf0]  ;;  %v878_v23 = vld [vmem:[%s1145_s18 + $0x78] sm:$0xf0]  ;;  %v1072_v24 = vld [vmem:[%s1145_s18 + $0x12c] sm:$0xf]  ;;  %v861_v26 = vor.u32 %v1046_v17, %v860_v16 }
  0x31   : > { %v974_v25 = vld [vmem:[%s1145_s18 + $0x138] sm:$0xf0]  ;;  %v957_v27 = vor.u32 %v1070_v21, %v956_v20  ;;  %v881_v28 = vor.u32 %v1048_v22, %v878_v23  ;;  %v844_v30 = vld [vmem:[%s1145_s18 + $0x28] sm:$0xf]  ;;  %v1042_v31 = vld [vmem:[%s1145_s18 + $0x34] sm:$0xf0] }
  0x32   : > { %v977_v29 = vor.u32 %v1072_v24, %v974_v25  ;;  %v1044_v33 = vld [vmem:[%s1145_s18 + $0x4c] sm:$0xf]  ;;  %v862_v34 = vld [vmem:[%s1145_s18 + $0x58] sm:$0xf0]  ;;  %v845_v37 = vor.u32 %v1042_v31, %v844_v30  ;;  %v828_v40 = vld [vmem:[%s1145_s18 + $0x8] sm:$0xf] }
  0x33   : > { %582 = vmatpush.bf16.msrb.mxu1 %v925_v41  ;;  %598 = vmatpush.bf16.msrb.mxu3 %v1021_v42  ;;  %v1068_v35 = vld [vmem:[%s1145_s18 + $0x10c] sm:$0xf]  ;;  %v958_v36 = vld [vmem:[%s1145_s18 + $0x118] sm:$0xf0]  ;;  %v865_v38 = vor.u32 %v1044_v33, %v862_v34  ;;  %v1038_v41 = vld [vmem:[%s1145_s18 + $0x14] sm:$0xf0] }
  0x34   : > { %609 = vmatpush.bf16.msrb.mxu0 %v945_v46  ;;  %625 = vmatpush.bf16.msrb.mxu2 %v523_v43  ;;  %v961_v39 = vor.u32 %v1068_v35, %v958_v36  ;;  %v1040_v42 = vld [vmem:[%s1145_s18 + $0x2c] sm:$0xf]  ;;  %v846_v43 = vld [vmem:[%s1145_s18 + $0x38] sm:$0xf0]  ;;  %v829_v44 = vor.u32 %v1038_v41, %v828_v40 }
  0x35   : > { %561 = vmatmul.bf16.vlgmr.msra.gmra.mxu2 %v1236_v50  ;;  %533 = vmatmul.bf16.vlgmr.msra.gmra.mxu0 %v1236_v50  ;;  %v849_v45 = vor.u32 %v1040_v42, %v846_v43  ;;  %v1036_v46 = vld [vmem:[%s1145_s18 + $0xc] sm:$0xf]  ;;  %v830_v47 = vld [vmem:[%s1145_s18 + $0x18] sm:$0xf0] }
  0x36   : > { %v833_v48 = vor.u32 %v1036_v46, %v830_v47 }
  0x37   : > { %583 = vmatpush.bf16.msrb.mxu1 %v909_v54  ;;  %599 = vmatpush.bf16.msrb.mxu3 %v1005_v55 }
  0x38   : > { %610 = vmatpush.bf16.msrb.mxu0 %v929_v58  ;;  %626 = vmatpush.bf16.msrb.mxu2 %v1025_v59 }
  0x3b   : > { %584 = vmatpush.bf16.msrb.mxu1 %v893_v2  ;;  %600 = vmatpush.bf16.msrb.mxu3 %v989_v3 }
  0x3c   : > { %611 = vmatpush.bf16.msrb.mxu0 %v913_v6  ;;  %627 = vmatpush.bf16.msrb.mxu2 %v1009_v7 }
  0x3f   : > { %585 = vmatpush.bf16.msrb.mxu1 %v877_v14  ;;  %601 = vmatpush.bf16.msrb.mxu3 %v973_v15 }
  0x40   : > { %612 = vmatpush.bf16.msrb.mxu0 %v897_v18  ;;  %628 = vmatpush.bf16.msrb.mxu2 %v993_v19 }
  0x43   : > { %586 = vmatpush.bf16.msrb.mxu1 %v861_v26  ;;  %602 = vmatpush.bf16.msrb.mxu3 %v957_v27 }
  0x44   : > { %613 = vmatpush.bf16.msrb.mxu0 %v881_v28  ;;  %629 = vmatpush.bf16.msrb.mxu2 %v977_v29 }
  0x46   : > { %1028 = vmatmul.msk.bf16.vlgmr.msrb.gmra.mxu3 %vm508_vm1, %v1214_v32 }
  0x47   : > { %587 = vmatpush.bf16.msrb.mxu1 %v845_v37 }
  0x48   : > { %614 = vmatpush.bf16.msrb.mxu0 %v865_v38  ;;  %630 = vmatpush.bf16.msrb.mxu2 %v961_v39 }
  0x4b   : > { %588 = vmatpush.bf16.msrb.mxu1 %v829_v44  ;;  %1029 = vmatmul.msk.bf16.vlgmr.msrb.gmra.mxu2 %vm508_vm1, %v1214_v32 }
  0x4c   : > { %615 = vmatpush.bf16.msrb.mxu0 %v849_v45 }
  0x4e   : > { %589 = vmatmul.bf16.vlgmr.msrb.gmra.mxu1 %v1236_v50 }
  0x50   : > { %616 = vmatpush.bf16.msrb.mxu0 %v833_v48 }
  0x53   : > { %617 = vmatmul.bf16.vlgmr.msrb.gmra.mxu0 %v1236_v50 }
  0xab   : > { %v548_v51 = vpop.f32.mrf.mxu1 }
  0xb1   : > { %v576_v49 = vpop.f32.mrf.mxu3 }
  0xb2   : > { %v534_v53 = vpop.f32.mrf.mxu0 }
  0xb3   : > { %v550_v55 = vpop.f32.mrf.mxu1  ;;  %v1285_v58 = vadd.f32 %v548_v51, %v534_v53 }
  0xb5   : > { %v647_v62 = vmul.f32 %v1285_v58, %v1285_v58 }
  0xb8   : > { %v562_v52 = vpop.f32.mrf.mxu2 }
  0xb9   : > { %v578_v54 = vpop.f32.mrf.mxu3  ;;  %v1287_v59 = vadd.f32 %v576_v49, %v562_v52 }
  0xba   : > { %v536_v57 = vpop.f32.mrf.mxu0 }
  0xbb   : > { %v648_v50 = vmul.f32 %v1287_v59, %v1287_v59  ;;  %v637_v0 = vadd.f32 %v1287_v59, %v1285_v58  ;;  %v1304_v7 = vadd.f32 %v550_v55, %v536_v57 }
  0xbd   : > { %v655_v6 = vadd.f32 %v648_v50, %v647_v62  ;;  %v651_v16 = vmul.f32 %v1304_v7, %v1304_v7 }
  0xc0   : > { %v564_v56 = vpop.f32.mrf.mxu2 }
  0xc1   : > { %v1299_v3 = vadd.f32 %v578_v54, %v564_v56 }
  0xc3   : > { %v652_v14 = vmul.f32 %v1299_v3, %v1299_v3  ;;  %v642_v17 = vadd.f32 %v1299_v3, %v1304_v7 }
  0xc5   : > { %v660_v23 = vadd.f32 %v652_v14, %v651_v16 }
  0xc9   : > { %v604_v32 = vpop.f32.mrf.mxu3 }
  0xcb   : > { %v590_v60 = vpop.f32.mrf.mxu1 }
  0xcc   : > { %v1289_v61 = vadd.f32 %v604_v32, %v590_v60  ;;  %v722_v32 = vstv %s713_s27 }
  0xce   : > { %v632_v63 = vpop.f32.mrf.mxu2  ;;  %v649_v1 = vmul.f32 %v1289_v61, %v1289_v61  ;;  %v638_v5 = vadd.f32 %v637_v0, %v1289_v61 }
  0xd0   : > { %v618_v2 = vpop.f32.mrf.mxu0  ;;  %v656_v12 = vadd.f32 %v655_v6, %v649_v1 }
  0xd1   : > { %v1301_v4 = vadd.f32 %v632_v63, %v618_v2  ;;  %v606_v8 = vpop.f32.mrf.mxu3 }
  0xd3   : > { %v592_v9 = vpop.f32.mrf.mxu1  ;;  %v639_v10 = vadd.f32 %v638_v5, %v1301_v4  ;;  %v650_v11 = vmul.f32 %v1301_v4, %v1301_v4 }
  0xd4   : > { %v1309_v13 = vadd.f32 %v606_v8, %v592_v9 }
  0xd5   : > { %640 = vadd.xlane.f32.xlu0 %v639_v10  ;;  %v657_v15 = vadd.f32 %v656_v12, %v650_v11 }
  0xd6   : > { %v653_v18 = vmul.f32 %v1309_v13, %v1309_v13  ;;  %v634_v19 = vpop.f32.mrf.mxu2  ;;  %v643_v22 = vadd.f32 %v642_v17, %v1309_v13 }
  0xd7   : > { %658 = vadd.xlane.f32.xlu1 %v657_v15 }
  0xd8   : > { %v620_v20 = vpop.f32.mrf.mxu0  ;;  %v661_v26 = vadd.f32 %v660_v23, %v653_v18 }
  0xd9   : > { %v1319_v21 = vadd.f32 %v634_v19, %v620_v20 }
  0xdb   : > { %v644_v24 = vadd.f32 %v643_v22, %v1319_v21  ;;  %v654_v25 = vmul.f32 %v1319_v21, %v1319_v21 }
  0xdd   : > { %645 = vadd.xlane.f32.xlu0 %v644_v24  ;;  %v662_v27 = vadd.f32 %v661_v26, %v654_v25 }
  0xdf   : > { %663 = vadd.xlane.f32.xlu1 %v662_v27 }
 0x148   : > { %v641_v28 = vpop.xlane.xlu0 %640 }
 0x149   : > { %v665_v29 = vmul.f32 0.001953125, %v641_v28 }
 0x14a   : > { %v659_v30 = vpop.xlane.xlu1 %658 }
 0x14b   : > { %v667_v31 = vmul.f32 0.001953125, %v659_v30  ;;  %v669_v33 = vmul.f32 %v665_v29, %v665_v29  ;;  %v675_v54 = vsub.f32 %v1285_v58, %v665_v29  ;;  %v676_v55 = vsub.f32 %v1287_v59, %v665_v29 }
 0x14c   : > { %v677_v56 = vsub.f32 %v1289_v61, %v665_v29  ;;  %v678_v57 = vsub.f32 %v1301_v4, %v665_v29 }
 0x14d   : > { %v671_v34 = vsub.f32 %v667_v31, %v669_v33 }
 0x14f   : > { %v673_v35 = vmax.f32 %v671_v34, 0.0 }
 0x150   : > { %v646_v36 = vpop.xlane.xlu0 %645 }
 0x151   : > { %v1325_v37 = vmul.f32 0.001953125, %v646_v36  ;;  %v683_v38 = vadd.f32 1e-05, %v673_v35 }
 0x152   : > { %v664_v39 = vpop.xlane.xlu1 %663 }
 0x153   : > { %1096 = vrsqrt.f32 %v683_v38  ;;  %v668_v40 = vmul.f32 0.001953125, %v664_v39  ;;  %v670_v41 = vmul.f32 %v1325_v37, %v1325_v37  ;;  %vm691_vm3 = vweird.f32 %v683_v38 }
 0x154   : > { %v679_v12 = vsub.f32 %v1304_v7, %v1325_v37  ;;  %v680_v14 = vsub.f32 %v1299_v3, %v1325_v37  ;;  %v681_v15 = vsub.f32 %v1309_v13, %v1325_v37  ;;  %v682_v16 = vsub.f32 %v1319_v21, %v1325_v37 }
 0x155   : > { %v672_v42 = vsub.f32 %v668_v40, %v670_v41 }
 0x157   : > { %v674_v43 = vmax.f32 %v672_v42, 0.0 }
 0x159   : > { %v1097_v44 = vpop.eup %1096  ;;  %v684_v45 = vadd.f32 1e-05, %v674_v43 }
 0x15a   : > { %v686_v46 = vmul.f32 %v1097_v44, %v683_v38  ;;  %vm692_vm2 = vweird.f32 %v1097_v44 }
 0x15b   : > { %1098 = vrsqrt.f32 %v684_v45  ;;  %vm693_vm4 = vmor %vm691_vm3, %vm692_vm2  ;;  %vm701_vm10 = vweird.f32 %v684_v45 }
 0x15c   : > { %v687_v47 = vmul.f32 %v1097_v44, %v686_v46 }
 0x15e   : > { %v688_v48 = vmul.f32 0.5, %v687_v47 }
 0x160   : > { %v689_v49 = vsub.f32 1.5, %v688_v48 }
 0x161   : > { %v1099_v51 = vpop.eup %1098 }
 0x162   : > { %v690_v52 = vmul.f32 %v1097_v44, %v689_v49  ;;  %v696_v53 = vmul.f32 %v1099_v51, %v684_v45  ;;  %vm702_vm9 = vweird.f32 %v1099_v51 }
 0x163   : > { %vm703_vm11 = vmor %vm701_vm10, %vm702_vm9 }
 0x164   : > { %v694_v60 = vsel %vm693_vm4, %v1097_v44, %v690_v52  ;;  %v697_v62 = vmul.f32 %v1099_v51, %v696_v53 }
 0x165   : > { %v705_v50 = vmul.f32 %v694_v60, %v675_v54  ;;  %v706_v63 = vmul.f32 %v694_v60, %v676_v55  ;;  %v707_v0 = vmul.f32 %v694_v60, %v677_v56  ;;  %v708_v1 = vmul.f32 %v694_v60, %v678_v57 }
 0x166   : > { %v698_v2 = vmul.f32 0.5, %v697_v62 }
 0x167   : > { %vm714_vm5 = vcmp.ge.f32.partialorder %v705_v50, 0.0  ;;  %vm715_vm6 = vcmp.ge.f32.partialorder %v706_v63, 0.0  ;;  %vm716_vm7 = vcmp.ge.f32.partialorder %v707_v0, 0.0  ;;  %vm717_vm8 = vcmp.ge.f32.partialorder %v708_v1, 0.0 }
 0x168   : > { %v723_v58 = vmul.f32 %v722_v32, %v705_v50  ;;  %v724_v59 = vmul.f32 %v722_v32, %v706_v63  ;;  %v725_v61 = vmul.f32 %v722_v32, %v707_v0  ;;  %v726_v4 = vmul.f32 %v722_v32, %v708_v1 }
 0x169   : > { %v699_v5 = vsub.f32 1.5, %v698_v2 }
 0x16a   : > { %v731_v6 = vsel %vm714_vm5, %v705_v50, %v723_v58  ;;  %v732_v8 = vsel %vm715_vm6, %v706_v63, %v724_v59  ;;  %v733_v9 = vsel %vm716_vm7, %v707_v0, %v725_v61  ;;  %v734_v10 = vsel %vm717_vm8, %v708_v1, %v726_v4 }
 0x16b   : > { %739 = vst [vmem:[%s1337_s4] sm:$0xff] %v731_v6  ;;  %v700_v11 = vmul.f32 %v1099_v51, %v699_v5 }
 0x16c   : > { %740 = vst [vmem:[%s1337_s4 + $0x8] sm:$0xff] %v732_v8 }
 0x16d   : > { %741 = vst [vmem:[%s1337_s4 + $0x10] sm:$0xff] %v733_v9  ;;  %v704_v17 = vsel %vm703_vm11, %v1099_v51, %v700_v11 }
 0x16e   : > { %742 = vst [vmem:[%s1337_s4 + $0x18] sm:$0xff] %v734_v10  ;;  %v709_v18 = vmul.f32 %v704_v17, %v679_v12  ;;  %v710_v19 = vmul.f32 %v704_v17, %v680_v14  ;;  %v711_v20 = vmul.f32 %v704_v17, %v681_v15  ;;  %v712_v7 = vmul.f32 %v704_v17, %v682_v16 }
 0x170   : > { %vm718_vm12 = vcmp.ge.f32.partialorder %v709_v18, 0.0  ;;  %vm719_vm13 = vcmp.ge.f32.partialorder %v710_v19, 0.0  ;;  %vm720_vm14 = vcmp.ge.f32.partialorder %v711_v20, 0.0  ;;  %vm721_vm15 = vcmp.ge.f32.partialorder %v712_v7, 0.0 }
 0x171   : > { %v727_v3 = vmul.f32 %v722_v32, %v709_v18  ;;  %v728_v13 = vmul.f32 %v722_v32, %v710_v19  ;;  %v729_v22 = vmul.f32 %v722_v32, %v711_v20  ;;  %v730_v21 = vmul.f32 %v722_v32, %v712_v7 }
 0x173   : > { %v735_v23 = vsel %vm718_vm12, %v709_v18, %v727_v3  ;;  %v736_v24 = vsel %vm719_vm13, %v710_v19, %v728_v13  ;;  %v737_v25 = vsel %vm720_vm14, %v711_v20, %v729_v22  ;;  %v738_v26 = vsel %vm721_vm15, %v712_v7, %v730_v21 }
 0x174   : > { %743 = vst [vmem:[%s1337_s4 + $0x20] sm:$0xff] %v735_v23 }
 0x175   : > { %744 = vst [vmem:[%s1337_s4 + $0x28] sm:$0xff] %v736_v24 }
 0x176   : > { %745 = vst [vmem:[%s1337_s4 + $0x30] sm:$0xff] %v737_v25 }
 0x177   : > { %746 = vst [vmem:[%s1337_s4 + $0x38] sm:$0xff] %v738_v26 }
 0x178 PF: > { %s14_s14 = sadd.s32 1, %s1106_s14  }
 0x179   : > { %p11_p4 = scmp.ge.s32.totalorder %s14_s14, 4  }
 0x17b   :  { %13 = sbr.rel (!%p11_p4) target bundleno = 2 (0x2), region = 62 }

// kernel: unet_encoder_forward.14
= control target key start
LH: loop header
LB: loop body
LE: loop exit
PB: predicated region body
PF: predicated region fallthrough
CT: control target
= control target key end

     0   :  { %s1856_s14 = smov 0   ;;  %s2213_s0 = inlined_call_operand.<no memory space> [shape: f32[1], index: 0, kind: input, shape index: {}]   ;;  %s2214_s1 = inlined_call_operand.vmem [shape: bf16[2,432,512], index: 1, kind: input, shape index: {}]   ;;  %s2215_s2 = inlined_call_operand.vmem [shape: bf16[16,432], index: 2, kind: input, shape index: {}]   ;;  %s2216_s3 = inlined_call_operand.vmem [shape: f32[2,16,512], index: 3, kind: output, shape index: {}]  }
   0x1   :  { %8 = sst [smem:[#allocation2]] %s2213_s0 }
   0x2 LB: > { %s1237_s15 = sadd.s32 4294967295, %s1831_s14   ;;  %p1241_p0 = scmp.ge.s32.totalorder %s1831_s14, 1  ;;  %s1831_s14 = sphi %s1856_s14, %s14_s14  }
   0x3   : > { %p138_p1 = scmp.lt.s32.totalorder %s1831_s14, 3 }
   0x5   : > { %p139_p2 = pnand %p1241_p0, %p138_p1 }
   0x6   : > { %p162_p3 = scmp.lt.s32.totalorder (!%p139_p2), %s1237_s15, 1  ;;  %s1148_s8 = sld [smem:[#allocation2]] (!%p139_p2) }
   0x7   : > { %142 = sbr.rel (%p139_p2) target bundleno = 432 (0x1b0), region = 32 }
   0xc   : > { %s2218_s15 = smov (!%p162_p3, %s1237_s15), 1  ;;  %vm844_vm0 = vcmask 392192  }
   0xd   : > { %s1812_s0 = smul.u32 864, %s2218_s15  ;;  %s1699_s9 = sshll.u32 %s2218_s15, 6 }
   0xe   : > { %s2192_s12 = scalar_lea.vmem %s2216_s3, %s1699_s9 }
   0xf   : > { %s1870_s18 = scalar_lea.vmem %s2214_s1, %s1812_s0 }
  0x10   : > { %v1375_v0 = vld [vmem:[%s1870_s18 + $0xe0] sm:$0xf]  ;;  %v1734_v1 = vld [vmem:[%s1870_s18 + $0xec] sm:$0xf0]  ;;  %v1732_v35 = vld [vmem:[%s1870_s18 + $0xe4] sm:$0xf] }
  0x11   : > { %v1503_v2 = vld [vmem:[%s1870_s18 + $0x1e0] sm:$0xf]  ;;  %v1376_v3 = vor.u32 %v1734_v1, %v1375_v0  ;;  %v1766_v4 = vld [vmem:[%s1870_s18 + $0x1ec] sm:$0xf0]  ;;  %v1377_v36 = vld [vmem:[%s1870_s18 + $0xf0] sm:$0xf0] }
  0x12   : > { %v1631_v5 = vld [vmem:[%s1870_s18 + $0x2e0] sm:$0xf]  ;;  %v1798_v6 = vld [vmem:[%s1870_s18 + $0x2ec] sm:$0xf0]  ;;  %v1504_v7 = vor.u32 %v1766_v4, %v1503_v2  ;;  %v1380_v42 = vor.u32 %v1732_v35, %v1377_v36  ;;  %v1728_v46 = vld [vmem:[%s1870_s18 + $0xc4] sm:$0xf] }
  0x13   : > { %v1632_v8 = vor.u32 %v1798_v6, %v1631_v5  ;;  %v1679_v9 = vld [vmem:[%s1870_s18 + $0x340] sm:$0xf]  ;;  %v1810_v10 = vld [vmem:[%s1870_s18 + $0x34c] sm:$0xf0]  ;;  %848 = vmatpush.bf16.msra.mxu0 %v1376_v3  ;;  %v1361_v47 = vld [vmem:[%s1870_s18 + $0xd0] sm:$0xf0] }
  0x14   : > { %v1359_v11 = vld [vmem:[%s1870_s18 + $0xc0] sm:$0xf]  ;;  %v1680_v12 = vor.u32 %v1810_v10, %v1679_v9  ;;  %v1730_v13 = vld [vmem:[%s1870_s18 + $0xcc] sm:$0xf0]  ;;  %862 = vmatpush.bf16.msra.mxu1 %v1504_v7  ;;  %v1364_v56 = vor.u32 %v1728_v46, %v1361_v47  ;;  %v1724_v58 = vld [vmem:[%s1870_s18 + $0xa4] sm:$0xf] }
  0x15   : > { %v1487_v14 = vld [vmem:[%s1870_s18 + $0x1c0] sm:$0xf]  ;;  %v1762_v15 = vld [vmem:[%s1870_s18 + $0x1cc] sm:$0xf0]  ;;  %876 = vmatpush.bf16.msra.mxu2 %v1632_v8  ;;  %v1360_v16 = vor.u32 %v1730_v13, %v1359_v11  ;;  %v1345_v59 = vld [vmem:[%s1870_s18 + $0xb0] sm:$0xf0] }
  0x16   : > { %v1488_v17 = vor.u32 %v1762_v15, %v1487_v14  ;;  %v1615_v18 = vld [vmem:[%s1870_s18 + $0x2c0] sm:$0xf]  ;;  %v1794_v19 = vld [vmem:[%s1870_s18 + $0x2cc] sm:$0xf0]  ;;  %895 = vmatpush.bf16.msra.mxu3 %v1680_v12  ;;  %v1348_v4 = vor.u32 %v1724_v58, %v1345_v59  ;;  %v1720_v6 = vld [vmem:[%s1870_s18 + $0x84] sm:$0xf] }
  0x17   : > { %v1663_v20 = vld [vmem:[%s1870_s18 + $0x320] sm:$0xf]  ;;  %v1616_v21 = vor.u32 %v1794_v19, %v1615_v18  ;;  %v1806_v22 = vld [vmem:[%s1870_s18 + $0x32c] sm:$0xf0]  ;;  %849 = vmatpush.bf16.msra.mxu0 %v1360_v16  ;;  %v1329_v7 = vld [vmem:[%s1870_s18 + $0x90] sm:$0xf0] }
  0x18   : > { %v1343_v23 = vld [vmem:[%s1870_s18 + $0xa0] sm:$0xf]  ;;  %v1726_v24 = vld [vmem:[%s1870_s18 + $0xac] sm:$0xf0]  ;;  %v1664_v25 = vor.u32 %v1806_v22, %v1663_v20  ;;  %863 = vmatpush.bf16.msra.mxu1 %v1488_v17  ;;  %v1716_v16 = vld [vmem:[%s1870_s18 + $0x64] sm:$0xf]  ;;  %v1332_v17 = vor.u32 %v1720_v6, %v1329_v7 }
  0x19   : > { %v1471_v26 = vld [vmem:[%s1870_s18 + $0x1a0] sm:$0xf]  ;;  %v1758_v27 = vld [vmem:[%s1870_s18 + $0x1ac] sm:$0xf0]  ;;  %v1344_v29 = vor.u32 %v1726_v24, %v1343_v23  ;;  %877 = vmatpush.bf16.msra.mxu2 %v1616_v21  ;;  %v1313_v18 = vld [vmem:[%s1870_s18 + $0x70] sm:$0xf0] }
  0x1a   : > { %v1599_v28 = vld [vmem:[%s1870_s18 + $0x2a0] sm:$0xf]  ;;  %v1790_v30 = vld [vmem:[%s1870_s18 + $0x2ac] sm:$0xf0]  ;;  %v1472_v33 = vor.u32 %v1758_v27, %v1471_v26  ;;  %896 = vmatpush.bf16.msra.mxu3 %v1664_v25  ;;  %v1505_v35 = vld [vmem:[%s1870_s18 + $0x1f0] sm:$0xf0] }
  0x1b   : > { %v1647_v31 = vld [vmem:[%s1870_s18 + $0x300] sm:$0xf]  ;;  %v1802_v32 = vld [vmem:[%s1870_s18 + $0x30c] sm:$0xf0]  ;;  %v1600_v34 = vor.u32 %v1790_v30, %v1599_v28  ;;  %850 = vmatpush.bf16.msra.mxu0 %v1344_v29  ;;  %v1701_v28 = vld [vmem:[%s2215_s2 + $0xc] sm:$0xf] }
  0x1c   : > { %v1327_v37 = vld [vmem:[%s1870_s18 + $0x80] sm:$0xf]  ;;  %v1648_v38 = vor.u32 %v1802_v32, %v1647_v31  ;;  %v1722_v39 = vld [vmem:[%s1870_s18 + $0x8c] sm:$0xf0]  ;;  %864 = vmatpush.bf16.msra.mxu1 %v1472_v33  ;;  %v1257_v29 = vld [vmem:[%s2215_s2 + $0x18] sm:$0xf0] }
  0x1d   : > { %v1455_v40 = vld [vmem:[%s1870_s18 + $0x180] sm:$0xf]  ;;  %v1754_v41 = vld [vmem:[%s1870_s18 + $0x18c] sm:$0xf0]  ;;  %v1328_v45 = vor.u32 %v1722_v39, %v1327_v37  ;;  %878 = vmatpush.bf16.msra.mxu2 %v1600_v34  ;;  %v1712_v30 = vld [vmem:[%s1870_s18 + $0x44] sm:$0xf]  ;;  %v1945_v33 = vor.u32 %v1701_v28, %v1257_v29  ;;  %v1316_v34 = vor.u32 %v1716_v16, %v1313_v18 }
  0x1e   : > { %v1583_v43 = vld [vmem:[%s1870_s18 + $0x280] sm:$0xf]  ;;  %v1786_v44 = vld [vmem:[%s1870_s18 + $0x28c] sm:$0xf0]  ;;  %v1456_v48 = vor.u32 %v1754_v41, %v1455_v40  ;;  %897 = vmatpush.bf16.msra.mxu3 %v1648_v38  ;;  %v1297_v31 = vld [vmem:[%s1870_s18 + $0x50] sm:$0xf0] }
  0x1f   : > { %v1584_v49 = vor.u32 %v1786_v44, %v1583_v43  ;;  %v1311_v50 = vld [vmem:[%s1870_s18 + $0x60] sm:$0xf]  ;;  %v1718_v51 = vld [vmem:[%s1870_s18 + $0x6c] sm:$0xf0]  ;;  %851 = vmatpush.bf16.msra.mxu0 %v1328_v45  ;;  %v1764_v32 = vld [vmem:[%s1870_s18 + $0x1e4] sm:$0xf] }
  0x20   : > { %v1439_v52 = vld [vmem:[%s1870_s18 + $0x160] sm:$0xf]  ;;  %v1750_v53 = vld [vmem:[%s1870_s18 + $0x16c] sm:$0xf0]  ;;  %v1312_v57 = vor.u32 %v1718_v51, %v1311_v50  ;;  %865 = vmatpush.bf16.msra.mxu1 %v1456_v48  ;;  %v1796_v36 = vld [vmem:[%s1870_s18 + $0x2e4] sm:$0xf]  ;;  %v1508_v47 = vor.u32 %v1764_v32, %v1505_v35 }
  0x21   : > { %v1567_v54 = vld [vmem:[%s1870_s18 + $0x260] sm:$0xf]  ;;  %v1782_v55 = vld [vmem:[%s1870_s18 + $0x26c] sm:$0xf0]  ;;  %879 = vmatpush.bf16.msra.mxu2 %v1584_v49  ;;  %v1440_v60 = vor.u32 %v1750_v53, %v1439_v52  ;;  %v1633_v37 = vld [vmem:[%s1870_s18 + $0x2f0] sm:$0xf0]  ;;  %1693 = vmatmul.msk.bf16.vlgmr.msra.gmra.mxu3 %vm844_vm0, %v1945_v33  ;;  %v1300_v53 = vor.u32 %v1712_v30, %v1297_v31 }
  0x22   : > { %904 = vmatpush.bf16.msrb.mxu3 %v1380_v42  ;;  %v1568_v61 = vor.u32 %v1782_v55, %v1567_v54  ;;  %v1295_v62 = vld [vmem:[%s1870_s18 + $0x40] sm:$0xf]  ;;  %v1714_v63 = vld [vmem:[%s1870_s18 + $0x4c] sm:$0xf0]  ;;  %v1808_v39 = vld [vmem:[%s1870_s18 + $0x344] sm:$0xf]  ;;  %v1636_v48 = vor.u32 %v1796_v36, %v1633_v37 }
  0x23   : > { %v1423_v0 = vld [vmem:[%s1870_s18 + $0x140] sm:$0xf]  ;;  %v1746_v1 = vld [vmem:[%s1870_s18 + $0x14c] sm:$0xf0]  ;;  %852 = vmatpush.bf16.msra.mxu0 %v1312_v57  ;;  %v1296_v5 = vor.u32 %v1714_v63, %v1295_v62  ;;  %v1681_v40 = vld [vmem:[%s1870_s18 + $0x350] sm:$0xf0] }
  0x24   : > { %v1551_v2 = vld [vmem:[%s1870_s18 + $0x240] sm:$0xf]  ;;  %v1778_v3 = vld [vmem:[%s1870_s18 + $0x24c] sm:$0xf0]  ;;  %866 = vmatpush.bf16.msra.mxu1 %v1440_v60  ;;  %v1424_v9 = vor.u32 %v1746_v1, %v1423_v0  ;;  %v1255_v41 = vld [vmem:[%s2215_s2 + $0x8] sm:$0xf]  ;;  %v1684_v54 = vor.u32 %v1808_v39, %v1681_v40 }
  0x25   : > { %v1279_v8 = vld [vmem:[%s1870_s18 + $0x20] sm:$0xf]  ;;  %880 = vmatpush.bf16.msra.mxu2 %v1568_v61  ;;  %v1552_v10 = vor.u32 %v1778_v3, %v1551_v2  ;;  %v1710_v11 = vld [vmem:[%s1870_s18 + $0x2c] sm:$0xf0]  ;;  %v1703_v44 = vld [vmem:[%s2215_s2 + $0x14] sm:$0xf0] }
  0x26   : > { %905 = vmatpush.bf16.msrb.mxu3 %v1364_v56  ;;  %v1407_v12 = vld [vmem:[%s1870_s18 + $0x120] sm:$0xf]  ;;  %v1742_v13 = vld [vmem:[%s1870_s18 + $0x12c] sm:$0xf0]  ;;  %v1280_v21 = vor.u32 %v1710_v11, %v1279_v8  ;;  %v1708_v49 = vld [vmem:[%s1870_s18 + $0x24] sm:$0xf]  ;;  %v1977_v58 = vor.u32 %v1703_v44, %v1255_v41 }
  0x27   : > { %v1535_v14 = vld [vmem:[%s1870_s18 + $0x220] sm:$0xf]  ;;  %v1774_v15 = vld [vmem:[%s1870_s18 + $0x22c] sm:$0xf0]  ;;  %853 = vmatpush.bf16.msra.mxu0 %v1296_v5  ;;  %v1408_v26 = vor.u32 %v1742_v13, %v1407_v12  ;;  %v1760_v50 = vld [vmem:[%s1870_s18 + $0x1c4] sm:$0xf] }
  0x28   : > { %v1263_v19 = vld [vmem:[%s1870_s18] sm:$0xf]  ;;  %v1706_v20 = vld [vmem:[%s1870_s18 + $0xc] sm:$0xf0]  ;;  %867 = vmatpush.bf16.msra.mxu1 %v1424_v9  ;;  %v1536_v27 = vor.u32 %v1774_v15, %v1535_v14  ;;  %v1700_v51 = vld [vmem:[%s2215_s2 + $0x4] sm:$0xf] }
  0x29   : > { %v1391_v22 = vld [vmem:[%s1870_s18 + $0x100] sm:$0xf]  ;;  %v1738_v23 = vld [vmem:[%s1870_s18 + $0x10c] sm:$0xf0]  ;;  %881 = vmatpush.bf16.msra.mxu2 %v1552_v10  ;;  %v1264_v38 = vor.u32 %v1706_v20, %v1263_v19  ;;  %v1249_v52 = vld [vmem:[%s2215_s2 + $0x10] sm:$0xf0] }
  0x2a   : > { %906 = vmatpush.bf16.msrb.mxu3 %v1348_v4  ;;  %v1519_v24 = vld [vmem:[%s1870_s18 + $0x200] sm:$0xf]  ;;  %v1770_v25 = vld [vmem:[%s1870_s18 + $0x20c] sm:$0xf0]  ;;  %v1392_v42 = vor.u32 %v1738_v23, %v1391_v22  ;;  %v1489_v55 = vld [vmem:[%s1870_s18 + $0x1d0] sm:$0xf0]  ;;  %v1984_v63 = vor.u32 %v1700_v51, %v1249_v52 }
  0x2b   : > { %854 = vmatpush.bf16.msra.mxu0 %v1280_v21  ;;  %v1520_v43 = vor.u32 %v1770_v25, %v1519_v24  ;;  %v1247_v45 = vld [vmem:[%s2215_s2] sm:$0xf]  ;;  %v1702_v46 = vld [vmem:[%s2215_s2 + $0xc] sm:$0xf0]  ;;  %v1792_v56 = vld [vmem:[%s1870_s18 + $0x2c4] sm:$0xf]  ;;  %v1492_v0 = vor.u32 %v1760_v50, %v1489_v55 }
  0x2c   : > { %868 = vmatpush.bf16.msra.mxu1 %v1408_v26  ;;  %v1617_v57 = vld [vmem:[%s1870_s18 + $0x2d0] sm:$0xf0]  ;;  %v1804_v60 = vld [vmem:[%s1870_s18 + $0x324] sm:$0xf]  ;;  %v1982_v62 = vor.u32 %v1702_v46, %v1247_v45  ;;  %v1383_v12 = vld [vmem:[%s1870_s18 + $0xe8] sm:$0xf] }
  0x2d   : > { %882 = vmatpush.bf16.msra.mxu2 %v1536_v27  ;;  %v1281_v59 = vld [vmem:[%s1870_s18 + $0x30] sm:$0xf0]  ;;  %v1620_v1 = vor.u32 %v1792_v56, %v1617_v57  ;;  %v1704_v2 = vld [vmem:[%s1870_s18 + $0x4] sm:$0xf]  ;;  %v1735_v13 = vld [vmem:[%s1870_s18 + $0xf4] sm:$0xf0] }
  0x2e   : > { %907 = vmatpush.bf16.msrb.mxu3 %v1332_v17  ;;  %v1665_v61 = vld [vmem:[%s1870_s18 + $0x330] sm:$0xf0]  ;;  %v1756_v4 = vld [vmem:[%s1870_s18 + $0x1a4] sm:$0xf]  ;;  %v1284_v5 = vor.u32 %v1708_v49, %v1281_v59  ;;  %v1511_v14 = vld [vmem:[%s1870_s18 + $0x1e8] sm:$0xf]  ;;  %v1384_v24 = vor.u32 %v1735_v13, %v1383_v12 }
  0x2f   : > { %855 = vmatpush.bf16.msra.mxu0 %v1264_v38  ;;  %v1265_v3 = vld [vmem:[%s1870_s18 + $0x10] sm:$0xf0]  ;;  %v1668_v6 = vor.u32 %v1804_v60, %v1665_v61  ;;  %v1788_v8 = vld [vmem:[%s1870_s18 + $0x2a4] sm:$0xf]  ;;  %v1767_v15 = vld [vmem:[%s1870_s18 + $0x1f4] sm:$0xf0] }
  0x30   : > { %869 = vmatpush.bf16.msra.mxu1 %v1392_v42  ;;  %v1473_v7 = vld [vmem:[%s1870_s18 + $0x1b0] sm:$0xf0]  ;;  %v1800_v10 = vld [vmem:[%s1870_s18 + $0x304] sm:$0xf]  ;;  %v1268_v19 = vor.u32 %v1704_v2, %v1265_v3  ;;  %v1512_v25 = vor.u32 %v1767_v15, %v1511_v14  ;;  %v1367_v26 = vld [vmem:[%s1870_s18 + $0xc8] sm:$0xf] }
  0x31   : > { %883 = vmatpush.bf16.msra.mxu2 %v1520_v43  ;;  %v1601_v9 = vld [vmem:[%s1870_s18 + $0x2b0] sm:$0xf0]  ;;  %v1476_v16 = vor.u32 %v1756_v4, %v1473_v7  ;;  %v1752_v18 = vld [vmem:[%s1870_s18 + $0x184] sm:$0xf]  ;;  %v1731_v27 = vld [vmem:[%s1870_s18 + $0xd4] sm:$0xf0] }
  0x32   : > { %908 = vmatpush.bf16.msrb.mxu3 %v1316_v34  ;;  %856 = vmatmul.bf16.vlgmr.msra.gmra.mxu0 %v1982_v62  ;;  %v1649_v11 = vld [vmem:[%s1870_s18 + $0x310] sm:$0xf0]  ;;  %v1604_v17 = vor.u32 %v1788_v8, %v1601_v9  ;;  %v1784_v22 = vld [vmem:[%s1870_s18 + $0x284] sm:$0xf]  ;;  %v1495_v28 = vld [vmem:[%s1870_s18 + $0x1c8] sm:$0xf]  ;;  %v1368_v37 = vor.u32 %v1731_v27, %v1367_v26 }
  0x33   : > { %918 = vmatpush.bf16.msrb.mxu0 %v1508_v47  ;;  %870 = vmatmul.bf16.vlgmr.msra.gmra.mxu1 %v1984_v63  ;;  %v1652_v20 = vor.u32 %v1800_v10, %v1649_v11  ;;  %v1457_v21 = vld [vmem:[%s1870_s18 + $0x190] sm:$0xf0]  ;;  %v1763_v29 = vld [vmem:[%s1870_s18 + $0x1d4] sm:$0xf0]  ;;  %v1748_v32 = vld [vmem:[%s1870_s18 + $0x164] sm:$0xf] }
  0x34   : > { %932 = vmatpush.bf16.msrb.mxu1 %v1636_v48  ;;  %884 = vmatmul.bf16.vlgmr.msra.gmra.mxu2 %v1977_v58  ;;  %v1585_v23 = vld [vmem:[%s1870_s18 + $0x290] sm:$0xf0]  ;;  %v1460_v30 = vor.u32 %v1752_v18, %v1457_v21  ;;  %v1780_v35 = vld [vmem:[%s1870_s18 + $0x264] sm:$0xf]  ;;  %v1496_v38 = vor.u32 %v1763_v29, %v1495_v28  ;;  %v1351_v39 = vld [vmem:[%s1870_s18 + $0xa8] sm:$0xf] }
  0x35   : > { %951 = vmatpush.bf16.msrb.mxu2 %v1684_v54  ;;  %v1588_v31 = vor.u32 %v1784_v22, %v1585_v23  ;;  %v1441_v34 = vld [vmem:[%s1870_s18 + $0x170] sm:$0xf0]  ;;  %v1727_v40 = vld [vmem:[%s1870_s18 + $0xb4] sm:$0xf0]  ;;  %v1479_v41 = vld [vmem:[%s1870_s18 + $0x1a8] sm:$0xf] }
  0x36   : > { %909 = vmatpush.bf16.msrb.mxu3 %v1300_v53  ;;  %v1569_v36 = vld [vmem:[%s1870_s18 + $0x270] sm:$0xf0]  ;;  %v1759_v42 = vld [vmem:[%s1870_s18 + $0x1b4] sm:$0xf0]  ;;  %v1444_v43 = vor.u32 %v1748_v32, %v1441_v34  ;;  %v1744_v45 = vld [vmem:[%s1870_s18 + $0x144] sm:$0xf]  ;;  %v1352_v49 = vor.u32 %v1727_v40, %v1351_v39 }
  0x37   : > { %919 = vmatpush.bf16.msrb.mxu0 %v1492_v0  ;;  %v1572_v44 = vor.u32 %v1780_v35, %v1569_v36  ;;  %v1425_v46 = vld [vmem:[%s1870_s18 + $0x150] sm:$0xf0]  ;;  %v1776_v47 = vld [vmem:[%s1870_s18 + $0x244] sm:$0xf]  ;;  %v1480_v50 = vor.u32 %v1759_v42, %v1479_v41  ;;  %v1335_v51 = vld [vmem:[%s1870_s18 + $0x88] sm:$0xf] }
  0x38   : > { %933 = vmatpush.bf16.msrb.mxu1 %v1620_v1  ;;  %v1553_v48 = vld [vmem:[%s1870_s18 + $0x250] sm:$0xf0]  ;;  %v1723_v52 = vld [vmem:[%s1870_s18 + $0x94] sm:$0xf0]  ;;  %v1463_v53 = vld [vmem:[%s1870_s18 + $0x188] sm:$0xf]  ;;  %v1428_v55 = vor.u32 %v1744_v45, %v1425_v46 }
  0x39   : > { %952 = vmatpush.bf16.msrb.mxu2 %v1668_v6  ;;  %v1755_v54 = vld [vmem:[%s1870_s18 + $0x194] sm:$0xf0]  ;;  %v1556_v56 = vor.u32 %v1776_v47, %v1553_v48  ;;  %v1740_v57 = vld [vmem:[%s1870_s18 + $0x124] sm:$0xf]  ;;  %v1409_v59 = vld [vmem:[%s1870_s18 + $0x130] sm:$0xf0]  ;;  %v1336_v0 = vor.u32 %v1723_v52, %v1335_v51 }
  0x3a   : > { %910 = vmatpush.bf16.msrb.mxu3 %v1284_v5  ;;  %v1772_v60 = vld [vmem:[%s1870_s18 + $0x224] sm:$0xf]  ;;  %v1537_v61 = vld [vmem:[%s1870_s18 + $0x230] sm:$0xf0]  ;;  %v1464_v1 = vor.u32 %v1755_v54, %v1463_v53  ;;  %v1319_v2 = vld [vmem:[%s1870_s18 + $0x68] sm:$0xf]  ;;  %v1412_v6 = vor.u32 %v1740_v57, %v1409_v59 }
  0x3b   : > { %920 = vmatpush.bf16.msrb.mxu0 %v1476_v16  ;;  %v1719_v3 = vld [vmem:[%s1870_s18 + $0x74] sm:$0xf0]  ;;  %v1447_v4 = vld [vmem:[%s1870_s18 + $0x168] sm:$0xf]  ;;  %v1540_v7 = vor.u32 %v1772_v60, %v1537_v61  ;;  %v1736_v8 = vld [vmem:[%s1870_s18 + $0x104] sm:$0xf] }
  0x3c   : > { %934 = vmatpush.bf16.msrb.mxu1 %v1604_v17  ;;  %v1751_v5 = vld [vmem:[%s1870_s18 + $0x174] sm:$0xf0]  ;;  %v1393_v9 = vld [vmem:[%s1870_s18 + $0x110] sm:$0xf0]  ;;  %v1768_v10 = vld [vmem:[%s1870_s18 + $0x204] sm:$0xf]  ;;  %v1320_v14 = vor.u32 %v1719_v3, %v1319_v2 }
  0x3d   : > { %953 = vmatpush.bf16.msrb.mxu2 %v1652_v20  ;;  %v1521_v11 = vld [vmem:[%s1870_s18 + $0x210] sm:$0xf0]  ;;  %v1303_v12 = vld [vmem:[%s1870_s18 + $0x48] sm:$0xf]  ;;  %v1448_v15 = vor.u32 %v1751_v5, %v1447_v4  ;;  %v1799_v16 = vld [vmem:[%s1870_s18 + $0x2f4] sm:$0xf0]  ;;  %v1396_v22 = vor.u32 %v1736_v8, %v1393_v9 }
  0x3e   : > { %911 = vmatpush.bf16.msrb.mxu3 %v1268_v19  ;;  %v1639_v13 = vld [vmem:[%s1870_s18 + $0x2e8] sm:$0xf]  ;;  %v1811_v18 = vld [vmem:[%s1870_s18 + $0x354] sm:$0xf0]  ;;  %v1524_v23 = vor.u32 %v1768_v10, %v1521_v11  ;;  %v1765_v51 = vld [vmem:[%s1870_s18 + $0x1ec] sm:$0xf] }
  0x3f   : > { %921 = vmatpush.bf16.msrb.mxu0 %v1460_v30  ;;  %v1687_v17 = vld [vmem:[%s1870_s18 + $0x348] sm:$0xf]  ;;  %v1715_v19 = vld [vmem:[%s1870_s18 + $0x54] sm:$0xf0]  ;;  %v1513_v52 = vld [vmem:[%s1870_s18 + $0x1f8] sm:$0xf0] }
  0x40   : > { %935 = vmatpush.bf16.msrb.mxu1 %v1588_v31  ;;  %v1431_v20 = vld [vmem:[%s1870_s18 + $0x148] sm:$0xf]  ;;  %v1747_v21 = vld [vmem:[%s1870_s18 + $0x154] sm:$0xf0]  ;;  %v1304_v28 = vor.u32 %v1715_v19, %v1303_v12  ;;  %v1729_v2 = vld [vmem:[%s1870_s18 + $0xcc] sm:$0xf] }
  0x41   : > { %974 = vmatpush.bf16.msra.mxu2 %v1512_v25  ;;  %912 = vmatmul.bf16.vlgmr.msrb.gmra.mxu3 %v1982_v62  ;;  %v1688_v25 = vor.u32 %v1811_v18, %v1687_v17  ;;  %v1287_v26 = vld [vmem:[%s1870_s18 + $0x28] sm:$0xf]  ;;  %v1432_v29 = vor.u32 %v1747_v21, %v1431_v20  ;;  %v1795_v30 = vld [vmem:[%s1870_s18 + $0x2d4] sm:$0xf0]  ;;  %v1369_v4 = vld [vmem:[%s1870_s18 + $0xd8] sm:$0xf0] }
  0x42   : > { %960 = vmatpush.bf16.msra.mxu3 %v1384_v24  ;;  %v1640_v24 = vor.u32 %v1799_v16, %v1639_v13  ;;  %v1623_v27 = vld [vmem:[%s1870_s18 + $0x2c8] sm:$0xf]  ;;  %v1807_v32 = vld [vmem:[%s1870_s18 + $0x334] sm:$0xf0]  ;;  %v1761_v5 = vld [vmem:[%s1870_s18 + $0x1cc] sm:$0xf]  ;;  %v1372_v12 = vor.u32 %v1729_v2, %v1369_v4 }
  0x43   : > { %922 = vmatpush.bf16.msrb.mxu0 %v1444_v43  ;;  %v1671_v31 = vld [vmem:[%s1870_s18 + $0x328] sm:$0xf]  ;;  %v1711_v34 = vld [vmem:[%s1870_s18 + $0x34] sm:$0xf0]  ;;  %v1793_v8 = vld [vmem:[%s1870_s18 + $0x2cc] sm:$0xf] }
  0x44   : > { %936 = vmatpush.bf16.msrb.mxu1 %v1572_v44  ;;  %1694 = vmatmul.msk.bf16.vlgmr.msrb.gmra.mxu2 %vm844_vm0, %v1945_v33  ;;  %v1415_v35 = vld [vmem:[%s1870_s18 + $0x128] sm:$0xf]  ;;  %v1743_v36 = vld [vmem:[%s1870_s18 + $0x134] sm:$0xf0]  ;;  %v1288_v42 = vor.u32 %v1711_v34, %v1287_v26  ;;  %v1625_v9 = vld [vmem:[%s1870_s18 + $0x2d8] sm:$0xf0] }
  0x45   : > { %975 = vmatpush.bf16.msra.mxu2 %v1496_v38  ;;  %v1672_v38 = vor.u32 %v1807_v32, %v1671_v31  ;;  %v1271_v39 = vld [vmem:[%s1870_s18 + $0x8] sm:$0xf]  ;;  %v1707_v40 = vld [vmem:[%s1870_s18 + $0x14] sm:$0xf0]  ;;  %v1416_v43 = vor.u32 %v1743_v36, %v1415_v35  ;;  %v1353_v16 = vld [vmem:[%s1870_s18 + $0xb8] sm:$0xf0] }
  0x46   : > { %961 = vmatpush.bf16.msra.mxu3 %v1368_v37  ;;  %v1624_v37 = vor.u32 %v1795_v30, %v1623_v27  ;;  %v1607_v41 = vld [vmem:[%s1870_s18 + $0x2a8] sm:$0xf]  ;;  %v1791_v44 = vld [vmem:[%s1870_s18 + $0x2b4] sm:$0xf0]  ;;  %v1272_v57 = vor.u32 %v1707_v40, %v1271_v39  ;;  %v1757_v17 = vld [vmem:[%s1870_s18 + $0x1ac] sm:$0xf] }
  0x47   : > { %923 = vmatpush.bf16.msrb.mxu0 %v1428_v55  ;;  %v1655_v45 = vld [vmem:[%s1870_s18 + $0x308] sm:$0xf]  ;;  %v1803_v46 = vld [vmem:[%s1870_s18 + $0x314] sm:$0xf0]  ;;  %v1608_v53 = vor.u32 %v1791_v44, %v1607_v41  ;;  %v1797_v55 = vld [vmem:[%s1870_s18 + $0x2ec] sm:$0xf] }
  0x48   : > { %937 = vmatpush.bf16.msrb.mxu1 %v1556_v56  ;;  %v1399_v47 = vld [vmem:[%s1870_s18 + $0x108] sm:$0xf]  ;;  %v1739_v48 = vld [vmem:[%s1870_s18 + $0x114] sm:$0xf0]  ;;  %v1656_v54 = vor.u32 %v1803_v46, %v1655_v45  ;;  %v1641_v56 = vld [vmem:[%s1870_s18 + $0x2f8] sm:$0xf0] }
  0x49   : > { %976 = vmatpush.bf16.msra.mxu2 %v1480_v50  ;;  %v1385_v50 = vld [vmem:[%s1870_s18 + $0xf8] sm:$0xf0]  ;;  %v1400_v59 = vor.u32 %v1739_v48, %v1399_v47  ;;  %v1591_v60 = vld [vmem:[%s1870_s18 + $0x288] sm:$0xf]  ;;  %v1787_v61 = vld [vmem:[%s1870_s18 + $0x294] sm:$0xf0]  ;;  %v1644_v3 = vor.u32 %v1797_v55, %v1641_v56 }
  0x4a   : > { %962 = vmatpush.bf16.msra.mxu3 %v1352_v49  ;;  %v1733_v49 = vld [vmem:[%s1870_s18 + $0xec] sm:$0xf]  ;;  %v1575_v10 = vld [vmem:[%s1870_s18 + $0x268] sm:$0xf]  ;;  %v1783_v11 = vld [vmem:[%s1870_s18 + $0x274] sm:$0xf0] }
  0x4b   : > { %924 = vmatpush.bf16.msrb.mxu0 %v1412_v6  ;;  %v1497_v6 = vld [vmem:[%s1870_s18 + $0x1d8] sm:$0xf0]  ;;  %v1576_v19 = vor.u32 %v1783_v11, %v1575_v10  ;;  %v1789_v20 = vld [vmem:[%s1870_s18 + $0x2ac] sm:$0xf]  ;;  %v1543_v35 = vld [vmem:[%s1870_s18 + $0x228] sm:$0xf] }
  0x4c   : > { %938 = vmatpush.bf16.msrb.mxu1 %v1540_v7  ;;  %v1592_v7 = vor.u32 %v1787_v61, %v1591_v60  ;;  %v1500_v13 = vor.u32 %v1761_v5, %v1497_v6  ;;  %v1481_v18 = vld [vmem:[%s1870_s18 + $0x1b8] sm:$0xf0]  ;;  %v1721_v26 = vld [vmem:[%s1870_s18 + $0x8c] sm:$0xf]  ;;  %v1775_v36 = vld [vmem:[%s1870_s18 + $0x234] sm:$0xf0] }
  0x4d   : > { %977 = vmatpush.bf16.msra.mxu2 %v1464_v1  ;;  %v1516_v1 = vor.u32 %v1765_v51, %v1513_v52  ;;  %v1609_v21 = vld [vmem:[%s1870_s18 + $0x2b8] sm:$0xf0]  ;;  %v1785_v32 = vld [vmem:[%s1870_s18 + $0x28c] sm:$0xf]  ;;  %v1544_v44 = vor.u32 %v1775_v36, %v1543_v35  ;;  %v1527_v47 = vld [vmem:[%s1870_s18 + $0x208] sm:$0xf] }
  0x4e   : > { %963 = vmatpush.bf16.msra.mxu3 %v1336_v0  ;;  %v1388_v0 = vor.u32 %v1733_v49, %v1385_v50  ;;  %v1612_v27 = vor.u32 %v1789_v20, %v1609_v21  ;;  %v1465_v30 = vld [vmem:[%s1870_s18 + $0x198] sm:$0xf0]  ;;  %v1717_v39 = vld [vmem:[%s1870_s18 + $0x6c] sm:$0xf]  ;;  %v1771_v48 = vld [vmem:[%s1870_s18 + $0x214] sm:$0xf0] }
  0x4f   : > { %925 = vmatpush.bf16.msrb.mxu0 %v1396_v22  ;;  %v1559_v22 = vld [vmem:[%s1870_s18 + $0x248] sm:$0xf]  ;;  %v1593_v34 = vld [vmem:[%s1870_s18 + $0x298] sm:$0xf0]  ;;  %v1781_v45 = vld [vmem:[%s1870_s18 + $0x26c] sm:$0xf] }
  0x50   : > { %939 = vmatpush.bf16.msrb.mxu1 %v1524_v23  ;;  %v1779_v23 = vld [vmem:[%s1870_s18 + $0x254] sm:$0xf0]  ;;  %v1596_v40 = vor.u32 %v1785_v32, %v1593_v34  ;;  %v1321_v41 = vld [vmem:[%s1870_s18 + $0x78] sm:$0xf0]  ;;  %v1713_v51 = vld [vmem:[%s1870_s18 + $0x4c] sm:$0xf] }
  0x51   : > { %978 = vmatpush.bf16.msra.mxu2 %v1448_v15  ;;  %v1628_v15 = vor.u32 %v1793_v8, %v1625_v9  ;;  %v1560_v31 = vor.u32 %v1779_v23, %v1559_v22  ;;  %v1577_v46 = vld [vmem:[%s1870_s18 + $0x278] sm:$0xf0]  ;;  %v1324_v49 = vor.u32 %v1717_v39, %v1321_v41  ;;  %v1809_v52 = vld [vmem:[%s1870_s18 + $0x34c] sm:$0xf] }
  0x52   : > { %964 = vmatpush.bf16.msra.mxu3 %v1320_v14  ;;  %926 = vmatmul.bf16.vlgmr.msrb.gmra.mxu0 %v1984_v63  ;;  %v1725_v14 = vld [vmem:[%s1870_s18 + $0xac] sm:$0xf]  ;;  %v1305_v55 = vld [vmem:[%s1870_s18 + $0x58] sm:$0xf0] }
  0x53   : > { %988 = vmatpush.bf16.msra.mxu0 %v1640_v24  ;;  %940 = vmatmul.bf16.vlgmr.msrb.gmra.mxu1 %v1977_v58  ;;  %v1356_v24 = vor.u32 %v1725_v14, %v1353_v16  ;;  %v1745_v56 = vld [vmem:[%s1870_s18 + $0x14c] sm:$0xf]  ;;  %v1561_v61 = vld [vmem:[%s1870_s18 + $0x258] sm:$0xf0] }
  0x54   : > { %1007 = vmatpush.bf16.msra.mxu1 %v1688_v25  ;;  %v1484_v25 = vor.u32 %v1757_v17, %v1481_v18  ;;  %v1777_v60 = vld [vmem:[%s1870_s18 + $0x24c] sm:$0xf]  ;;  %v1673_v5 = vld [vmem:[%s1870_s18 + $0x338] sm:$0xf0] }
  0x55   : > { %979 = vmatpush.bf16.msra.mxu2 %v1432_v29  ;;  %v1753_v29 = vld [vmem:[%s1870_s18 + $0x18c] sm:$0xf]  ;;  %v1564_v6 = vor.u32 %v1777_v60, %v1561_v61  ;;  %v1417_v9 = vld [vmem:[%s1870_s18 + $0x138] sm:$0xf0] }
  0x56   : > { %965 = vmatpush.bf16.msra.mxu3 %v1304_v28  ;;  %v1337_v28 = vld [vmem:[%s1870_s18 + $0x98] sm:$0xf0]  ;;  %v1805_v4 = vld [vmem:[%s1870_s18 + $0x32c] sm:$0xf] }
  0x57   : > { %989 = vmatpush.bf16.msra.mxu0 %v1624_v37  ;;  %v1340_v37 = vor.u32 %v1721_v26, %v1337_v28  ;;  %v1741_v8 = vld [vmem:[%s1870_s18 + $0x12c] sm:$0xf]  ;;  %v1545_v11 = vld [vmem:[%s1870_s18 + $0x238] sm:$0xf0] }
  0x58   : > { %1008 = vmatpush.bf16.msra.mxu1 %v1672_v38  ;;  %v1468_v38 = vor.u32 %v1753_v29, %v1465_v30  ;;  %v1773_v10 = vld [vmem:[%s1870_s18 + $0x22c] sm:$0xf]  ;;  %v1420_v14 = vor.u32 %v1741_v8, %v1417_v9  ;;  %v1657_v17 = vld [vmem:[%s1870_s18 + $0x318] sm:$0xf0] }
  0x59   : > { %980 = vmatpush.bf16.msra.mxu2 %v1416_v43  ;;  %v1449_v43 = vld [vmem:[%s1870_s18 + $0x178] sm:$0xf0]  ;;  %v1801_v16 = vld [vmem:[%s1870_s18 + $0x30c] sm:$0xf]  ;;  %v1548_v18 = vor.u32 %v1773_v10, %v1545_v11 }
  0x5a   : > { %966 = vmatpush.bf16.msra.mxu3 %v1288_v42  ;;  %v1749_v42 = vld [vmem:[%s1870_s18 + $0x16c] sm:$0xf]  ;;  %v1401_v21 = vld [vmem:[%s1870_s18 + $0x118] sm:$0xf0] }
  0x5b   : > { %990 = vmatpush.bf16.msra.mxu0 %v1608_v53  ;;  %v1452_v50 = vor.u32 %v1749_v42, %v1449_v43  ;;  %v1689_v53 = vld [vmem:[%s1870_s18 + $0x358] sm:$0xf0]  ;;  %v1737_v20 = vld [vmem:[%s1870_s18 + $0x10c] sm:$0xf] }
  0x5c   : > { %1009 = vmatpush.bf16.msra.mxu1 %v1656_v54  ;;  %v1580_v54 = vor.u32 %v1781_v45, %v1577_v46  ;;  %v1769_v22 = vld [vmem:[%s1870_s18 + $0x20c] sm:$0xf]  ;;  %v1529_v23 = vld [vmem:[%s1870_s18 + $0x218] sm:$0xf0]  ;;  %v1404_v26 = vor.u32 %v1737_v20, %v1401_v21 }
  0x5d   : > { %981 = vmatpush.bf16.msra.mxu2 %v1400_v59  ;;  %v1528_v59 = vor.u32 %v1771_v48, %v1527_v47 }
  0x5e   : > { %967 = vmatpush.bf16.msra.mxu3 %v1272_v57  ;;  %v1433_v57 = vld [vmem:[%s1870_s18 + $0x158] sm:$0xf0] }
  0x5f   : > { %991 = vmatpush.bf16.msra.mxu0 %v1592_v7  ;;  %v1436_v2 = vor.u32 %v1745_v56, %v1433_v57  ;;  %v1289_v7 = vld [vmem:[%s1870_s18 + $0x38] sm:$0xf0] }
  0x60   : > { %1030 = vmatpush.bf16.msrb.mxu1 %v1516_v1  ;;  %982 = vmatmul.bf16.vlgmr.msra.gmra.mxu2 %v1984_v63  ;;  %v1308_v1 = vor.u32 %v1713_v51, %v1305_v55 }
  0x61   : > { %1044 = vmatpush.bf16.msrb.mxu2 %v1644_v3  ;;  %968 = vmatmul.bf16.vlgmr.msra.gmra.mxu3 %v1982_v62  ;;  %v1709_v3 = vld [vmem:[%s1870_s18 + $0x2c] sm:$0xf] }
  0x62   : > { %1016 = vmatpush.bf16.msrb.mxu3 %v1388_v0  ;;  %v1692_v0 = vor.u32 %v1809_v52, %v1689_v53 }
  0x63   : > { %992 = vmatpush.bf16.msra.mxu0 %v1576_v19  ;;  %1695 = vmatmul.msk.bf16.vlgmr.msra.gmra.mxu1 %vm844_vm0, %v1945_v33  ;;  %v1273_v19 = vld [vmem:[%s1870_s18 + $0x18] sm:$0xf0] }
  0x64   : > { %1031 = vmatpush.bf16.msrb.mxu1 %v1500_v13  ;;  %v1292_v13 = vor.u32 %v1709_v3, %v1289_v7 }
  0x65   : > { %1045 = vmatpush.bf16.msrb.mxu2 %v1628_v15  ;;  %v1705_v15 = vld [vmem:[%s1870_s18 + $0xc] sm:$0xf] }
  0x66   : > { %1017 = vmatpush.bf16.msrb.mxu3 %v1372_v12  ;;  %v1676_v12 = vor.u32 %v1805_v4, %v1673_v5 }
  0x67   : > { %993 = vmatpush.bf16.msra.mxu0 %v1560_v31 }
  0x68   : > { %1032 = vmatpush.bf16.msrb.mxu1 %v1484_v25  ;;  %v1276_v25 = vor.u32 %v1705_v15, %v1273_v19 }
  0x69   : > { %1046 = vmatpush.bf16.msrb.mxu2 %v1612_v27  ;;  %v1532_v27 = vor.u32 %v1769_v22, %v1529_v23 }
  0x6a   : > { %1018 = vmatpush.bf16.msrb.mxu3 %v1356_v24  ;;  %v1660_v24 = vor.u32 %v1801_v16, %v1657_v17 }
  0x6b   : > { %994 = vmatpush.bf16.msra.mxu0 %v1544_v44 }
  0x6c   : > { %1033 = vmatpush.bf16.msrb.mxu1 %v1468_v38 }
  0x6d   : > { %1047 = vmatpush.bf16.msrb.mxu2 %v1596_v40 }
  0x6e   : > { %1019 = vmatpush.bf16.msrb.mxu3 %v1340_v37 }
  0x6f   : > { %995 = vmatpush.bf16.msra.mxu0 %v1528_v59 }
  0x70   : > { %1034 = vmatpush.bf16.msrb.mxu1 %v1452_v50 }
  0x71   : > { %1048 = vmatpush.bf16.msrb.mxu2 %v1580_v54 }
  0x72   : > { %1020 = vmatpush.bf16.msrb.mxu3 %v1324_v49  ;;  %996 = vmatmul.bf16.vlgmr.msra.gmra.mxu0 %v1977_v58 }
  0x73   : > { %1063 = vmatpush.bf16.msrb.mxu0 %v1692_v0 }
  0x74   : > { %1035 = vmatpush.bf16.msrb.mxu1 %v1436_v2 }
  0x75   : > { %1049 = vmatpush.bf16.msrb.mxu2 %v1564_v6 }
  0x76   : > { %1021 = vmatpush.bf16.msrb.mxu3 %v1308_v1 }
  0x77   : > { %1064 = vmatpush.bf16.msrb.mxu0 %v1676_v12 }
  0x78   : > { %1036 = vmatpush.bf16.msrb.mxu1 %v1420_v14 }
  0x79   : > { %1050 = vmatpush.bf16.msrb.mxu2 %v1548_v18 }
  0x7a   : > { %1022 = vmatpush.bf16.msrb.mxu3 %v1292_v13 }
  0x7b   : > { %1065 = vmatpush.bf16.msrb.mxu0 %v1660_v24 }
  0x7c   : > { %1037 = vmatpush.bf16.msrb.mxu1 %v1404_v26 }
  0x7d   : > { %1051 = vmatpush.bf16.msrb.mxu2 %v1532_v27 }
  0x7e   : > { %1023 = vmatpush.bf16.msrb.mxu3 %v1276_v25 }
  0x7f   : > { %1038 = vmatmul.bf16.vlgmr.msrb.gmra.mxu1 %v1984_v63 }
  0x80   : > { %1052 = vmatmul.bf16.vlgmr.msrb.gmra.mxu2 %v1977_v58 }
  0x81   : > { %1024 = vmatmul.bf16.vlgmr.msrb.gmra.mxu3 %v1982_v62 }
  0x82   : > { %1696 = vmatmul.msk.bf16.vlgmr.msrb.gmra.mxu0 %vm844_vm0, %v1945_v33 }
  0xa4   : > { %v899_v30 = vpop.f32.mrf.mxu3 }
  0xac   : > { %v901_v35 = vpop.f32.mrf.mxu3 }
  0xaf   : > { %v857_v31 = vpop.f32.mrf.mxu0 }
  0xb0   : > { %v871_v28 = vpop.f32.mrf.mxu1 }
  0xb1   : > { %v872_v46 = vadd.f32 %v871_v28, %v857_v31 }
  0xb7   : > { %v885_v29 = vpop.f32.mrf.mxu2  ;;  %v859_v36 = vpop.f32.mrf.mxu0 }
  0xb8   : > { %v873_v32 = vpop.f32.mrf.mxu1  ;;  %v886_v53 = vadd.f32 %v885_v29, %v872_v46 }
  0xb9   : > { %v874_v59 = vadd.f32 %v873_v32, %v859_v36 }
  0xba   : > { %v2142_v57 = vadd.f32 %v899_v30, %v886_v53 }
  0xbc   : > { %v1082_v8 = vmul.f32 %v2142_v57, %v2142_v57 }
  0xbf   : > { %v887_v34 = vpop.f32.mrf.mxu2 }
  0xc0   : > { %v888_v6 = vadd.f32 %v887_v34, %v874_v59 }
  0xc2   : > { %v2159_v17 = vadd.f32 %v901_v35, %v888_v6 }
  0xc4   : > { %v913_v39 = vpop.f32.mrf.mxu3  ;;  %v1086_v28 = vmul.f32 %v2159_v17, %v2159_v17 }
  0xc7   : > { %v955_v38 = vpop.f32.mrf.mxu2 }
  0xcc   : > { %v915_v63 = vpop.f32.mrf.mxu3 }
  0xcf   : > { %v927_v40 = vpop.f32.mrf.mxu0  ;;  %v957_v41 = vpop.f32.mrf.mxu2 }
  0xd0   : > { %v941_v37 = vpop.f32.mrf.mxu1  ;;  %v928_v45 = vadd.f32 %v927_v40, %v913_v39 }
  0xd2   : > { %v942_v51 = vadd.f32 %v941_v37, %v928_v45 }
  0xd4   : > { %v2140_v55 = vadd.f32 %v955_v38, %v942_v51 }
  0xd6   : > { %v1083_v1 = vmul.f32 %v2140_v55, %v2140_v55  ;;  %v1072_v11 = vadd.f32 %v2140_v55, %v2142_v57 }
  0xd7   : > { %v929_v42 = vpop.f32.mrf.mxu0 }
  0xd8   : > { %v943_v62 = vpop.f32.mrf.mxu1  ;;  %v930_v56 = vadd.f32 %v929_v42, %v915_v63  ;;  %v1090_v16 = vadd.f32 %v1083_v1, %v1082_v8 }
  0xda   : > { %v944_v2 = vadd.f32 %v943_v62, %v930_v56 }
  0xdc   : > { %v2154_v13 = vadd.f32 %v957_v41, %v944_v2 }
  0xde   : > { %v1087_v24 = vmul.f32 %v2154_v13, %v2154_v13  ;;  %v1077_v29 = vadd.f32 %v2154_v13, %v2159_v17 }
  0xe0   : > { %v1011_v58 = vpop.f32.mrf.mxu1  ;;  %v1095_v36 = vadd.f32 %v1087_v24, %v1086_v28 }
  0xe3   : > { %v983_v44 = vpop.f32.mrf.mxu2 }
  0xe4   : > { %v969_v43 = vpop.f32.mrf.mxu3 }
  0xe5   : > { %v984_v48 = vadd.f32 %v983_v44, %v969_v43 }
  0xe8   : > { %v1013_v47 = vpop.f32.mrf.mxu1 }
  0xeb   : > { %v985_v52 = vpop.f32.mrf.mxu2 }
  0xec   : > { %v971_v49 = vpop.f32.mrf.mxu3 }
  0xed   : > { %v986_v3 = vadd.f32 %v985_v52, %v971_v49 }
  0xef   : > { %v997_v33 = vpop.f32.mrf.mxu0 }
  0xf0   : > { %v998_v54 = vadd.f32 %v997_v33, %v984_v48 }
  0xf2   : > { %v2144_v61 = vadd.f32 %v1011_v58, %v998_v54 }
  0xf4   : > { %v1084_v12 = vmul.f32 %v2144_v61, %v2144_v61  ;;  %v1073_v15 = vadd.f32 %v1072_v11, %v2144_v61 }
  0xf6   : > { %v1091_v21 = vadd.f32 %v1090_v16, %v1084_v12 }
  0xf7   : > { %v999_v50 = vpop.f32.mrf.mxu0 }
  0xf8   : > { %v1000_v9 = vadd.f32 %v999_v50, %v986_v3 }
  0xfa   : > { %v2161_v18 = vadd.f32 %v1013_v47, %v1000_v9 }
  0xfc   : > { %v1039_v60 = vpop.f32.mrf.mxu1  ;;  %v1088_v31 = vmul.f32 %v2161_v18, %v2161_v18  ;;  %v1078_v35 = vadd.f32 %v1077_v29, %v2161_v18 }
  0xfe   : > { %v1096_v39 = vadd.f32 %v1095_v36, %v1088_v31 }
  0xff   : > { %v1067_v7 = vpop.f32.mrf.mxu0 }
 0x103   : > { %v1053_v5 = vpop.f32.mrf.mxu2 }
 0x104   : > { %v1025_v0 = vpop.f32.mrf.mxu3  ;;  %v1041_v22 = vpop.f32.mrf.mxu1 }
 0x105   : > { %v1040_v4 = vadd.f32 %v1039_v60, %v1025_v0 }
 0x107   : > { %v1054_v10 = vadd.f32 %v1053_v5, %v1040_v4  ;;  %v1069_v32 = vpop.f32.mrf.mxu0 }
 0x109   : > { %v2156_v14 = vadd.f32 %v1067_v7, %v1054_v10  ;;  %v1157_v7 = vstv %s1148_s8 }
 0x10b   : > { %v1074_v19 = vadd.f32 %v1073_v15, %v2156_v14  ;;  %v1085_v20 = vmul.f32 %v2156_v14, %v2156_v14  ;;  %v1055_v27 = vpop.f32.mrf.mxu2 }
 0x10c   : > { %v1027_v23 = vpop.f32.mrf.mxu3 }
 0x10d   : > { %v1042_v25 = vadd.f32 %v1041_v22, %v1027_v23  ;;  %1075 = vadd.xlane.f32.xlu0 %v1074_v19  ;;  %v1092_v26 = vadd.f32 %v1091_v21, %v1085_v20 }
 0x10f   : > { %v1056_v30 = vadd.f32 %v1055_v27, %v1042_v25  ;;  %1093 = vadd.xlane.f32.xlu1 %v1092_v26 }
 0x111   : > { %v2174_v34 = vadd.f32 %v1069_v32, %v1056_v30 }
 0x113   : > { %v1079_v37 = vadd.f32 %v1078_v35, %v2174_v34  ;;  %v1089_v38 = vmul.f32 %v2174_v34, %v2174_v34 }
 0x115   : > { %1080 = vadd.xlane.f32.xlu0 %v1079_v37  ;;  %v1097_v40 = vadd.f32 %v1096_v39, %v1089_v38 }
 0x117   : > { %1098 = vadd.xlane.f32.xlu1 %v1097_v40 }
 0x180   : > { %v1076_v62 = vpop.xlane.xlu0 %1075 }
 0x181   : > { %v1100_v41 = vmul.f32 0.001953125, %v1076_v62 }
 0x182   : > { %v1094_v63 = vpop.xlane.xlu1 %1093 }
 0x183   : > { %v1102_v42 = vmul.f32 0.001953125, %v1094_v63  ;;  %v1104_v58 = vmul.f32 %v1100_v41, %v1100_v41  ;;  %v1110_v3 = vsub.f32 %v2142_v57, %v1100_v41  ;;  %v1111_v4 = vsub.f32 %v2140_v55, %v1100_v41 }
 0x184   : > { %v1112_v5 = vsub.f32 %v2144_v61, %v1100_v41  ;;  %v1113_v6 = vsub.f32 %v2156_v14, %v1100_v41 }
 0x185   : > { %v1106_v43 = vsub.f32 %v1102_v42, %v1104_v58 }
 0x187   : > { %v1108_v44 = vmax.f32 %v1106_v43, 0.0 }
 0x188   : > { %v1081_v33 = vpop.xlane.xlu0 %1080 }
 0x189   : > { %v2180_v45 = vmul.f32 0.001953125, %v1081_v33  ;;  %v1118_v46 = vadd.f32 1e-05, %v1108_v44 }
 0x18a   : > { %v1099_v47 = vpop.xlane.xlu1 %1098 }
 0x18b   : > { %1821 = vrsqrt.f32 %v1118_v46  ;;  %v1103_v48 = vmul.f32 0.001953125, %v1099_v47  ;;  %v1105_v49 = vmul.f32 %v2180_v45, %v2180_v45  ;;  %vm1126_vm2 = vweird.f32 %v1118_v46 }
 0x18c   : > { %v1114_v25 = vsub.f32 %v2159_v17, %v2180_v45  ;;  %v1115_v26 = vsub.f32 %v2154_v13, %v2180_v45  ;;  %v1116_v27 = vsub.f32 %v2161_v18, %v2180_v45  ;;  %v1117_v28 = vsub.f32 %v2174_v34, %v2180_v45 }
 0x18d   : > { %v1107_v50 = vsub.f32 %v1103_v48, %v1105_v49 }
 0x18f   : > { %v1109_v51 = vmax.f32 %v1107_v50, 0.0 }
 0x191   : > { %v1822_v52 = vpop.eup %1821  ;;  %v1119_v53 = vadd.f32 1e-05, %v1109_v51 }
 0x192   : > { %v1121_v54 = vmul.f32 %v1822_v52, %v1118_v46  ;;  %vm1127_vm1 = vweird.f32 %v1822_v52 }
 0x193   : > { %1823 = vrsqrt.f32 %v1119_v53  ;;  %vm1128_vm3 = vmor %vm1126_vm2, %vm1127_vm1  ;;  %vm1136_vm9 = vweird.f32 %v1119_v53 }
 0x194   : > { %v1122_v56 = vmul.f32 %v1822_v52, %v1121_v54 }
 0x196   : > { %v1123_v59 = vmul.f32 0.5, %v1122_v56 }
 0x198   : > { %v1124_v60 = vsub.f32 1.5, %v1123_v59 }
 0x199   : > { %v1824_v0 = vpop.eup %1823 }
 0x19a   : > { %v1125_v1 = vmul.f32 %v1822_v52, %v1124_v60  ;;  %v1131_v2 = vmul.f32 %v1824_v0, %v1119_v53  ;;  %vm1137_vm8 = vweird.f32 %v1824_v0 }
 0x19b   : > { %vm1138_vm10 = vmor %vm1136_vm9, %vm1137_vm8 }
 0x19c   : > { %v1129_v8 = vsel %vm1128_vm3, %v1822_v52, %v1125_v1  ;;  %v1132_v9 = vmul.f32 %v1824_v0, %v1131_v2 }
 0x19d   : > { %v1140_v10 = vmul.f32 %v1129_v8, %v1110_v3  ;;  %v1141_v11 = vmul.f32 %v1129_v8, %v1111_v4  ;;  %v1142_v12 = vmul.f32 %v1129_v8, %v1112_v5  ;;  %v1143_v15 = vmul.f32 %v1129_v8, %v1113_v6 }
 0x19e   : > { %v1133_v16 = vmul.f32 0.5, %v1132_v9 }
 0x19f   : > { %vm1149_vm4 = vcmp.ge.f32.partialorder %v1140_v10, 0.0  ;;  %vm1150_vm5 = vcmp.ge.f32.partialorder %v1141_v11, 0.0  ;;  %vm1151_vm6 = vcmp.ge.f32.partialorder %v1142_v12, 0.0  ;;  %vm1152_vm7 = vcmp.ge.f32.partialorder %v1143_v15, 0.0 }
 0x1a0   : > { %v1158_v55 = vmul.f32 %v1157_v7, %v1140_v10  ;;  %v1159_v57 = vmul.f32 %v1157_v7, %v1141_v11  ;;  %v1160_v61 = vmul.f32 %v1157_v7, %v1142_v12  ;;  %v1161_v14 = vmul.f32 %v1157_v7, %v1143_v15 }
 0x1a1   : > { %v1134_v19 = vsub.f32 1.5, %v1133_v16 }
 0x1a2   : > { %v1166_v20 = vsel %vm1149_vm4, %v1140_v10, %v1158_v55  ;;  %v1167_v21 = vsel %vm1150_vm5, %v1141_v11, %v1159_v57  ;;  %v1168_v22 = vsel %vm1151_vm6, %v1142_v12, %v1160_v61  ;;  %v1169_v23 = vsel %vm1152_vm7, %v1143_v15, %v1161_v14 }
 0x1a3   : > { %1174 = vst [vmem:[%s2192_s12] sm:$0xff] %v1166_v20  ;;  %v1135_v24 = vmul.f32 %v1824_v0, %v1134_v19 }
 0x1a4   : > { %1175 = vst [vmem:[%s2192_s12 + $0x8] sm:$0xff] %v1167_v21 }
 0x1a5   : > { %1176 = vst [vmem:[%s2192_s12 + $0x10] sm:$0xff] %v1168_v22  ;;  %v1139_v29 = vsel %vm1138_vm10, %v1824_v0, %v1135_v24 }
 0x1a6   : > { %1177 = vst [vmem:[%s2192_s12 + $0x18] sm:$0xff] %v1169_v23  ;;  %v1144_v30 = vmul.f32 %v1139_v29, %v1114_v25  ;;  %v1145_v31 = vmul.f32 %v1139_v29, %v1115_v26  ;;  %v1146_v32 = vmul.f32 %v1139_v29, %v1116_v27  ;;  %v1147_v17 = vmul.f32 %v1139_v29, %v1117_v28 }
 0x1a8   : > { %vm1153_vm11 = vcmp.ge.f32.partialorder %v1144_v30, 0.0  ;;  %vm1154_vm12 = vcmp.ge.f32.partialorder %v1145_v31, 0.0  ;;  %vm1155_vm13 = vcmp.ge.f32.partialorder %v1146_v32, 0.0  ;;  %vm1156_vm14 = vcmp.ge.f32.partialorder %v1147_v17, 0.0 }
 0x1a9   : > { %v1162_v13 = vmul.f32 %v1157_v7, %v1144_v30  ;;  %v1163_v18 = vmul.f32 %v1157_v7, %v1145_v31  ;;  %v1164_v35 = vmul.f32 %v1157_v7, %v1146_v32  ;;  %v1165_v34 = vmul.f32 %v1157_v7, %v1147_v17 }
 0x1ab   : > { %v1170_v36 = vsel %vm1153_vm11, %v1144_v30, %v1162_v13  ;;  %v1171_v37 = vsel %vm1154_vm12, %v1145_v31, %v1163_v18  ;;  %v1172_v38 = vsel %vm1155_vm13, %v1146_v32, %v1164_v35  ;;  %v1173_v39 = vsel %vm1156_vm14, %v1147_v17, %v1165_v34 }
 0x1ac   : > { %1178 = vst [vmem:[%s2192_s12 + $0x20] sm:$0xff] %v1170_v36 }
 0x1ad   : > { %1179 = vst [vmem:[%s2192_s12 + $0x28] sm:$0xff] %v1171_v37 }
 0x1ae   : > { %1180 = vst [vmem:[%s2192_s12 + $0x30] sm:$0xff] %v1172_v38 }
 0x1af   : > { %1181 = vst [vmem:[%s2192_s12 + $0x38] sm:$0xff] %v1173_v39 }
 0x1b0 PF: > { %s14_s14 = sadd.s32 1, %s1831_s14  }
 0x1b1   : > { %p11_p4 = scmp.ge.s32.totalorder %s14_s14, 4  }
 0x1b3   :  { %13 = sbr.rel (!%p11_p4) target bundleno = 2 (0x2), region = 62 }

// kernel: unet_encoder_forward.15
= control target key start
LH: loop header
LB: loop body
LE: loop exit
PB: predicated region body
PF: predicated region fallthrough
CT: control target
= control target key end

     0   :  { %s919_s14 = smov 0   ;;  %s1054_s0 = inlined_call_operand.<no memory space> [shape: f32[1], index: 0, kind: input, shape index: {}]   ;;  %s1055_s1 = inlined_call_operand.vmem [shape: bf16[2,432,128], index: 1, kind: input, shape index: {}]   ;;  %s1056_s2 = inlined_call_operand.vmem [shape: bf16[32,432], index: 2, kind: input, shape index: {}]   ;;  %s1057_s3 = inlined_call_operand.vmem [shape: f32[2,32,128], index: 3, kind: output, shape index: {}]  }
   0x1   :  { %8 = sst [smem:[#allocation2]] %s1054_s0 }
   0x2 LB: > { %s683_s15 = sadd.s32 4294967295, %s894_s14   ;;  %p687_p0 = scmp.ge.s32.totalorder %s894_s14, 1  ;;  %s894_s14 = sphi %s919_s14, %s14_s14  }
   0x3   : > { %p138_p1 = scmp.lt.s32.totalorder %s894_s14, 3 }
   0x5   : > { %p139_p2 = pnand %p687_p0, %p138_p1 }
   0x6   : > { %p162_p3 = scmp.lt.s32.totalorder (!%p139_p2), %s683_s15, 1  ;;  %s610_s25 = sld [smem:[#allocation2]] (!%p139_p2) }
   0x7   : > { %142 = sbr.rel (%p139_p2) target bundleno = 366 (0x16e), region = 32 }
   0xc   : > { %s1059_s15 = smov (!%p162_p3, %s683_s15), 1  ;;  %v837_v15 = vld [vmem:[%s1056_s2 + $0xc] sm:$0xf]  ;;  %v703_v16 = vld [vmem:[%s1056_s2 + $0x18] sm:$0xf0]  ;;  %vm435_vm0 = vcmask 392192  }
   0xd   : > { %s871_s0 = smul.u32 216, %s1059_s15  ;;  %v706_v20 = vor.u32 %v837_v15, %v703_v16  ;;  %v693_v27 = vld [vmem:[%s1056_s2] sm:$0xf]  ;;  %v838_v28 = vld [vmem:[%s1056_s2 + $0xc] sm:$0xf0]  ;;  %s835_s26 = sshll.u32 %s1059_s15, 5 }
   0xe   : > { %v836_v29 = vld [vmem:[%s1056_s2 + $0x4] sm:$0xf]  ;;  %v695_v32 = vld [vmem:[%s1056_s2 + $0x10] sm:$0xf0]  ;;  %v701_v34 = vld [vmem:[%s1056_s2 + $0x8] sm:$0xf]  ;;  %v694_v38 = vor.u32 %v838_v28, %v693_v27  ;;  %s1041_s29 = scalar_lea.vmem %s1057_s3, %s835_s26 }
   0xf   : > { %s933_s18 = scalar_lea.vmem %s1055_s1, %s871_s0  ;;  %v839_v35 = vld [vmem:[%s1056_s2 + $0x14] sm:$0xf0]  ;;  %v841_v36 = vld [vmem:[%s1056_s2 + $0x2c] sm:$0xf]  ;;  %v719_v37 = vld [vmem:[%s1056_s2 + $0x38] sm:$0xf0]  ;;  %v698_v39 = vor.u32 %v836_v29, %v695_v32 }
  0x10   : > { %v851_v0 = vld [vmem:[%s933_s18 + $0x38] sm:$0xff]  ;;  %v850_v3 = vld [vmem:[%s933_s18 + $0x30] sm:$0xff]  ;;  %v849_v7 = vld [vmem:[%s933_s18 + $0x28] sm:$0xff]  ;;  %v702_v40 = vor.u32 %v839_v35, %v701_v34  ;;  %v722_v41 = vor.u32 %v841_v36, %v719_v37 }
  0x11   : > { %v859_v1 = vld [vmem:[%s933_s18 + $0x78] sm:$0xff]  ;;  %442 = vmatpush.bf16.msra.mxu0 %v851_v0  ;;  %v858_v4 = vld [vmem:[%s933_s18 + $0x70] sm:$0xff]  ;;  %v857_v8 = vld [vmem:[%s933_s18 + $0x68] sm:$0xff] }
  0x12   : > { %v867_v2 = vld [vmem:[%s933_s18 + $0xb8] sm:$0xff]  ;;  %461 = vmatpush.bf16.msra.mxu1 %v859_v1  ;;  %v866_v5 = vld [vmem:[%s933_s18 + $0xb0] sm:$0xff]  ;;  %v865_v9 = vld [vmem:[%s933_s18 + $0xa8] sm:$0xff] }
  0x13   : > { %480 = vmatpush.bf16.msra.mxu2 %v867_v2  ;;  %v870_v6 = vld [vmem:[%s933_s18 + $0xd0] sm:$0xff]  ;;  %v869_v10 = vld [vmem:[%s933_s18 + $0xc8] sm:$0xff]  ;;  %v848_v11 = vld [vmem:[%s933_s18 + $0x20] sm:$0xff] }
  0x14   : > { %504 = vmatpush.bf16.msra.mxu3 %v870_v6  ;;  %v856_v12 = vld [vmem:[%s933_s18 + $0x60] sm:$0xff]  ;;  %v847_v17 = vld [vmem:[%s933_s18 + $0x18] sm:$0xff]  ;;  %v846_v21 = vld [vmem:[%s933_s18 + $0x10] sm:$0xff] }
  0x15   : > { %443 = vmatpush.bf16.msra.mxu0 %v850_v3  ;;  %v864_v13 = vld [vmem:[%s933_s18 + $0xa0] sm:$0xff]  ;;  %v855_v18 = vld [vmem:[%s933_s18 + $0x58] sm:$0xff]  ;;  %v854_v22 = vld [vmem:[%s933_s18 + $0x50] sm:$0xff] }
  0x16   : > { %462 = vmatpush.bf16.msra.mxu1 %v858_v4  ;;  %v868_v14 = vld [vmem:[%s933_s18 + $0xc0] sm:$0xff]  ;;  %v863_v19 = vld [vmem:[%s933_s18 + $0x98] sm:$0xff]  ;;  %v862_v23 = vld [vmem:[%s933_s18 + $0x90] sm:$0xff] }
  0x17   : > { %481 = vmatpush.bf16.msra.mxu2 %v866_v5  ;;  %v845_v24 = vld [vmem:[%s933_s18 + $0x8] sm:$0xff]  ;;  %v844_v30 = vld [vmem:[%s933_s18] sm:$0xff]  ;;  %v842_v43 = vld [vmem:[%s1056_s2 + $0x2c] sm:$0xf0] }
  0x18   : > { %505 = vmatpush.bf16.msra.mxu3 %v869_v10  ;;  %v853_v25 = vld [vmem:[%s933_s18 + $0x48] sm:$0xff]  ;;  %v852_v31 = vld [vmem:[%s933_s18 + $0x40] sm:$0xff]  ;;  %v711_v45 = vld [vmem:[%s1056_s2 + $0x30] sm:$0xf0] }
  0x19   : > { %444 = vmatpush.bf16.msra.mxu0 %v849_v7  ;;  %v861_v26 = vld [vmem:[%s933_s18 + $0x88] sm:$0xff]  ;;  %v860_v33 = vld [vmem:[%s933_s18 + $0x80] sm:$0xff]  ;;  %v843_v47 = vld [vmem:[%s1056_s2 + $0x34] sm:$0xf0] }
  0x1a   : > { %463 = vmatpush.bf16.msra.mxu1 %v857_v8  ;;  %v709_v42 = vld [vmem:[%s1056_s2 + $0x20] sm:$0xf]  ;;  %v840_v44 = vld [vmem:[%s1056_s2 + $0x24] sm:$0xf]  ;;  %v717_v46 = vld [vmem:[%s1056_s2 + $0x28] sm:$0xf] }
  0x1b   : > { %482 = vmatpush.bf16.msra.mxu2 %v865_v9  ;;  %v710_v48 = vor.u32 %v842_v43, %v709_v42  ;;  %v714_v49 = vor.u32 %v840_v44, %v711_v45  ;;  %v718_v50 = vor.u32 %v843_v47, %v717_v46 }
  0x1c   : > { %506 = vmatpush.bf16.msra.mxu3 %v868_v14 }
  0x1d   : > { %445 = vmatpush.bf16.msra.mxu0 %v848_v11 }
  0x1e   : > { %464 = vmatpush.bf16.msra.mxu1 %v856_v12 }
  0x1f   : > { %483 = vmatpush.bf16.msra.mxu2 %v864_v13  ;;  %831 = vmatmul.msk.bf16.vlgmr.msra.gmra.mxu3 %vm435_vm0, %v706_v20 }
  0x21   : > { %446 = vmatpush.bf16.msra.mxu0 %v847_v17 }
  0x22   : > { %465 = vmatpush.bf16.msra.mxu1 %v855_v18 }
  0x23   : > { %484 = vmatpush.bf16.msra.mxu2 %v863_v19 }
  0x25   : > { %447 = vmatpush.bf16.msra.mxu0 %v846_v21 }
  0x26   : > { %466 = vmatpush.bf16.msra.mxu1 %v854_v22 }
  0x27   : > { %485 = vmatpush.bf16.msra.mxu2 %v862_v23 }
  0x29   : > { %448 = vmatpush.bf16.msra.mxu0 %v845_v24 }
  0x2a   : > { %467 = vmatpush.bf16.msra.mxu1 %v853_v25 }
  0x2b   : > { %486 = vmatpush.bf16.msra.mxu2 %v861_v26 }
  0x2d   : > { %449 = vmatpush.bf16.msra.mxu0 %v844_v30 }
  0x2e   : > { %468 = vmatpush.bf16.msra.mxu1 %v852_v31 }
  0x2f   : > { %487 = vmatpush.bf16.msra.mxu2 %v860_v33  ;;  %832 = vmatmul.msk.bf16.gmra.mxu3 %vm435_vm0, %v722_v41 }
  0x30   : > { %450 = vmatmul.bf16.vlgmr.msra.gmra.mxu0 %v694_v38 }
  0x31   : > { %469 = vmatmul.bf16.vlgmr.msra.gmra.mxu1 %v698_v39 }
  0x32   : > { %488 = vmatmul.bf16.vlgmr.msra.gmra.mxu2 %v702_v40 }
  0x40   : > { %455 = vmatmul.bf16.gmra.mxu0 %v710_v48 }
  0x41   : > { %474 = vmatmul.bf16.gmra.mxu1 %v714_v49 }
  0x42   : > { %493 = vmatmul.bf16.gmra.mxu2 %v718_v50 }
  0xa2   : > { %v508_v53 = vpop.f32.mrf.mxu3 }
  0xaa   : > { %v510_v61 = vpop.f32.mrf.mxu3 }
  0xad   : > { %v451_v51 = vpop.f32.mrf.mxu0 }
  0xae   : > { %v470_v52 = vpop.f32.mrf.mxu1 }
  0xaf   : > { %v471_v54 = vadd.f32 %v470_v52, %v451_v51 }
  0xb2   : > { %v513_v6 = vpop.f32.mrf.mxu3 }
  0xb5   : > { %v489_v55 = vpop.f32.mrf.mxu2  ;;  %v453_v57 = vpop.f32.mrf.mxu0 }
  0xb6   : > { %v490_v56 = vadd.f32 %v489_v55, %v471_v54  ;;  %v472_v58 = vpop.f32.mrf.mxu1 }
  0xb7   : > { %v473_v62 = vadd.f32 %v472_v58, %v453_v57 }
  0xb8   : > { %v1012_v59 = vadd.f32 %v508_v53, %v490_v56  ;;  %v615_v53 = vstv %s610_s25 }
  0xba   : > { %518 = vadd.xlane.f32.xlu0 %v1012_v59  ;;  %v526_v60 = vmul.f32 %v1012_v59, %v1012_v59  ;;  %v515_v16 = vpop.f32.mrf.mxu3 }
  0xbc   : > { %530 = vadd.xlane.f32.xlu2 %v526_v60 }
  0xbd   : > { %v491_v63 = vpop.f32.mrf.mxu2  ;;  %v456_v1 = vpop.f32.mrf.mxu0 }
  0xbe   : > { %v492_v0 = vadd.f32 %v491_v63, %v473_v62  ;;  %v475_v2 = vpop.f32.mrf.mxu1 }
  0xbf   : > { %v476_v4 = vadd.f32 %v475_v2, %v456_v1 }
  0xc0   : > { %v1017_v3 = vadd.f32 %v510_v61, %v492_v0 }
  0xc2   : > { %520 = vadd.xlane.f32.xlu0 %v1017_v3  ;;  %v527_v5 = vmul.f32 %v1017_v3, %v1017_v3 }
  0xc4   : > { %532 = vadd.xlane.f32.xlu2 %v527_v5 }
  0xc5   : > { %v494_v7 = vpop.f32.mrf.mxu2  ;;  %v458_v10 = vpop.f32.mrf.mxu0 }
  0xc6   : > { %v495_v8 = vadd.f32 %v494_v7, %v476_v4  ;;  %v477_v11 = vpop.f32.mrf.mxu1 }
  0xc7   : > { %v478_v13 = vadd.f32 %v477_v11, %v458_v10 }
  0xc8   : > { %v1022_v9 = vadd.f32 %v513_v6, %v495_v8 }
  0xca   : > { %522 = vadd.xlane.f32.xlu1 %v1022_v9  ;;  %v528_v12 = vmul.f32 %v1022_v9, %v1022_v9 }
  0xcc   : > { %534 = vadd.xlane.f32.xlu0 %v528_v12 }
  0xcd   : > { %v496_v14 = vpop.f32.mrf.mxu2 }
  0xce   : > { %v497_v15 = vadd.f32 %v496_v14, %v478_v13 }
  0xd0   : > { %v1027_v17 = vadd.f32 %v515_v16, %v497_v15 }
  0xd2   : > { %524 = vadd.xlane.f32.xlu1 %v1027_v17  ;;  %v529_v18 = vmul.f32 %v1027_v17, %v1027_v17 }
  0xda   : > { %536 = vadd.xlane.f32.xlu1 %v529_v18 }
 0x12d   : > { %v519_v19 = vpop.xlane.xlu0 %518 }
 0x12e   : > { %v538_v20 = vmul.f32 0.015625, %v519_v19 }
 0x12f   : > { %v531_v21 = vpop.xlane.xlu2 %530 }
 0x130   : > { %v546_v22 = vmul.f32 %v538_v20, %v538_v20  ;;  %v542_v23 = vmul.f32 0.015625, %v531_v21  ;;  %v558_v51 = vsub.f32 %v1012_v59, %v538_v20 }
 0x132   : > { %v550_v24 = vsub.f32 %v542_v23, %v546_v22 }
 0x134   : > { %v554_v25 = vmax.f32 %v550_v24, 0.0 }
 0x135   : > { %v521_v26 = vpop.xlane.xlu0 %520 }
 0x136   : > { %v562_v27 = vadd.f32 1e-05, %v554_v25  ;;  %v539_v28 = vmul.f32 0.015625, %v521_v26 }
 0x137   : > { %v533_v29 = vpop.xlane.xlu2 %532 }
 0x138   : > { %880 = vrsqrt.f32 %v562_v27  ;;  %v547_v30 = vmul.f32 %v539_v28, %v539_v28  ;;  %v543_v31 = vmul.f32 0.015625, %v533_v29  ;;  %vm572_vm2 = vweird.f32 %v562_v27 }
 0x139   : > { %v559_v6 = vsub.f32 %v1017_v3, %v539_v28 }
 0x13a   : > { %v551_v32 = vsub.f32 %v543_v31, %v547_v30 }
 0x13c   : > { %v555_v33 = vmax.f32 %v551_v32, 0.0 }
 0x13d   : > { %v523_v34 = vpop.xlane.xlu1 %522 }
 0x13e   : > { %v881_v35 = vpop.eup %880  ;;  %v1032_v36 = vmul.f32 0.015625, %v523_v34  ;;  %v563_v38 = vadd.f32 1e-05, %v555_v33 }
 0x13f   : > { %v567_v37 = vmul.f32 %v881_v35, %v562_v27  ;;  %v535_v39 = vpop.xlane.xlu0 %534  ;;  %vm573_vm1 = vweird.f32 %v881_v35 }
 0x140   : > { %v548_v40 = vmul.f32 %v1032_v36, %v1032_v36  ;;  %v544_v41 = vmul.f32 0.015625, %v535_v39  ;;  %882 = vrsqrt.f32 %v563_v38  ;;  %vm574_vm3 = vmor %vm572_vm2, %vm573_vm1  ;;  %vm582_vm6 = vweird.f32 %v563_v38 }
 0x141   : > { %v568_v42 = vmul.f32 %v881_v35, %v567_v37  ;;  %v560_v3 = vsub.f32 %v1022_v9, %v1032_v36 }
 0x142   : > { %v552_v43 = vsub.f32 %v544_v41, %v548_v40 }
 0x143   : > { %v569_v44 = vmul.f32 0.5, %v568_v42 }
 0x144   : > { %v556_v45 = vmax.f32 %v552_v43, 0.0 }
 0x145   : > { %v570_v46 = vsub.f32 1.5, %v569_v44  ;;  %v525_v47 = vpop.xlane.xlu1 %524 }
 0x146   : > { %v564_v48 = vadd.f32 1e-05, %v556_v45  ;;  %v883_v49 = vpop.eup %882  ;;  %v541_v57 = vmul.f32 0.015625, %v525_v47 }
 0x147   : > { %v571_v50 = vmul.f32 %v881_v35, %v570_v46  ;;  %v577_v52 = vmul.f32 %v883_v49, %v563_v38  ;;  %vm583_vm5 = vweird.f32 %v883_v49 }
 0x148   : > { %884 = vrsqrt.f32 %v564_v48  ;;  %v549_v0 = vmul.f32 %v541_v57, %v541_v57  ;;  %vm584_vm7 = vmor %vm582_vm6, %vm583_vm5  ;;  %vm592_vm10 = vweird.f32 %v564_v48  ;;  %v561_v29 = vsub.f32 %v1027_v17, %v541_v57 }
 0x149   : > { %v575_v54 = vsel %vm574_vm3, %v881_v35, %v571_v50  ;;  %v578_v56 = vmul.f32 %v883_v49, %v577_v52 }
 0x14a   : > { %v606_v55 = vmul.f32 %v575_v54, %v558_v51 }
 0x14b   : > { %v579_v60 = vmul.f32 0.5, %v578_v56 }
 0x14c   : > { %vm611_vm4 = vcmp.ge.f32.partialorder %v606_v55, 0.0  ;;  %v616_v58 = vmul.f32 %v615_v53, %v606_v55 }
 0x14d   : > { %v537_v59 = vpop.xlane.xlu1 %536  ;;  %v580_v63 = vsub.f32 1.5, %v579_v60 }
 0x14e   : > { %v885_v61 = vpop.eup %884  ;;  %v620_v62 = vsel %vm611_vm4, %v606_v55, %v616_v58  ;;  %v545_v1 = vmul.f32 0.015625, %v537_v59 }
 0x14f   : > { %624 = vst [vmem:[%s1041_s29] sm:$0xff] %v620_v62  ;;  %v587_v2 = vmul.f32 %v885_v61, %v564_v48  ;;  %v581_v4 = vmul.f32 %v883_v49, %v580_v63  ;;  %vm593_vm9 = vweird.f32 %v885_v61 }
 0x150   : > { %v553_v5 = vsub.f32 %v545_v1, %v549_v0  ;;  %vm594_vm11 = vmor %vm592_vm10, %vm593_vm9 }
 0x151   : > { %v588_v7 = vmul.f32 %v885_v61, %v587_v2  ;;  %v585_v8 = vsel %vm584_vm7, %v883_v49, %v581_v4 }
 0x152   : > { %v557_v10 = vmax.f32 %v553_v5, 0.0  ;;  %v607_v11 = vmul.f32 %v585_v8, %v559_v6 }
 0x153   : > { %v589_v12 = vmul.f32 0.5, %v588_v7 }
 0x154   : > { %v565_v13 = vadd.f32 1e-05, %v557_v10  ;;  %vm612_vm8 = vcmp.ge.f32.partialorder %v607_v11, 0.0  ;;  %v617_v14 = vmul.f32 %v615_v53, %v607_v11 }
 0x155   : > { %v590_v15 = vsub.f32 1.5, %v589_v12 }
 0x156   : > { %886 = vrsqrt.f32 %v565_v13  ;;  %v621_v16 = vsel %vm612_vm8, %v607_v11, %v617_v14  ;;  %vm602_vm14 = vweird.f32 %v565_v13 }
 0x157   : > { %v591_v18 = vmul.f32 %v885_v61, %v590_v15  ;;  %625 = vst [vmem:[%s1041_s29 + $0x8] sm:$0xff] %v621_v16 }
 0x159   : > { %v595_v19 = vsel %vm594_vm11, %v885_v61, %v591_v18 }
 0x15a   : > { %v608_v20 = vmul.f32 %v595_v19, %v560_v3 }
 0x15c   : > { %v887_v21 = vpop.eup %886  ;;  %vm613_vm12 = vcmp.ge.f32.partialorder %v608_v20, 0.0  ;;  %v618_v22 = vmul.f32 %v615_v53, %v608_v20 }
 0x15d   : > { %v597_v23 = vmul.f32 %v887_v21, %v565_v13  ;;  %vm603_vm13 = vweird.f32 %v887_v21 }
 0x15e   : > { %v622_v24 = vsel %vm613_vm12, %v608_v20, %v618_v22  ;;  %vm604_vm15 = vmor %vm602_vm14, %vm603_vm13 }
 0x15f   : > { %626 = vst [vmem:[%s1041_s29 + $0x10] sm:$0xff] %v622_v24  ;;  %v598_v25 = vmul.f32 %v887_v21, %v597_v23 }
 0x161   : > { %v599_v26 = vmul.f32 0.5, %v598_v25 }
 0x163   : > { %v600_v27 = vsub.f32 1.5, %v599_v26 }
 0x165   : > { %v601_v28 = vmul.f32 %v887_v21, %v600_v27 }
 0x167   : > { %v605_v9 = vsel %vm604_vm15, %v887_v21, %v601_v28 }
 0x168   : > { %v609_v30 = vmul.f32 %v605_v9, %v561_v29 }
 0x16a   : > { %vm614_vm0 = vcmp.ge.f32.partialorder %v609_v30, 0.0  ;;  %v619_v31 = vmul.f32 %v615_v53, %v609_v30 }
 0x16c   : > { %v623_v32 = vsel %vm614_vm0, %v609_v30, %v619_v31 }
 0x16d   : > { %627 = vst [vmem:[%s1041_s29 + $0x18] sm:$0xff] %v623_v32 }
 0x16e PF: > { %s14_s14 = sadd.s32 1, %s894_s14  }
 0x16f   : > { %p11_p4 = scmp.ge.s32.totalorder %s14_s14, 4  }
 0x171   :  { %13 = sbr.rel (!%p11_p4) target bundleno = 2 (0x2), region = 62 }

// kernel: unet_encoder_forward.16
= control target key start
LH: loop header
LB: loop body
LE: loop exit
PB: predicated region body
PF: predicated region fallthrough
CT: control target
= control target key end

     0   :  { %s1405_s14 = smov 0   ;;  %s1601_s0 = inlined_call_operand.<no memory space> [shape: f32[1], index: 0, kind: input, shape index: {}]   ;;  %s1602_s1 = inlined_call_operand.vmem [shape: bf16[2,864,128], index: 1, kind: input, shape index: {}]   ;;  %s1603_s2 = inlined_call_operand.vmem [shape: bf16[32,864], index: 2, kind: input, shape index: {}]   ;;  %s1604_s3 = inlined_call_operand.vmem [shape: f32[2,32,128], index: 3, kind: output, shape index: {}]  }
   0x1   :  { %8 = sst [smem:[#allocation2]] %s1601_s0 }
   0x2 LB: > { %s996_s15 = sadd.s32 4294967295, %s1380_s14   ;;  %p1000_p0 = scmp.ge.s32.totalorder %s1380_s14, 1  ;;  %s1380_s14 = sphi %s1405_s14, %s14_s14  }
   0x3   : > { %p138_p1 = scmp.lt.s32.totalorder %s1380_s14, 3 }
   0x5   : > { %p139_p2 = pnand %p1000_p0, %p138_p1 }
   0x6   : > { %p162_p3 = scmp.lt.s32.totalorder (!%p139_p2), %s996_s15, 1  ;;  %s923_s24 = sld [smem:[#allocation2]] (!%p139_p2) }
   0x7   : > { %142 = sbr.rel (%p139_p2) target bundleno = 396 (0x18c), region = 32 }
   0xc   : > { %s1606_s15 = smov (!%p162_p3, %s996_s15), 1  ;;  %v1006_v28 = vld [vmem:[%s1603_s2] sm:$0xf]  ;;  %v1284_v29 = vld [vmem:[%s1603_s2 + $0x18] sm:$0xf0]  ;;  %vm691_vm0 = vcmask 785408  }
   0xd   : > { %s1357_s0 = smul.u32 432, %s1606_s15  ;;  %v1281_v30 = vld [vmem:[%s1603_s2 + $0x4] sm:$0xf]  ;;  %v1008_v35 = vld [vmem:[%s1603_s2 + $0x1c] sm:$0xf0]  ;;  %v1007_v42 = vor.u32 %v1284_v29, %v1006_v28  ;;  %s1280_s25 = sshll.u32 %s1606_s15, 5 }
   0xe   : > { %v1014_v36 = vld [vmem:[%s1603_s2 + $0x8] sm:$0xf]  ;;  %v1285_v37 = vld [vmem:[%s1603_s2 + $0x20] sm:$0xf0]  ;;  %v1282_v38 = vld [vmem:[%s1603_s2 + $0xc] sm:$0xf]  ;;  %v1011_v43 = vor.u32 %v1281_v30, %v1008_v35  ;;  %s1588_s28 = scalar_lea.vmem %s1604_s3, %s1280_s25 }
   0xf   : > { %s1419_s18 = scalar_lea.vmem %s1602_s1, %s1357_s0  ;;  %v1016_v39 = vld [vmem:[%s1603_s2 + $0x24] sm:$0xf0]  ;;  %v1015_v44 = vor.u32 %v1285_v37, %v1014_v36  ;;  %v1034_v56 = vld [vmem:[%s1603_s2 + $0x38] sm:$0xf]  ;;  %v1291_v57 = vld [vmem:[%s1603_s2 + $0x50] sm:$0xf0] }
  0x10   : > { %v1302_v0 = vld [vmem:[%s1419_s18 + $0x38] sm:$0xff]  ;;  %v1301_v4 = vld [vmem:[%s1419_s18 + $0x30] sm:$0xff]  ;;  %v1300_v8 = vld [vmem:[%s1419_s18 + $0x28] sm:$0xff]  ;;  %v1019_v45 = vor.u32 %v1282_v38, %v1016_v39 }
  0x11   : > { %v1310_v1 = vld [vmem:[%s1419_s18 + $0x78] sm:$0xff]  ;;  %698 = vmatpush.bf16.msra.mxu0 %v1302_v0  ;;  %v1309_v5 = vld [vmem:[%s1419_s18 + $0x70] sm:$0xff]  ;;  %v1308_v9 = vld [vmem:[%s1419_s18 + $0x68] sm:$0xff] }
  0x12   : > { %v1318_v2 = vld [vmem:[%s1419_s18 + $0xb8] sm:$0xff]  ;;  %717 = vmatpush.bf16.msra.mxu1 %v1310_v1  ;;  %v1317_v6 = vld [vmem:[%s1419_s18 + $0xb0] sm:$0xff]  ;;  %v1316_v10 = vld [vmem:[%s1419_s18 + $0xa8] sm:$0xff] }
  0x13   : > { %v1326_v3 = vld [vmem:[%s1419_s18 + $0xf8] sm:$0xff]  ;;  %736 = vmatpush.bf16.msra.mxu2 %v1318_v2  ;;  %v1325_v7 = vld [vmem:[%s1419_s18 + $0xf0] sm:$0xff]  ;;  %v1324_v11 = vld [vmem:[%s1419_s18 + $0xe8] sm:$0xff]  ;;  %v1035_v2 = vor.u32 %v1291_v57, %v1034_v56 }
  0x14   : > { %755 = vmatpush.bf16.msra.mxu3 %v1326_v3  ;;  %v1299_v12 = vld [vmem:[%s1419_s18 + $0x20] sm:$0xff]  ;;  %v1298_v16 = vld [vmem:[%s1419_s18 + $0x18] sm:$0xff]  ;;  %v1297_v20 = vld [vmem:[%s1419_s18 + $0x10] sm:$0xff] }
  0x15   : > { %699 = vmatpush.bf16.msra.mxu0 %v1301_v4  ;;  %v1307_v13 = vld [vmem:[%s1419_s18 + $0x60] sm:$0xff]  ;;  %v1306_v17 = vld [vmem:[%s1419_s18 + $0x58] sm:$0xff]  ;;  %v1305_v21 = vld [vmem:[%s1419_s18 + $0x50] sm:$0xff] }
  0x16   : > { %718 = vmatpush.bf16.msra.mxu1 %v1309_v5  ;;  %v1315_v14 = vld [vmem:[%s1419_s18 + $0xa0] sm:$0xff]  ;;  %v1314_v18 = vld [vmem:[%s1419_s18 + $0x98] sm:$0xff]  ;;  %v1313_v22 = vld [vmem:[%s1419_s18 + $0x90] sm:$0xff] }
  0x17   : > { %737 = vmatpush.bf16.msra.mxu2 %v1317_v6  ;;  %v1323_v15 = vld [vmem:[%s1419_s18 + $0xe0] sm:$0xff]  ;;  %v1322_v19 = vld [vmem:[%s1419_s18 + $0xd8] sm:$0xff]  ;;  %v1321_v23 = vld [vmem:[%s1419_s18 + $0xd0] sm:$0xff] }
  0x18   : > { %756 = vmatpush.bf16.msra.mxu3 %v1325_v7  ;;  %v1296_v24 = vld [vmem:[%s1419_s18 + $0x8] sm:$0xff]  ;;  %v1295_v31 = vld [vmem:[%s1419_s18] sm:$0xff]  ;;  %v1334_v41 = vld [vmem:[%s1419_s18 + $0x138] sm:$0xff] }
  0x19   : > { %700 = vmatpush.bf16.msra.mxu0 %v1300_v8  ;;  %v1304_v25 = vld [vmem:[%s1419_s18 + $0x48] sm:$0xff]  ;;  %v1303_v32 = vld [vmem:[%s1419_s18 + $0x40] sm:$0xff]  ;;  %v1342_v46 = vld [vmem:[%s1419_s18 + $0x178] sm:$0xff] }
  0x1a   : > { %719 = vmatpush.bf16.msra.mxu1 %v1308_v9  ;;  %v1312_v26 = vld [vmem:[%s1419_s18 + $0x88] sm:$0xff]  ;;  %v1311_v33 = vld [vmem:[%s1419_s18 + $0x80] sm:$0xff]  ;;  %v1333_v47 = vld [vmem:[%s1419_s18 + $0x130] sm:$0xff] }
  0x1b   : > { %738 = vmatpush.bf16.msra.mxu2 %v1316_v10  ;;  %v1320_v27 = vld [vmem:[%s1419_s18 + $0xc8] sm:$0xff]  ;;  %v1319_v34 = vld [vmem:[%s1419_s18 + $0xc0] sm:$0xff]  ;;  %v1341_v49 = vld [vmem:[%s1419_s18 + $0x170] sm:$0xff] }
  0x1c   : > { %757 = vmatpush.bf16.msra.mxu3 %v1324_v11  ;;  %v1348_v40 = vld [vmem:[%s1419_s18 + $0x1a8] sm:$0xff]  ;;  %v1347_v48 = vld [vmem:[%s1419_s18 + $0x1a0] sm:$0xff]  ;;  %v1346_v51 = vld [vmem:[%s1419_s18 + $0x198] sm:$0xff] }
  0x1d   : > { %701 = vmatpush.bf16.msra.mxu0 %v1299_v12  ;;  %v1332_v50 = vld [vmem:[%s1419_s18 + $0x128] sm:$0xff]  ;;  %v1331_v53 = vld [vmem:[%s1419_s18 + $0x120] sm:$0xff]  ;;  %v1345_v54 = vld [vmem:[%s1419_s18 + $0x190] sm:$0xff] }
  0x1e   : > { %720 = vmatpush.bf16.msra.mxu1 %v1307_v13  ;;  %v1340_v52 = vld [vmem:[%s1419_s18 + $0x168] sm:$0xff]  ;;  %v1339_v55 = vld [vmem:[%s1419_s18 + $0x160] sm:$0xff]  ;;  %v1288_v58 = vld [vmem:[%s1603_s2 + $0x3c] sm:$0xf] }
  0x1f   : > { %739 = vmatpush.bf16.msra.mxu2 %v1315_v14  ;;  %v1036_v59 = vld [vmem:[%s1603_s2 + $0x54] sm:$0xf0]  ;;  %v1042_v60 = vld [vmem:[%s1603_s2 + $0x40] sm:$0xf]  ;;  %v1292_v61 = vld [vmem:[%s1603_s2 + $0x58] sm:$0xf0] }
  0x20   : > { %758 = vmatpush.bf16.msra.mxu3 %v1323_v15  ;;  %v1289_v62 = vld [vmem:[%s1603_s2 + $0x44] sm:$0xf]  ;;  %v1044_v63 = vld [vmem:[%s1603_s2 + $0x5c] sm:$0xf0]  ;;  %v1330_v0 = vld [vmem:[%s1419_s18 + $0x118] sm:$0xff]  ;;  %v1039_v3 = vor.u32 %v1288_v58, %v1036_v59  ;;  %v1043_v4 = vor.u32 %v1292_v61, %v1042_v60 }
  0x21   : > { %702 = vmatpush.bf16.msra.mxu0 %v1298_v16  ;;  %v1344_v1 = vld [vmem:[%s1419_s18 + $0x188] sm:$0xff]  ;;  %v1047_v5 = vor.u32 %v1289_v62, %v1044_v63  ;;  %v1338_v6 = vld [vmem:[%s1419_s18 + $0x158] sm:$0xff]  ;;  %v1329_v7 = vld [vmem:[%s1419_s18 + $0x110] sm:$0xff] }
  0x22   : > { %721 = vmatpush.bf16.msra.mxu1 %v1306_v17  ;;  %v1343_v8 = vld [vmem:[%s1419_s18 + $0x180] sm:$0xff]  ;;  %v1337_v9 = vld [vmem:[%s1419_s18 + $0x150] sm:$0xff]  ;;  %v1328_v10 = vld [vmem:[%s1419_s18 + $0x108] sm:$0xff] }
  0x23   : > { %740 = vmatpush.bf16.msra.mxu2 %v1314_v18  ;;  %v1336_v11 = vld [vmem:[%s1419_s18 + $0x148] sm:$0xff]  ;;  %v1327_v12 = vld [vmem:[%s1419_s18 + $0x100] sm:$0xff]  ;;  %v1022_v14 = vld [vmem:[%s1603_s2 + $0x10] sm:$0xf] }
  0x24   : > { %759 = vmatpush.bf16.msra.mxu3 %v1322_v19  ;;  %v1335_v13 = vld [vmem:[%s1419_s18 + $0x140] sm:$0xff]  ;;  %v1286_v15 = vld [vmem:[%s1603_s2 + $0x28] sm:$0xf0]  ;;  %v1050_v16 = vld [vmem:[%s1603_s2 + $0x48] sm:$0xf] }
  0x25   : > { %703 = vmatpush.bf16.msra.mxu0 %v1297_v20  ;;  %v1293_v17 = vld [vmem:[%s1603_s2 + $0x60] sm:$0xf0]  ;;  %v1283_v18 = vld [vmem:[%s1603_s2 + $0x14] sm:$0xf]  ;;  %v1024_v19 = vld [vmem:[%s1603_s2 + $0x2c] sm:$0xf0] }
  0x26   : > { %722 = vmatpush.bf16.msra.mxu1 %v1305_v21  ;;  %v1030_v20 = vld [vmem:[%s1603_s2 + $0x18] sm:$0xf]  ;;  %v1287_v21 = vld [vmem:[%s1603_s2 + $0x30] sm:$0xf0]  ;;  %v1058_v28 = vld [vmem:[%s1603_s2 + $0x50] sm:$0xf] }
  0x27   : > { %741 = vmatpush.bf16.msra.mxu2 %v1313_v22  ;;  %v1023_v22 = vor.u32 %v1286_v15, %v1022_v14  ;;  %v1294_v29 = vld [vmem:[%s1603_s2 + $0x68] sm:$0xf0] }
  0x28   : > { %760 = vmatpush.bf16.msra.mxu3 %v1321_v23  ;;  %v1051_v23 = vor.u32 %v1293_v17, %v1050_v16 }
  0x29   : > { %704 = vmatpush.bf16.msra.mxu0 %v1296_v24  ;;  %v1027_v24 = vor.u32 %v1283_v18, %v1024_v19 }
  0x2a   : > { %723 = vmatpush.bf16.msra.mxu1 %v1304_v25  ;;  %v1031_v25 = vor.u32 %v1287_v21, %v1030_v20 }
  0x2b   : > { %742 = vmatpush.bf16.msra.mxu2 %v1312_v26  ;;  %v1290_v26 = vld [vmem:[%s1603_s2 + $0x4c] sm:$0xf] }
  0x2c   : > { %761 = vmatpush.bf16.msra.mxu3 %v1320_v27  ;;  %v1052_v27 = vld [vmem:[%s1603_s2 + $0x64] sm:$0xf0] }
  0x2d   : > { %705 = vmatpush.bf16.msra.mxu0 %v1295_v31  ;;  %v1055_v30 = vor.u32 %v1290_v26, %v1052_v27  ;;  %v1059_v31 = vor.u32 %v1294_v29, %v1058_v28 }
  0x2e   : > { %724 = vmatpush.bf16.msra.mxu1 %v1303_v32 }
  0x2f   : > { %743 = vmatpush.bf16.msra.mxu2 %v1311_v33 }
  0x30   : > { %762 = vmatpush.bf16.msra.mxu3 %v1319_v34  ;;  %706 = vmatmul.bf16.vlgmr.msra.gmra.mxu0 %v1007_v42 }
  0x31   : > { %774 = vmatpush.bf16.msrb.mxu0 %v1334_v41  ;;  %725 = vmatmul.bf16.vlgmr.msra.gmra.mxu1 %v1011_v43 }
  0x32   : > { %744 = vmatmul.bf16.vlgmr.msra.gmra.mxu2 %v1015_v44  ;;  %793 = vmatpush.bf16.msrb.mxu1 %v1342_v46 }
  0x33   : > { %814 = vmatpush.bf16.msrb.mxu2 %v1348_v40  ;;  %763 = vmatmul.bf16.vlgmr.msra.gmra.mxu3 %v1019_v45 }
  0x34   : > { %1349 = vmatpush.bf16.msrb.mxu3 %v1334_v41 }
  0x35   : > { %775 = vmatpush.bf16.msrb.mxu0 %v1333_v47 }
  0x36   : > { %794 = vmatpush.bf16.msrb.mxu1 %v1341_v49 }
  0x37   : > { %815 = vmatpush.bf16.msrb.mxu2 %v1347_v48 }
  0x38   : > { %1350 = vmatpush.bf16.msrb.mxu3 %v1333_v47 }
  0x39   : > { %776 = vmatpush.bf16.msrb.mxu0 %v1332_v50 }
  0x3a   : > { %795 = vmatpush.bf16.msrb.mxu1 %v1340_v52 }
  0x3b   : > { %816 = vmatpush.bf16.msrb.mxu2 %v1346_v51 }
  0x3c   : > { %1351 = vmatpush.bf16.msrb.mxu3 %v1332_v50 }
  0x3d   : > { %777 = vmatpush.bf16.msrb.mxu0 %v1331_v53 }
  0x3e   : > { %796 = vmatpush.bf16.msrb.mxu1 %v1339_v55 }
  0x3f   : > { %817 = vmatpush.bf16.msrb.mxu2 %v1345_v54 }
  0x40   : > { %1352 = vmatpush.bf16.msrb.mxu3 %v1331_v53  ;;  %711 = vmatmul.bf16.gmra.mxu0 %v1035_v2 }
  0x41   : > { %778 = vmatpush.bf16.msrb.mxu0 %v1330_v0  ;;  %730 = vmatmul.bf16.gmra.mxu1 %v1039_v3 }
  0x42   : > { %749 = vmatmul.bf16.gmra.mxu2 %v1043_v4  ;;  %797 = vmatpush.bf16.msrb.mxu1 %v1338_v6 }
  0x43   : > { %818 = vmatpush.bf16.msrb.mxu2 %v1344_v1  ;;  %768 = vmatmul.bf16.gmra.mxu3 %v1047_v5 }
  0x44   : > { %1353 = vmatpush.bf16.msrb.mxu3 %v1330_v0 }
  0x45   : > { %779 = vmatpush.bf16.msrb.mxu0 %v1329_v7 }
  0x46   : > { %798 = vmatpush.bf16.msrb.mxu1 %v1337_v9 }
  0x47   : > { %819 = vmatpush.bf16.msrb.mxu2 %v1343_v8 }
  0x48   : > { %1354 = vmatpush.bf16.msrb.mxu3 %v1329_v7 }
  0x49   : > { %780 = vmatpush.bf16.msrb.mxu0 %v1328_v10 }
  0x4a   : > { %799 = vmatpush.bf16.msrb.mxu1 %v1336_v11 }
  0x4c   : > { %1355 = vmatpush.bf16.msrb.mxu3 %v1328_v10 }
  0x4d   : > { %781 = vmatpush.bf16.msrb.mxu0 %v1327_v12 }
  0x4e   : > { %800 = vmatpush.bf16.msrb.mxu1 %v1335_v13 }
  0x50   : > { %1356 = vmatpush.bf16.msrb.mxu3 %v1327_v12  ;;  %782 = vmatmul.bf16.vlgmr.msrb.gmra.mxu0 %v1023_v22 }
  0x51   : > { %801 = vmatmul.bf16.vlgmr.msrb.gmra.mxu1 %v1027_v24 }
  0x52   : > { %1276 = vmatmul.msk.bf16.vlgmr.msrb.gmra.mxu2 %vm691_vm0, %v1031_v25 }
  0x53   : > { %787 = vmatmul.bf16.vlgmr.msrb.gmra.mxu3 %v1051_v23 }
  0x61   : > { %806 = vmatmul.bf16.gmra.mxu1 %v1055_v30 }
  0x62   : > { %1277 = vmatmul.msk.bf16.gmra.mxu2 %vm691_vm0, %v1059_v31 }
  0xad   : > { %v707_v32 = vpop.f32.mrf.mxu0 }
  0xae   : > { %v726_v33 = vpop.f32.mrf.mxu1 }
  0xaf   : > { %v727_v45 = vadd.f32 %v726_v33, %v707_v32 }
  0xb5   : > { %v745_v34 = vpop.f32.mrf.mxu2  ;;  %v709_v36 = vpop.f32.mrf.mxu0 }
  0xb6   : > { %v764_v35 = vpop.f32.mrf.mxu3  ;;  %v728_v37 = vpop.f32.mrf.mxu1  ;;  %v746_v47 = vadd.f32 %v745_v34, %v727_v45 }
  0xb7   : > { %v729_v52 = vadd.f32 %v728_v37, %v709_v36 }
  0xb8   : > { %v765_v50 = vadd.f32 %v764_v35, %v746_v47 }
  0xbd   : > { %v747_v38 = vpop.f32.mrf.mxu2  ;;  %v712_v39 = vpop.f32.mrf.mxu0 }
  0xbe   : > { %v731_v40 = vpop.f32.mrf.mxu1  ;;  %v766_v41 = vpop.f32.mrf.mxu3  ;;  %v748_v54 = vadd.f32 %v747_v38, %v729_v52 }
  0xbf   : > { %v732_v62 = vadd.f32 %v731_v40, %v712_v39 }
  0xc0   : > { %v767_v59 = vadd.f32 %v766_v41, %v748_v54 }
  0xc5   : > { %v750_v42 = vpop.f32.mrf.mxu2  ;;  %v714_v43 = vpop.f32.mrf.mxu0 }
  0xc6   : > { %v733_v44 = vpop.f32.mrf.mxu1  ;;  %v769_v46 = vpop.f32.mrf.mxu3  ;;  %v751_v1 = vadd.f32 %v750_v42, %v732_v62 }
  0xc7   : > { %v734_v9 = vadd.f32 %v733_v44, %v714_v43 }
  0xc8   : > { %v770_v7 = vadd.f32 %v769_v46, %v751_v1 }
  0xcd   : > { %v752_v48 = vpop.f32.mrf.mxu2  ;;  %v783_v49 = vpop.f32.mrf.mxu0 }
  0xce   : > { %v802_v51 = vpop.f32.mrf.mxu1  ;;  %v784_v53 = vadd.f32 %v783_v49, %v765_v50  ;;  %v771_v55 = vpop.f32.mrf.mxu3  ;;  %v753_v11 = vadd.f32 %v752_v48, %v734_v9 }
  0xd0   : > { %v803_v56 = vadd.f32 %v802_v51, %v784_v53  ;;  %v772_v16 = vadd.f32 %v771_v55, %v753_v11 }
  0xd5   : > { %v821_v57 = vpop.f32.mrf.mxu2  ;;  %v785_v58 = vpop.f32.mrf.mxu0 }
  0xd6   : > { %v1559_v60 = vadd.f32 %v821_v57, %v803_v56  ;;  %v804_v61 = vpop.f32.mrf.mxu1  ;;  %v786_v63 = vadd.f32 %v785_v58, %v767_v59  ;;  %v788_v3 = vpop.f32.mrf.mxu3  ;;  %v928_v58 = vstv %s923_s24 }
  0xd7   : > { %v789_v10 = vadd.f32 %v788_v3, %v770_v7 }
  0xd8   : > { %831 = vadd.xlane.f32.xlu0 %v1559_v60  ;;  %v839_v0 = vmul.f32 %v1559_v60, %v1559_v60  ;;  %v805_v2 = vadd.f32 %v804_v61, %v786_v63 }
  0xda   : > { %843 = vadd.xlane.f32.xlu2 %v839_v0 }
  0xdd   : > { %v823_v4 = vpop.f32.mrf.mxu2 }
  0xde   : > { %v1564_v5 = vadd.f32 %v823_v4, %v805_v2  ;;  %v807_v6 = vpop.f32.mrf.mxu1  ;;  %v790_v15 = vpop.f32.mrf.mxu3 }
  0xdf   : > { %v808_v12 = vadd.f32 %v807_v6, %v789_v10  ;;  %v791_v19 = vadd.f32 %v790_v15, %v772_v16 }
  0xe0   : > { %833 = vadd.xlane.f32.xlu0 %v1564_v5  ;;  %v840_v8 = vmul.f32 %v1564_v5, %v1564_v5 }
  0xe2   : > { %845 = vadd.xlane.f32.xlu2 %v840_v8 }
  0xe5   : > { %v826_v13 = vpop.f32.mrf.mxu2 }
  0xe6   : > { %v1569_v14 = vadd.f32 %v826_v13, %v808_v12  ;;  %v809_v18 = vpop.f32.mrf.mxu1 }
  0xe7   : > { %v810_v20 = vadd.f32 %v809_v18, %v791_v19 }
  0xe8   : > { %835 = vadd.xlane.f32.xlu1 %v1569_v14  ;;  %v841_v17 = vmul.f32 %v1569_v14, %v1569_v14 }
  0xea   : > { %847 = vadd.xlane.f32.xlu0 %v841_v17 }
  0xed   : > { %v828_v21 = vpop.f32.mrf.mxu2 }
  0xee   : > { %v1574_v22 = vadd.f32 %v828_v21, %v810_v20 }
  0xf0   : > { %837 = vadd.xlane.f32.xlu1 %v1574_v22  ;;  %v842_v23 = vmul.f32 %v1574_v22, %v1574_v22 }
  0xf8   : > { %849 = vadd.xlane.f32.xlu1 %v842_v23 }
 0x14b   : > { %v832_v24 = vpop.xlane.xlu0 %831 }
 0x14c   : > { %v851_v25 = vmul.f32 0.015625, %v832_v24 }
 0x14d   : > { %v844_v26 = vpop.xlane.xlu2 %843 }
 0x14e   : > { %v859_v27 = vmul.f32 %v851_v25, %v851_v25  ;;  %v855_v28 = vmul.f32 0.015625, %v844_v26  ;;  %v871_v56 = vsub.f32 %v1559_v60, %v851_v25 }
 0x150   : > { %v863_v29 = vsub.f32 %v855_v28, %v859_v27 }
 0x152   : > { %v867_v30 = vmax.f32 %v863_v29, 0.0 }
 0x153   : > { %v834_v31 = vpop.xlane.xlu0 %833 }
 0x154   : > { %v875_v32 = vadd.f32 1e-05, %v867_v30  ;;  %v852_v33 = vmul.f32 0.015625, %v834_v31 }
 0x155   : > { %v846_v34 = vpop.xlane.xlu2 %845 }
 0x156   : > { %1366 = vrsqrt.f32 %v875_v32  ;;  %v860_v35 = vmul.f32 %v852_v33, %v852_v33  ;;  %v856_v36 = vmul.f32 0.015625, %v846_v34  ;;  %vm885_vm2 = vweird.f32 %v875_v32 }
 0x157   : > { %v872_v11 = vsub.f32 %v1564_v5, %v852_v33 }
 0x158   : > { %v864_v37 = vsub.f32 %v856_v36, %v860_v35 }
 0x15a   : > { %v868_v38 = vmax.f32 %v864_v37, 0.0 }
 0x15b   : > { %v836_v39 = vpop.xlane.xlu1 %835 }
 0x15c   : > { %v1367_v40 = vpop.eup %1366  ;;  %v1579_v41 = vmul.f32 0.015625, %v836_v39  ;;  %v876_v43 = vadd.f32 1e-05, %v868_v38 }
 0x15d   : > { %v880_v42 = vmul.f32 %v1367_v40, %v875_v32  ;;  %v848_v44 = vpop.xlane.xlu0 %847  ;;  %vm886_vm1 = vweird.f32 %v1367_v40 }
 0x15e   : > { %v861_v45 = vmul.f32 %v1579_v41, %v1579_v41  ;;  %v857_v46 = vmul.f32 0.015625, %v848_v44  ;;  %1368 = vrsqrt.f32 %v876_v43  ;;  %vm887_vm3 = vmor %vm885_vm2, %vm886_vm1  ;;  %vm895_vm6 = vweird.f32 %v876_v43 }
 0x15f   : > { %v881_v47 = vmul.f32 %v1367_v40, %v880_v42  ;;  %v873_v5 = vsub.f32 %v1569_v14, %v1579_v41 }
 0x160   : > { %v865_v48 = vsub.f32 %v857_v46, %v861_v45 }
 0x161   : > { %v882_v49 = vmul.f32 0.5, %v881_v47 }
 0x162   : > { %v869_v50 = vmax.f32 %v865_v48, 0.0 }
 0x163   : > { %v883_v51 = vsub.f32 1.5, %v882_v49  ;;  %v838_v52 = vpop.xlane.xlu1 %837 }
 0x164   : > { %v877_v53 = vadd.f32 1e-05, %v869_v50  ;;  %v1369_v54 = vpop.eup %1368  ;;  %v854_v63 = vmul.f32 0.015625, %v838_v52 }
 0x165   : > { %v884_v55 = vmul.f32 %v1367_v40, %v883_v51  ;;  %v890_v57 = vmul.f32 %v1369_v54, %v876_v43  ;;  %vm896_vm5 = vweird.f32 %v1369_v54 }
 0x166   : > { %1370 = vrsqrt.f32 %v877_v53  ;;  %v862_v6 = vmul.f32 %v854_v63, %v854_v63  ;;  %vm897_vm7 = vmor %vm895_vm6, %vm896_vm5  ;;  %vm905_vm10 = vweird.f32 %v877_v53  ;;  %v874_v34 = vsub.f32 %v1574_v22, %v854_v63 }
 0x167   : > { %v888_v59 = vsel %vm887_vm3, %v1367_v40, %v884_v55  ;;  %v891_v62 = vmul.f32 %v1369_v54, %v890_v57 }
 0x168   : > { %v919_v61 = vmul.f32 %v888_v59, %v871_v56 }
 0x169   : > { %v892_v1 = vmul.f32 0.5, %v891_v62 }
 0x16a   : > { %vm924_vm4 = vcmp.ge.f32.partialorder %v919_v61, 0.0  ;;  %v929_v0 = vmul.f32 %v928_v58, %v919_v61 }
 0x16b   : > { %v850_v60 = vpop.xlane.xlu1 %849  ;;  %v893_v4 = vsub.f32 1.5, %v892_v1 }
 0x16c   : > { %v1371_v2 = vpop.eup %1370  ;;  %v933_v3 = vsel %vm924_vm4, %v919_v61, %v929_v0  ;;  %v858_v7 = vmul.f32 0.015625, %v850_v60 }
 0x16d   : > { %937 = vst [vmem:[%s1588_s28] sm:$0xff] %v933_v3  ;;  %v900_v8 = vmul.f32 %v1371_v2, %v877_v53  ;;  %v894_v9 = vmul.f32 %v1369_v54, %v893_v4  ;;  %vm906_vm9 = vweird.f32 %v1371_v2 }
 0x16e   : > { %v866_v10 = vsub.f32 %v858_v7, %v862_v6  ;;  %vm907_vm11 = vmor %vm905_vm10, %vm906_vm9 }
 0x16f   : > { %v901_v12 = vmul.f32 %v1371_v2, %v900_v8  ;;  %v898_v13 = vsel %vm897_vm7, %v1369_v54, %v894_v9 }
 0x170   : > { %v870_v15 = vmax.f32 %v866_v10, 0.0  ;;  %v920_v16 = vmul.f32 %v898_v13, %v872_v11 }
 0x171   : > { %v902_v17 = vmul.f32 0.5, %v901_v12 }
 0x172   : > { %v878_v18 = vadd.f32 1e-05, %v870_v15  ;;  %vm925_vm8 = vcmp.ge.f32.partialorder %v920_v16, 0.0  ;;  %v930_v19 = vmul.f32 %v928_v58, %v920_v16 }
 0x173   : > { %v903_v20 = vsub.f32 1.5, %v902_v17 }
 0x174   : > { %1372 = vrsqrt.f32 %v878_v18  ;;  %v934_v21 = vsel %vm925_vm8, %v920_v16, %v930_v19  ;;  %vm915_vm14 = vweird.f32 %v878_v18 }
 0x175   : > { %v904_v23 = vmul.f32 %v1371_v2, %v903_v20  ;;  %938 = vst [vmem:[%s1588_s28 + $0x8] sm:$0xff] %v934_v21 }
 0x177   : > { %v908_v24 = vsel %vm907_vm11, %v1371_v2, %v904_v23 }
 0x178   : > { %v921_v25 = vmul.f32 %v908_v24, %v873_v5 }
 0x17a   : > { %v1373_v26 = vpop.eup %1372  ;;  %vm926_vm12 = vcmp.ge.f32.partialorder %v921_v25, 0.0  ;;  %v931_v27 = vmul.f32 %v928_v58, %v921_v25 }
 0x17b   : > { %v910_v28 = vmul.f32 %v1373_v26, %v878_v18  ;;  %vm916_vm13 = vweird.f32 %v1373_v26 }
 0x17c   : > { %v935_v29 = vsel %vm926_vm12, %v921_v25, %v931_v27  ;;  %vm917_vm15 = vmor %vm915_vm14, %vm916_vm13 }
 0x17d   : > { %939 = vst [vmem:[%s1588_s28 + $0x10] sm:$0xff] %v935_v29  ;;  %v911_v30 = vmul.f32 %v1373_v26, %v910_v28 }
 0x17f   : > { %v912_v31 = vmul.f32 0.5, %v911_v30 }
 0x181   : > { %v913_v32 = vsub.f32 1.5, %v912_v31 }
 0x183   : > { %v914_v33 = vmul.f32 %v1373_v26, %v913_v32 }
 0x185   : > { %v918_v14 = vsel %vm917_vm15, %v1373_v26, %v914_v33 }
 0x186   : > { %v922_v35 = vmul.f32 %v918_v14, %v874_v34 }
 0x188   : > { %vm927_vm0 = vcmp.ge.f32.partialorder %v922_v35, 0.0  ;;  %v932_v36 = vmul.f32 %v928_v58, %v922_v35 }
 0x18a   : > { %v936_v37 = vsel %vm927_vm0, %v922_v35, %v932_v36 }
 0x18b   : > { %940 = vst [vmem:[%s1588_s28 + $0x18] sm:$0xff] %v936_v37 }
 0x18c PF: > { %s14_s14 = sadd.s32 1, %s1380_s14  }
 0x18d   : > { %p11_p4 = scmp.ge.s32.totalorder %s14_s14, 4  }
 0x18f   :  { %13 = sbr.rel (!%p11_p4) target bundleno = 2 (0x2), region = 62 }

// kernel: unet_encoder_forward.17
= control target key start
LH: loop header
LB: loop body
LE: loop exit
PB: predicated region body
PF: predicated region fallthrough
CT: control target
= control target key end

     0   :  { %s1405_s14 = smov 0   ;;  %s1601_s0 = inlined_call_operand.<no memory space> [shape: f32[1], index: 0, kind: input, shape index: {}]   ;;  %s1602_s1 = inlined_call_operand.vmem [shape: bf16[2,864,128], index: 1, kind: input, shape index: {}]   ;;  %s1603_s2 = inlined_call_operand.vmem [shape: bf16[32,864], index: 2, kind: input, shape index: {}]   ;;  %s1604_s3 = inlined_call_operand.vmem [shape: f32[2,32,128], index: 3, kind: output, shape index: {}]  }
   0x1   :  { %8 = sst [smem:[#allocation2]] %s1601_s0 }
   0x2 LB: > { %s996_s15 = sadd.s32 4294967295, %s1380_s14   ;;  %p1000_p0 = scmp.ge.s32.totalorder %s1380_s14, 1  ;;  %s1380_s14 = sphi %s1405_s14, %s14_s14  }
   0x3   : > { %p138_p1 = scmp.lt.s32.totalorder %s1380_s14, 3 }
   0x5   : > { %p139_p2 = pnand %p1000_p0, %p138_p1 }
   0x6   : > { %p162_p3 = scmp.lt.s32.totalorder (!%p139_p2), %s996_s15, 1  ;;  %s923_s24 = sld [smem:[#allocation2]] (!%p139_p2) }
   0x7   : > { %142 = sbr.rel (%p139_p2) target bundleno = 396 (0x18c), region = 32 }
   0xc   : > { %s1606_s15 = smov (!%p162_p3, %s996_s15), 1  ;;  %v1006_v28 = vld [vmem:[%s1603_s2] sm:$0xf]  ;;  %v1284_v29 = vld [vmem:[%s1603_s2 + $0x18] sm:$0xf0]  ;;  %vm691_vm0 = vcmask 785408  }
   0xd   : > { %s1357_s0 = smul.u32 432, %s1606_s15  ;;  %v1281_v30 = vld [vmem:[%s1603_s2 + $0x4] sm:$0xf]  ;;  %v1008_v35 = vld [vmem:[%s1603_s2 + $0x1c] sm:$0xf0]  ;;  %v1007_v42 = vor.u32 %v1284_v29, %v1006_v28  ;;  %s1280_s25 = sshll.u32 %s1606_s15, 5 }
   0xe   : > { %v1014_v36 = vld [vmem:[%s1603_s2 + $0x8] sm:$0xf]  ;;  %v1285_v37 = vld [vmem:[%s1603_s2 + $0x20] sm:$0xf0]  ;;  %v1282_v38 = vld [vmem:[%s1603_s2 + $0xc] sm:$0xf]  ;;  %v1011_v43 = vor.u32 %v1281_v30, %v1008_v35  ;;  %s1588_s28 = scalar_lea.vmem %s1604_s3, %s1280_s25 }
   0xf   : > { %s1419_s18 = scalar_lea.vmem %s1602_s1, %s1357_s0  ;;  %v1016_v39 = vld [vmem:[%s1603_s2 + $0x24] sm:$0xf0]  ;;  %v1015_v44 = vor.u32 %v1285_v37, %v1014_v36  ;;  %v1034_v56 = vld [vmem:[%s1603_s2 + $0x38] sm:$0xf]  ;;  %v1291_v57 = vld [vmem:[%s1603_s2 + $0x50] sm:$0xf0] }
  0x10   : > { %v1302_v0 = vld [vmem:[%s1419_s18 + $0x38] sm:$0xff]  ;;  %v1301_v4 = vld [vmem:[%s1419_s18 + $0x30] sm:$0xff]  ;;  %v1300_v8 = vld [vmem:[%s1419_s18 + $0x28] sm:$0xff]  ;;  %v1019_v45 = vor.u32 %v1282_v38, %v1016_v39 }
  0x11   : > { %v1310_v1 = vld [vmem:[%s1419_s18 + $0x78] sm:$0xff]  ;;  %698 = vmatpush.bf16.msra.mxu0 %v1302_v0  ;;  %v1309_v5 = vld [vmem:[%s1419_s18 + $0x70] sm:$0xff]  ;;  %v1308_v9 = vld [vmem:[%s1419_s18 + $0x68] sm:$0xff] }
  0x12   : > { %v1318_v2 = vld [vmem:[%s1419_s18 + $0xb8] sm:$0xff]  ;;  %717 = vmatpush.bf16.msra.mxu1 %v1310_v1  ;;  %v1317_v6 = vld [vmem:[%s1419_s18 + $0xb0] sm:$0xff]  ;;  %v1316_v10 = vld [vmem:[%s1419_s18 + $0xa8] sm:$0xff] }
  0x13   : > { %v1326_v3 = vld [vmem:[%s1419_s18 + $0xf8] sm:$0xff]  ;;  %736 = vmatpush.bf16.msra.mxu2 %v1318_v2  ;;  %v1325_v7 = vld [vmem:[%s1419_s18 + $0xf0] sm:$0xff]  ;;  %v1324_v11 = vld [vmem:[%s1419_s18 + $0xe8] sm:$0xff]  ;;  %v1035_v2 = vor.u32 %v1291_v57, %v1034_v56 }
  0x14   : > { %755 = vmatpush.bf16.msra.mxu3 %v1326_v3  ;;  %v1299_v12 = vld [vmem:[%s1419_s18 + $0x20] sm:$0xff]  ;;  %v1298_v16 = vld [vmem:[%s1419_s18 + $0x18] sm:$0xff]  ;;  %v1297_v20 = vld [vmem:[%s1419_s18 + $0x10] sm:$0xff] }
  0x15   : > { %699 = vmatpush.bf16.msra.mxu0 %v1301_v4  ;;  %v1307_v13 = vld [vmem:[%s1419_s18 + $0x60] sm:$0xff]  ;;  %v1306_v17 = vld [vmem:[%s1419_s18 + $0x58] sm:$0xff]  ;;  %v1305_v21 = vld [vmem:[%s1419_s18 + $0x50] sm:$0xff] }
  0x16   : > { %718 = vmatpush.bf16.msra.mxu1 %v1309_v5  ;;  %v1315_v14 = vld [vmem:[%s1419_s18 + $0xa0] sm:$0xff]  ;;  %v1314_v18 = vld [vmem:[%s1419_s18 + $0x98] sm:$0xff]  ;;  %v1313_v22 = vld [vmem:[%s1419_s18 + $0x90] sm:$0xff] }
  0x17   : > { %737 = vmatpush.bf16.msra.mxu2 %v1317_v6  ;;  %v1323_v15 = vld [vmem:[%s1419_s18 + $0xe0] sm:$0xff]  ;;  %v1322_v19 = vld [vmem:[%s1419_s18 + $0xd8] sm:$0xff]  ;;  %v1321_v23 = vld [vmem:[%s1419_s18 + $0xd0] sm:$0xff] }
  0x18   : > { %756 = vmatpush.bf16.msra.mxu3 %v1325_v7  ;;  %v1296_v24 = vld [vmem:[%s1419_s18 + $0x8] sm:$0xff]  ;;  %v1295_v31 = vld [vmem:[%s1419_s18] sm:$0xff]  ;;  %v1334_v41 = vld [vmem:[%s1419_s18 + $0x138] sm:$0xff] }
  0x19   : > { %700 = vmatpush.bf16.msra.mxu0 %v1300_v8  ;;  %v1304_v25 = vld [vmem:[%s1419_s18 + $0x48] sm:$0xff]  ;;  %v1303_v32 = vld [vmem:[%s1419_s18 + $0x40] sm:$0xff]  ;;  %v1342_v46 = vld [vmem:[%s1419_s18 + $0x178] sm:$0xff] }
  0x1a   : > { %719 = vmatpush.bf16.msra.mxu1 %v1308_v9  ;;  %v1312_v26 = vld [vmem:[%s1419_s18 + $0x88] sm:$0xff]  ;;  %v1311_v33 = vld [vmem:[%s1419_s18 + $0x80] sm:$0xff]  ;;  %v1333_v47 = vld [vmem:[%s1419_s18 + $0x130] sm:$0xff] }
  0x1b   : > { %738 = vmatpush.bf16.msra.mxu2 %v1316_v10  ;;  %v1320_v27 = vld [vmem:[%s1419_s18 + $0xc8] sm:$0xff]  ;;  %v1319_v34 = vld [vmem:[%s1419_s18 + $0xc0] sm:$0xff]  ;;  %v1341_v49 = vld [vmem:[%s1419_s18 + $0x170] sm:$0xff] }
  0x1c   : > { %757 = vmatpush.bf16.msra.mxu3 %v1324_v11  ;;  %v1348_v40 = vld [vmem:[%s1419_s18 + $0x1a8] sm:$0xff]  ;;  %v1347_v48 = vld [vmem:[%s1419_s18 + $0x1a0] sm:$0xff]  ;;  %v1346_v51 = vld [vmem:[%s1419_s18 + $0x198] sm:$0xff] }
  0x1d   : > { %701 = vmatpush.bf16.msra.mxu0 %v1299_v12  ;;  %v1332_v50 = vld [vmem:[%s1419_s18 + $0x128] sm:$0xff]  ;;  %v1331_v53 = vld [vmem:[%s1419_s18 + $0x120] sm:$0xff]  ;;  %v1345_v54 = vld [vmem:[%s1419_s18 + $0x190] sm:$0xff] }
  0x1e   : > { %720 = vmatpush.bf16.msra.mxu1 %v1307_v13  ;;  %v1340_v52 = vld [vmem:[%s1419_s18 + $0x168] sm:$0xff]  ;;  %v1339_v55 = vld [vmem:[%s1419_s18 + $0x160] sm:$0xff]  ;;  %v1288_v58 = vld [vmem:[%s1603_s2 + $0x3c] sm:$0xf] }
  0x1f   : > { %739 = vmatpush.bf16.msra.mxu2 %v1315_v14  ;;  %v1036_v59 = vld [vmem:[%s1603_s2 + $0x54] sm:$0xf0]  ;;  %v1042_v60 = vld [vmem:[%s1603_s2 + $0x40] sm:$0xf]  ;;  %v1292_v61 = vld [vmem:[%s1603_s2 + $0x58] sm:$0xf0] }
  0x20   : > { %758 = vmatpush.bf16.msra.mxu3 %v1323_v15  ;;  %v1289_v62 = vld [vmem:[%s1603_s2 + $0x44] sm:$0xf]  ;;  %v1044_v63 = vld [vmem:[%s1603_s2 + $0x5c] sm:$0xf0]  ;;  %v1330_v0 = vld [vmem:[%s1419_s18 + $0x118] sm:$0xff]  ;;  %v1039_v3 = vor.u32 %v1288_v58, %v1036_v59  ;;  %v1043_v4 = vor.u32 %v1292_v61, %v1042_v60 }
  0x21   : > { %702 = vmatpush.bf16.msra.mxu0 %v1298_v16  ;;  %v1344_v1 = vld [vmem:[%s1419_s18 + $0x188] sm:$0xff]  ;;  %v1047_v5 = vor.u32 %v1289_v62, %v1044_v63  ;;  %v1338_v6 = vld [vmem:[%s1419_s18 + $0x158] sm:$0xff]  ;;  %v1329_v7 = vld [vmem:[%s1419_s18 + $0x110] sm:$0xff] }
  0x22   : > { %721 = vmatpush.bf16.msra.mxu1 %v1306_v17  ;;  %v1343_v8 = vld [vmem:[%s1419_s18 + $0x180] sm:$0xff]  ;;  %v1337_v9 = vld [vmem:[%s1419_s18 + $0x150] sm:$0xff]  ;;  %v1328_v10 = vld [vmem:[%s1419_s18 + $0x108] sm:$0xff] }
  0x23   : > { %740 = vmatpush.bf16.msra.mxu2 %v1314_v18  ;;  %v1336_v11 = vld [vmem:[%s1419_s18 + $0x148] sm:$0xff]  ;;  %v1327_v12 = vld [vmem:[%s1419_s18 + $0x100] sm:$0xff]  ;;  %v1022_v14 = vld [vmem:[%s1603_s2 + $0x10] sm:$0xf] }
  0x24   : > { %759 = vmatpush.bf16.msra.mxu3 %v1322_v19  ;;  %v1335_v13 = vld [vmem:[%s1419_s18 + $0x140] sm:$0xff]  ;;  %v1286_v15 = vld [vmem:[%s1603_s2 + $0x28] sm:$0xf0]  ;;  %v1050_v16 = vld [vmem:[%s1603_s2 + $0x48] sm:$0xf] }
  0x25   : > { %703 = vmatpush.bf16.msra.mxu0 %v1297_v20  ;;  %v1293_v17 = vld [vmem:[%s1603_s2 + $0x60] sm:$0xf0]  ;;  %v1283_v18 = vld [vmem:[%s1603_s2 + $0x14] sm:$0xf]  ;;  %v1024_v19 = vld [vmem:[%s1603_s2 + $0x2c] sm:$0xf0] }
  0x26   : > { %722 = vmatpush.bf16.msra.mxu1 %v1305_v21  ;;  %v1030_v20 = vld [vmem:[%s1603_s2 + $0x18] sm:$0xf]  ;;  %v1287_v21 = vld [vmem:[%s1603_s2 + $0x30] sm:$0xf0]  ;;  %v1058_v28 = vld [vmem:[%s1603_s2 + $0x50] sm:$0xf] }
  0x27   : > { %741 = vmatpush.bf16.msra.mxu2 %v1313_v22  ;;  %v1023_v22 = vor.u32 %v1286_v15, %v1022_v14  ;;  %v1294_v29 = vld [vmem:[%s1603_s2 + $0x68] sm:$0xf0] }
  0x28   : > { %760 = vmatpush.bf16.msra.mxu3 %v1321_v23  ;;  %v1051_v23 = vor.u32 %v1293_v17, %v1050_v16 }
  0x29   : > { %704 = vmatpush.bf16.msra.mxu0 %v1296_v24  ;;  %v1027_v24 = vor.u32 %v1283_v18, %v1024_v19 }
  0x2a   : > { %723 = vmatpush.bf16.msra.mxu1 %v1304_v25  ;;  %v1031_v25 = vor.u32 %v1287_v21, %v1030_v20 }
  0x2b   : > { %742 = vmatpush.bf16.msra.mxu2 %v1312_v26  ;;  %v1290_v26 = vld [vmem:[%s1603_s2 + $0x4c] sm:$0xf] }
  0x2c   : > { %761 = vmatpush.bf16.msra.mxu3 %v1320_v27  ;;  %v1052_v27 = vld [vmem:[%s1603_s2 + $0x64] sm:$0xf0] }
  0x2d   : > { %705 = vmatpush.bf16.msra.mxu0 %v1295_v31  ;;  %v1055_v30 = vor.u32 %v1290_v26, %v1052_v27  ;;  %v1059_v31 = vor.u32 %v1294_v29, %v1058_v28 }
  0x2e   : > { %724 = vmatpush.bf16.msra.mxu1 %v1303_v32 }
  0x2f   : > { %743 = vmatpush.bf16.msra.mxu2 %v1311_v33 }
  0x30   : > { %762 = vmatpush.bf16.msra.mxu3 %v1319_v34  ;;  %706 = vmatmul.bf16.vlgmr.msra.gmra.mxu0 %v1007_v42 }
  0x31   : > { %774 = vmatpush.bf16.msrb.mxu0 %v1334_v41  ;;  %725 = vmatmul.bf16.vlgmr.msra.gmra.mxu1 %v1011_v43 }
  0x32   : > { %744 = vmatmul.bf16.vlgmr.msra.gmra.mxu2 %v1015_v44  ;;  %793 = vmatpush.bf16.msrb.mxu1 %v1342_v46 }
  0x33   : > { %814 = vmatpush.bf16.msrb.mxu2 %v1348_v40  ;;  %763 = vmatmul.bf16.vlgmr.msra.gmra.mxu3 %v1019_v45 }
  0x34   : > { %1349 = vmatpush.bf16.msrb.mxu3 %v1334_v41 }
  0x35   : > { %775 = vmatpush.bf16.msrb.mxu0 %v1333_v47 }
  0x36   : > { %794 = vmatpush.bf16.msrb.mxu1 %v1341_v49 }
  0x37   : > { %815 = vmatpush.bf16.msrb.mxu2 %v1347_v48 }
  0x38   : > { %1350 = vmatpush.bf16.msrb.mxu3 %v1333_v47 }
  0x39   : > { %776 = vmatpush.bf16.msrb.mxu0 %v1332_v50 }
  0x3a   : > { %795 = vmatpush.bf16.msrb.mxu1 %v1340_v52 }
  0x3b   : > { %816 = vmatpush.bf16.msrb.mxu2 %v1346_v51 }
  0x3c   : > { %1351 = vmatpush.bf16.msrb.mxu3 %v1332_v50 }
  0x3d   : > { %777 = vmatpush.bf16.msrb.mxu0 %v1331_v53 }
  0x3e   : > { %796 = vmatpush.bf16.msrb.mxu1 %v1339_v55 }
  0x3f   : > { %817 = vmatpush.bf16.msrb.mxu2 %v1345_v54 }
  0x40   : > { %1352 = vmatpush.bf16.msrb.mxu3 %v1331_v53  ;;  %711 = vmatmul.bf16.gmra.mxu0 %v1035_v2 }
  0x41   : > { %778 = vmatpush.bf16.msrb.mxu0 %v1330_v0  ;;  %730 = vmatmul.bf16.gmra.mxu1 %v1039_v3 }
  0x42   : > { %749 = vmatmul.bf16.gmra.mxu2 %v1043_v4  ;;  %797 = vmatpush.bf16.msrb.mxu1 %v1338_v6 }
  0x43   : > { %818 = vmatpush.bf16.msrb.mxu2 %v1344_v1  ;;  %768 = vmatmul.bf16.gmra.mxu3 %v1047_v5 }
  0x44   : > { %1353 = vmatpush.bf16.msrb.mxu3 %v1330_v0 }
  0x45   : > { %779 = vmatpush.bf16.msrb.mxu0 %v1329_v7 }
  0x46   : > { %798 = vmatpush.bf16.msrb.mxu1 %v1337_v9 }
  0x47   : > { %819 = vmatpush.bf16.msrb.mxu2 %v1343_v8 }
  0x48   : > { %1354 = vmatpush.bf16.msrb.mxu3 %v1329_v7 }
  0x49   : > { %780 = vmatpush.bf16.msrb.mxu0 %v1328_v10 }
  0x4a   : > { %799 = vmatpush.bf16.msrb.mxu1 %v1336_v11 }
  0x4c   : > { %1355 = vmatpush.bf16.msrb.mxu3 %v1328_v10 }
  0x4d   : > { %781 = vmatpush.bf16.msrb.mxu0 %v1327_v12 }
  0x4e   : > { %800 = vmatpush.bf16.msrb.mxu1 %v1335_v13 }
  0x50   : > { %1356 = vmatpush.bf16.msrb.mxu3 %v1327_v12  ;;  %782 = vmatmul.bf16.vlgmr.msrb.gmra.mxu0 %v1023_v22 }
  0x51   : > { %801 = vmatmul.bf16.vlgmr.msrb.gmra.mxu1 %v1027_v24 }
  0x52   : > { %1276 = vmatmul.msk.bf16.vlgmr.msrb.gmra.mxu2 %vm691_vm0, %v1031_v25 }
  0x53   : > { %787 = vmatmul.bf16.vlgmr.msrb.gmra.mxu3 %v1051_v23 }
  0x61   : > { %806 = vmatmul.bf16.gmra.mxu1 %v1055_v30 }
  0x62   : > { %1277 = vmatmul.msk.bf16.gmra.mxu2 %vm691_vm0, %v1059_v31 }
  0xad   : > { %v707_v32 = vpop.f32.mrf.mxu0 }
  0xae   : > { %v726_v33 = vpop.f32.mrf.mxu1 }
  0xaf   : > { %v727_v45 = vadd.f32 %v726_v33, %v707_v32 }
  0xb5   : > { %v745_v34 = vpop.f32.mrf.mxu2  ;;  %v709_v36 = vpop.f32.mrf.mxu0 }
  0xb6   : > { %v764_v35 = vpop.f32.mrf.mxu3  ;;  %v728_v37 = vpop.f32.mrf.mxu1  ;;  %v746_v47 = vadd.f32 %v745_v34, %v727_v45 }
  0xb7   : > { %v729_v52 = vadd.f32 %v728_v37, %v709_v36 }
  0xb8   : > { %v765_v50 = vadd.f32 %v764_v35, %v746_v47 }
  0xbd   : > { %v747_v38 = vpop.f32.mrf.mxu2  ;;  %v712_v39 = vpop.f32.mrf.mxu0 }
  0xbe   : > { %v731_v40 = vpop.f32.mrf.mxu1  ;;  %v766_v41 = vpop.f32.mrf.mxu3  ;;  %v748_v54 = vadd.f32 %v747_v38, %v729_v52 }
  0xbf   : > { %v732_v62 = vadd.f32 %v731_v40, %v712_v39 }
  0xc0   : > { %v767_v59 = vadd.f32 %v766_v41, %v748_v54 }
  0xc5   : > { %v750_v42 = vpop.f32.mrf.mxu2  ;;  %v714_v43 = vpop.f32.mrf.mxu0 }
  0xc6   : > { %v733_v44 = vpop.f32.mrf.mxu1  ;;  %v769_v46 = vpop.f32.mrf.mxu3  ;;  %v751_v1 = vadd.f32 %v750_v42, %v732_v62 }
  0xc7   : > { %v734_v9 = vadd.f32 %v733_v44, %v714_v43 }
  0xc8   : > { %v770_v7 = vadd.f32 %v769_v46, %v751_v1 }
  0xcd   : > { %v752_v48 = vpop.f32.mrf.mxu2  ;;  %v783_v49 = vpop.f32.mrf.mxu0 }
  0xce   : > { %v802_v51 = vpop.f32.mrf.mxu1  ;;  %v784_v53 = vadd.f32 %v783_v49, %v765_v50  ;;  %v771_v55 = vpop.f32.mrf.mxu3  ;;  %v753_v11 = vadd.f32 %v752_v48, %v734_v9 }
  0xd0   : > { %v803_v56 = vadd.f32 %v802_v51, %v784_v53  ;;  %v772_v16 = vadd.f32 %v771_v55, %v753_v11 }
  0xd5   : > { %v821_v57 = vpop.f32.mrf.mxu2  ;;  %v785_v58 = vpop.f32.mrf.mxu0 }
  0xd6   : > { %v1559_v60 = vadd.f32 %v821_v57, %v803_v56  ;;  %v804_v61 = vpop.f32.mrf.mxu1  ;;  %v786_v63 = vadd.f32 %v785_v58, %v767_v59  ;;  %v788_v3 = vpop.f32.mrf.mxu3  ;;  %v928_v58 = vstv %s923_s24 }
  0xd7   : > { %v789_v10 = vadd.f32 %v788_v3, %v770_v7 }
  0xd8   : > { %831 = vadd.xlane.f32.xlu0 %v1559_v60  ;;  %v839_v0 = vmul.f32 %v1559_v60, %v1559_v60  ;;  %v805_v2 = vadd.f32 %v804_v61, %v786_v63 }
  0xda   : > { %843 = vadd.xlane.f32.xlu2 %v839_v0 }
  0xdd   : > { %v823_v4 = vpop.f32.mrf.mxu2 }
  0xde   : > { %v1564_v5 = vadd.f32 %v823_v4, %v805_v2  ;;  %v807_v6 = vpop.f32.mrf.mxu1  ;;  %v790_v15 = vpop.f32.mrf.mxu3 }
  0xdf   : > { %v808_v12 = vadd.f32 %v807_v6, %v789_v10  ;;  %v791_v19 = vadd.f32 %v790_v15, %v772_v16 }
  0xe0   : > { %833 = vadd.xlane.f32.xlu0 %v1564_v5  ;;  %v840_v8 = vmul.f32 %v1564_v5, %v1564_v5 }
  0xe2   : > { %845 = vadd.xlane.f32.xlu2 %v840_v8 }
  0xe5   : > { %v826_v13 = vpop.f32.mrf.mxu2 }
  0xe6   : > { %v1569_v14 = vadd.f32 %v826_v13, %v808_v12  ;;  %v809_v18 = vpop.f32.mrf.mxu1 }
  0xe7   : > { %v810_v20 = vadd.f32 %v809_v18, %v791_v19 }
  0xe8   : > { %835 = vadd.xlane.f32.xlu1 %v1569_v14  ;;  %v841_v17 = vmul.f32 %v1569_v14, %v1569_v14 }
  0xea   : > { %847 = vadd.xlane.f32.xlu0 %v841_v17 }
  0xed   : > { %v828_v21 = vpop.f32.mrf.mxu2 }
  0xee   : > { %v1574_v22 = vadd.f32 %v828_v21, %v810_v20 }
  0xf0   : > { %837 = vadd.xlane.f32.xlu1 %v1574_v22  ;;  %v842_v23 = vmul.f32 %v1574_v22, %v1574_v22 }
  0xf8   : > { %849 = vadd.xlane.f32.xlu1 %v842_v23 }
 0x14b   : > { %v832_v24 = vpop.xlane.xlu0 %831 }
 0x14c   : > { %v851_v25 = vmul.f32 0.125, %v832_v24 }
 0x14d   : > { %v844_v26 = vpop.xlane.xlu2 %843 }
 0x14e   : > { %v859_v27 = vmul.f32 %v851_v25, %v851_v25  ;;  %v855_v28 = vmul.f32 0.125, %v844_v26  ;;  %v871_v56 = vsub.f32 %v1559_v60, %v851_v25 }
 0x150   : > { %v863_v29 = vsub.f32 %v855_v28, %v859_v27 }
 0x152   : > { %v867_v30 = vmax.f32 %v863_v29, 0.0 }
 0x153   : > { %v834_v31 = vpop.xlane.xlu0 %833 }
 0x154   : > { %v875_v32 = vadd.f32 1e-05, %v867_v30  ;;  %v852_v33 = vmul.f32 0.125, %v834_v31 }
 0x155   : > { %v846_v34 = vpop.xlane.xlu2 %845 }
 0x156   : > { %1366 = vrsqrt.f32 %v875_v32  ;;  %v860_v35 = vmul.f32 %v852_v33, %v852_v33  ;;  %v856_v36 = vmul.f32 0.125, %v846_v34  ;;  %vm885_vm2 = vweird.f32 %v875_v32 }
 0x157   : > { %v872_v11 = vsub.f32 %v1564_v5, %v852_v33 }
 0x158   : > { %v864_v37 = vsub.f32 %v856_v36, %v860_v35 }
 0x15a   : > { %v868_v38 = vmax.f32 %v864_v37, 0.0 }
 0x15b   : > { %v836_v39 = vpop.xlane.xlu1 %835 }
 0x15c   : > { %v1367_v40 = vpop.eup %1366  ;;  %v1579_v41 = vmul.f32 0.125, %v836_v39  ;;  %v876_v43 = vadd.f32 1e-05, %v868_v38 }
 0x15d   : > { %v880_v42 = vmul.f32 %v1367_v40, %v875_v32  ;;  %v848_v44 = vpop.xlane.xlu0 %847  ;;  %vm886_vm1 = vweird.f32 %v1367_v40 }
 0x15e   : > { %v861_v45 = vmul.f32 %v1579_v41, %v1579_v41  ;;  %v857_v46 = vmul.f32 0.125, %v848_v44  ;;  %1368 = vrsqrt.f32 %v876_v43  ;;  %vm887_vm3 = vmor %vm885_vm2, %vm886_vm1  ;;  %vm895_vm6 = vweird.f32 %v876_v43 }
 0x15f   : > { %v881_v47 = vmul.f32 %v1367_v40, %v880_v42  ;;  %v873_v5 = vsub.f32 %v1569_v14, %v1579_v41 }
 0x160   : > { %v865_v48 = vsub.f32 %v857_v46, %v861_v45 }
 0x161   : > { %v882_v49 = vmul.f32 0.5, %v881_v47 }
 0x162   : > { %v869_v50 = vmax.f32 %v865_v48, 0.0 }
 0x163   : > { %v883_v51 = vsub.f32 1.5, %v882_v49  ;;  %v838_v52 = vpop.xlane.xlu1 %837 }
 0x164   : > { %v877_v53 = vadd.f32 1e-05, %v869_v50  ;;  %v1369_v54 = vpop.eup %1368  ;;  %v854_v63 = vmul.f32 0.125, %v838_v52 }
 0x165   : > { %v884_v55 = vmul.f32 %v1367_v40, %v883_v51  ;;  %v890_v57 = vmul.f32 %v1369_v54, %v876_v43  ;;  %vm896_vm5 = vweird.f32 %v1369_v54 }
 0x166   : > { %1370 = vrsqrt.f32 %v877_v53  ;;  %v862_v6 = vmul.f32 %v854_v63, %v854_v63  ;;  %vm897_vm7 = vmor %vm895_vm6, %vm896_vm5  ;;  %vm905_vm10 = vweird.f32 %v877_v53  ;;  %v874_v34 = vsub.f32 %v1574_v22, %v854_v63 }
 0x167   : > { %v888_v59 = vsel %vm887_vm3, %v1367_v40, %v884_v55  ;;  %v891_v62 = vmul.f32 %v1369_v54, %v890_v57 }
 0x168   : > { %v919_v61 = vmul.f32 %v888_v59, %v871_v56 }
 0x169   : > { %v892_v1 = vmul.f32 0.5, %v891_v62 }
 0x16a   : > { %vm924_vm4 = vcmp.ge.f32.partialorder %v919_v61, 0.0  ;;  %v929_v0 = vmul.f32 %v928_v58, %v919_v61 }
 0x16b   : > { %v850_v60 = vpop.xlane.xlu1 %849  ;;  %v893_v4 = vsub.f32 1.5, %v892_v1 }
 0x16c   : > { %v1371_v2 = vpop.eup %1370  ;;  %v933_v3 = vsel %vm924_vm4, %v919_v61, %v929_v0  ;;  %v858_v7 = vmul.f32 0.125, %v850_v60 }
 0x16d   : > { %937 = vst [vmem:[%s1588_s28] sm:$0xff] %v933_v3  ;;  %v900_v8 = vmul.f32 %v1371_v2, %v877_v53  ;;  %v894_v9 = vmul.f32 %v1369_v54, %v893_v4  ;;  %vm906_vm9 = vweird.f32 %v1371_v2 }
 0x16e   : > { %v866_v10 = vsub.f32 %v858_v7, %v862_v6  ;;  %vm907_vm11 = vmor %vm905_vm10, %vm906_vm9 }
 0x16f   : > { %v901_v12 = vmul.f32 %v1371_v2, %v900_v8  ;;  %v898_v13 = vsel %vm897_vm7, %v1369_v54, %v894_v9 }
 0x170   : > { %v870_v15 = vmax.f32 %v866_v10, 0.0  ;;  %v920_v16 = vmul.f32 %v898_v13, %v872_v11 }
 0x171   : > { %v902_v17 = vmul.f32 0.5, %v901_v12 }
 0x172   : > { %v878_v18 = vadd.f32 1e-05, %v870_v15  ;;  %vm925_vm8 = vcmp.ge.f32.partialorder %v920_v16, 0.0  ;;  %v930_v19 = vmul.f32 %v928_v58, %v920_v16 }
 0x173   : > { %v903_v20 = vsub.f32 1.5, %v902_v17 }
 0x174   : > { %1372 = vrsqrt.f32 %v878_v18  ;;  %v934_v21 = vsel %vm925_vm8, %v920_v16, %v930_v19  ;;  %vm915_vm14 = vweird.f32 %v878_v18 }
 0x175   : > { %v904_v23 = vmul.f32 %v1371_v2, %v903_v20  ;;  %938 = vst [vmem:[%s1588_s28 + $0x8] sm:$0xff] %v934_v21 }
 0x177   : > { %v908_v24 = vsel %vm907_vm11, %v1371_v2, %v904_v23 }
 0x178   : > { %v921_v25 = vmul.f32 %v908_v24, %v873_v5 }
 0x17a   : > { %v1373_v26 = vpop.eup %1372  ;;  %vm926_vm12 = vcmp.ge.f32.partialorder %v921_v25, 0.0  ;;  %v931_v27 = vmul.f32 %v928_v58, %v921_v25 }
 0x17b   : > { %v910_v28 = vmul.f32 %v1373_v26, %v878_v18  ;;  %vm916_vm13 = vweird.f32 %v1373_v26 }
 0x17c   : > { %v935_v29 = vsel %vm926_vm12, %v921_v25, %v931_v27  ;;  %vm917_vm15 = vmor %vm915_vm14, %vm916_vm13 }
 0x17d   : > { %939 = vst [vmem:[%s1588_s28 + $0x10] sm:$0xff] %v935_v29  ;;  %v911_v30 = vmul.f32 %v1373_v26, %v910_v28 }
 0x17f   : > { %v912_v31 = vmul.f32 0.5, %v911_v30 }
 0x181   : > { %v913_v32 = vsub.f32 1.5, %v912_v31 }
 0x183   : > { %v914_v33 = vmul.f32 %v1373_v26, %v913_v32 }
 0x185   : > { %v918_v14 = vsel %vm917_vm15, %v1373_v26, %v914_v33 }
 0x186   : > { %v922_v35 = vmul.f32 %v918_v14, %v874_v34 }
 0x188   : > { %vm927_vm0 = vcmp.ge.f32.partialorder %v922_v35, 0.0  ;;  %v932_v36 = vmul.f32 %v928_v58, %v922_v35 }
 0x18a   : > { %v936_v37 = vsel %vm927_vm0, %v922_v35, %v932_v36 }
 0x18b   : > { %940 = vst [vmem:[%s1588_s28 + $0x18] sm:$0xff] %v936_v37 }
 0x18c PF: > { %s14_s14 = sadd.s32 1, %s1380_s14  }
 0x18d   : > { %p11_p4 = scmp.ge.s32.totalorder %s14_s14, 4  }
 0x18f   :  { %13 = sbr.rel (!%p11_p4) target bundleno = 2 (0x2), region = 62 }

</bundles_post_ra>
